<compile_context>
chip_gen: v5e
topology: v5e:2x2
jax: 0.10.0
libtpu: 0.0.40
codegen_flags: <defaults>
</compile_context>

<pallas_src>
import functools

import jax
import jax.numpy as jnp
from jax.experimental import pallas as pl
from jax.experimental.pallas import tpu as pltpu

KERNEL_SIZE = 3
PADDING_SIZE = 1
STRIDE = 1

LANE = 128     # cout (MXU N dim) padding -> lane-dense matmul outputs
CIN_MULT = 16  # cin padding granularity for the K dim (bf16 sublane tile)
COL0 = 8       # interior columns start here -> sublane-aligned write-back
OUT_PAD = 8    # channel padding of the latent / reconstruction HBM outputs


def _round_up(x, m):
    return (x + m - 1) // m * m


def _fused_kernel(x_ref, w_ref, b_ref, lat_ref, rec_ref,
                  act_ref, cols_ref,
                  *, H, W, layer_meta, relu_flags, latent_layer,
                  lat_c, rec_c, m_chunk):
    """All six conv layers for one image; activations stay resident in VMEM.

    x_ref   : (HP, WB, cp0)   f32   zero-padded input (cp0 = round_up(Cin,16))
    w_ref   : (sumK, 128)     bf16  weights, rows = [layer][kh][kw*cp + ci]
    b_ref   : (L, 1, 128)     f32   biases (zero-padded over cout)
    lat_ref : (H, W, lat_c)   f32   latent output (channel-packed)
    rec_ref : (H, W, rec_c)   f32   reconstruction output (channel-packed)
    act_ref : (HP, WB, 128)   f32   resident activation buffer
    cols_ref: (HP*W, Kmax)    bf16  kw-folded im2col buffer
    """
    HP = H + 2 * PADDING_SIZE
    n_layers = len(relu_flags)
    M = H * W

    # Only the halo has to be zero; the interior is always written before it
    # is read.  A full clear is ~56 vreg stores, cheaper than being clever,
    # and keeps megacore-sharded grid steps self-contained.
    act_ref[...] = jnp.zeros_like(act_ref)

    for l in range(n_layers):
        cp, k_l, w_off = layer_meta[l]            # padded cin, K=3*cp, row off
        src = x_ref if l == 0 else act_ref

        # kw-folded im2col: three lane-block stores, cast to bf16 once here.
        # TODO(synk): the kw=0 / kw=2 taps are sublane-misaligned copies; a
        # pltpu.roll(+-1, axis=0) of the aligned kw=1 tap plus a (row % W)
        # boundary mask would move this relayout onto the otherwise-idle XLU.
        for kw in range(KERNEL_SIZE):
            start = COL0 - PADDING_SIZE + kw
            tap = src[:, start:start + W, :cp]                 # (HP, W, cp) f32
            cols_ref[:, kw * cp:(kw + 1) * cp] = (
                tap.reshape(HP * W, cp).astype(cols_ref.dtype))

        bias = b_ref[l]                                        # (1, 128) f32

        for m0 in range(0, M, m_chunk):
            mc = min(m_chunk, M - m0)
            # kh partials accumulate in registers (16 vregs for mc=128);
            # kh slice offsets kh*W are multiples of 16 -> aligned reads.
            acc = None
            for kh in range(KERNEL_SIZE):
                r0 = kh * W + m0
                contrib = jnp.dot(
                    cols_ref[r0:r0 + mc, :k_l],
                    w_ref[w_off + kh * k_l:w_off + (kh + 1) * k_l, :],
                    preferred_element_type=jnp.float32)
                acc = contrib if acc is None else acc + contrib

            out = acc + bias
            if relu_flags[l]:
                out = jnp.maximum(out, 0.0)

            rows = mc // W
            h0 = m0 // W
            out3d = out.reshape(rows, W, LANE)

            if l == latent_layer:
                lat_ref[h0:h0 + rows, :, :] = out3d[:, :, :lat_c]
            if l == n_layers - 1:
                rec_ref[h0:h0 + rows, :, :] = out3d[:, :, :rec_c]
            else:
                # Sublane-aligned interior write-back; halo stays zero.
                act_ref[PADDING_SIZE + h0:PADDING_SIZE + h0 + rows,
                        COL0:COL0 + W, :] = out3d


def fused_autoencoder(x_pad, w_all, b_all, *, H, W, layer_meta, relu_flags,
                      latent_layer, lat_c, rec_c):
    """x_pad: (N, H+2, WB, cp0). Returns (latent, rec) as (N, H, W, lat_c/rec_c)."""
    N, HP, WB, cp0 = x_pad.shape
    L = len(relu_flags)
    sum_k = w_all.shape[0]
    k_max = max(k for _, k, _ in layer_meta)
    rows_per_chunk = max(1, min(H, 128 // W)) if W <= 128 else 1
    m_chunk = rows_per_chunk * W

    kernel = functools.partial(
        _fused_kernel, H=H, W=W, layer_meta=tuple(layer_meta),
        relu_flags=tuple(relu_flags), latent_layer=latent_layer,
        lat_c=lat_c, rec_c=rec_c, m_chunk=m_chunk)

    return pl.pallas_call(
        kernel,
        out_shape=(jax.ShapeDtypeStruct((N, H, W, lat_c), jnp.float32),
                   jax.ShapeDtypeStruct((N, H, W, rec_c), jnp.float32)),
        grid_spec=pltpu.PrefetchScalarGridSpec(
            num_scalar_prefetch=0,
            grid=(N,),
            in_specs=[
                pl.BlockSpec((None, HP, WB, cp0), lambda n: (n, 0, 0, 0)),
                pl.BlockSpec((sum_k, LANE), lambda n: (0, 0)),
                pl.BlockSpec((L, 1, LANE), lambda n: (0, 0, 0)),
            ],
            out_specs=[
                pl.BlockSpec((None, H, W, lat_c), lambda n: (n, 0, 0, 0)),
                pl.BlockSpec((None, H, W, rec_c), lambda n: (n, 0, 0, 0)),
            ],
            scratch_shapes=[
                pltpu.VMEM((HP, WB, LANE), jnp.float32),       # resident act
                pltpu.VMEM((HP * W, k_max), jnp.bfloat16),     # im2col cols
            ]),
        compiler_params=pltpu.CompilerParams(
            dimension_semantics=("parallel",),
            vmem_limit_bytes=32 * 1024 * 1024),
    )(x_pad, w_all, b_all)


def _init_conv_params(key, cin, cout):
    """Deterministic init mimicking PyTorch Conv2d default (Kaiming-uniform-ish)."""
    kw_key, kb_key = jax.random.split(key)
    fan_in = cin * KERNEL_SIZE * KERNEL_SIZE
    bound = 1.0 / jnp.sqrt(jnp.asarray(fan_in, jnp.float32))
    w = jax.random.uniform(kw_key, (cout, cin, KERNEL_SIZE, KERNEL_SIZE),
                           jnp.float32, -bound, bound)
    b = jax.random.uniform(kb_key, (cout,), jnp.float32, -bound, bound)
    return w, b


def _pack_params(torch_params):
    """Pack per-layer (cout, cin, 3, 3) weights into one (sumK, 128) bf16 buffer.

    Row layout: [layer l][kh][kw * cp_l + ci] with cp_l = round_up(cin_l, 16);
    column = cout (zero-padded to 128).  Returns (w_all, b_all, layer_meta)
    where layer_meta[l] = (cp_l, K_l, row_offset_l).
    """
    blocks, layer_meta = [], []
    b_all = jnp.zeros((len(torch_params), 1, LANE), jnp.float32)
    off = 0
    for l, (w, b, _) in enumerate(torch_params):
        cout, cin = w.shape[0], w.shape[1]
        cp = _round_up(cin, CIN_MULT)
        k_l = KERNEL_SIZE * cp
        wt = jnp.transpose(w, (2, 3, 1, 0))          # (kh, kw, cin, cout)
        for kh in range(KERNEL_SIZE):
            blk = jnp.zeros((k_l, LANE), jnp.float32)
            for kw in range(KERNEL_SIZE):
                blk = blk.at[kw * cp:kw * cp + cin, :cout].set(wt[kh, kw])
            blocks.append(blk)
        layer_meta.append((cp, k_l, off))
        b_all = b_all.at[l, 0, :cout].set(b)
        off += KERNEL_SIZE * k_l
    w_all = jnp.concatenate(blocks, axis=0).astype(jnp.bfloat16)
    return w_all, b_all, tuple(layer_meta)


class FeatureAutoencoderPallas:
    """Pallas implementation of FeatureAutoencoder.forward -> (latent, reconstructed)."""

    def __init__(self, in_channels, out_channels, key):
        print(f"defined an autoencoder with input channels={in_channels} "
              f"and out channels={out_channels}")
        # NOTE: like the PyTorch module, the final layer maps back to in_channels
        # (out_channels is accepted but unused by the reference module too).
        layer_dims = [
            (in_channels, 64, True),
            (64, 32, True),
            (32, 3, False),     # end of encoder -> latent
            (3, 32, True),
            (32, 64, True),
            (64, in_channels, False),
        ]
        self.in_channels = in_channels
        self.latent_channels = 3
        self.latent_layer = 2
        self.relu_flags = tuple(r for _, _, r in layer_dims)
        self.lat_c = _round_up(self.latent_channels, OUT_PAD)
        self.rec_c = _round_up(in_channels, OUT_PAD)
        self.cp0 = _round_up(in_channels, CIN_MULT)

        keys = jax.random.split(key, len(layer_dims))
        self.torch_params = []   # kept for the plain-JAX reference check
        for k, (cin, cout, relu) in zip(keys, layer_dims):
            w, b = _init_conv_params(k, cin, cout)
            self.torch_params.append((w, b, relu))
        self.w_all, self.b_all, self.layer_meta = _pack_params(self.torch_params)

    def __call__(self, x_nchw):
        N, C, H, W = x_nchw.shape
        # NCHW -> NHWC, pad once: rows +-1, columns [COL0 zeros | W | 1 zero],
        # channels -> round_up(C, 16).  Everything else stays resident in VMEM.
        x_nhwc = jnp.transpose(x_nchw, (0, 2, 3, 1))
        x_pad = jnp.pad(
            x_nhwc,
            ((0, 0), (PADDING_SIZE, PADDING_SIZE), (COL0, PADDING_SIZE),
             (0, self.cp0 - C)))
        lat_pad, rec_pad = fused_autoencoder(
            x_pad, self.w_all, self.b_all, H=H, W=W,
            layer_meta=self.layer_meta, relu_flags=self.relu_flags,
            latent_layer=self.latent_layer, lat_c=self.lat_c, rec_c=self.rec_c)
        latent = jnp.transpose(lat_pad[..., :self.latent_channels], (0, 3, 1, 2))
        reconstructed = jnp.transpose(rec_pad[..., :self.in_channels], (0, 3, 1, 2))
        return latent, reconstructed

    def reference(self, x_nchw, matmul_dtype=jnp.float32):
        """Plain-JAX (lax.conv) reference of the same forward.

        matmul_dtype=bf16 mirrors the kernel's bf16 MXU inputs / f32 accumulation.
        """
        h = x_nchw
        latent = None
        for i, (w, b, relu) in enumerate(self.torch_params):
            h = jax.lax.conv_general_dilated(
                h.astype(matmul_dtype), w.astype(matmul_dtype),
                window_strides=(STRIDE, STRIDE),
                padding=((PADDING_SIZE, PADDING_SIZE),
                         (PADDING_SIZE, PADDING_SIZE)),
                dimension_numbers=("NCHW", "OIHW", "NCHW"),
                preferred_element_type=jnp.float32,
            ) + b.reshape(1, -1, 1, 1)
            if relu:
                h = jnp.maximum(h, 0.0)
            if i == self.latent_layer:
                latent = h
        return latent, h


if __name__ == "__main__":
    key = jax.random.PRNGKey(0)
    k_model, k_x = jax.random.split(key)

    N, C, H, W = 2, 4, 16, 16
    x = jax.random.normal(k_x, (N, C, H, W), jnp.float32)

    model = FeatureAutoencoderPallas(in_channels=C, out_channels=C, key=k_model)

    latent, reconstructed = model(x)
    latent = jax.block_until_ready(latent)
    reconstructed = jax.block_until_ready(reconstructed)

    assert latent.shape == (N, 3, H, W), latent.shape
    assert reconstructed.shape == (N, C, H, W), reconstructed.shape

    # Tight check vs a reference that mirrors the kernel's bf16 MXU inputs
    # with f32 accumulation (differences are summation order only).
    lat_bf, rec_bf = model.reference(x, matmul_dtype=jnp.bfloat16)
    assert jnp.allclose(latent, lat_bf, rtol=1e-2, atol=1e-2)
    assert jnp.allclose(reconstructed, rec_bf, rtol=1e-2, atol=1e-2)

    # Loose sanity check vs the exact f32 forward: bf16 matmul inputs change
    # numerics slightly; this only guards against structural/wiring errors.
    lat_f32, rec_f32 = model.reference(x, matmul_dtype=jnp.float32)
    assert jnp.allclose(latent, lat_f32, rtol=0.25, atol=0.25)
    assert jnp.allclose(reconstructed, rec_f32, rtol=0.25, atol=0.25)

    print("KERNEL_OK")
</pallas_src>

<mosaic_0001>
module attributes {stable_mosaic.version = 11 : i64} {
  func.func @_fused_kernel(%arg0: i32, %arg1: memref<1x18x25x16xf32, #tpu.memory_space<vmem>>, %arg2: memref<2016x128xbf16, #tpu.memory_space<vmem>>, %arg3: memref<6x1x128xf32, #tpu.memory_space<vmem>>, %arg4: memref<1x16x16x8xf32, #tpu.memory_space<vmem>>, %arg5: memref<1x16x16x8xf32, #tpu.memory_space<vmem>>, %arg6: memref<18x25x128xf32, #tpu.memory_space<vmem>>, %arg7: memref<288x192xbf16, #tpu.memory_space<vmem>>) attributes {dimension_semantics = [#tpu.dimension_semantics<parallel>], iteration_bounds = array<i64: 2>, scalar_prefetch = 0 : i64, scratch_operands = 2 : i64, tpu.core_type = #tpu.core_type<tc>, window_params = [{transform_indices = @transform_0, window_bounds = array<i64: 1, 18, 25, 16>}, {pipeline_mode = #tpu.pipeline_mode<synchronous>, transform_indices = @transform_1, window_bounds = array<i64: 2016, 128>}, {pipeline_mode = #tpu.pipeline_mode<synchronous>, transform_indices = @transform_2, window_bounds = array<i64: 6, 1, 128>}, {transform_indices = @transform_3, window_bounds = array<i64: 1, 16, 16, 8>}, {transform_indices = @transform_4, window_bounds = array<i64: 1, 16, 16, 8>}]} {
    %cst = arith.constant 0.000000e+00 : f32
    %0 = vector.broadcast %cst : f32 to vector<18x25x128xf32>
    %c0 = arith.constant 0 : index
    %c0_0 = arith.constant 0 : index
    %c0_1 = arith.constant 0 : index
    %1 = vector.load %arg6[%c0, %c0_0, %c0_1] : memref<18x25x128xf32, #tpu.memory_space<vmem>>, vector<18x25x128xf32>
    tpu.vector_store %arg6[%c0, %c0_0, %c0_1], %0 {strides = array<i32>} : memref<18x25x128xf32, #tpu.memory_space<vmem>>, vector<18x25x128xf32>,
    %c0_2 = arith.constant 0 : index
    %c0_3 = arith.constant 0 : index
    %c7 = arith.constant 7 : index
    %c0_4 = arith.constant 0 : index
    %2 = vector.load %arg1[%c0_2, %c0_3, %c7, %c0_4] : memref<1x18x25x16xf32, #tpu.memory_space<vmem>>, vector<1x18x16x16xf32>
    %3 = vector.shape_cast %2 : vector<1x18x16x16xf32> to vector<18x16x16xf32>
    %4 = vector.shape_cast %3 : vector<18x16x16xf32> to vector<288x16xf32>
    %5 = arith.truncf %4 : vector<288x16xf32> to vector<288x16xbf16>
    %c0_5 = arith.constant 0 : index
    %c0_6 = arith.constant 0 : index
    %6 = vector.load %arg7[%c0_5, %c0_6] : memref<288x192xbf16, #tpu.memory_space<vmem>>, vector<288x16xbf16>
    tpu.vector_store %arg7[%c0_5, %c0_6], %5 {strides = array<i32>} : memref<288x192xbf16, #tpu.memory_space<vmem>>, vector<288x16xbf16>,
    %c0_7 = arith.constant 0 : index
    %c0_8 = arith.constant 0 : index
    %c8 = arith.constant 8 : index
    %c0_9 = arith.constant 0 : index
    %7 = vector.load %arg1[%c0_7, %c0_8, %c8, %c0_9] : memref<1x18x25x16xf32, #tpu.memory_space<vmem>>, vector<1x18x16x16xf32>
    %8 = vector.shape_cast %7 : vector<1x18x16x16xf32> to vector<18x16x16xf32>
    %9 = vector.shape_cast %8 : vector<18x16x16xf32> to vector<288x16xf32>
    %10 = arith.truncf %9 : vector<288x16xf32> to vector<288x16xbf16>
    %c0_10 = arith.constant 0 : index
    %c16 = arith.constant 16 : index
    %11 = vector.load %arg7[%c0_10, %c16] : memref<288x192xbf16, #tpu.memory_space<vmem>>, vector<288x16xbf16>
    tpu.vector_store %arg7[%c0_10, %c16], %10 {strides = array<i32>} : memref<288x192xbf16, #tpu.memory_space<vmem>>, vector<288x16xbf16>,
    %c0_11 = arith.constant 0 : index
    %c0_12 = arith.constant 0 : index
    %c9 = arith.constant 9 : index
    %c0_13 = arith.constant 0 : index
    %12 = vector.load %arg1[%c0_11, %c0_12, %c9, %c0_13] : memref<1x18x25x16xf32, #tpu.memory_space<vmem>>, vector<1x18x16x16xf32>
    %13 = vector.shape_cast %12 : vector<1x18x16x16xf32> to vector<18x16x16xf32>
    %14 = vector.shape_cast %13 : vector<18x16x16xf32> to vector<288x16xf32>
    %15 = arith.truncf %14 : vector<288x16xf32> to vector<288x16xbf16>
    %c0_14 = arith.constant 0 : index
    %c32 = arith.constant 32 : index
    %16 = vector.load %arg7[%c0_14, %c32] : memref<288x192xbf16, #tpu.memory_space<vmem>>, vector<288x16xbf16>
    tpu.vector_store %arg7[%c0_14, %c32], %15 {strides = array<i32>} : memref<288x192xbf16, #tpu.memory_space<vmem>>, vector<288x16xbf16>,
    %c0_15 = arith.constant 0 : index
    %c0_16 = arith.constant 0 : index
    %c0_17 = arith.constant 0 : index
    %17 = vector.load %arg3[%c0_15, %c0_16, %c0_17] : memref<6x1x128xf32, #tpu.memory_space<vmem>>, vector<1x1x128xf32>
    %18 = vector.shape_cast %17 : vector<1x1x128xf32> to vector<1x128xf32>
    %c0_18 = arith.constant 0 : index
    %c0_19 = arith.constant 0 : index
    %19 = vector.load %arg7[%c0_18, %c0_19] : memref<288x192xbf16, #tpu.memory_space<vmem>>, vector<128x48xbf16>
    %c0_20 = arith.constant 0 : index
    %c0_21 = arith.constant 0 : index
    %20 = vector.load %arg2[%c0_20, %c0_21] : memref<2016x128xbf16, #tpu.memory_space<vmem>>, vector<48x128xbf16>
    %cst_22 = arith.constant dense<0.000000e+00> : vector<128x128xf32>
    %21 = tpu.matmul %19, %20, %cst_22 {dimension_numbers = #tpu.dot_dimension_numbers<[1], [0], [0], [1], [0, 0, 1, 1], [], []>} : vector<128x48xbf16>, vector<48x128xbf16>, vector<128x128xf32> -> vector<128x128xf32>
    %c16_23 = arith.constant 16 : index
    %c0_24 = arith.constant 0 : index
    %22 = vector.load %arg7[%c16_23, %c0_24] : memref<288x192xbf16, #tpu.memory_space<vmem>>, vector<128x48xbf16>
    %c48 = arith.constant 48 : index
    %c0_25 = arith.constant 0 : index
    %23 = vector.load %arg2[%c48, %c0_25] : memref<2016x128xbf16, #tpu.memory_space<vmem>>, vector<48x128xbf16>
    %cst_26 = arith.constant dense<0.000000e+00> : vector<128x128xf32>
    %24 = tpu.matmul %22, %23, %cst_26 {dimension_numbers = #tpu.dot_dimension_numbers<[1], [0], [0], [1], [0, 0, 1, 1], [], []>} : vector<128x48xbf16>, vector<48x128xbf16>, vector<128x128xf32> -> vector<128x128xf32>
    %25 = arith.addf %21, %24 : vector<128x128xf32>
    %c32_27 = arith.constant 32 : index
    %c0_28 = arith.constant 0 : index
    %26 = vector.load %arg7[%c32_27, %c0_28] : memref<288x192xbf16, #tpu.memory_space<vmem>>, vector<128x48xbf16>
    %c96 = arith.constant 96 : index
    %c0_29 = arith.constant 0 : index
    %27 = vector.load %arg2[%c96, %c0_29] : memref<2016x128xbf16, #tpu.memory_space<vmem>>, vector<48x128xbf16>
    %cst_30 = arith.constant dense<0.000000e+00> : vector<128x128xf32>
    %28 = tpu.matmul %26, %27, %cst_30 {dimension_numbers = #tpu.dot_dimension_numbers<[1], [0], [0], [1], [0, 0, 1, 1], [], []>} : vector<128x48xbf16>, vector<48x128xbf16>, vector<128x128xf32> -> vector<128x128xf32>
    %29 = arith.addf %25, %28 : vector<128x128xf32>
    %30 = vector.broadcast %18 : vector<1x128xf32> to vector<128x128xf32>
    %31 = arith.addf %29, %30 : vector<128x128xf32>
    %cst_31 = arith.constant 0.000000e+00 : f32
    %32 = vector.broadcast %cst_31 : f32 to vector<128x128xf32>
    %33 = arith.maximumf %31, %32 : vector<128x128xf32>
    %34 = vector.shape_cast %33 : vector<128x128xf32> to vector<8x16x128xf32>
    %c1 = arith.constant 1 : index
    %c8_32 = arith.constant 8 : index
    %c0_33 = arith.constant 0 : index
    %35 = vector.load %arg6[%c1, %c8_32, %c0_33] : memref<18x25x128xf32, #tpu.memory_space<vmem>>, vector<8x16x128xf32>
    tpu.vector_store %arg6[%c1, %c8_32, %c0_33], %34 {strides = array<i32>} : memref<18x25x128xf32, #tpu.memory_space<vmem>>, vector<8x16x128xf32>,
    %c128 = arith.constant 128 : index
    %c0_34 = arith.constant 0 : index
    %36 = vector.load %arg7[%c128, %c0_34] : memref<288x192xbf16, #tpu.memory_space<vmem>>, vector<128x48xbf16>
    %c0_35 = arith.constant 0 : index
    %c0_36 = arith.constant 0 : index
    %37 = vector.load %arg2[%c0_35, %c0_36] : memref<2016x128xbf16, #tpu.memory_space<vmem>>, vector<48x128xbf16>
    %cst_37 = arith.constant dense<0.000000e+00> : vector<128x128xf32>
    %38 = tpu.matmul %36, %37, %cst_37 {dimension_numbers = #tpu.dot_dimension_numbers<[1], [0], [0], [1], [0, 0, 1, 1], [], []>} : vector<128x48xbf16>, vector<48x128xbf16>, vector<128x128xf32> -> vector<128x128xf32>
    %c144 = arith.constant 144 : index
    %c0_38 = arith.constant 0 : index
    %39 = vector.load %arg7[%c144, %c0_38] : memref<288x192xbf16, #tpu.memory_space<vmem>>, vector<128x48xbf16>
    %c48_39 = arith.constant 48 : index
    %c0_40 = arith.constant 0 : index
    %40 = vector.load %arg2[%c48_39, %c0_40] : memref<2016x128xbf16, #tpu.memory_space<vmem>>, vector<48x128xbf16>
    %cst_41 = arith.constant dense<0.000000e+00> : vector<128x128xf32>
    %41 = tpu.matmul %39, %40, %cst_41 {dimension_numbers = #tpu.dot_dimension_numbers<[1], [0], [0], [1], [0, 0, 1, 1], [], []>} : vector<128x48xbf16>, vector<48x128xbf16>, vector<128x128xf32> -> vector<128x128xf32>
    %42 = arith.addf %38, %41 : vector<128x128xf32>
    %c160 = arith.constant 160 : index
    %c0_42 = arith.constant 0 : index
    %43 = vector.load %arg7[%c160, %c0_42] : memref<288x192xbf16, #tpu.memory_space<vmem>>, vector<128x48xbf16>
    %c96_43 = arith.constant 96 : index
    %c0_44 = arith.constant 0 : index
    %44 = vector.load %arg2[%c96_43, %c0_44] : memref<2016x128xbf16, #tpu.memory_space<vmem>>, vector<48x128xbf16>
    %cst_45 = arith.constant dense<0.000000e+00> : vector<128x128xf32>
    %45 = tpu.matmul %43, %44, %cst_45 {dimension_numbers = #tpu.dot_dimension_numbers<[1], [0], [0], [1], [0, 0, 1, 1], [], []>} : vector<128x48xbf16>, vector<48x128xbf16>, vector<128x128xf32> -> vector<128x128xf32>
    %46 = arith.addf %42, %45 : vector<128x128xf32>
    %47 = vector.broadcast %18 : vector<1x128xf32> to vector<128x128xf32>
    %48 = arith.addf %46, %47 : vector<128x128xf32>
    %cst_46 = arith.constant 0.000000e+00 : f32
    %49 = vector.broadcast %cst_46 : f32 to vector<128x128xf32>
    %50 = arith.maximumf %48, %49 : vector<128x128xf32>
    %51 = vector.shape_cast %50 : vector<128x128xf32> to vector<8x16x128xf32>
    %c9_47 = arith.constant 9 : index
    %c8_48 = arith.constant 8 : index
    %c0_49 = arith.constant 0 : index
    %52 = vector.load %arg6[%c9_47, %c8_48, %c0_49] : memref<18x25x128xf32, #tpu.memory_space<vmem>>, vector<8x16x128xf32>
    tpu.vector_store %arg6[%c9_47, %c8_48, %c0_49], %51 {strides = array<i32>} : memref<18x25x128xf32, #tpu.memory_space<vmem>>, vector<8x16x128xf32>,
    %c0_50 = arith.constant 0 : index
    %c7_51 = arith.constant 7 : index
    %c0_52 = arith.constant 0 : index
    %53 = vector.load %arg6[%c0_50, %c7_51, %c0_52] : memref<18x25x128xf32, #tpu.memory_space<vmem>>, vector<18x16x64xf32>
    %54 = vector.shape_cast %53 : vector<18x16x64xf32> to vector<288x64xf32>
    %55 = arith.truncf %54 : vector<288x64xf32> to vector<288x64xbf16>
    %c0_53 = arith.constant 0 : index
    %c0_54 = arith.constant 0 : index
    %56 = vector.load %arg7[%c0_53, %c0_54] : memref<288x192xbf16, #tpu.memory_space<vmem>>, vector<288x64xbf16>
    tpu.vector_store %arg7[%c0_53, %c0_54], %55 {strides = array<i32>} : memref<288x192xbf16, #tpu.memory_space<vmem>>, vector<288x64xbf16>,
    %c0_55 = arith.constant 0 : index
    %c8_56 = arith.constant 8 : index
    %c0_57 = arith.constant 0 : index
    %57 = vector.load %arg6[%c0_55, %c8_56, %c0_57] : memref<18x25x128xf32, #tpu.memory_space<vmem>>, vector<18x16x64xf32>
    %58 = vector.shape_cast %57 : vector<18x16x64xf32> to vector<288x64xf32>
    %59 = arith.truncf %58 : vector<288x64xf32> to vector<288x64xbf16>
    %c0_58 = arith.constant 0 : index
    %c64 = arith.constant 64 : index
    %60 = vector.load %arg7[%c0_58, %c64] : memref<288x192xbf16, #tpu.memory_space<vmem>>, vector<288x64xbf16>
    tpu.vector_store %arg7[%c0_58, %c64], %59 {strides = array<i32>} : memref<288x192xbf16, #tpu.memory_space<vmem>>, vector<288x64xbf16>,
    %c0_59 = arith.constant 0 : index
    %c9_60 = arith.constant 9 : index
    %c0_61 = arith.constant 0 : index
    %61 = vector.load %arg6[%c0_59, %c9_60, %c0_61] : memref<18x25x128xf32, #tpu.memory_space<vmem>>, vector<18x16x64xf32>
    %62 = vector.shape_cast %61 : vector<18x16x64xf32> to vector<288x64xf32>
    %63 = arith.truncf %62 : vector<288x64xf32> to vector<288x64xbf16>
    %c0_62 = arith.constant 0 : index
    %c128_63 = arith.constant 128 : index
    %64 = vector.load %arg7[%c0_62, %c128_63] : memref<288x192xbf16, #tpu.memory_space<vmem>>, vector<288x64xbf16>
    tpu.vector_store %arg7[%c0_62, %c128_63], %63 {strides = array<i32>} : memref<288x192xbf16, #tpu.memory_space<vmem>>, vector<288x64xbf16>,
    %c1_64 = arith.constant 1 : index
    %c0_65 = arith.constant 0 : index
    %c0_66 = arith.constant 0 : index
    %65 = vector.load %arg3[%c1_64, %c0_65, %c0_66] : memref<6x1x128xf32, #tpu.memory_space<vmem>>, vector<1x1x128xf32>
    %66 = vector.shape_cast %65 : vector<1x1x128xf32> to vector<1x128xf32>
    %c0_67 = arith.constant 0 : index
    %c0_68 = arith.constant 0 : index
    %67 = vector.load %arg7[%c0_67, %c0_68] : memref<288x192xbf16, #tpu.memory_space<vmem>>, vector<128x192xbf16>
    %c144_69 = arith.constant 144 : index
    %c0_70 = arith.constant 0 : index
    %68 = vector.load %arg2[%c144_69, %c0_70] : memref<2016x128xbf16, #tpu.memory_space<vmem>>, vector<192x128xbf16>
    %cst_71 = arith.constant dense<0.000000e+00> : vector<128x128xf32>
    %69 = tpu.matmul %67, %68, %cst_71 {dimension_numbers = #tpu.dot_dimension_numbers<[1], [0], [0], [1], [0, 0, 1, 1], [], []>} : vector<128x192xbf16>, vector<192x128xbf16>, vector<128x128xf32> -> vector<128x128xf32>
    %c16_72 = arith.constant 16 : index
    %c0_73 = arith.constant 0 : index
    %70 = vector.load %arg7[%c16_72, %c0_73] : memref<288x192xbf16, #tpu.memory_space<vmem>>, vector<128x192xbf16>
    %c336 = arith.constant 336 : index
    %c0_74 = arith.constant 0 : index
    %71 = vector.load %arg2[%c336, %c0_74] : memref<2016x128xbf16, #tpu.memory_space<vmem>>, vector<192x128xbf16>
    %cst_75 = arith.constant dense<0.000000e+00> : vector<128x128xf32>
    %72 = tpu.matmul %70, %71, %cst_75 {dimension_numbers = #tpu.dot_dimension_numbers<[1], [0], [0], [1], [0, 0, 1, 1], [], []>} : vector<128x192xbf16>, vector<192x128xbf16>, vector<128x128xf32> -> vector<128x128xf32>
    %73 = arith.addf %69, %72 : vector<128x128xf32>
    %c32_76 = arith.constant 32 : index
    %c0_77 = arith.constant 0 : index
    %74 = vector.load %arg7[%c32_76, %c0_77] : memref<288x192xbf16, #tpu.memory_space<vmem>>, vector<128x192xbf16>
    %c528 = arith.constant 528 : index
    %c0_78 = arith.constant 0 : index
    %75 = vector.load %arg2[%c528, %c0_78] : memref<2016x128xbf16, #tpu.memory_space<vmem>>, vector<192x128xbf16>
    %cst_79 = arith.constant dense<0.000000e+00> : vector<128x128xf32>
    %76 = tpu.matmul %74, %75, %cst_79 {dimension_numbers = #tpu.dot_dimension_numbers<[1], [0], [0], [1], [0, 0, 1, 1], [], []>} : vector<128x192xbf16>, vector<192x128xbf16>, vector<128x128xf32> -> vector<128x128xf32>
    %77 = arith.addf %73, %76 : vector<128x128xf32>
    %78 = vector.broadcast %66 : vector<1x128xf32> to vector<128x128xf32>
    %79 = arith.addf %77, %78 : vector<128x128xf32>
    %cst_80 = arith.constant 0.000000e+00 : f32
    %80 = vector.broadcast %cst_80 : f32 to vector<128x128xf32>
    %81 = arith.maximumf %79, %80 : vector<128x128xf32>
    %82 = vector.shape_cast %81 : vector<128x128xf32> to vector<8x16x128xf32>
    %c1_81 = arith.constant 1 : index
    %c8_82 = arith.constant 8 : index
    %c0_83 = arith.constant 0 : index
    %83 = vector.load %arg6[%c1_81, %c8_82, %c0_83] : memref<18x25x128xf32, #tpu.memory_space<vmem>>, vector<8x16x128xf32>
    tpu.vector_store %arg6[%c1_81, %c8_82, %c0_83], %82 {strides = array<i32>} : memref<18x25x128xf32, #tpu.memory_space<vmem>>, vector<8x16x128xf32>,
    %c128_84 = arith.constant 128 : index
    %c0_85 = arith.constant 0 : index
    %84 = vector.load %arg7[%c128_84, %c0_85] : memref<288x192xbf16, #tpu.memory_space<vmem>>, vector<128x192xbf16>
    %c144_86 = arith.constant 144 : index
    %c0_87 = arith.constant 0 : index
    %85 = vector.load %arg2[%c144_86, %c0_87] : memref<2016x128xbf16, #tpu.memory_space<vmem>>, vector<192x128xbf16>
    %cst_88 = arith.constant dense<0.000000e+00> : vector<128x128xf32>
    %86 = tpu.matmul %84, %85, %cst_88 {dimension_numbers = #tpu.dot_dimension_numbers<[1], [0], [0], [1], [0, 0, 1, 1], [], []>} : vector<128x192xbf16>, vector<192x128xbf16>, vector<128x128xf32> -> vector<128x128xf32>
    %c144_89 = arith.constant 144 : index
    %c0_90 = arith.constant 0 : index
    %87 = vector.load %arg7[%c144_89, %c0_90] : memref<288x192xbf16, #tpu.memory_space<vmem>>, vector<128x192xbf16>
    %c336_91 = arith.constant 336 : index
    %c0_92 = arith.constant 0 : index
    %88 = vector.load %arg2[%c336_91, %c0_92] : memref<2016x128xbf16, #tpu.memory_space<vmem>>, vector<192x128xbf16>
    %cst_93 = arith.constant dense<0.000000e+00> : vector<128x128xf32>
    %89 = tpu.matmul %87, %88, %cst_93 {dimension_numbers = #tpu.dot_dimension_numbers<[1], [0], [0], [1], [0, 0, 1, 1], [], []>} : vector<128x192xbf16>, vector<192x128xbf16>, vector<128x128xf32> -> vector<128x128xf32>
    %90 = arith.addf %86, %89 : vector<128x128xf32>
    %c160_94 = arith.constant 160 : index
    %c0_95 = arith.constant 0 : index
    %91 = vector.load %arg7[%c160_94, %c0_95] : memref<288x192xbf16, #tpu.memory_space<vmem>>, vector<128x192xbf16>
    %c528_96 = arith.constant 528 : index
    %c0_97 = arith.constant 0 : index
    %92 = vector.load %arg2[%c528_96, %c0_97] : memref<2016x128xbf16, #tpu.memory_space<vmem>>, vector<192x128xbf16>
    %cst_98 = arith.constant dense<0.000000e+00> : vector<128x128xf32>
    %93 = tpu.matmul %91, %92, %cst_98 {dimension_numbers = #tpu.dot_dimension_numbers<[1], [0], [0], [1], [0, 0, 1, 1], [], []>} : vector<128x192xbf16>, vector<192x128xbf16>, vector<128x128xf32> -> vector<128x128xf32>
    %94 = arith.addf %90, %93 : vector<128x128xf32>
    %95 = vector.broadcast %66 : vector<1x128xf32> to vector<128x128xf32>
    %96 = arith.addf %94, %95 : vector<128x128xf32>
    %cst_99 = arith.constant 0.000000e+00 : f32
    %97 = vector.broadcast %cst_99 : f32 to vector<128x128xf32>
    %98 = arith.maximumf %96, %97 : vector<128x128xf32>
    %99 = vector.shape_cast %98 : vector<128x128xf32> to vector<8x16x128xf32>
    %c9_100 = arith.constant 9 : index
    %c8_101 = arith.constant 8 : index
    %c0_102 = arith.constant 0 : index
    %100 = vector.load %arg6[%c9_100, %c8_101, %c0_102] : memref<18x25x128xf32, #tpu.memory_space<vmem>>, vector<8x16x128xf32>
    tpu.vector_store %arg6[%c9_100, %c8_101, %c0_102], %99 {strides = array<i32>} : memref<18x25x128xf32, #tpu.memory_space<vmem>>, vector<8x16x128xf32>,
    %c0_103 = arith.constant 0 : index
    %c7_104 = arith.constant 7 : index
    %c0_105 = arith.constant 0 : index
    %101 = vector.load %arg6[%c0_103, %c7_104, %c0_105] : memref<18x25x128xf32, #tpu.memory_space<vmem>>, vector<18x16x32xf32>
    %102 = vector.shape_cast %101 : vector<18x16x32xf32> to vector<288x32xf32>
    %103 = arith.truncf %102 : vector<288x32xf32> to vector<288x32xbf16>
    %c0_106 = arith.constant 0 : index
    %c0_107 = arith.constant 0 : index
    %104 = vector.load %arg7[%c0_106, %c0_107] : memref<288x192xbf16, #tpu.memory_space<vmem>>, vector<288x32xbf16>
    tpu.vector_store %arg7[%c0_106, %c0_107], %103 {strides = array<i32>} : memref<288x192xbf16, #tpu.memory_space<vmem>>, vector<288x32xbf16>,
    %c0_108 = arith.constant 0 : index
    %c8_109 = arith.constant 8 : index
    %c0_110 = arith.constant 0 : index
    %105 = vector.load %arg6[%c0_108, %c8_109, %c0_110] : memref<18x25x128xf32, #tpu.memory_space<vmem>>, vector<18x16x32xf32>
    %106 = vector.shape_cast %105 : vector<18x16x32xf32> to vector<288x32xf32>
    %107 = arith.truncf %106 : vector<288x32xf32> to vector<288x32xbf16>
    %c0_111 = arith.constant 0 : index
    %c32_112 = arith.constant 32 : index
    %108 = vector.load %arg7[%c0_111, %c32_112] : memref<288x192xbf16, #tpu.memory_space<vmem>>, vector<288x32xbf16>
    tpu.vector_store %arg7[%c0_111, %c32_112], %107 {strides = array<i32>} : memref<288x192xbf16, #tpu.memory_space<vmem>>, vector<288x32xbf16>,
    %c0_113 = arith.constant 0 : index
    %c9_114 = arith.constant 9 : index
    %c0_115 = arith.constant 0 : index
    %109 = vector.load %arg6[%c0_113, %c9_114, %c0_115] : memref<18x25x128xf32, #tpu.memory_space<vmem>>, vector<18x16x32xf32>
    %110 = vector.shape_cast %109 : vector<18x16x32xf32> to vector<288x32xf32>
    %111 = arith.truncf %110 : vector<288x32xf32> to vector<288x32xbf16>
    %c0_116 = arith.constant 0 : index
    %c64_117 = arith.constant 64 : index
    %112 = vector.load %arg7[%c0_116, %c64_117] : memref<288x192xbf16, #tpu.memory_space<vmem>>, vector<288x32xbf16>
    tpu.vector_store %arg7[%c0_116, %c64_117], %111 {strides = array<i32>} : memref<288x192xbf16, #tpu.memory_space<vmem>>, vector<288x32xbf16>,
    %c2 = arith.constant 2 : index
    %c0_118 = arith.constant 0 : index
    %c0_119 = arith.constant 0 : index
    %113 = vector.load %arg3[%c2, %c0_118, %c0_119] : memref<6x1x128xf32, #tpu.memory_space<vmem>>, vector<1x1x128xf32>
    %114 = vector.shape_cast %113 : vector<1x1x128xf32> to vector<1x128xf32>
    %c0_120 = arith.constant 0 : index
    %c0_121 = arith.constant 0 : index
    %115 = vector.load %arg7[%c0_120, %c0_121] : memref<288x192xbf16, #tpu.memory_space<vmem>>, vector<128x96xbf16>
    %c720 = arith.constant 720 : index
    %c0_122 = arith.constant 0 : index
    %116 = vector.load %arg2[%c720, %c0_122] : memref<2016x128xbf16, #tpu.memory_space<vmem>>, vector<96x128xbf16>
    %cst_123 = arith.constant dense<0.000000e+00> : vector<128x128xf32>
    %117 = tpu.matmul %115, %116, %cst_123 {dimension_numbers = #tpu.dot_dimension_numbers<[1], [0], [0], [1], [0, 0, 1, 1], [], []>} : vector<128x96xbf16>, vector<96x128xbf16>, vector<128x128xf32> -> vector<128x128xf32>
    %c16_124 = arith.constant 16 : index
    %c0_125 = arith.constant 0 : index
    %118 = vector.load %arg7[%c16_124, %c0_125] : memref<288x192xbf16, #tpu.memory_space<vmem>>, vector<128x96xbf16>
    %c816 = arith.constant 816 : index
    %c0_126 = arith.constant 0 : index
    %119 = vector.load %arg2[%c816, %c0_126] : memref<2016x128xbf16, #tpu.memory_space<vmem>>, vector<96x128xbf16>
    %cst_127 = arith.constant dense<0.000000e+00> : vector<128x128xf32>
    %120 = tpu.matmul %118, %119, %cst_127 {dimension_numbers = #tpu.dot_dimension_numbers<[1], [0], [0], [1], [0, 0, 1, 1], [], []>} : vector<128x96xbf16>, vector<96x128xbf16>, vector<128x128xf32> -> vector<128x128xf32>
    %121 = arith.addf %117, %120 : vector<128x128xf32>
    %c32_128 = arith.constant 32 : index
    %c0_129 = arith.constant 0 : index
    %122 = vector.load %arg7[%c32_128, %c0_129] : memref<288x192xbf16, #tpu.memory_space<vmem>>, vector<128x96xbf16>
    %c912 = arith.constant 912 : index
    %c0_130 = arith.constant 0 : index
    %123 = vector.load %arg2[%c912, %c0_130] : memref<2016x128xbf16, #tpu.memory_space<vmem>>, vector<96x128xbf16>
    %cst_131 = arith.constant dense<0.000000e+00> : vector<128x128xf32>
    %124 = tpu.matmul %122, %123, %cst_131 {dimension_numbers = #tpu.dot_dimension_numbers<[1], [0], [0], [1], [0, 0, 1, 1], [], []>} : vector<128x96xbf16>, vector<96x128xbf16>, vector<128x128xf32> -> vector<128x128xf32>
    %125 = arith.addf %121, %124 : vector<128x128xf32>
    %126 = vector.broadcast %114 : vector<1x128xf32> to vector<128x128xf32>
    %127 = arith.addf %125, %126 : vector<128x128xf32>
    %128 = vector.shape_cast %127 : vector<128x128xf32> to vector<8x16x128xf32>
    %129 = vector.extract_strided_slice %128 {offsets = [0, 0, 0], sizes = [8, 16, 8], strides = [1, 1, 1]} : vector<8x16x128xf32> to vector<8x16x8xf32>
    %c0_132 = arith.constant 0 : index
    %c0_133 = arith.constant 0 : index
    %c0_134 = arith.constant 0 : index
    %c0_135 = arith.constant 0 : index
    %130 = vector.load %arg4[%c0_132, %c0_133, %c0_134, %c0_135] : memref<1x16x16x8xf32, #tpu.memory_space<vmem>>, vector<1x8x16x8xf32>
    %131 = vector.shape_cast %130 : vector<1x8x16x8xf32> to vector<8x16x8xf32>
    %132 = vector.shape_cast %129 : vector<8x16x8xf32> to vector<1x8x16x8xf32>
    tpu.vector_store %arg4[%c0_132, %c0_133, %c0_134, %c0_135], %132 {strides = array<i32>} : memref<1x16x16x8xf32, #tpu.memory_space<vmem>>, vector<1x8x16x8xf32>,
    %c1_136 = arith.constant 1 : index
    %c8_137 = arith.constant 8 : index
    %c0_138 = arith.constant 0 : index
    %133 = vector.load %arg6[%c1_136, %c8_137, %c0_138] : memref<18x25x128xf32, #tpu.memory_space<vmem>>, vector<8x16x128xf32>
    tpu.vector_store %arg6[%c1_136, %c8_137, %c0_138], %128 {strides = array<i32>} : memref<18x25x128xf32, #tpu.memory_space<vmem>>, vector<8x16x128xf32>,
    %c128_139 = arith.constant 128 : index
    %c0_140 = arith.constant 0 : index
    %134 = vector.load %arg7[%c128_139, %c0_140] : memref<288x192xbf16, #tpu.memory_space<vmem>>, vector<128x96xbf16>
    %c720_141 = arith.constant 720 : index
    %c0_142 = arith.constant 0 : index
    %135 = vector.load %arg2[%c720_141, %c0_142] : memref<2016x128xbf16, #tpu.memory_space<vmem>>, vector<96x128xbf16>
    %cst_143 = arith.constant dense<0.000000e+00> : vector<128x128xf32>
    %136 = tpu.matmul %134, %135, %cst_143 {dimension_numbers = #tpu.dot_dimension_numbers<[1], [0], [0], [1], [0, 0, 1, 1], [], []>} : vector<128x96xbf16>, vector<96x128xbf16>, vector<128x128xf32> -> vector<128x128xf32>
    %c144_144 = arith.constant 144 : index
    %c0_145 = arith.constant 0 : index
    %137 = vector.load %arg7[%c144_144, %c0_145] : memref<288x192xbf16, #tpu.memory_space<vmem>>, vector<128x96xbf16>
    %c816_146 = arith.constant 816 : index
    %c0_147 = arith.constant 0 : index
    %138 = vector.load %arg2[%c816_146, %c0_147] : memref<2016x128xbf16, #tpu.memory_space<vmem>>, vector<96x128xbf16>
    %cst_148 = arith.constant dense<0.000000e+00> : vector<128x128xf32>
    %139 = tpu.matmul %137, %138, %cst_148 {dimension_numbers = #tpu.dot_dimension_numbers<[1], [0], [0], [1], [0, 0, 1, 1], [], []>} : vector<128x96xbf16>, vector<96x128xbf16>, vector<128x128xf32> -> vector<128x128xf32>
    %140 = arith.addf %136, %139 : vector<128x128xf32>
    %c160_149 = arith.constant 160 : index
    %c0_150 = arith.constant 0 : index
    %141 = vector.load %arg7[%c160_149, %c0_150] : memref<288x192xbf16, #tpu.memory_space<vmem>>, vector<128x96xbf16>
    %c912_151 = arith.constant 912 : index
    %c0_152 = arith.constant 0 : index
    %142 = vector.load %arg2[%c912_151, %c0_152] : memref<2016x128xbf16, #tpu.memory_space<vmem>>, vector<96x128xbf16>
    %cst_153 = arith.constant dense<0.000000e+00> : vector<128x128xf32>
    %143 = tpu.matmul %141, %142, %cst_153 {dimension_numbers = #tpu.dot_dimension_numbers<[1], [0], [0], [1], [0, 0, 1, 1], [], []>} : vector<128x96xbf16>, vector<96x128xbf16>, vector<128x128xf32> -> vector<128x128xf32>
    %144 = arith.addf %140, %143 : vector<128x128xf32>
    %145 = vector.broadcast %114 : vector<1x128xf32> to vector<128x128xf32>
    %146 = arith.addf %144, %145 : vector<128x128xf32>
    %147 = vector.shape_cast %146 : vector<128x128xf32> to vector<8x16x128xf32>
    %148 = vector.extract_strided_slice %147 {offsets = [0, 0, 0], sizes = [8, 16, 8], strides = [1, 1, 1]} : vector<8x16x128xf32> to vector<8x16x8xf32>
    %c0_154 = arith.constant 0 : index
    %c8_155 = arith.constant 8 : index
    %c0_156 = arith.constant 0 : index
    %c0_157 = arith.constant 0 : index
    %149 = vector.load %arg4[%c0_154, %c8_155, %c0_156, %c0_157] : memref<1x16x16x8xf32, #tpu.memory_space<vmem>>, vector<1x8x16x8xf32>
    %150 = vector.shape_cast %149 : vector<1x8x16x8xf32> to vector<8x16x8xf32>
    %151 = vector.shape_cast %148 : vector<8x16x8xf32> to vector<1x8x16x8xf32>
    tpu.vector_store %arg4[%c0_154, %c8_155, %c0_156, %c0_157], %151 {strides = array<i32>} : memref<1x16x16x8xf32, #tpu.memory_space<vmem>>, vector<1x8x16x8xf32>,
    %c9_158 = arith.constant 9 : index
    %c8_159 = arith.constant 8 : index
    %c0_160 = arith.constant 0 : index
    %152 = vector.load %arg6[%c9_158, %c8_159, %c0_160] : memref<18x25x128xf32, #tpu.memory_space<vmem>>, vector<8x16x128xf32>
    tpu.vector_store %arg6[%c9_158, %c8_159, %c0_160], %147 {strides = array<i32>} : memref<18x25x128xf32, #tpu.memory_space<vmem>>, vector<8x16x128xf32>,
    %c0_161 = arith.constant 0 : index
    %c7_162 = arith.constant 7 : index
    %c0_163 = arith.constant 0 : index
    %153 = vector.load %arg6[%c0_161, %c7_162, %c0_163] : memref<18x25x128xf32, #tpu.memory_space<vmem>>, vector<18x16x16xf32>
    %154 = vector.shape_cast %153 : vector<18x16x16xf32> to vector<288x16xf32>
    %155 = arith.truncf %154 : vector<288x16xf32> to vector<288x16xbf16>
    %c0_164 = arith.constant 0 : index
    %c0_165 = arith.constant 0 : index
    %156 = vector.load %arg7[%c0_164, %c0_165] : memref<288x192xbf16, #tpu.memory_space<vmem>>, vector<288x16xbf16>
    tpu.vector_store %arg7[%c0_164, %c0_165], %155 {strides = array<i32>} : memref<288x192xbf16, #tpu.memory_space<vmem>>, vector<288x16xbf16>,
    %c0_166 = arith.constant 0 : index
    %c8_167 = arith.constant 8 : index
    %c0_168 = arith.constant 0 : index
    %157 = vector.load %arg6[%c0_166, %c8_167, %c0_168] : memref<18x25x128xf32, #tpu.memory_space<vmem>>, vector<18x16x16xf32>
    %158 = vector.shape_cast %157 : vector<18x16x16xf32> to vector<288x16xf32>
    %159 = arith.truncf %158 : vector<288x16xf32> to vector<288x16xbf16>
    %c0_169 = arith.constant 0 : index
    %c16_170 = arith.constant 16 : index
    %160 = vector.load %arg7[%c0_169, %c16_170] : memref<288x192xbf16, #tpu.memory_space<vmem>>, vector<288x16xbf16>
    tpu.vector_store %arg7[%c0_169, %c16_170], %159 {strides = array<i32>} : memref<288x192xbf16, #tpu.memory_space<vmem>>, vector<288x16xbf16>,
    %c0_171 = arith.constant 0 : index
    %c9_172 = arith.constant 9 : index
    %c0_173 = arith.constant 0 : index
    %161 = vector.load %arg6[%c0_171, %c9_172, %c0_173] : memref<18x25x128xf32, #tpu.memory_space<vmem>>, vector<18x16x16xf32>
    %162 = vector.shape_cast %161 : vector<18x16x16xf32> to vector<288x16xf32>
    %163 = arith.truncf %162 : vector<288x16xf32> to vector<288x16xbf16>
    %c0_174 = arith.constant 0 : index
    %c32_175 = arith.constant 32 : index
    %164 = vector.load %arg7[%c0_174, %c32_175] : memref<288x192xbf16, #tpu.memory_space<vmem>>, vector<288x16xbf16>
    tpu.vector_store %arg7[%c0_174, %c32_175], %163 {strides = array<i32>} : memref<288x192xbf16, #tpu.memory_space<vmem>>, vector<288x16xbf16>,
    %c3 = arith.constant 3 : index
    %c0_176 = arith.constant 0 : index
    %c0_177 = arith.constant 0 : index
    %165 = vector.load %arg3[%c3, %c0_176, %c0_177] : memref<6x1x128xf32, #tpu.memory_space<vmem>>, vector<1x1x128xf32>
    %166 = vector.shape_cast %165 : vector<1x1x128xf32> to vector<1x128xf32>
    %c0_178 = arith.constant 0 : index
    %c0_179 = arith.constant 0 : index
    %167 = vector.load %arg7[%c0_178, %c0_179] : memref<288x192xbf16, #tpu.memory_space<vmem>>, vector<128x48xbf16>
    %c1008 = arith.constant 1008 : index
    %c0_180 = arith.constant 0 : index
    %168 = vector.load %arg2[%c1008, %c0_180] : memref<2016x128xbf16, #tpu.memory_space<vmem>>, vector<48x128xbf16>
    %cst_181 = arith.constant dense<0.000000e+00> : vector<128x128xf32>
    %169 = tpu.matmul %167, %168, %cst_181 {dimension_numbers = #tpu.dot_dimension_numbers<[1], [0], [0], [1], [0, 0, 1, 1], [], []>} : vector<128x48xbf16>, vector<48x128xbf16>, vector<128x128xf32> -> vector<128x128xf32>
    %c16_182 = arith.constant 16 : index
    %c0_183 = arith.constant 0 : index
    %170 = vector.load %arg7[%c16_182, %c0_183] : memref<288x192xbf16, #tpu.memory_space<vmem>>, vector<128x48xbf16>
    %c1056 = arith.constant 1056 : index
    %c0_184 = arith.constant 0 : index
    %171 = vector.load %arg2[%c1056, %c0_184] : memref<2016x128xbf16, #tpu.memory_space<vmem>>, vector<48x128xbf16>
    %cst_185 = arith.constant dense<0.000000e+00> : vector<128x128xf32>
    %172 = tpu.matmul %170, %171, %cst_185 {dimension_numbers = #tpu.dot_dimension_numbers<[1], [0], [0], [1], [0, 0, 1, 1], [], []>} : vector<128x48xbf16>, vector<48x128xbf16>, vector<128x128xf32> -> vector<128x128xf32>
    %173 = arith.addf %169, %172 : vector<128x128xf32>
    %c32_186 = arith.constant 32 : index
    %c0_187 = arith.constant 0 : index
    %174 = vector.load %arg7[%c32_186, %c0_187] : memref<288x192xbf16, #tpu.memory_space<vmem>>, vector<128x48xbf16>
    %c1104 = arith.constant 1104 : index
    %c0_188 = arith.constant 0 : index
    %175 = vector.load %arg2[%c1104, %c0_188] : memref<2016x128xbf16, #tpu.memory_space<vmem>>, vector<48x128xbf16>
    %cst_189 = arith.constant dense<0.000000e+00> : vector<128x128xf32>
    %176 = tpu.matmul %174, %175, %cst_189 {dimension_numbers = #tpu.dot_dimension_numbers<[1], [0], [0], [1], [0, 0, 1, 1], [], []>} : vector<128x48xbf16>, vector<48x128xbf16>, vector<128x128xf32> -> vector<128x128xf32>
    %177 = arith.addf %173, %176 : vector<128x128xf32>
    %178 = vector.broadcast %166 : vector<1x128xf32> to vector<128x128xf32>
    %179 = arith.addf %177, %178 : vector<128x128xf32>
    %cst_190 = arith.constant 0.000000e+00 : f32
    %180 = vector.broadcast %cst_190 : f32 to vector<128x128xf32>
    %181 = arith.maximumf %179, %180 : vector<128x128xf32>
    %182 = vector.shape_cast %181 : vector<128x128xf32> to vector<8x16x128xf32>
    %c1_191 = arith.constant 1 : index
    %c8_192 = arith.constant 8 : index
    %c0_193 = arith.constant 0 : index
    %183 = vector.load %arg6[%c1_191, %c8_192, %c0_193] : memref<18x25x128xf32, #tpu.memory_space<vmem>>, vector<8x16x128xf32>
    tpu.vector_store %arg6[%c1_191, %c8_192, %c0_193], %182 {strides = array<i32>} : memref<18x25x128xf32, #tpu.memory_space<vmem>>, vector<8x16x128xf32>,
    %c128_194 = arith.constant 128 : index
    %c0_195 = arith.constant 0 : index
    %184 = vector.load %arg7[%c128_194, %c0_195] : memref<288x192xbf16, #tpu.memory_space<vmem>>, vector<128x48xbf16>
    %c1008_196 = arith.constant 1008 : index
    %c0_197 = arith.constant 0 : index
    %185 = vector.load %arg2[%c1008_196, %c0_197] : memref<2016x128xbf16, #tpu.memory_space<vmem>>, vector<48x128xbf16>
    %cst_198 = arith.constant dense<0.000000e+00> : vector<128x128xf32>
    %186 = tpu.matmul %184, %185, %cst_198 {dimension_numbers = #tpu.dot_dimension_numbers<[1], [0], [0], [1], [0, 0, 1, 1], [], []>} : vector<128x48xbf16>, vector<48x128xbf16>, vector<128x128xf32> -> vector<128x128xf32>
    %c144_199 = arith.constant 144 : index
    %c0_200 = arith.constant 0 : index
    %187 = vector.load %arg7[%c144_199, %c0_200] : memref<288x192xbf16, #tpu.memory_space<vmem>>, vector<128x48xbf16>
    %c1056_201 = arith.constant 1056 : index
    %c0_202 = arith.constant 0 : index
    %188 = vector.load %arg2[%c1056_201, %c0_202] : memref<2016x128xbf16, #tpu.memory_space<vmem>>, vector<48x128xbf16>
    %cst_203 = arith.constant dense<0.000000e+00> : vector<128x128xf32>
    %189 = tpu.matmul %187, %188, %cst_203 {dimension_numbers = #tpu.dot_dimension_numbers<[1], [0], [0], [1], [0, 0, 1, 1], [], []>} : vector<128x48xbf16>, vector<48x128xbf16>, vector<128x128xf32> -> vector<128x128xf32>
    %190 = arith.addf %186, %189 : vector<128x128xf32>
    %c160_204 = arith.constant 160 : index
    %c0_205 = arith.constant 0 : index
    %191 = vector.load %arg7[%c160_204, %c0_205] : memref<288x192xbf16, #tpu.memory_space<vmem>>, vector<128x48xbf16>
    %c1104_206 = arith.constant 1104 : index
    %c0_207 = arith.constant 0 : index
    %192 = vector.load %arg2[%c1104_206, %c0_207] : memref<2016x128xbf16, #tpu.memory_space<vmem>>, vector<48x128xbf16>
    %cst_208 = arith.constant dense<0.000000e+00> : vector<128x128xf32>
    %193 = tpu.matmul %191, %192, %cst_208 {dimension_numbers = #tpu.dot_dimension_numbers<[1], [0], [0], [1], [0, 0, 1, 1], [], []>} : vector<128x48xbf16>, vector<48x128xbf16>, vector<128x128xf32> -> vector<128x128xf32>
    %194 = arith.addf %190, %193 : vector<128x128xf32>
    %195 = vector.broadcast %166 : vector<1x128xf32> to vector<128x128xf32>
    %196 = arith.addf %194, %195 : vector<128x128xf32>
    %cst_209 = arith.constant 0.000000e+00 : f32
    %197 = vector.broadcast %cst_209 : f32 to vector<128x128xf32>
    %198 = arith.maximumf %196, %197 : vector<128x128xf32>
    %199 = vector.shape_cast %198 : vector<128x128xf32> to vector<8x16x128xf32>
    %c9_210 = arith.constant 9 : index
    %c8_211 = arith.constant 8 : index
    %c0_212 = arith.constant 0 : index
    %200 = vector.load %arg6[%c9_210, %c8_211, %c0_212] : memref<18x25x128xf32, #tpu.memory_space<vmem>>, vector<8x16x128xf32>
    tpu.vector_store %arg6[%c9_210, %c8_211, %c0_212], %199 {strides = array<i32>} : memref<18x25x128xf32, #tpu.memory_space<vmem>>, vector<8x16x128xf32>,
    %c0_213 = arith.constant 0 : index
    %c7_214 = arith.constant 7 : index
    %c0_215 = arith.constant 0 : index
    %201 = vector.load %arg6[%c0_213, %c7_214, %c0_215] : memref<18x25x128xf32, #tpu.memory_space<vmem>>, vector<18x16x32xf32>
    %202 = vector.shape_cast %201 : vector<18x16x32xf32> to vector<288x32xf32>
    %203 = arith.truncf %202 : vector<288x32xf32> to vector<288x32xbf16>
    %c0_216 = arith.constant 0 : index
    %c0_217 = arith.constant 0 : index
    %204 = vector.load %arg7[%c0_216, %c0_217] : memref<288x192xbf16, #tpu.memory_space<vmem>>, vector<288x32xbf16>
    tpu.vector_store %arg7[%c0_216, %c0_217], %203 {strides = array<i32>} : memref<288x192xbf16, #tpu.memory_space<vmem>>, vector<288x32xbf16>,
    %c0_218 = arith.constant 0 : index
    %c8_219 = arith.constant 8 : index
    %c0_220 = arith.constant 0 : index
    %205 = vector.load %arg6[%c0_218, %c8_219, %c0_220] : memref<18x25x128xf32, #tpu.memory_space<vmem>>, vector<18x16x32xf32>
    %206 = vector.shape_cast %205 : vector<18x16x32xf32> to vector<288x32xf32>
    %207 = arith.truncf %206 : vector<288x32xf32> to vector<288x32xbf16>
    %c0_221 = arith.constant 0 : index
    %c32_222 = arith.constant 32 : index
    %208 = vector.load %arg7[%c0_221, %c32_222] : memref<288x192xbf16, #tpu.memory_space<vmem>>, vector<288x32xbf16>
    tpu.vector_store %arg7[%c0_221, %c32_222], %207 {strides = array<i32>} : memref<288x192xbf16, #tpu.memory_space<vmem>>, vector<288x32xbf16>,
    %c0_223 = arith.constant 0 : index
    %c9_224 = arith.constant 9 : index
    %c0_225 = arith.constant 0 : index
    %209 = vector.load %arg6[%c0_223, %c9_224, %c0_225] : memref<18x25x128xf32, #tpu.memory_space<vmem>>, vector<18x16x32xf32>
    %210 = vector.shape_cast %209 : vector<18x16x32xf32> to vector<288x32xf32>
    %211 = arith.truncf %210 : vector<288x32xf32> to vector<288x32xbf16>
    %c0_226 = arith.constant 0 : index
    %c64_227 = arith.constant 64 : index
    %212 = vector.load %arg7[%c0_226, %c64_227] : memref<288x192xbf16, #tpu.memory_space<vmem>>, vector<288x32xbf16>
    tpu.vector_store %arg7[%c0_226, %c64_227], %211 {strides = array<i32>} : memref<288x192xbf16, #tpu.memory_space<vmem>>, vector<288x32xbf16>,
    %c4 = arith.constant 4 : index
    %c0_228 = arith.constant 0 : index
    %c0_229 = arith.constant 0 : index
    %213 = vector.load %arg3[%c4, %c0_228, %c0_229] : memref<6x1x128xf32, #tpu.memory_space<vmem>>, vector<1x1x128xf32>
    %214 = vector.shape_cast %213 : vector<1x1x128xf32> to vector<1x128xf32>
    %c0_230 = arith.constant 0 : index
    %c0_231 = arith.constant 0 : index
    %215 = vector.load %arg7[%c0_230, %c0_231] : memref<288x192xbf16, #tpu.memory_space<vmem>>, vector<128x96xbf16>
    %c1152 = arith.constant 1152 : index
    %c0_232 = arith.constant 0 : index
    %216 = vector.load %arg2[%c1152, %c0_232] : memref<2016x128xbf16, #tpu.memory_space<vmem>>, vector<96x128xbf16>
    %cst_233 = arith.constant dense<0.000000e+00> : vector<128x128xf32>
    %217 = tpu.matmul %215, %216, %cst_233 {dimension_numbers = #tpu.dot_dimension_numbers<[1], [0], [0], [1], [0, 0, 1, 1], [], []>} : vector<128x96xbf16>, vector<96x128xbf16>, vector<128x128xf32> -> vector<128x128xf32>
    %c16_234 = arith.constant 16 : index
    %c0_235 = arith.constant 0 : index
    %218 = vector.load %arg7[%c16_234, %c0_235] : memref<288x192xbf16, #tpu.memory_space<vmem>>, vector<128x96xbf16>
    %c1248 = arith.constant 1248 : index
    %c0_236 = arith.constant 0 : index
    %219 = vector.load %arg2[%c1248, %c0_236] : memref<2016x128xbf16, #tpu.memory_space<vmem>>, vector<96x128xbf16>
    %cst_237 = arith.constant dense<0.000000e+00> : vector<128x128xf32>
    %220 = tpu.matmul %218, %219, %cst_237 {dimension_numbers = #tpu.dot_dimension_numbers<[1], [0], [0], [1], [0, 0, 1, 1], [], []>} : vector<128x96xbf16>, vector<96x128xbf16>, vector<128x128xf32> -> vector<128x128xf32>
    %221 = arith.addf %217, %220 : vector<128x128xf32>
    %c32_238 = arith.constant 32 : index
    %c0_239 = arith.constant 0 : index
    %222 = vector.load %arg7[%c32_238, %c0_239] : memref<288x192xbf16, #tpu.memory_space<vmem>>, vector<128x96xbf16>
    %c1344 = arith.constant 1344 : index
    %c0_240 = arith.constant 0 : index
    %223 = vector.load %arg2[%c1344, %c0_240] : memref<2016x128xbf16, #tpu.memory_space<vmem>>, vector<96x128xbf16>
    %cst_241 = arith.constant dense<0.000000e+00> : vector<128x128xf32>
    %224 = tpu.matmul %222, %223, %cst_241 {dimension_numbers = #tpu.dot_dimension_numbers<[1], [0], [0], [1], [0, 0, 1, 1], [], []>} : vector<128x96xbf16>, vector<96x128xbf16>, vector<128x128xf32> -> vector<128x128xf32>
    %225 = arith.addf %221, %224 : vector<128x128xf32>
    %226 = vector.broadcast %214 : vector<1x128xf32> to vector<128x128xf32>
    %227 = arith.addf %225, %226 : vector<128x128xf32>
    %cst_242 = arith.constant 0.000000e+00 : f32
    %228 = vector.broadcast %cst_242 : f32 to vector<128x128xf32>
    %229 = arith.maximumf %227, %228 : vector<128x128xf32>
    %230 = vector.shape_cast %229 : vector<128x128xf32> to vector<8x16x128xf32>
    %c1_243 = arith.constant 1 : index
    %c8_244 = arith.constant 8 : index
    %c0_245 = arith.constant 0 : index
    %231 = vector.load %arg6[%c1_243, %c8_244, %c0_245] : memref<18x25x128xf32, #tpu.memory_space<vmem>>, vector<8x16x128xf32>
    tpu.vector_store %arg6[%c1_243, %c8_244, %c0_245], %230 {strides = array<i32>} : memref<18x25x128xf32, #tpu.memory_space<vmem>>, vector<8x16x128xf32>,
    %c128_246 = arith.constant 128 : index
    %c0_247 = arith.constant 0 : index
    %232 = vector.load %arg7[%c128_246, %c0_247] : memref<288x192xbf16, #tpu.memory_space<vmem>>, vector<128x96xbf16>
    %c1152_248 = arith.constant 1152 : index
    %c0_249 = arith.constant 0 : index
    %233 = vector.load %arg2[%c1152_248, %c0_249] : memref<2016x128xbf16, #tpu.memory_space<vmem>>, vector<96x128xbf16>
    %cst_250 = arith.constant dense<0.000000e+00> : vector<128x128xf32>
    %234 = tpu.matmul %232, %233, %cst_250 {dimension_numbers = #tpu.dot_dimension_numbers<[1], [0], [0], [1], [0, 0, 1, 1], [], []>} : vector<128x96xbf16>, vector<96x128xbf16>, vector<128x128xf32> -> vector<128x128xf32>
    %c144_251 = arith.constant 144 : index
    %c0_252 = arith.constant 0 : index
    %235 = vector.load %arg7[%c144_251, %c0_252] : memref<288x192xbf16, #tpu.memory_space<vmem>>, vector<128x96xbf16>
    %c1248_253 = arith.constant 1248 : index
    %c0_254 = arith.constant 0 : index
    %236 = vector.load %arg2[%c1248_253, %c0_254] : memref<2016x128xbf16, #tpu.memory_space<vmem>>, vector<96x128xbf16>
    %cst_255 = arith.constant dense<0.000000e+00> : vector<128x128xf32>
    %237 = tpu.matmul %235, %236, %cst_255 {dimension_numbers = #tpu.dot_dimension_numbers<[1], [0], [0], [1], [0, 0, 1, 1], [], []>} : vector<128x96xbf16>, vector<96x128xbf16>, vector<128x128xf32> -> vector<128x128xf32>
    %238 = arith.addf %234, %237 : vector<128x128xf32>
    %c160_256 = arith.constant 160 : index
    %c0_257 = arith.constant 0 : index
    %239 = vector.load %arg7[%c160_256, %c0_257] : memref<288x192xbf16, #tpu.memory_space<vmem>>, vector<128x96xbf16>
    %c1344_258 = arith.constant 1344 : index
    %c0_259 = arith.constant 0 : index
    %240 = vector.load %arg2[%c1344_258, %c0_259] : memref<2016x128xbf16, #tpu.memory_space<vmem>>, vector<96x128xbf16>
    %cst_260 = arith.constant dense<0.000000e+00> : vector<128x128xf32>
    %241 = tpu.matmul %239, %240, %cst_260 {dimension_numbers = #tpu.dot_dimension_numbers<[1], [0], [0], [1], [0, 0, 1, 1], [], []>} : vector<128x96xbf16>, vector<96x128xbf16>, vector<128x128xf32> -> vector<128x128xf32>
    %242 = arith.addf %238, %241 : vector<128x128xf32>
    %243 = vector.broadcast %214 : vector<1x128xf32> to vector<128x128xf32>
    %244 = arith.addf %242, %243 : vector<128x128xf32>
    %cst_261 = arith.constant 0.000000e+00 : f32
    %245 = vector.broadcast %cst_261 : f32 to vector<128x128xf32>
    %246 = arith.maximumf %244, %245 : vector<128x128xf32>
    %247 = vector.shape_cast %246 : vector<128x128xf32> to vector<8x16x128xf32>
    %c9_262 = arith.constant 9 : index
    %c8_263 = arith.constant 8 : index
    %c0_264 = arith.constant 0 : index
    %248 = vector.load %arg6[%c9_262, %c8_263, %c0_264] : memref<18x25x128xf32, #tpu.memory_space<vmem>>, vector<8x16x128xf32>
    tpu.vector_store %arg6[%c9_262, %c8_263, %c0_264], %247 {strides = array<i32>} : memref<18x25x128xf32, #tpu.memory_space<vmem>>, vector<8x16x128xf32>,
    %c0_265 = arith.constant 0 : index
    %c7_266 = arith.constant 7 : index
    %c0_267 = arith.constant 0 : index
    %249 = vector.load %arg6[%c0_265, %c7_266, %c0_267] : memref<18x25x128xf32, #tpu.memory_space<vmem>>, vector<18x16x64xf32>
    %250 = vector.shape_cast %249 : vector<18x16x64xf32> to vector<288x64xf32>
    %251 = arith.truncf %250 : vector<288x64xf32> to vector<288x64xbf16>
    %c0_268 = arith.constant 0 : index
    %c0_269 = arith.constant 0 : index
    %252 = vector.load %arg7[%c0_268, %c0_269] : memref<288x192xbf16, #tpu.memory_space<vmem>>, vector<288x64xbf16>
    tpu.vector_store %arg7[%c0_268, %c0_269], %251 {strides = array<i32>} : memref<288x192xbf16, #tpu.memory_space<vmem>>, vector<288x64xbf16>,
    %c0_270 = arith.constant 0 : index
    %c8_271 = arith.constant 8 : index
    %c0_272 = arith.constant 0 : index
    %253 = vector.load %arg6[%c0_270, %c8_271, %c0_272] : memref<18x25x128xf32, #tpu.memory_space<vmem>>, vector<18x16x64xf32>
    %254 = vector.shape_cast %253 : vector<18x16x64xf32> to vector<288x64xf32>
    %255 = arith.truncf %254 : vector<288x64xf32> to vector<288x64xbf16>
    %c0_273 = arith.constant 0 : index
    %c64_274 = arith.constant 64 : index
    %256 = vector.load %arg7[%c0_273, %c64_274] : memref<288x192xbf16, #tpu.memory_space<vmem>>, vector<288x64xbf16>
    tpu.vector_store %arg7[%c0_273, %c64_274], %255 {strides = array<i32>} : memref<288x192xbf16, #tpu.memory_space<vmem>>, vector<288x64xbf16>,
    %c0_275 = arith.constant 0 : index
    %c9_276 = arith.constant 9 : index
    %c0_277 = arith.constant 0 : index
    %257 = vector.load %arg6[%c0_275, %c9_276, %c0_277] : memref<18x25x128xf32, #tpu.memory_space<vmem>>, vector<18x16x64xf32>
    %258 = vector.shape_cast %257 : vector<18x16x64xf32> to vector<288x64xf32>
    %259 = arith.truncf %258 : vector<288x64xf32> to vector<288x64xbf16>
    %c0_278 = arith.constant 0 : index
    %c128_279 = arith.constant 128 : index
    %260 = vector.load %arg7[%c0_278, %c128_279] : memref<288x192xbf16, #tpu.memory_space<vmem>>, vector<288x64xbf16>
    tpu.vector_store %arg7[%c0_278, %c128_279], %259 {strides = array<i32>} : memref<288x192xbf16, #tpu.memory_space<vmem>>, vector<288x64xbf16>,
    %c5 = arith.constant 5 : index
    %c0_280 = arith.constant 0 : index
    %c0_281 = arith.constant 0 : index
    %261 = vector.load %arg3[%c5, %c0_280, %c0_281] : memref<6x1x128xf32, #tpu.memory_space<vmem>>, vector<1x1x128xf32>
    %262 = vector.shape_cast %261 : vector<1x1x128xf32> to vector<1x128xf32>
    %c0_282 = arith.constant 0 : index
    %c0_283 = arith.constant 0 : index
    %263 = vector.load %arg7[%c0_282, %c0_283] : memref<288x192xbf16, #tpu.memory_space<vmem>>, vector<128x192xbf16>
    %c1440 = arith.constant 1440 : index
    %c0_284 = arith.constant 0 : index
    %264 = vector.load %arg2[%c1440, %c0_284] : memref<2016x128xbf16, #tpu.memory_space<vmem>>, vector<192x128xbf16>
    %cst_285 = arith.constant dense<0.000000e+00> : vector<128x128xf32>
    %265 = tpu.matmul %263, %264, %cst_285 {dimension_numbers = #tpu.dot_dimension_numbers<[1], [0], [0], [1], [0, 0, 1, 1], [], []>} : vector<128x192xbf16>, vector<192x128xbf16>, vector<128x128xf32> -> vector<128x128xf32>
    %c16_286 = arith.constant 16 : index
    %c0_287 = arith.constant 0 : index
    %266 = vector.load %arg7[%c16_286, %c0_287] : memref<288x192xbf16, #tpu.memory_space<vmem>>, vector<128x192xbf16>
    %c1632 = arith.constant 1632 : index
    %c0_288 = arith.constant 0 : index
    %267 = vector.load %arg2[%c1632, %c0_288] : memref<2016x128xbf16, #tpu.memory_space<vmem>>, vector<192x128xbf16>
    %cst_289 = arith.constant dense<0.000000e+00> : vector<128x128xf32>
    %268 = tpu.matmul %266, %267, %cst_289 {dimension_numbers = #tpu.dot_dimension_numbers<[1], [0], [0], [1], [0, 0, 1, 1], [], []>} : vector<128x192xbf16>, vector<192x128xbf16>, vector<128x128xf32> -> vector<128x128xf32>
    %269 = arith.addf %265, %268 : vector<128x128xf32>
    %c32_290 = arith.constant 32 : index
    %c0_291 = arith.constant 0 : index
    %270 = vector.load %arg7[%c32_290, %c0_291] : memref<288x192xbf16, #tpu.memory_space<vmem>>, vector<128x192xbf16>
    %c1824 = arith.constant 1824 : index
    %c0_292 = arith.constant 0 : index
    %271 = vector.load %arg2[%c1824, %c0_292] : memref<2016x128xbf16, #tpu.memory_space<vmem>>, vector<192x128xbf16>
    %cst_293 = arith.constant dense<0.000000e+00> : vector<128x128xf32>
    %272 = tpu.matmul %270, %271, %cst_293 {dimension_numbers = #tpu.dot_dimension_numbers<[1], [0], [0], [1], [0, 0, 1, 1], [], []>} : vector<128x192xbf16>, vector<192x128xbf16>, vector<128x128xf32> -> vector<128x128xf32>
    %273 = arith.addf %269, %272 : vector<128x128xf32>
    %274 = vector.broadcast %262 : vector<1x128xf32> to vector<128x128xf32>
    %275 = arith.addf %273, %274 : vector<128x128xf32>
    %276 = vector.shape_cast %275 : vector<128x128xf32> to vector<8x16x128xf32>
    %277 = vector.extract_strided_slice %276 {offsets = [0, 0, 0], sizes = [8, 16, 8], strides = [1, 1, 1]} : vector<8x16x128xf32> to vector<8x16x8xf32>
    %c0_294 = arith.constant 0 : index
    %c0_295 = arith.constant 0 : index
    %c0_296 = arith.constant 0 : index
    %c0_297 = arith.constant 0 : index
    %278 = vector.load %arg5[%c0_294, %c0_295, %c0_296, %c0_297] : memref<1x16x16x8xf32, #tpu.memory_space<vmem>>, vector<1x8x16x8xf32>
    %279 = vector.shape_cast %278 : vector<1x8x16x8xf32> to vector<8x16x8xf32>
    %280 = vector.shape_cast %277 : vector<8x16x8xf32> to vector<1x8x16x8xf32>
    tpu.vector_store %arg5[%c0_294, %c0_295, %c0_296, %c0_297], %280 {strides = array<i32>} : memref<1x16x16x8xf32, #tpu.memory_space<vmem>>, vector<1x8x16x8xf32>,
    %c128_298 = arith.constant 128 : index
    %c0_299 = arith.constant 0 : index
    %281 = vector.load %arg7[%c128_298, %c0_299] : memref<288x192xbf16, #tpu.memory_space<vmem>>, vector<128x192xbf16>
    %c1440_300 = arith.constant 1440 : index
    %c0_301 = arith.constant 0 : index
    %282 = vector.load %arg2[%c1440_300, %c0_301] : memref<2016x128xbf16, #tpu.memory_space<vmem>>, vector<192x128xbf16>
    %cst_302 = arith.constant dense<0.000000e+00> : vector<128x128xf32>
    %283 = tpu.matmul %281, %282, %cst_302 {dimension_numbers = #tpu.dot_dimension_numbers<[1], [0], [0], [1], [0, 0, 1, 1], [], []>} : vector<128x192xbf16>, vector<192x128xbf16>, vector<128x128xf32> -> vector<128x128xf32>
    %c144_303 = arith.constant 144 : index
    %c0_304 = arith.constant 0 : index
    %284 = vector.load %arg7[%c144_303, %c0_304] : memref<288x192xbf16, #tpu.memory_space<vmem>>, vector<128x192xbf16>
    %c1632_305 = arith.constant 1632 : index
    %c0_306 = arith.constant 0 : index
    %285 = vector.load %arg2[%c1632_305, %c0_306] : memref<2016x128xbf16, #tpu.memory_space<vmem>>, vector<192x128xbf16>
    %cst_307 = arith.constant dense<0.000000e+00> : vector<128x128xf32>
    %286 = tpu.matmul %284, %285, %cst_307 {dimension_numbers = #tpu.dot_dimension_numbers<[1], [0], [0], [1], [0, 0, 1, 1], [], []>} : vector<128x192xbf16>, vector<192x128xbf16>, vector<128x128xf32> -> vector<128x128xf32>
    %287 = arith.addf %283, %286 : vector<128x128xf32>
    %c160_308 = arith.constant 160 : index
    %c0_309 = arith.constant 0 : index
    %288 = vector.load %arg7[%c160_308, %c0_309] : memref<288x192xbf16, #tpu.memory_space<vmem>>, vector<128x192xbf16>
    %c1824_310 = arith.constant 1824 : index
    %c0_311 = arith.constant 0 : index
    %289 = vector.load %arg2[%c1824_310, %c0_311] : memref<2016x128xbf16, #tpu.memory_space<vmem>>, vector<192x128xbf16>
    %cst_312 = arith.constant dense<0.000000e+00> : vector<128x128xf32>
    %290 = tpu.matmul %288, %289, %cst_312 {dimension_numbers = #tpu.dot_dimension_numbers<[1], [0], [0], [1], [0, 0, 1, 1], [], []>} : vector<128x192xbf16>, vector<192x128xbf16>, vector<128x128xf32> -> vector<128x128xf32>
    %291 = arith.addf %287, %290 : vector<128x128xf32>
    %292 = vector.broadcast %262 : vector<1x128xf32> to vector<128x128xf32>
    %293 = arith.addf %291, %292 : vector<128x128xf32>
    %294 = vector.shape_cast %293 : vector<128x128xf32> to vector<8x16x128xf32>
    %295 = vector.extract_strided_slice %294 {offsets = [0, 0, 0], sizes = [8, 16, 8], strides = [1, 1, 1]} : vector<8x16x128xf32> to vector<8x16x8xf32>
    %c0_313 = arith.constant 0 : index
    %c8_314 = arith.constant 8 : index
    %c0_315 = arith.constant 0 : index
    %c0_316 = arith.constant 0 : index
    %296 = vector.load %arg5[%c0_313, %c8_314, %c0_315, %c0_316] : memref<1x16x16x8xf32, #tpu.memory_space<vmem>>, vector<1x8x16x8xf32>
    %297 = vector.shape_cast %296 : vector<1x8x16x8xf32> to vector<8x16x8xf32>
    %298 = vector.shape_cast %295 : vector<8x16x8xf32> to vector<1x8x16x8xf32>
    tpu.vector_store %arg5[%c0_313, %c8_314, %c0_315, %c0_316], %298 {strides = array<i32>} : memref<1x16x16x8xf32, #tpu.memory_space<vmem>>, vector<1x8x16x8xf32>,
    return
  }
  func.func @transform_0(%arg0: i32) -> (i32, i32, i32, i32) {
    %c0_i32 = arith.constant 0 : i32
    %c0_i32_0 = arith.constant 0 : i32
    %c0_i32_1 = arith.constant 0 : i32
    %c0_i32_2 = arith.constant 0 : i32
    return %arg0, %c0_i32, %c0_i32_0, %c0_i32_1 : i32, i32, i32, i32
  }
  func.func @transform_1(%arg0: i32) -> (i32, i32) {
    %c0_i32 = arith.constant 0 : i32
    %c0_i32_0 = arith.constant 0 : i32
    %c0_i32_1 = arith.constant 0 : i32
    return %c0_i32, %c0_i32_0 : i32, i32
  }
  func.func @transform_2(%arg0: i32) -> (i32, i32, i32) {
    %c0_i32 = arith.constant 0 : i32
    %c0_i32_0 = arith.constant 0 : i32
    %c0_i32_1 = arith.constant 0 : i32
    %c0_i32_2 = arith.constant 0 : i32
    return %c0_i32, %c0_i32_0, %c0_i32_1 : i32, i32, i32
  }
  func.func @transform_3(%arg0: i32) -> (i32, i32, i32, i32) {
    %c0_i32 = arith.constant 0 : i32
    %c0_i32_0 = arith.constant 0 : i32
    %c0_i32_1 = arith.constant 0 : i32
    %c0_i32_2 = arith.constant 0 : i32
    return %arg0, %c0_i32, %c0_i32_0, %c0_i32_1 : i32, i32, i32, i32
  }
  func.func @transform_4(%arg0: i32) -> (i32, i32, i32, i32) {
    %c0_i32 = arith.constant 0 : i32
    %c0_i32_0 = arith.constant 0 : i32
    %c0_i32_1 = arith.constant 0 : i32
    %c0_i32_2 = arith.constant 0 : i32
    return %arg0, %c0_i32, %c0_i32_0, %c0_i32_1 : i32, i32, i32, i32
  }
}

</mosaic_0001>

<bundles_post_ra>
// kernel: tpu_custom_call.1
= control target key start
LH: loop header
LB: loop body
LE: loop exit
PB: predicated region body
PF: predicated region fallthrough
CT: control target
= control target key end

     0   :  { %s14243_s15 = smov 0   ;;  %s17760_s0 = inlined_call_operand.vmem [shape: f32[2,18,25,16], index: 0, kind: input, shape index: {}]   ;;  %s17761_s1 = inlined_call_operand.vmem [shape: bf16[2016,128], index: 1, kind: input, shape index: {}]   ;;  %s17762_s2 = inlined_call_operand.vmem [shape: f32[6,1,128], index: 2, kind: input, shape index: {}]   ;;  %s17763_s3 = inlined_call_operand.vmem [shape: f32[2,16,16,8], index: 3, kind: output, shape index: {0}]   ;;  %s17764_s4 = inlined_call_operand.vmem [shape: f32[2,16,16,8], index: 4, kind: output, shape index: {1}]  }
   0x1 LB: > { %s11217_s16 = sadd.s32 4294967295, %s14212_s15   ;;  %p11221_p0 = scmp.ge.s32.totalorder %s14212_s15, 1  ;;  %s14212_s15 = sphi %s14243_s15, %s15_s15  }
   0x2   : > { %p165_p1 = scmp.lt.s32.totalorder %s14212_s15, 3 }
   0x4   : > { %p166_p2 = pnand %p11221_p0, %p165_p1 }
   0x5   : > { %p196_p3 = scmp.lt.s32.totalorder (!%p166_p2), %s11217_s16, 1  ;;  %s14214_s21 = smov (!%p166_p2), 16  }
   0x6   : > { %169 = sbr.rel (%p166_p2) target bundleno = 2341 (0x925), region = 32  ;;  %s14215_s22 = smov (!%p166_p2), 32  }
   0x7   : > { %s14217_s23 = smov (!%p166_p2), 64  }
   0xb   : > { %s17766_s16 = smov (!%p196_p3, %s11217_s16), 1  ;;  %vm356_vm0 = vcmask 125952   ;;  %vm609_vm1 = vcmask 257152   ;;  %vm862_vm2 = vcmask 388352   ;;  %vm1884_vm3 = vcmask 519168  }
   0xc   : > { %s14176_s17 = smul.u32 576, %s17766_s16  ;;  %vm988_vm4 = vcmask 392192   ;;  %vm2494_vm5 = vcmask 523264   ;;  %vm2137_vm6 = vcmask 1043968   ;;  %vm4128_vm7 = vcmask 257024   ;;  %s13650_s7 = sshll.u32 %s17766_s16, 8 }
   0xd   : > { %vm4381_vm8 = vcmask 519424   ;;  %vm4634_vm9 = vcmask 781824   ;;  %vm4791_vm10 = vcmask 785408   ;;  %s15996_s11 = scalar_lea.vmem %s17763_s3, %s13650_s7  ;;  %vm5170_vm11 = vcmask 64512   ;;  %s17570_s26 = scalar_lea.vmem %s17764_s4, %s13650_s7 }
   0xe   : > { %s14257_s20 = scalar_lea.vmem %s17760_s0, %s14176_s17 }
   0xf   : > { %v395_v0 = vld [vmem:[%s14257_s20 + $0x28] sm:$0xff]  ;;  %v396_v6 = vld [vmem:[%s14257_s20 + $0x30] sm:$0xff] }
  0x10   : > { %v393_v1 = vld [vmem:[%s14257_s20 + $0x8] sm:$0xff]  ;;  %v431_v2 = vpack.c.bf16 %v395_v0, %v395_v0  ;;  %v394_v7 = vld [vmem:[%s14257_s20 + $0x10] sm:$0xff]  ;;  %v432_v9 = vpack.c.bf16 %v396_v6, %v396_v6 }
  0x11   : > { %v429_v3 = vpack.c.bf16 %v393_v1, %v393_v1  ;;  %v646_v4 = vld [vmem:[%s14257_s20 + $0x9] sm:$0xff]  ;;  %v647_v8 = vld [vmem:[%s14257_s20 + $0x11] sm:$0xff]  ;;  %v430_v10 = vpack.c.bf16 %v394_v7, %v394_v7 }
  0x12   : > { %505 = vrot.lane.b32.xlu1 %v431_v2, %s14214_s21  ;;  %v682_v5 = vpack.c.bf16 %v646_v4, %v646_v4  ;;  %v683_v11 = vpack.c.bf16 %v647_v8, %v647_v8  ;;  %v649_v12 = vld [vmem:[%s14257_s20 + $0x31] sm:$0xff]  ;;  %v648_v13 = vld [vmem:[%s14257_s20 + $0x29] sm:$0xff] }
  0x13   : > { %501 = vrot.lane.b32.xlu0 %v429_v3, %s14214_s21  ;;  %v397_v14 = vld [vmem:[%s14257_s20 + $0x48] sm:$0xff]  ;;  %v685_v15 = vpack.c.bf16 %v649_v12, %v649_v12  ;;  %v684_v16 = vpack.c.bf16 %v648_v13, %v648_v13  ;;  %v398_v18 = vld [vmem:[%s14257_s20 + $0x50] sm:$0xff] }
  0x14   : > { %754 = vrot.lane.b32.xlu2 %v682_v5, %s14215_s22  ;;  %v433_v17 = vpack.c.bf16 %v397_v14, %v397_v14  ;;  %v650_v19 = vld [vmem:[%s14257_s20 + $0x49] sm:$0xff]  ;;  %v651_v20 = vld [vmem:[%s14257_s20 + $0x51] sm:$0xff]  ;;  %v434_v21 = vpack.c.bf16 %v398_v18, %v398_v18 }
  0x15   : > { %v686_v22 = vpack.c.bf16 %v650_v19, %v650_v19  ;;  %v687_v23 = vpack.c.bf16 %v651_v20, %v651_v20  ;;  %v399_v24 = vld [vmem:[%s14257_s20 + $0x68] sm:$0xff]  ;;  %v400_v25 = vld [vmem:[%s14257_s20 + $0x70] sm:$0xff] }
  0x16   : > { %v652_v26 = vld [vmem:[%s14257_s20 + $0x69] sm:$0xff]  ;;  %v435_v27 = vpack.c.bf16 %v399_v24, %v399_v24  ;;  %v436_v28 = vpack.c.bf16 %v400_v25, %v400_v25  ;;  %v653_v30 = vld [vmem:[%s14257_s20 + $0x71] sm:$0xff] }
  0x17   : > { %v688_v29 = vpack.c.bf16 %v652_v26, %v652_v26  ;;  %v401_v31 = vld [vmem:[%s14257_s20 + $0x88] sm:$0xff]  ;;  %v402_v32 = vld [vmem:[%s14257_s20 + $0x90] sm:$0xff]  ;;  %v689_v33 = vpack.c.bf16 %v653_v30, %v653_v30 }
  0x18   : > { %v437_v34 = vpack.c.bf16 %v401_v31, %v401_v31  ;;  %v438_v35 = vpack.c.bf16 %v402_v32, %v402_v32  ;;  %v654_v36 = vld [vmem:[%s14257_s20 + $0x89] sm:$0xff]  ;;  %v655_v37 = vld [vmem:[%s14257_s20 + $0x91] sm:$0xff]  ;;  %v13660_v32 = vld [vmem:[%s17761_s1] sm:$0xff] }
  0x19   : > { %v403_v38 = vld [vmem:[%s14257_s20 + $0xa8] sm:$0xff]  ;;  %v690_v39 = vpack.c.bf16 %v654_v36, %v654_v36  ;;  %v691_v40 = vpack.c.bf16 %v655_v37, %v655_v37  ;;  %v404_v42 = vld [vmem:[%s14257_s20 + $0xb0] sm:$0xff]  ;;  %v13665_v36 = vld [vmem:[%s17761_s1 + $0x20] sm:$0xff] }
  0x1a   : > { %507 = vrot.lane.b32.xlu1 %v432_v9, %s14214_s21  ;;  %v439_v41 = vpack.c.bf16 %v403_v38, %v403_v38  ;;  %v656_v43 = vld [vmem:[%s14257_s20 + $0xa9] sm:$0xff]  ;;  %v657_v44 = vld [vmem:[%s14257_s20 + $0xb1] sm:$0xff]  ;;  %v440_v45 = vpack.c.bf16 %v404_v42, %v404_v42 }
  0x1b   : > { %503 = vrot.lane.b32.xlu0 %v430_v10, %s14214_s21  ;;  %v692_v46 = vpack.c.bf16 %v656_v43, %v656_v43  ;;  %v693_v47 = vpack.c.bf16 %v657_v44, %v657_v44  ;;  %v405_v48 = vld [vmem:[%s14257_s20 + $0xc8] sm:$0xff]  ;;  %v406_v49 = vld [vmem:[%s14257_s20 + $0xd0] sm:$0xff]  ;;  %v13664_v38 = vld [vmem:[%s17761_s1 + $0x18] sm:$0xff] }
  0x1c   : > { %756 = vrot.lane.b32.xlu2 %v683_v11, %s14215_s22  ;;  %v658_v50 = vld [vmem:[%s14257_s20 + $0xc9] sm:$0xff]  ;;  %v441_v51 = vpack.c.bf16 %v405_v48, %v405_v48  ;;  %v442_v52 = vpack.c.bf16 %v406_v49, %v406_v49  ;;  %v659_v54 = vld [vmem:[%s14257_s20 + $0xd1] sm:$0xff]  ;;  %v14216_v11 = vmov 0.0  }
  0x1d   : > { %v694_v53 = vpack.c.bf16 %v658_v50, %v658_v50  ;;  %v411_v55 = vld [vmem:[%s14257_s20 + $0x128] sm:$0xff]  ;;  %v412_v56 = vld [vmem:[%s14257_s20 + $0x130] sm:$0xff]  ;;  %v695_v57 = vpack.c.bf16 %v659_v54, %v659_v54  ;;  %212 = vst [vmem:[#allocation2] sm:$0xff] %v14216_v11  ;;  %v13676_v48 = vld [vmem:[%s17761_s1 + $0x38] sm:$0xff] }
  0x1e   : > { %v447_v58 = vpack.c.bf16 %v411_v55, %v411_v55  ;;  %v448_v59 = vpack.c.bf16 %v412_v56, %v412_v56  ;;  %v407_v60 = vld [vmem:[%s14257_s20 + $0xe8] sm:$0xff]  ;;  %v408_v61 = vld [vmem:[%s14257_s20 + $0xf0] sm:$0xff]  ;;  %213 = vst [vmem:[#allocation2 + $0x8] sm:$0xff] %v14216_v11 }
  0x1f   : > { %v664_v62 = vld [vmem:[%s14257_s20 + $0x129] sm:$0xff]  ;;  %v443_v63 = vpack.c.bf16 %v407_v60, %v407_v60  ;;  %v444_v0 = vpack.c.bf16 %v408_v61, %v408_v61  ;;  %v665_v5 = vld [vmem:[%s14257_s20 + $0x131] sm:$0xff]  ;;  %214 = vst [vmem:[#allocation2 + $0x10] sm:$0xff] %v14216_v11 }
  0x20   : > { %v700_v1 = vpack.c.bf16 %v664_v62, %v664_v62  ;;  %v284_v2 = vld [vmem:[%s14257_s20 + $0x7] sm:$0xff]  ;;  %v661_v8 = vld [vmem:[%s14257_s20 + $0xf1] sm:$0xff]  ;;  %v701_v9 = vpack.c.bf16 %v665_v5, %v665_v5  ;;  %215 = vst [vmem:[#allocation2 + $0x18] sm:$0x1] %v14216_v11 }
  0x21   : > { %v286_v3 = vld [vmem:[%s14257_s20 + $0x27] sm:$0xff]  ;;  %v320_v4 = vpack.c.bf16 %v284_v2, %v284_v2  ;;  %v697_v12 = vpack.c.bf16 %v661_v8, %v661_v8  ;;  %v414_v14 = vld [vmem:[%s14257_s20 + $0x150] sm:$0xff]  ;;  %216 = vst [vmem:[#allocation2 + $0x20] sm:$0xff] %v14216_v11 }
  0x22   : > { %760 = vrot.lane.b32.xlu1 %v685_v15, %s14215_s22  ;;  %v660_v6 = vld [vmem:[%s14257_s20 + $0xe9] sm:$0xff]  ;;  %v322_v7 = vpack.c.bf16 %v286_v3, %v286_v3  ;;  %219 = vst [vmem:[#allocation2 + $0x38] sm:$0x1] %v14216_v11  ;;  %v663_v30 = vld [vmem:[%s14257_s20 + $0x111] sm:$0xff] }
  0x23   : > { %758 = vrot.lane.b32.xlu0 %v684_v16, %s14215_s22  ;;  %357 = vst.msk [vmem:[#allocation3] sm:$0xf] %vm356_vm0, %v320_v4  ;;  %v696_v10 = vpack.c.bf16 %v660_v6, %v660_v6  ;;  %v413_v13 = vld [vmem:[%s14257_s20 + $0x148] sm:$0xff]  ;;  %v410_v20 = vld [vmem:[%s14257_s20 + $0x110] sm:$0xff] }
  0x24   : > { %509 = vrot.lane.b32.xlu2 %v433_v17, %s14214_s21  ;;  %359 = vst.msk [vmem:[#allocation3 + $0x10] sm:$0xf] %vm356_vm0, %v322_v7  ;;  %v409_v15 = vld [vmem:[%s14257_s20 + $0x108] sm:$0xff]  ;;  %v449_v16 = vpack.c.bf16 %v413_v13, %v413_v13  ;;  %v450_v17 = vpack.c.bf16 %v414_v14, %v414_v14  ;;  %v669_v49 = vld [vmem:[%s14257_s20 + $0x171] sm:$0xff] }
  0x25   : > { %220 = vst [vmem:[#allocation2 + $0x40] sm:$0xff] %v14216_v11  ;;  %v445_v19 = vpack.c.bf16 %v409_v15, %v409_v15  ;;  %v13661_v26 = vld [vmem:[%s17761_s1 + $0x8] sm:$0xff]  ;;  %v418_v55 = vld [vmem:[%s14257_s20 + $0x190] sm:$0xff] }
  0x26   : > { %223 = vst [vmem:[#allocation2 + $0x58] sm:$0x1] %v14216_v11  ;;  %v13666_v31 = vld [vmem:[%s17761_s1 + $0x28] sm:$0xff]  ;;  %v454_v62 = vpack.c.bf16 %v418_v55, %v418_v55  ;;  %v671_v3 = vld [vmem:[%s14257_s20 + $0x191] sm:$0xff] }
  0x27   : > { %224 = vst [vmem:[#allocation2 + $0x60] sm:$0xff] %v14216_v11  ;;  %1018 = vmatpush.bf16.msra.mxu0 %v13666_v31  ;;  %v415_v37 = vld [vmem:[%s14257_s20 + $0x168] sm:$0xff] }
  0x28   : > { %227 = vst [vmem:[#allocation2 + $0x78] sm:$0x1] %v14216_v11  ;;  %v668_v42 = vld [vmem:[%s14257_s20 + $0x169] sm:$0xff] }
  0x29   : > { %228 = vst [vmem:[#allocation2 + $0x80] sm:$0xff] %v14216_v11  ;;  %v1812_v50 = vld [vmem:[#allocation2 + $0x7] sm:$0xff]  ;;  %v285_v60 = vld [vmem:[%s14257_s20 + $0xf] sm:$0xff] }
  0x2a   : > { %762 = vrot.lane.b32.xlu1 %v686_v22, %s14215_s22  ;;  %231 = vst [vmem:[#allocation2 + $0x98] sm:$0x1] %v14216_v11  ;;  %v13662_v22 = vld [vmem:[%s17761_s1 + $0x10] sm:$0xff]  ;;  %v417_v54 = vld [vmem:[%s14257_s20 + $0x188] sm:$0xff] }
  0x2b   : > { %511 = vrot.lane.b32.xlu0 %v434_v21, %s14214_s21  ;;  %v666_v21 = vld [vmem:[%s14257_s20 + $0x149] sm:$0xff]  ;;  %232 = vst [vmem:[#allocation2 + $0xa0] sm:$0xff] %v14216_v11  ;;  %1093 = vmatpush.bf16.msra.mxu1 %v13662_v22  ;;  %v453_v61 = vpack.c.bf16 %v417_v54, %v417_v54 }
  0x2c   : > { %764 = vrot.lane.b32.xlu2 %v687_v23, %s14215_s22  ;;  %235 = vst [vmem:[#allocation2 + $0xb8] sm:$0x1] %v14216_v11  ;;  %v446_v23 = vpack.c.bf16 %v410_v20, %v410_v20  ;;  %v702_v24 = vpack.c.bf16 %v666_v21, %v666_v21  ;;  %1019 = vmatpush.bf16.msra.mxu0 %v13665_v36  ;;  %v288_v2 = vld [vmem:[%s14257_s20 + $0x47] sm:$0xff]  ;;  %v289_v8 = vld [vmem:[%s14257_s20 + $0x4f] sm:$0xff] }
  0x2d   : > { %236 = vst [vmem:[#allocation2 + $0xc0] sm:$0xff] %v14216_v11  ;;  %v419_v4 = vld [vmem:[%s14257_s20 + $0x1a8] sm:$0xff]  ;;  %v325_v15 = vpack.c.bf16 %v289_v8, %v289_v8 }
  0x2e   : > { %239 = vst [vmem:[#allocation2 + $0xd8] sm:$0x1] %v14216_v11  ;;  %v670_v7 = vld [vmem:[%s14257_s20 + $0x189] sm:$0xff] }
  0x2f   : > { %240 = vst [vmem:[#allocation2 + $0xe0] sm:$0xff] %v14216_v11  ;;  %1094 = vmatpush.bf16.msra.mxu1 %v13661_v26  ;;  %v1813_v14 = vld [vmem:[#allocation2 + $0xf] sm:$0xff]  ;;  %v294_v36 = vld [vmem:[%s14257_s20 + $0xa7] sm:$0xff] }
  0x30   : > { %243 = vst [vmem:[#allocation2 + $0xf8] sm:$0x1] %v14216_v11  ;;  %1020 = vmatpush.bf16.msra.mxu0 %v13664_v38  ;;  %v672_v20 = vld [vmem:[%s14257_s20 + $0x1a9] sm:$0xff] }
  0x31   : > { %244 = vst [vmem:[#allocation2 + $0x100] sm:$0xff] %v14216_v11  ;;  %v423_v55 = vld [vmem:[%s14257_s20 + $0x1e8] sm:$0xff] }
  0x32   : > { %515 = vrot.lane.b32.xlu1 %v436_v28, %s14214_s21  ;;  %247 = vst [vmem:[#allocation2 + $0x118] sm:$0x1] %v14216_v11 }
  0x33   : > { %513 = vrot.lane.b32.xlu0 %v435_v27, %s14214_s21  ;;  %v667_v27 = vld [vmem:[%s14257_s20 + $0x151] sm:$0xff]  ;;  %248 = vst [vmem:[#allocation2 + $0x120] sm:$0xff] %v14216_v11  ;;  %1095 = vmatpush.bf16.msra.mxu1 %v13660_v32 }
  0x34   : > { %766 = vrot.lane.b32.xlu2 %v688_v29, %s14215_s22  ;;  %v703_v28 = vpack.c.bf16 %v667_v27, %v667_v27  ;;  %v662_v29 = vld [vmem:[%s14257_s20 + $0x109] sm:$0xff]  ;;  %251 = vst [vmem:[#allocation2 + $0x138] sm:$0x1] %v14216_v11 }
  0x35   : > { %252 = vst [vmem:[#allocation2 + $0x140] sm:$0xff] %v14216_v11 }
  0x36   : > { %255 = vst [vmem:[#allocation2 + $0x158] sm:$0x1] %v14216_v11 }
  0x37   : > { %256 = vst [vmem:[#allocation2 + $0x160] sm:$0xff] %v14216_v11 }
  0x38   : > { %259 = vst [vmem:[#allocation2 + $0x178] sm:$0x1] %v14216_v11 }
  0x39   : > { %260 = vst [vmem:[#allocation2 + $0x180] sm:$0xff] %v14216_v11 }
  0x3a   : > { %517 = vrot.lane.b32.xlu1 %v437_v34, %s14214_s21  ;;  %v699_v34 = vpack.c.bf16 %v663_v30, %v663_v30  ;;  %263 = vst [vmem:[#allocation2 + $0x198] sm:$0x1] %v14216_v11 }
  0x3b   : > { %768 = vrot.lane.b32.xlu0 %v689_v33, %s14215_s22  ;;  %v698_v33 = vpack.c.bf16 %v662_v29, %v662_v29  ;;  %264 = vst [vmem:[#allocation2 + $0x1a0] sm:$0xff] %v14216_v11 }
  0x3c   : > { %519 = vrot.lane.b32.xlu2 %v438_v35, %s14214_s21  ;;  %267 = vst [vmem:[#allocation2 + $0x1b8] sm:$0x1] %v14216_v11 }
  0x3d   : > { %268 = vst [vmem:[#allocation2 + $0x1c0] sm:$0xff] %v14216_v11 }
  0x3e   : > { %271 = vst [vmem:[#allocation2 + $0x1d8] sm:$0x1] %v14216_v11 }
  0x3f   : > { %272 = vst [vmem:[#allocation2 + $0x1e0] sm:$0xff] %v14216_v11 }
  0x40   : > { %275 = vst [vmem:[#allocation2 + $0x1f8] sm:$0x1] %v14216_v11 }
  0x41   : > { %276 = vst [vmem:[#allocation2 + $0x200] sm:$0xff] %v14216_v11 }
  0x42   : > { %772 = vrot.lane.b32.xlu1 %v691_v40, %s14215_s22  ;;  %v13677_v40 = vld [vmem:[%s17761_s1 + $0x40] sm:$0xff]  ;;  %279 = vst [vmem:[#allocation2 + $0x218] sm:$0x1] %v14216_v11 }
  0x43   : > { %770 = vrot.lane.b32.xlu0 %v690_v39, %s14215_s22  ;;  %v451_v39 = vpack.c.bf16 %v415_v37, %v415_v37  ;;  %1246 = vmatpush.bf16.msra.mxu2 %v13677_v40  ;;  %280 = vst [vmem:[#allocation2 + $0x220] sm:$0xff] %v14216_v11  ;;  %v422_v37 = vld [vmem:[%s14257_s20 + $0x1d0] sm:$0xff] }
  0x44   : > { %521 = vrot.lane.b32.xlu2 %v439_v41, %s14214_s21  ;;  %v416_v41 = vld [vmem:[%s14257_s20 + $0x170] sm:$0xff]  ;;  %281 = vst [vmem:[#allocation2 + $0x228] sm:$0xff] %v14216_v11 }
  0x45   : > { %282 = vst [vmem:[#allocation2 + $0x230] sm:$0xff] %v14216_v11 }
  0x46   : > { %283 = vst [vmem:[#allocation2 + $0x238] sm:$0x1] %v14216_v11  ;;  %v707_v11 = vpack.c.bf16 %v671_v3, %v671_v3  ;;  %v421_v3 = vld [vmem:[%s14257_s20 + $0x1c8] sm:$0xff] }
  0x47   : > { %1247 = vmatpush.bf16.msra.mxu2 %v13676_v48  ;;  %362 = vst.msk [vmem:[#allocation3 + $0x28] sm:$0xf] %vm356_vm0, %v325_v15  ;;  %v296_v48 = vld [vmem:[%s14257_s20 + $0xc7] sm:$0xff] }
  0x48   : > { %v332_v54 = vpack.c.bf16 %v296_v48, %v296_v48 }
  0x4a   : > { %774 = vrot.lane.b32.xlu1 %v692_v46, %s14215_s22  ;;  %v704_v46 = vpack.c.bf16 %v668_v42, %v668_v42  ;;  %v295_v42 = vld [vmem:[%s14257_s20 + $0xaf] sm:$0xff]  ;;  %369 = vst.msk [vmem:[#allocation3 + $0x60] sm:$0xf] %vm356_vm0, %v332_v54 }
  0x4b   : > { %523 = vrot.lane.b32.xlu0 %v440_v45, %s14214_s21  ;;  %v452_v45 = vpack.c.bf16 %v416_v41, %v416_v41  ;;  %v674_v41 = vld [vmem:[%s14257_s20 + $0x1c9] sm:$0xff] }
  0x4c   : > { %776 = vrot.lane.b32.xlu2 %v693_v47, %s14215_s22 }
  0x52   : > { %527 = vrot.lane.b32.xlu1 %v442_v52, %s14214_s21  ;;  %v13675_v52 = vld [vmem:[%s17761_s1 + $0x30] sm:$0xff] }
  0x53   : > { %525 = vrot.lane.b32.xlu0 %v441_v51, %s14214_s21  ;;  %v705_v51 = vpack.c.bf16 %v669_v49, %v669_v49  ;;  %1248 = vmatpush.bf16.msra.mxu2 %v13675_v52 }
  0x54   : > { %778 = vrot.lane.b32.xlu2 %v694_v53, %s14215_s22  ;;  %v1848_v53 = vpack.c.bf16 %v1812_v50, %v1812_v50  ;;  %v710_v50 = vpack.c.bf16 %v674_v41, %v674_v41 }
  0x5a   : > { %537 = vrot.lane.b32.xlu1 %v447_v58, %s14214_s21 }
  0x5b   : > { %780 = vrot.lane.b32.xlu0 %v695_v57, %s14215_s22  ;;  %v287_v57 = vld [vmem:[%s14257_s20 + $0x2f] sm:$0xff] }
  0x5c   : > { %539 = vrot.lane.b32.xlu2 %v448_v59, %s14214_s21 }
  0x62   : > { %531 = vrot.lane.b32.xlu1 %v444_v0, %s14214_s21  ;;  %v323_v0 = vpack.c.bf16 %v287_v57, %v287_v57 }
  0x63   : > { %529 = vrot.lane.b32.xlu0 %v443_v63, %s14214_s21 }
  0x64   : > { %790 = vrot.lane.b32.xlu2 %v700_v1, %s14215_s22  ;;  %v321_v1 = vpack.c.bf16 %v285_v60, %v285_v60  ;;  %360 = vst.msk [vmem:[#allocation3 + $0x18] sm:$0xf] %vm356_vm0, %v323_v0  ;;  %v459_v60 = vpack.c.bf16 %v423_v55, %v423_v55  ;;  %v424_v0 = vld [vmem:[%s14257_s20 + $0x1f0] sm:$0xff] }
  0x66   : > { %358 = vst.msk [vmem:[#allocation3 + $0x8] sm:$0xf] %vm356_vm0, %v321_v1 }
  0x6a   : > { %782 = vrot.lane.b32.xlu1 %v696_v10, %s14215_s22  ;;  %v324_v10 = vpack.c.bf16 %v288_v2, %v288_v2  ;;  %v460_v2 = vpack.c.bf16 %v424_v0, %v424_v0 }
  0x6b   : > { %792 = vrot.lane.b32.xlu0 %v701_v9, %s14215_s22  ;;  %v706_v9 = vpack.c.bf16 %v670_v7, %v670_v7 }
  0x6c   : > { %784 = vrot.lane.b32.xlu2 %v697_v12, %s14215_s22  ;;  %v455_v12 = vpack.c.bf16 %v419_v4, %v419_v4  ;;  %361 = vst.msk [vmem:[#allocation3 + $0x20] sm:$0xf] %vm356_vm0, %v324_v10  ;;  %v457_v4 = vpack.c.bf16 %v421_v3, %v421_v3  ;;  %v303_v10 = vld [vmem:[%s14257_s20 + $0x12f] sm:$0xff] }
  0x6e   : > { %v14345_v18 = vpop.permute.xlu2 %754 }
  0x72   : > { %543 = vrot.lane.b32.xlu1 %v450_v17, %s14214_s21  ;;  %v1849_v17 = vpack.c.bf16 %v1813_v14, %v1813_v14  ;;  %v425_v14 = vld [vmem:[%s14257_s20 + $0x208] sm:$0xff] }
  0x73   : > { %541 = vrot.lane.b32.xlu0 %v449_v16, %s14214_s21  ;;  %v290_v16 = vld [vmem:[%s14257_s20 + $0x67] sm:$0xff] }
  0x74   : > { %533 = vrot.lane.b32.xlu2 %v445_v19, %s14214_s21  ;;  %v673_v19 = vld [vmem:[%s14257_s20 + $0x1b1] sm:$0xff] }
  0x75   : > { %v709_v27 = vpack.c.bf16 %v673_v19, %v673_v19  ;;  %v298_v19 = vld [vmem:[%s14257_s20 + $0xe7] sm:$0xff] }
  0x76   : > { %v14364_v25 = vpop.permute.xlu2 %756 }
  0x7a   : > { %794 = vrot.lane.b32.xlu1 %v702_v24, %s14215_s22  ;;  %v326_v24 = vpack.c.bf16 %v290_v16, %v290_v16 }
  0x7b   : > { %535 = vrot.lane.b32.xlu0 %v446_v23, %s14214_s21  ;;  %v293_v23 = vld [vmem:[%s14257_s20 + $0x8f] sm:$0xff] }
  0x7c   : > { %796 = vrot.lane.b32.xlu2 %v703_v28, %s14215_s22  ;;  %v708_v28 = vpack.c.bf16 %v672_v20, %v672_v20  ;;  %v329_v32 = vpack.c.bf16 %v293_v23, %v293_v23  ;;  %363 = vst.msk [vmem:[#allocation3 + $0x30] sm:$0xf] %vm356_vm0, %v326_v24  ;;  %v299_v20 = vld [vmem:[%s14257_s20 + $0xef] sm:$0xff] }
  0x7d   : > { %v335_v23 = vpack.c.bf16 %v299_v20, %v299_v20 }
  0x7e   : > { %v14389_v35 = vpop.permute.xlu2 %509  ;;  %366 = vst.msk [vmem:[#allocation3 + $0x48] sm:$0xf] %vm356_vm0, %v329_v32  ;;  %v678_v32 = vld [vmem:[%s14257_s20 + $0x209] sm:$0xff] }
  0x7f   : > { %614 = vst.msk [vmem:[#allocation3 + $0x20] sm:$0xf] %vm609_vm1, %v14389_v35  ;;  %v292_v35 = vld [vmem:[%s14257_s20 + $0x87] sm:$0xff] }
  0x80   : > { %v328_v40 = vpack.c.bf16 %v292_v35, %v292_v35  ;;  %372 = vst.msk [vmem:[#allocation3 + $0x78] sm:$0xf] %vm356_vm0, %v335_v23  ;;  %v308_v23 = vld [vmem:[%s14257_s20 + $0x187] sm:$0xff] }
  0x82   : > { %788 = vrot.lane.b32.xlu1 %v699_v34, %s14215_s22  ;;  %365 = vst.msk [vmem:[#allocation3 + $0x40] sm:$0xf] %vm356_vm0, %v328_v40 }
  0x83   : > { %786 = vrot.lane.b32.xlu0 %v698_v33, %s14215_s22 }
  0x84   : > { %v506_v43 = vpop.permute.xlu1 %505  ;;  %545 = vrot.lane.b32.xlu2 %v451_v39, %s14214_s21 }
  0x85   : > { %v502_v44 = vpop.permute.xlu0 %501  ;;  %612 = vst.msk [vmem:[#allocation3 + $0x10] sm:$0xf] %vm609_vm1, %v506_v43 }
  0x86   : > { %610 = vst.msk [vmem:[#allocation3] sm:$0xf] %vm609_vm1, %v502_v44  ;;  %v14414_v47 = vpop.permute.xlu2 %764  ;;  %v330_v44 = vpack.c.bf16 %v294_v36, %v294_v36 }
  0x87   : > { %863 = vst.msk [vmem:[#allocation3] sm:$0xf] %vm862_vm2, %v14345_v18  ;;  %v291_v18 = vld [vmem:[%s14257_s20 + $0x6f] sm:$0xff] }
  0x88   : > { %v327_v26 = vpack.c.bf16 %v291_v18, %v291_v18  ;;  %367 = vst.msk [vmem:[#allocation3 + $0x50] sm:$0xf] %vm356_vm0, %v330_v44  ;;  %v13688_v44 = vld [vmem:[%s17761_s1 + $0x10] sm:$0xff] }
  0x89   : > { %1550 = vmatpush.bf16.msrb.mxu0 %v13688_v44  ;;  %v310_v44 = vld [vmem:[%s14257_s20 + $0x1a7] sm:$0xff] }
  0x8a   : > { %798 = vrot.lane.b32.xlu1 %v704_v46, %s14215_s22  ;;  %364 = vst.msk [vmem:[#allocation3 + $0x38] sm:$0xf] %vm356_vm0, %v327_v26 }
  0x8b   : > { %547 = vrot.lane.b32.xlu0 %v452_v45, %s14214_s21  ;;  %v458_v45 = vpack.c.bf16 %v422_v37, %v422_v37 }
  0x8c   : > { %v508_v56 = vpop.permute.xlu1 %507  ;;  %800 = vrot.lane.b32.xlu2 %v705_v51, %s14215_s22  ;;  %v331_v51 = vpack.c.bf16 %v295_v42, %v295_v42  ;;  %v13691_v42 = vld [vmem:[%s17761_s1 + $0x20] sm:$0xff] }
  0x8d   : > { %v504_v58 = vpop.permute.xlu0 %503  ;;  %613 = vst.msk [vmem:[#allocation3 + $0x18] sm:$0xf] %vm609_vm1, %v508_v56 }
  0x8e   : > { %v14437_v59 = vld [vmem:[#allocation3] sm:$0xf]  ;;  %v14441_v63 = vpop.permute.xlu2 %766  ;;  %611 = vst.msk [vmem:[#allocation3 + $0x8] sm:$0xf] %vm609_vm1, %v504_v58 }
  0x8f   : > { %1885 = vst.msk [vmem:[#allocation3] sm:$0xf] %vm1884_vm3, %v1848_v53 }
  0x90   : > { %864 = vst.msk [vmem:[#allocation3 + $0x8] sm:$0xf] %vm862_vm2, %v14364_v25 }
  0x91   : > { %368 = vst.msk [vmem:[#allocation3 + $0x58] sm:$0xf] %vm356_vm0, %v331_v51  ;;  %v13690_v51 = vld [vmem:[%s17761_s1 + $0x18] sm:$0xff] }
  0x92   : > { %551 = vrot.lane.b32.xlu1 %v454_v62, %s14214_s21  ;;  %v297_v62 = vld [vmem:[%s14257_s20 + $0xcf] sm:$0xff] }
  0x93   : > { %549 = vrot.lane.b32.xlu0 %v453_v61, %s14214_s21 }
  0x94   : > { %v761_v5 = vpop.permute.xlu1 %760  ;;  %802 = vrot.lane.b32.xlu2 %v706_v9, %s14215_s22 }
  0x95   : > { %v759_v6 = vpop.permute.xlu0 %758  ;;  %866 = vst.msk [vmem:[#allocation3 + $0x18] sm:$0xf] %vm862_vm2, %v761_v5 }
  0x96   : > { %v520_v13 = vpop.permute.xlu2 %519  ;;  %865 = vst.msk [vmem:[#allocation3 + $0x10] sm:$0xf] %vm862_vm2, %v759_v6  ;;  %v677_v6 = vld [vmem:[%s14257_s20 + $0x1f1] sm:$0xff] }
  0x97   : > { %v13652_v25 = vld [vmem:[#allocation3 + $0x4] sm:$0xf0]  ;;  %619 = vst.msk [vmem:[#allocation3 + $0x48] sm:$0xf] %vm609_vm1, %v520_v13  ;;  %v675_v13 = vld [vmem:[%s14257_s20 + $0x1d1] sm:$0xff]  ;;  %v713_v16 = vpack.c.bf16 %v677_v6, %v677_v6 }
  0x98   : > { %1886 = vst.msk [vmem:[#allocation3 + $0x8] sm:$0xf] %vm1884_vm3, %v1849_v17  ;;  %v11282_v31 = vor.u32 %v13652_v25, %v14437_v59  ;;  %v711_v24 = vpack.c.bf16 %v675_v13, %v675_v13 }
  0x9a   : > { %553 = vrot.lane.b32.xlu1 %v455_v12, %s14214_s21  ;;  %11295 = vmatmul.msk.bf16.vlgmr.msra.gmra.mxu1 %vm988_vm4, %v11282_v31  ;;  %v302_v12 = vld [vmem:[%s14257_s20 + $0x127] sm:$0xff]  ;;  %v679_v31 = vld [vmem:[%s14257_s20 + $0x211] sm:$0xff] }
  0x9b   : > { %804 = vrot.lane.b32.xlu0 %v707_v11, %s14215_s22  ;;  %v339_v11 = vpack.c.bf16 %v303_v10, %v303_v10  ;;  %v338_v18 = vpack.c.bf16 %v302_v12, %v302_v12 }
  0x9c   : > { %v763_v22 = vpop.permute.xlu1 %762  ;;  %v13653_v30 = vld [vmem:[#allocation3 + $0x14] sm:$0xf0] }
  0x9d   : > { %v512_v21 = vpop.permute.xlu0 %511  ;;  %v11229_v33 = vld [vmem:[#allocation3 + $0x10] sm:$0xf]  ;;  %867 = vst.msk [vmem:[#allocation3 + $0x20] sm:$0xf] %vm862_vm2, %v763_v22  ;;  %v334_v22 = vpack.c.bf16 %v298_v19, %v298_v19 }
  0x9e   : > { %615 = vst.msk [vmem:[#allocation3 + $0x28] sm:$0xf] %vm609_vm1, %v512_v21  ;;  %v522_v29 = vpop.permute.xlu2 %521  ;;  %v11230_v34 = vor.u32 %v13653_v30, %v11229_v33  ;;  %v461_v21 = vpack.c.bf16 %v425_v14, %v425_v14  ;;  %v715_v33 = vpack.c.bf16 %v679_v31, %v679_v31  ;;  %v307_v14 = vld [vmem:[%s14257_s20 + $0x16f] sm:$0xff] }
  0x9f   : > { %868 = vst.msk [vmem:[#allocation3 + $0x28] sm:$0xf] %vm862_vm2, %v14414_v47  ;;  %v420_v47 = vld [vmem:[%s14257_s20 + $0x1b0] sm:$0xff] }
  0xa0   : > { %11271 = vmatmul.msk.bf16.vlgmr.msra.gmra.mxu0 %vm988_vm4, %v11230_v34  ;;  %v456_v52 = vpack.c.bf16 %v420_v47, %v420_v47  ;;  %620 = vst.msk [vmem:[#allocation3 + $0x50] sm:$0xf] %vm609_vm1, %v522_v29  ;;  %v300_v47 = vld [vmem:[%s14257_s20 + $0x107] sm:$0xff]  ;;  %v309_v31 = vld [vmem:[%s14257_s20 + $0x18f] sm:$0xff] }
  0xa1   : > { %376 = vst.msk [vmem:[#allocation3 + $0x98] sm:$0xf] %vm356_vm0, %v339_v11 }
  0xa2   : > { %808 = vrot.lane.b32.xlu1 %v709_v27, %s14215_s22  ;;  %555 = vrot.lane.b32.xlu2 %v456_v52, %s14214_s21  ;;  %375 = vst.msk [vmem:[#allocation3 + $0x90] sm:$0xf] %vm356_vm0, %v338_v18  ;;  %v305_v52 = vld [vmem:[%s14257_s20 + $0x14f] sm:$0xff] }
  0xa3   : > { %806 = vrot.lane.b32.xlu0 %v708_v28, %s14215_s22  ;;  %371 = vst.msk [vmem:[#allocation3 + $0x70] sm:$0xf] %vm356_vm0, %v334_v22  ;;  %v341_v55 = vpack.c.bf16 %v305_v52, %v305_v52 }
  0xa4   : > { %v516_v39 = vpop.permute.xlu1 %515  ;;  %v11305_v49 = vld [vmem:[#allocation3 + $0x20] sm:$0xf] }
  0xa5   : > { %v514_v38 = vpop.permute.xlu0 %513  ;;  %617 = vst.msk [vmem:[#allocation3 + $0x38] sm:$0xf] %vm609_vm1, %v516_v39  ;;  %v11233_v59 = vld [vmem:[#allocation3 + $0x20] sm:$0xf]  ;;  %v13692_v39 = vld [vmem:[%s17761_s1 + $0x28] sm:$0xff] }
  0xa6   : > { %v13667_v43 = vld [vmem:[#allocation3 + $0x24] sm:$0xf0]  ;;  %616 = vst.msk [vmem:[#allocation3 + $0x30] sm:$0xf] %vm609_vm1, %v514_v38  ;;  %v14496_v46 = vpop.permute.xlu2 %776  ;;  %1475 = vmatpush.bf16.msra.mxu3 %v13692_v39  ;;  %v13702_v39 = vld [vmem:[%s17761_s1 + $0x38] sm:$0xff] }
  0xa7   : > { %869 = vst.msk [vmem:[#allocation3 + $0x30] sm:$0xf] %vm862_vm2, %v14441_v63  ;;  %v11306_v53 = vor.u32 %v13667_v43, %v11305_v49  ;;  %v13654_v58 = vld [vmem:[#allocation3 + $0x24] sm:$0xf0]  ;;  %v333_v63 = vpack.c.bf16 %v297_v62, %v297_v62  ;;  %v336_v49 = vpack.c.bf16 %v300_v47, %v300_v47 }
  0xa8   : > { %v11234_v1 = vor.u32 %v13654_v58, %v11233_v59  ;;  %v676_v43 = vld [vmem:[%s14257_s20 + $0x1e9] sm:$0xff]  ;;  %378 = vst.msk [vmem:[#allocation3 + $0xa8] sm:$0xf] %vm356_vm0, %v341_v55 }
  0xa9   : > { %11347 = vmatmul.msk.bf16.vlgmr.msra.gmra.mxu2 %vm988_vm4, %v11306_v53  ;;  %370 = vst.msk [vmem:[#allocation3 + $0x68] sm:$0xf] %vm356_vm0, %v333_v63 }
  0xaa   : > { %810 = vrot.lane.b32.xlu1 %v710_v50, %s14215_s22  ;;  %11296 = vmatmul.msk.bf16.gmra.mxu1 %vm988_vm4, %v11230_v34  ;;  %v714_v34 = vpack.c.bf16 %v678_v32, %v678_v32  ;;  %v13703_v50 = vld [vmem:[%s17761_s1 + $0x40] sm:$0xff]  ;;  %373 = vst.msk [vmem:[#allocation3 + $0x80] sm:$0xf] %vm356_vm0, %v336_v49  ;;  %v345_v32 = vpack.c.bf16 %v309_v31, %v309_v31 }
  0xab   : > { %559 = vrot.lane.b32.xlu0 %v458_v45, %s14214_s21  ;;  %557 = vrot.lane.b32.xlu2 %v457_v4, %s14214_s21  ;;  %v712_v45 = vpack.c.bf16 %v676_v43, %v676_v43  ;;  %v13701_v43 = vld [vmem:[%s17761_s1 + $0x30] sm:$0xff]  ;;  %v314_v31 = vld [vmem:[%s14257_s20 + $0x1e7] sm:$0xff] }
  0xac   : > { %v518_v57 = vpop.permute.xlu1 %517  ;;  %1476 = vmatpush.bf16.msra.mxu3 %v13691_v42  ;;  %1703 = vmatpush.bf16.msrb.mxu1 %v13703_v50  ;;  %382 = vst.msk [vmem:[#allocation3 + $0xc8] sm:$0xf] %vm356_vm0, %v345_v32  ;;  %v315_v32 = vld [vmem:[%s14257_s20 + $0x1ef] sm:$0xff] }
  0xad   : > { %v769_v56 = vpop.permute.xlu0 %768  ;;  %618 = vst.msk [vmem:[#allocation3 + $0x40] sm:$0xf] %vm609_vm1, %v518_v57 }
  0xae   : > { %870 = vst.msk [vmem:[#allocation3 + $0x38] sm:$0xf] %vm862_vm2, %v769_v56  ;;  %v14513_v61 = vpop.permute.xlu2 %778  ;;  %v11309_v5 = vld [vmem:[#allocation3 + $0x30] sm:$0xf] }
  0xaf   : > { %v11237_v27 = vld [vmem:[#allocation3 + $0x30] sm:$0xf] }
  0xb0   : > { %11272 = vmatmul.msk.bf16.gmra.mxu0 %vm988_vm4, %v11234_v1  ;;  %1477 = vmatpush.bf16.msra.mxu3 %v13690_v51 }
  0xb1   : > { %1704 = vmatpush.bf16.msrb.mxu1 %v13702_v39 }
  0xb2   : > { %563 = vrot.lane.b32.xlu1 %v460_v2, %s14214_s21  ;;  %v426_v2 = vld [vmem:[%s14257_s20 + $0x210] sm:$0xff] }
  0xb3   : > { %561 = vrot.lane.b32.xlu0 %v459_v60, %s14214_s21  ;;  %812 = vrot.lane.b32.xlu2 %v711_v24, %s14215_s22  ;;  %v301_v60 = vld [vmem:[%s14257_s20 + $0x10f] sm:$0xff]  ;;  %v462_v4 = vpack.c.bf16 %v426_v2, %v426_v2 }
  0xb4   : > { %v773_v9 = vpop.permute.xlu1 %772 }
  0xb5   : > { %v13668_v7 = vld [vmem:[#allocation3 + $0x34] sm:$0xf0]  ;;  %v771_v8 = vpop.permute.xlu0 %770  ;;  %872 = vst.msk [vmem:[#allocation3 + $0x48] sm:$0xf] %vm862_vm2, %v773_v9  ;;  %1705 = vmatpush.bf16.msrb.mxu1 %v13701_v43  ;;  %v13741_v43 = vld [vmem:[%s17761_s1 + $0xe0] sm:$0xff] }
  0xb6   : > { %871 = vst.msk [vmem:[#allocation3 + $0x40] sm:$0xf] %vm862_vm2, %v771_v8  ;;  %v11310_v15 = vor.u32 %v13668_v7, %v11309_v5  ;;  %v540_v17 = vpop.permute.xlu2 %539  ;;  %v13655_v28 = vld [vmem:[#allocation3 + $0x34] sm:$0xf0]  ;;  %v306_v8 = vld [vmem:[%s14257_s20 + $0x167] sm:$0xff]  ;;  %2519 = vmatpush.bf16.msrb.mxu2 %v13741_v43 }
  0xb7   : > { %629 = vst.msk [vmem:[#allocation3 + $0x98] sm:$0xf] %vm609_vm1, %v540_v17  ;;  %v11238_v30 = vor.u32 %v13655_v28, %v11237_v27  ;;  %v342_v9 = vpack.c.bf16 %v306_v8, %v306_v8 }
  0xb9   : > { %11348 = vmatmul.msk.bf16.gmra.mxu2 %vm988_vm4, %v11310_v15  ;;  %379 = vst.msk [vmem:[#allocation3 + $0xb0] sm:$0xf] %vm356_vm0, %v342_v9  ;;  %v313_v9 = vld [vmem:[%s14257_s20 + $0x1cf] sm:$0xff] }
  0xba   : > { %565 = vrot.lane.b32.xlu1 %v461_v21, %s14214_s21  ;;  %11297 = vmatmul.msk.bf16.gmra.mxu1 %vm988_vm4, %v11234_v1 }
  0xbb   : > { %816 = vrot.lane.b32.xlu0 %v713_v16, %s14215_s22  ;;  %814 = vrot.lane.b32.xlu2 %v712_v45, %s14215_s22  ;;  %v343_v16 = vpack.c.bf16 %v307_v14, %v307_v14  ;;  %v346_v45 = vpack.c.bf16 %v310_v44, %v310_v44  ;;  %v13745_v44 = vld [vmem:[%s17761_s1 + $0x100] sm:$0xff] }
  0xbc   : > { %v775_v26 = vpop.permute.xlu1 %774  ;;  %v13669_v36 = vld [vmem:[#allocation3 + $0x44] sm:$0xf0]  ;;  %2572 = vmatpush.bf16.msrb.mxu3 %v13745_v44 }
  0xbd   : > { %v524_v25 = vpop.permute.xlu0 %523  ;;  %873 = vst.msk [vmem:[#allocation3 + $0x50] sm:$0xf] %vm862_vm2, %v775_v26  ;;  %v11313_v35 = vld [vmem:[#allocation3 + $0x40] sm:$0xf]  ;;  %v13656_v57 = vld [vmem:[#allocation3 + $0x44] sm:$0xf0] }
  0xbe   : > { %621 = vst.msk [vmem:[#allocation3 + $0x58] sm:$0xf] %vm609_vm1, %v524_v25  ;;  %v791_v29 = vpop.permute.xlu2 %790  ;;  %v11314_v40 = vor.u32 %v13669_v36, %v11313_v35  ;;  %v11241_v56 = vld [vmem:[#allocation3 + $0x40] sm:$0xf]  ;;  %v344_v25 = vpack.c.bf16 %v308_v23, %v308_v23 }
  0xbf   : > { %874 = vst.msk [vmem:[#allocation3 + $0x58] sm:$0xf] %vm862_vm2, %v14496_v46  ;;  %v304_v46 = vld [vmem:[%s14257_s20 + $0x147] sm:$0xff]  ;;  %v11242_v59 = vor.u32 %v13656_v57, %v11241_v56 }
  0xc0   : > { %11273 = vmatmul.msk.bf16.gmra.mxu0 %vm988_vm4, %v11238_v30  ;;  %v340_v48 = vpack.c.bf16 %v304_v46, %v304_v46  ;;  %380 = vst.msk [vmem:[#allocation3 + $0xb8] sm:$0xf] %vm356_vm0, %v343_v16 }
  0xc1   : > { %381 = vst.msk [vmem:[#allocation3 + $0xc0] sm:$0xf] %vm356_vm0, %v344_v25 }
  0xc2   : > { %820 = vrot.lane.b32.xlu1 %v715_v33, %s14215_s22  ;;  %377 = vst.msk [vmem:[#allocation3 + $0xa0] sm:$0xf] %vm356_vm0, %v340_v48 }
  0xc3   : > { %818 = vrot.lane.b32.xlu0 %v714_v34, %s14215_s22  ;;  %567 = vrot.lane.b32.xlu2 %v462_v4, %s14214_s21  ;;  %383 = vst.msk [vmem:[#allocation3 + $0xd0] sm:$0xf] %vm356_vm0, %v346_v45 }
  0xc4   : > { %v528_v38 = vpop.permute.xlu1 %527  ;;  %v11317_v1 = vld [vmem:[#allocation3 + $0x50] sm:$0xf] }
  0xc5   : > { %v526_v37 = vpop.permute.xlu0 %525  ;;  %623 = vst.msk [vmem:[#allocation3 + $0x68] sm:$0xf] %vm609_vm1, %v528_v38  ;;  %v11245_v11 = vld [vmem:[#allocation3 + $0x50] sm:$0xf]  ;;  %v13687_v38 = vld [vmem:[%s17761_s1 + $0x8] sm:$0xff] }
  0xc6   : > { %622 = vst.msk [vmem:[#allocation3 + $0x60] sm:$0xf] %vm609_vm1, %v526_v37  ;;  %v785_v41 = vpop.permute.xlu2 %784  ;;  %v13670_v62 = vld [vmem:[#allocation3 + $0x54] sm:$0xf0]  ;;  %1551 = vmatpush.bf16.msrb.mxu0 %v13687_v38 }
  0xc7   : > { %875 = vst.msk [vmem:[#allocation3 + $0x60] sm:$0xf] %vm862_vm2, %v14513_v61  ;;  %v337_v61 = vpack.c.bf16 %v301_v60, %v301_v60  ;;  %v11318_v5 = vor.u32 %v13670_v62, %v11317_v1  ;;  %v13657_v10 = vld [vmem:[#allocation3 + $0x54] sm:$0xf0]  ;;  %v312_v1 = vld [vmem:[%s14257_s20 + $0x1c7] sm:$0xff] }
  0xc8   : > { %v11246_v13 = vor.u32 %v13657_v10, %v11245_v11  ;;  %v348_v2 = vpack.c.bf16 %v312_v1, %v312_v1  ;;  %v349_v11 = vpack.c.bf16 %v313_v9, %v313_v9 }
  0xc9   : > { %11349 = vmatmul.msk.bf16.gmra.mxu2 %vm988_vm4, %v11314_v40  ;;  %374 = vst.msk [vmem:[#allocation3 + $0x88] sm:$0xf] %vm356_vm0, %v337_v61 }
  0xca   : > { %11298 = vmatmul.msk.bf16.gmra.mxu1 %vm988_vm4, %v11238_v30  ;;  %385 = vst.msk [vmem:[#allocation3 + $0xe0] sm:$0xf] %vm356_vm0, %v348_v2 }
  0xcb   : > { %386 = vst.msk [vmem:[#allocation3 + $0xe8] sm:$0xf] %vm356_vm0, %v349_v11 }
  0xcc   : > { %v538_v54 = vpop.permute.xlu1 %537 }
  0xcd   : > { %v781_v53 = vpop.permute.xlu0 %780  ;;  %628 = vst.msk [vmem:[#allocation3 + $0x90] sm:$0xf] %vm609_vm1, %v538_v54  ;;  %v311_v54 = vld [vmem:[%s14257_s20 + $0x1af] sm:$0xff] }
  0xce   : > { %876 = vst.msk [vmem:[#allocation3 + $0x68] sm:$0xf] %vm862_vm2, %v781_v53  ;;  %v534_v58 = vpop.permute.xlu2 %533  ;;  %v11321_v20 = vld [vmem:[#allocation3 + $0x60] sm:$0xf]  ;;  %v347_v55 = vpack.c.bf16 %v311_v54, %v311_v54 }
  0xcf   : > { %881 = vst.msk [vmem:[#allocation3 + $0x90] sm:$0xf] %vm862_vm2, %v791_v29  ;;  %v11249_v28 = vld [vmem:[#allocation3 + $0x60] sm:$0xf] }
  0xd0   : > { %626 = vst.msk [vmem:[#allocation3 + $0x80] sm:$0xf] %vm609_vm1, %v534_v58  ;;  %11274 = vmatmul.msk.bf16.gmra.mxu0 %vm988_vm4, %v11242_v59  ;;  %v13686_v53 = vld [vmem:[%s17761_s1] sm:$0xff] }
  0xd1   : > { %1552 = vmatpush.bf16.msrb.mxu0 %v13686_v53  ;;  %384 = vst.msk [vmem:[#allocation3 + $0xd8] sm:$0xf] %vm356_vm0, %v347_v55 }
  0xd4   : > { %v532_v0 = vpop.permute.xlu1 %531 }
  0xd5   : > { %v530_v63 = vpop.permute.xlu0 %529  ;;  %625 = vst.msk [vmem:[#allocation3 + $0x78] sm:$0xf] %vm609_vm1, %v532_v0  ;;  %v13671_v21 = vld [vmem:[#allocation3 + $0x64] sm:$0xf0] }
  0xd6   : > { %624 = vst.msk [vmem:[#allocation3 + $0x70] sm:$0xf] %vm609_vm1, %v530_v63  ;;  %v797_v3 = vpop.permute.xlu2 %796  ;;  %v11357_v15 = vld [vmem:[#allocation3 + $0x90] sm:$0xf]  ;;  %v11322_v24 = vor.u32 %v13671_v21, %v11321_v20  ;;  %v13658_v29 = vld [vmem:[#allocation3 + $0x64] sm:$0xf0] }
  0xd7   : > { %878 = vst.msk [vmem:[#allocation3 + $0x78] sm:$0xf] %vm862_vm2, %v785_v41  ;;  %v11250_v30 = vor.u32 %v13658_v29, %v11249_v28 }
  0xd9   : > { %11350 = vmatmul.msk.bf16.gmra.mxu2 %vm988_vm4, %v11318_v5 }
  0xda   : > { %11299 = vmatmul.msk.bf16.gmra.mxu1 %vm988_vm4, %v11242_v59 }
  0xdc   : > { %v783_v7 = vpop.permute.xlu1 %782 }
  0xdd   : > { %v793_v6 = vpop.permute.xlu0 %792  ;;  %877 = vst.msk [vmem:[#allocation3 + $0x70] sm:$0xf] %vm862_vm2, %v783_v7 }
  0xde   : > { %882 = vst.msk [vmem:[#allocation3 + $0x98] sm:$0xf] %vm862_vm2, %v793_v6  ;;  %v546_v12 = vpop.permute.xlu2 %545  ;;  %v13672_v35 = vld [vmem:[#allocation3 + $0x74] sm:$0xf0] }
  0xdf   : > { %632 = vst.msk [vmem:[#allocation3 + $0xb0] sm:$0xf] %vm609_vm1, %v546_v12  ;;  %v13659_v50 = vld [vmem:[#allocation3 + $0x74] sm:$0xf0] }
  0xe0   : > { %11275 = vmatmul.msk.bf16.gmra.mxu0 %vm988_vm4, %v11246_v13 }
  0xe4   : > { %v544_v19 = vpop.permute.xlu1 %543  ;;  %v11325_v40 = vld [vmem:[#allocation3 + $0x70] sm:$0xf] }
  0xe5   : > { %v13679_v17 = vld [vmem:[#allocation3 + $0x94] sm:$0xf0]  ;;  %v542_v18 = vpop.permute.xlu0 %541  ;;  %631 = vst.msk [vmem:[#allocation3 + $0xa8] sm:$0xf] %vm609_vm1, %v544_v19  ;;  %v11326_v46 = vor.u32 %v13672_v35, %v11325_v40  ;;  %v11253_v51 = vld [vmem:[#allocation3 + $0x70] sm:$0xf]  ;;  %v350_v35 = vpack.c.bf16 %v314_v31, %v314_v31 }
  0xe6   : > { %630 = vst.msk [vmem:[#allocation3 + $0xa0] sm:$0xf] %vm609_vm1, %v542_v18  ;;  %v14604_v22 = vor.u32 %v13679_v17, %v11357_v15  ;;  %v801_v34 = vpop.permute.xlu2 %800  ;;  %v11254_v52 = vor.u32 %v13659_v50, %v11253_v51  ;;  %v11333_v15 = vld [vmem:[#allocation3 + $0x90] sm:$0xf]  ;;  %v13674_v16 = vld [vmem:[#allocation3 + $0x94] sm:$0xf0] }
  0xe7   : > { %884 = vst.msk [vmem:[#allocation3 + $0xa8] sm:$0xf] %vm862_vm2, %v797_v3  ;;  %v11334_v18 = vor.u32 %v13674_v16, %v11333_v15 }
  0xe8   : > { %11399 = vmatmul.msk.bf16.vlgmr.msra.gmra.mxu3 %vm988_vm4, %v14604_v22  ;;  %387 = vst.msk [vmem:[#allocation3 + $0xf0] sm:$0xf] %vm356_vm0, %v350_v35 }
  0xe9   : > { %11351 = vmatmul.msk.bf16.gmra.mxu2 %vm988_vm4, %v11322_v24 }
  0xea   : > { %11300 = vmatmul.msk.bf16.gmra.mxu1 %vm988_vm4, %v11246_v13 }
  0xec   : > { %v795_v27 = vpop.permute.xlu1 %794 }
  0xed   : > { %v536_v26 = vpop.permute.xlu0 %535  ;;  %883 = vst.msk [vmem:[#allocation3 + $0xa0] sm:$0xf] %vm862_vm2, %v795_v27 }
  0xee   : > { %627 = vst.msk [vmem:[#allocation3 + $0x88] sm:$0xf] %vm609_vm1, %v536_v26  ;;  %v13680_v33 = vld [vmem:[#allocation3 + $0xa4] sm:$0xf0]  ;;  %v803_v47 = vpop.permute.xlu2 %802 }
  0xef   : > { %v13693_v20 = vld [vmem:[#allocation3 + $0xa4] sm:$0xf0] }
  0xf0   : > { %11276 = vmatmul.msk.bf16.gmra.mxu0 %vm988_vm4, %v11250_v30 }
  0xf4   : > { %v789_v37 = vpop.permute.xlu1 %788  ;;  %v11361_v41 = vld [vmem:[#allocation3 + $0xa0] sm:$0xf] }
  0xf5   : > { %v787_v36 = vpop.permute.xlu0 %786  ;;  %880 = vst.msk [vmem:[#allocation3 + $0x88] sm:$0xf] %vm862_vm2, %v789_v37  ;;  %v14627_v42 = vor.u32 %v13680_v33, %v11361_v41  ;;  %v11433_v21 = vld [vmem:[#allocation3 + $0xa0] sm:$0xf] }
  0xf6   : > { %879 = vst.msk [vmem:[#allocation3 + $0x80] sm:$0xf] %vm862_vm2, %v787_v36  ;;  %v11434_v28 = vor.u32 %v13693_v20, %v11433_v21  ;;  %v351_v36 = vpack.c.bf16 %v315_v32, %v315_v32 }
  0xf8   : > { %11400 = vmatmul.msk.bf16.gmra.mxu3 %vm988_vm4, %v14627_v42  ;;  %388 = vst.msk [vmem:[#allocation3 + $0xf8] sm:$0xf] %vm356_vm0, %v351_v36 }
  0xf9   : > { %11352 = vmatmul.msk.bf16.gmra.mxu2 %vm988_vm4, %v11326_v46 }
  0xfa   : > { %11301 = vmatmul.msk.bf16.gmra.mxu1 %vm988_vm4, %v11250_v30 }
  0xfc   : > { %v799_v49 = vpop.permute.xlu1 %798  ;;  %v13673_v57 = vld [vmem:[#allocation3 + $0x84] sm:$0xf0]  ;;  %v556_v58 = vpop.permute.xlu2 %555 }
  0xfd   : > { %v548_v48 = vpop.permute.xlu0 %547  ;;  %885 = vst.msk [vmem:[#allocation3 + $0xb0] sm:$0xf] %vm862_vm2, %v799_v49  ;;  %v11329_v56 = vld [vmem:[#allocation3 + $0x80] sm:$0xf]  ;;  %v13663_v6 = vld [vmem:[#allocation3 + $0x84] sm:$0xf0] }
  0xfe   : > { %633 = vst.msk [vmem:[#allocation3 + $0xb8] sm:$0xf] %vm609_vm1, %v548_v48  ;;  %v11330_v62 = vor.u32 %v13673_v57, %v11329_v56  ;;  %v11257_v5 = vld [vmem:[#allocation3 + $0x80] sm:$0xf]  ;;  %v13678_v26 = vld [vmem:[#allocation3 + $0x84] sm:$0xf0] }
  0xff   : > { %886 = vst.msk [vmem:[#allocation3 + $0xb8] sm:$0xf] %vm862_vm2, %v801_v34  ;;  %v11258_v8 = vor.u32 %v13663_v6, %v11257_v5  ;;  %v11409_v25 = vld [vmem:[#allocation3 + $0x80] sm:$0xf] }
 0x100   : > { %11277 = vmatmul.msk.bf16.gmra.mxu0 %vm988_vm4, %v11254_v52  ;;  %637 = vst.msk [vmem:[#allocation3 + $0xd8] sm:$0xf] %vm609_vm1, %v556_v58  ;;  %v11410_v30 = vor.u32 %v13678_v26, %v11409_v25  ;;  %v14697_v49 = vld [vmem:[%s17762_s2] ss:$0 sm:$0xff]  ;;  %v427_v26 = vld [vmem:[%s14257_s20 + $0x228] sm:$0xff] }
 0x101   : > { %v463_v32 = vpack.c.bf16 %v427_v26, %v427_v26 }
 0x104   : > { %v552_v60 = vpop.permute.xlu1 %551  ;;  %v11365_v63 = vld [vmem:[#allocation3 + $0xb0] sm:$0xf] }
 0x105   : > { %v550_v59 = vpop.permute.xlu0 %549  ;;  %635 = vst.msk [vmem:[#allocation3 + $0xc8] sm:$0xf] %vm609_vm1, %v552_v60  ;;  %v558_v7 = vpop.permute.xlu2 %557  ;;  %v317_v60 = vld [vmem:[%s14257_s20 + $0x20f] sm:$0xff] }
 0x106   : > { %634 = vst.msk [vmem:[#allocation3 + $0xc0] sm:$0xf] %vm609_vm1, %v550_v59  ;;  %v13681_v61 = vld [vmem:[#allocation3 + $0xb4] sm:$0xf0]  ;;  %v316_v59 = vld [vmem:[%s14257_s20 + $0x207] sm:$0xff]  ;;  %v353_v1 = vpack.c.bf16 %v317_v60, %v317_v60 }
 0x107   : > { %887 = vst.msk [vmem:[#allocation3 + $0xc0] sm:$0xf] %vm862_vm2, %v803_v47  ;;  %v14650_v0 = vor.u32 %v13681_v61, %v11365_v63  ;;  %v13694_v46 = vld [vmem:[#allocation3 + $0xb4] sm:$0xf0]  ;;  %v11437_v47 = vld [vmem:[#allocation3 + $0xb0] sm:$0xf]  ;;  %v352_v63 = vpack.c.bf16 %v316_v59, %v316_v59 }
 0x108   : > { %638 = vst.msk [vmem:[#allocation3 + $0xe0] sm:$0xf] %vm609_vm1, %v558_v7 }
 0x109   : > { %11353 = vmatmul.msk.bf16.gmra.mxu2 %vm988_vm4, %v11330_v62  ;;  %11401 = vmatmul.msk.bf16.gmra.mxu3 %vm988_vm4, %v14650_v0  ;;  %389 = vst.msk [vmem:[#allocation3 + $0x100] sm:$0xf] %vm356_vm0, %v352_v63 }
 0x10a   : > { %11302 = vmatmul.msk.bf16.gmra.mxu1 %vm988_vm4, %v11254_v52  ;;  %v11438_v52 = vor.u32 %v13694_v46, %v11437_v47  ;;  %390 = vst.msk [vmem:[#allocation3 + $0x108] sm:$0xf] %vm356_vm0, %v353_v1 }
 0x10c   : > { %v554_v4 = vpop.permute.xlu1 %553 }
 0x10d   : > { %v805_v3 = vpop.permute.xlu0 %804  ;;  %636 = vst.msk [vmem:[#allocation3 + $0xd0] sm:$0xf] %vm609_vm1, %v554_v4  ;;  %v813_v19 = vpop.permute.xlu2 %812 }
 0x10e   : > { %888 = vst.msk [vmem:[#allocation3 + $0xc8] sm:$0xf] %vm862_vm2, %v805_v3  ;;  %v11369_v10 = vld [vmem:[#allocation3 + $0xc0] sm:$0xf] }
 0x110   : > { %11278 = vmatmul.msk.bf16.gmra.mxu0 %vm988_vm4, %v11258_v8 }
 0x114   : > { %v809_v13 = vpop.permute.xlu1 %808 }
 0x115   : > { %v13682_v12 = vld [vmem:[#allocation3 + $0xc4] sm:$0xf0]  ;;  %v807_v14 = vpop.permute.xlu0 %806  ;;  %890 = vst.msk [vmem:[#allocation3 + $0xd8] sm:$0xf] %vm862_vm2, %v809_v13  ;;  %v815_v41 = vpop.permute.xlu2 %814  ;;  %v11441_v13 = vld [vmem:[#allocation3 + $0xc0] sm:$0xf] }
 0x116   : > { %v14665_v17 = vor.u32 %v13682_v12, %v11369_v10  ;;  %889 = vst.msk [vmem:[#allocation3 + $0xd0] sm:$0xf] %vm862_vm2, %v807_v14  ;;  %v13695_v14 = vld [vmem:[#allocation3 + $0xc4] sm:$0xf0] }
 0x117   : > { %v1097_v27 = vpop.f32.mrf.mxu1 }
 0x119   : > { %11354 = vmatmul.msk.bf16.gmra.mxu2 %vm988_vm4, %v11334_v18  ;;  %11402 = vmatmul.msk.bf16.gmra.mxu3 %vm988_vm4, %v14665_v17 }
 0x11a   : > { %11475 = vmatmul.msk.bf16.vlgmr.msrb.gmra.mxu1 %vm988_vm4, %v11434_v28 }
 0x11c   : > { %v811_v24 = vpop.permute.xlu1 %810  ;;  %v13683_v33 = vld [vmem:[#allocation3 + $0xd4] sm:$0xf0] }
 0x11d   : > { %v560_v23 = vpop.permute.xlu0 %559  ;;  %891 = vst.msk [vmem:[#allocation3 + $0xe0] sm:$0xf] %vm862_vm2, %v811_v24  ;;  %v1022_v29 = vpop.f32.mrf.mxu0  ;;  %v11373_v34 = vld [vmem:[#allocation3 + $0xd0] sm:$0xf] }
 0x11e   : > { %639 = vst.msk [vmem:[#allocation3 + $0xe8] sm:$0xf] %vm609_vm1, %v560_v23  ;;  %v14680_v40 = vor.u32 %v13683_v33, %v11373_v34  ;;  %v1098_v48 = vadd.f32 %v1097_v27, %v1022_v29  ;;  %v568_v5 = vpop.permute.xlu2 %567  ;;  %v11442_v23 = vor.u32 %v13695_v14, %v11441_v13 }
 0x11f   : > { %892 = vst.msk [vmem:[#allocation3 + $0xe8] sm:$0xf] %vm862_vm2, %v813_v19  ;;  %v1099_v39 = vpop.f32.mrf.mxu1 }
 0x120   : > { %11423 = vmatmul.msk.bf16.vlgmr.msrb.gmra.mxu0 %vm988_vm4, %v11410_v30  ;;  %643 = vst.msk [vmem:[#allocation3 + $0x108] sm:$0xf] %vm609_vm1, %v568_v5  ;;  %v680_v5 = vld [vmem:[%s14257_s20 + $0x229] sm:$0xff] }
 0x124   : > { %v564_v38 = vpop.permute.xlu1 %563  ;;  %v11377_v62 = vld [vmem:[#allocation3 + $0xe0] sm:$0xf] }
 0x125   : > { %v562_v37 = vpop.permute.xlu0 %561  ;;  %v1024_v45 = vpop.f32.mrf.mxu0  ;;  %641 = vst.msk [vmem:[#allocation3 + $0xf8] sm:$0xf] %vm609_vm1, %v564_v38  ;;  %v13744_v38 = vld [vmem:[%s17761_s1 + $0xf8] sm:$0xff] }
 0x126   : > { %640 = vst.msk [vmem:[#allocation3 + $0xf0] sm:$0xf] %vm609_vm1, %v562_v37  ;;  %v13684_v61 = vld [vmem:[#allocation3 + $0xe4] sm:$0xf0]  ;;  %v1100_v2 = vadd.f32 %v1099_v39, %v1024_v45  ;;  %2573 = vmatpush.bf16.msrb.mxu3 %v13744_v38 }
 0x127   : > { %893 = vst.msk [vmem:[#allocation3 + $0xf0] sm:$0xf] %vm862_vm2, %v815_v41  ;;  %v1102_v53 = vpop.f32.mrf.mxu1  ;;  %v14707_v8 = vor.u32 %v13684_v61, %v11377_v62  ;;  %v13742_v62 = vld [vmem:[%s17761_s1 + $0xe8] sm:$0xff] }
 0x129   : > { %11403 = vmatmul.msk.bf16.gmra.mxu3 %vm988_vm4, %v14680_v40 }
 0x12a   : > { %11476 = vmatmul.msk.bf16.gmra.mxu1 %vm988_vm4, %v11438_v52 }
 0x12c   : > { %v1250_v51 = vpop.f32.mrf.mxu2  ;;  %v566_v55 = vpop.permute.xlu1 %565 }
 0x12d   : > { %v817_v50 = vpop.permute.xlu0 %816  ;;  %v1290_v54 = vadd.f32 %v1250_v51, %v1098_v48  ;;  %v1027_v57 = vpop.f32.mrf.mxu0  ;;  %642 = vst.msk [vmem:[#allocation3 + $0x100] sm:$0xf] %vm609_vm1, %v566_v55  ;;  %v428_v48 = vld [vmem:[%s14257_s20 + $0x230] sm:$0xff] }
 0x12e   : > { %894 = vst.msk [vmem:[#allocation3 + $0xf8] sm:$0xf] %vm862_vm2, %v817_v50  ;;  %v1103_v18 = vadd.f32 %v1102_v53, %v1027_v57  ;;  %v11381_v30 = vld [vmem:[#allocation3 + $0xf0] sm:$0xf]  ;;  %v464_v57 = vpack.c.bf16 %v428_v48, %v428_v48 }
 0x12f   : > { %v1309_v56 = vadd.f32 %v14697_v49, %v1290_v54  ;;  %v1104_v6 = vpop.f32.mrf.mxu1  ;;  %v13743_v50 = vld [vmem:[%s17761_s1 + $0xf0] sm:$0xff]  ;;  %v13696_v54 = vld [vmem:[#allocation3 + $0xd4] sm:$0xf0] }
 0x130   : > { %11424 = vmatmul.msk.bf16.gmra.mxu0 %vm988_vm4, %v14604_v22  ;;  %v13740_v22 = vld [vmem:[%s17761_s1 + $0xd8] sm:$0xff]  ;;  %v11445_v55 = vld [vmem:[#allocation3 + $0xd0] sm:$0xf]  ;;  %2574 = vmatpush.bf16.msrb.mxu3 %v13743_v50 }
 0x131   : > { %v1325_v58 = vmax.f32 %v1309_v56, 0.0  ;;  %2520 = vmatpush.bf16.msrb.mxu2 %v13740_v22  ;;  %v681_v53 = vld [vmem:[%s14257_s20 + $0x231] sm:$0xff] }
 0x133   : > { %1342 = vst [vmem:[#allocation2 + $0x28] sm:$0xff] %v1325_v58  ;;  %v1959_v3 = vpack.c.bf16 %v1325_v58, %v1325_v58  ;;  %v717_v58 = vpack.c.bf16 %v681_v53, %v681_v53  ;;  %v13731_v53 = vld [vmem:[%s17761_s1 + $0xa0] sm:$0xff] }
 0x134   : > { %v1252_v4 = vpop.f32.mrf.mxu2  ;;  %v821_v9 = vpop.permute.xlu1 %820  ;;  %2575 = vmatpush.bf16.msrb.mxu3 %v13742_v62  ;;  %2754 = vmatpush.bf16.msra.mxu1 %v13731_v53 }
 0x135   : > { %v1291_v7 = vadd.f32 %v1252_v4, %v1100_v2  ;;  %2033 = vrot.lane.b32.xlu2 %v1959_v3, %s14217_s23  ;;  %v819_v10 = vpop.permute.xlu0 %818  ;;  %v1029_v12 = vpop.f32.mrf.mxu0  ;;  %896 = vst.msk [vmem:[#allocation3 + $0x108] sm:$0xf] %vm862_vm2, %v821_v9  ;;  %v13685_v31 = vld [vmem:[#allocation3 + $0xf4] sm:$0xf0]  ;;  %v11446_v2 = vor.u32 %v13696_v54, %v11445_v55 }
 0x136   : > { %895 = vst.msk [vmem:[#allocation3 + $0x100] sm:$0xf] %vm862_vm2, %v819_v10  ;;  %v1105_v35 = vadd.f32 %v1104_v6, %v1029_v12  ;;  %v14731_v47 = vor.u32 %v13685_v31, %v11381_v30  ;;  %v13697_v30 = vld [vmem:[#allocation3 + $0xe4] sm:$0xf0]  ;;  %v11449_v31 = vld [vmem:[#allocation3 + $0xe0] sm:$0xf] }
 0x137   : > { %v1310_v11 = vadd.f32 %v14697_v49, %v1291_v7  ;;  %v1107_v24 = vpop.f32.mrf.mxu1  ;;  %v11450_v38 = vor.u32 %v13697_v30, %v11449_v31 }
 0x139   : > { %v1326_v15 = vmax.f32 %v1310_v11, 0.0  ;;  %11404 = vmatmul.msk.bf16.gmra.mxu3 %vm988_vm4, %v14707_v8  ;;  %v716_v11 = vpack.c.bf16 %v680_v5, %v680_v5 }
 0x13a   : > { %v1814_v16 = vld [vmem:[#allocation2 + $0x27] sm:$0xff]  ;;  %11477 = vmatmul.msk.bf16.gmra.mxu1 %vm988_vm4, %v11442_v23 }
 0x13b   : > { %1343 = vst [vmem:[#allocation2 + $0x30] sm:$0xff] %v1326_v15  ;;  %v1960_v19 = vpack.c.bf16 %v1326_v15, %v1326_v15  ;;  %v1850_v20 = vpack.c.bf16 %v1814_v16, %v1814_v16  ;;  %v14195_v16 = vld [vmem:[#allocation2] sm:$0xff] }
 0x13c   : > { %v1255_v21 = vpop.f32.mrf.mxu2  ;;  %v13689_v22 = vld [vmem:[#allocation3 + $0x104] sm:$0xf0] }
 0x13d   : > { %v1292_v25 = vadd.f32 %v1255_v21, %v1103_v18  ;;  %2035 = vrot.lane.b32.xlu0 %v1960_v19, %s14217_s23  ;;  %1887 = vst.msk [vmem:[#allocation3 + $0x10] sm:$0xf] %vm1884_vm3, %v1850_v20  ;;  %v1032_v28 = vpop.f32.mrf.mxu0  ;;  %v11385_v10 = vld [vmem:[#allocation3 + $0x100] sm:$0xf]  ;;  %v1958_v18 = vpack.c.bf16 %v14195_v16, %v14195_v16 }
 0x13e   : > { %v1108_v60 = vadd.f32 %v1107_v24, %v1032_v28  ;;  %v13738_v28 = vld [vmem:[%s17761_s1 + $0xc8] sm:$0xff] }
 0x13f   : > { %v1311_v27 = vadd.f32 %v14697_v49, %v1292_v25  ;;  %v1109_v45 = vpop.f32.mrf.mxu1 }
 0x140   : > { %11425 = vmatmul.msk.bf16.gmra.mxu0 %vm988_vm4, %v14627_v42  ;;  %v13739_v42 = vld [vmem:[%s17761_s1 + $0xd0] sm:$0xff] }
 0x141   : > { %v1327_v29 = vmax.f32 %v1311_v27, 0.0  ;;  %2521 = vmatpush.bf16.msrb.mxu2 %v13739_v42  ;;  %v11386_v27 = vor.u32 %v13689_v22, %v11385_v10 }
 0x142   : > { %v2176_v33 = vld [vmem:[#allocation2 + $0x29] sm:$0xff]  ;;  %v2177_v34 = vld [vmem:[#allocation2 + $0x31] sm:$0xff] }
 0x143   : > { %v1815_v36 = vld [vmem:[#allocation2 + $0x2f] sm:$0xff]  ;;  %1344 = vst [vmem:[#allocation2 + $0x48] sm:$0xff] %v1327_v29  ;;  %v1961_v37 = vpack.c.bf16 %v1327_v29, %v1327_v29  ;;  %v2212_v39 = vpack.c.bf16 %v2176_v33, %v2176_v33  ;;  %v2213_v41 = vpack.c.bf16 %v2177_v34, %v2177_v34 }
 0x144   : > { %v1851_v43 = vpack.c.bf16 %v1815_v36, %v1815_v36  ;;  %v1257_v44 = vpop.f32.mrf.mxu2 }
 0x145   : > { %v1293_v46 = vadd.f32 %v1257_v44, %v1105_v35  ;;  %2037 = vrot.lane.b32.xlu1 %v1961_v37, %s14217_s23  ;;  %569 = vrot.lane.b32.xlu0 %v463_v32, %s14214_s21  ;;  %2248 = vst.msk [vmem:[#allocation3 + $0x14] sm:$0xf] %vm1884_vm3, %v2212_v39  ;;  %v1034_v52 = vpop.f32.mrf.mxu0 }
 0x146   : > { %2249 = vst.msk [vmem:[#allocation3 + $0x1c] sm:$0xf] %vm1884_vm3, %v2213_v41  ;;  %v1110_v15 = vadd.f32 %v1109_v45, %v1034_v52  ;;  %2522 = vmatpush.bf16.msrb.mxu2 %v13738_v28  ;;  %v13727_v52 = vld [vmem:[%s17761_s1 + $0x80] sm:$0xff] }
 0x147   : > { %v1312_v51 = vadd.f32 %v14697_v49, %v1293_v46  ;;  %1888 = vst.msk [vmem:[#allocation3 + $0x18] sm:$0xf] %vm1884_vm3, %v1851_v43  ;;  %v1112_v3 = vpop.f32.mrf.mxu1  ;;  %2701 = vmatpush.bf16.msra.mxu0 %v13727_v52 }
 0x149   : > { %v1328_v56 = vmax.f32 %v1312_v51, 0.0  ;;  %11405 = vmatmul.msk.bf16.gmra.mxu3 %vm988_vm4, %v14731_v47 }
 0x14a   : > { %v1816_v59 = vld [vmem:[#allocation2 + $0x47] sm:$0xff]  ;;  %11478 = vmatmul.msk.bf16.gmra.mxu1 %vm988_vm4, %v11446_v2  ;;  %v11453_v2 = vld [vmem:[#allocation3 + $0xf0] sm:$0xf] }
 0x14b   : > { %1345 = vst [vmem:[#allocation2 + $0x50] sm:$0xff] %v1328_v56  ;;  %v1962_v61 = vpack.c.bf16 %v1328_v56, %v1328_v56  ;;  %v1852_v63 = vpack.c.bf16 %v1816_v59, %v1816_v59 }
 0x14c   : > { %v1260_v1 = vpop.f32.mrf.mxu2 }
 0x14d   : > { %v1294_v4 = vadd.f32 %v1260_v1, %v1108_v60  ;;  %571 = vrot.lane.b32.xlu1 %v464_v57, %s14214_s21  ;;  %2039 = vrot.lane.b32.xlu2 %v1962_v61, %s14217_s23  ;;  %1889 = vst.msk [vmem:[#allocation3 + $0x20] sm:$0xf] %vm1884_vm3, %v1852_v63  ;;  %v1037_v7 = vpop.f32.mrf.mxu0  ;;  %v11488_v59 = vld [vmem:[#allocation3 + $0x18] sm:$0xf0] }
 0x14e   : > { %824 = vrot.lane.b32.xlu0 %v717_v58, %s14215_s22  ;;  %v1113_v34 = vadd.f32 %v1112_v3, %v1037_v7  ;;  %v13706_v58 = vld [vmem:[#allocation3 + $0x14] sm:$0xf]  ;;  %v13698_v3 = vld [vmem:[#allocation3 + $0xf4] sm:$0xf0] }
 0x14f   : > { %v1313_v6 = vadd.f32 %v14697_v49, %v1294_v4  ;;  %v1114_v25 = vpop.f32.mrf.mxu1  ;;  %v14792_v1 = vor.u32 %v13706_v58, %v11488_v59 }
 0x150   : > { %11426 = vmatmul.msk.bf16.gmra.mxu0 %vm988_vm4, %v14650_v0 }
 0x151   : > { %v1329_v9 = vmax.f32 %v1313_v6, 0.0 }
 0x152   : > { %v1817_v12 = vld [vmem:[#allocation2 + $0x4f] sm:$0xff] }
 0x153   : > { %v2178_v13 = vld [vmem:[#allocation2 + $0x49] sm:$0xff]  ;;  %v2179_v14 = vld [vmem:[#allocation2 + $0x51] sm:$0xff]  ;;  %1346 = vst [vmem:[#allocation2 + $0x68] sm:$0xff] %v1329_v9  ;;  %v1963_v19 = vpack.c.bf16 %v1329_v9, %v1329_v9  ;;  %v1853_v23 = vpack.c.bf16 %v1817_v12, %v1817_v12 }
 0x154   : > { %v2214_v20 = vpack.c.bf16 %v2178_v13, %v2178_v13  ;;  %v2215_v21 = vpack.c.bf16 %v2179_v14, %v2179_v14  ;;  %v1262_v24 = vpop.f32.mrf.mxu2 }
 0x155   : > { %v1295_v26 = vadd.f32 %v1262_v24, %v1110_v15  ;;  %2041 = vrot.lane.b32.xlu1 %v1963_v19, %s14217_s23  ;;  %822 = vrot.lane.b32.xlu2 %v716_v11, %s14215_s22  ;;  %v1039_v29 = vpop.f32.mrf.mxu0  ;;  %1890 = vst.msk [vmem:[#allocation3 + $0x28] sm:$0xf] %vm1884_vm3, %v1853_v23  ;;  %v11454_v11 = vor.u32 %v13698_v3, %v11453_v2 }
 0x156   : > { %2250 = vst.msk [vmem:[#allocation3 + $0x24] sm:$0xf] %vm1884_vm3, %v2214_v20  ;;  %2029 = vrot.lane.b32.xlu0 %v1958_v18, %s14217_s23  ;;  %v1115_v50 = vadd.f32 %v1114_v25, %v1039_v29  ;;  %v13726_v25 = vld [vmem:[%s17761_s1 + $0x78] sm:$0xff] }
 0x157   : > { %2251 = vst.msk [vmem:[#allocation3 + $0x2c] sm:$0xf] %vm1884_vm3, %v2215_v21  ;;  %v1314_v0 = vadd.f32 %v14697_v49, %v1295_v26  ;;  %v1117_v39 = vpop.f32.mrf.mxu1  ;;  %2702 = vmatpush.bf16.msra.mxu0 %v13726_v25 }
 0x159   : > { %v1330_v32 = vmax.f32 %v1314_v0, 0.0  ;;  %11406 = vmatmul.msk.bf16.gmra.mxu3 %vm988_vm4, %v11386_v27 }
 0x15a   : > { %v1818_v33 = vld [vmem:[#allocation2 + $0x67] sm:$0xff]  ;;  %11479 = vmatmul.msk.bf16.gmra.mxu1 %vm988_vm4, %v11450_v38 }
 0x15b   : > { %1347 = vst [vmem:[#allocation2 + $0x70] sm:$0xff] %v1330_v32  ;;  %v1964_v35 = vpack.c.bf16 %v1330_v32, %v1330_v32  ;;  %v1854_v36 = vpack.c.bf16 %v1818_v33, %v1818_v33 }
 0x15c   : > { %v1265_v37 = vpop.f32.mrf.mxu2 }
 0x15d   : > { %v1296_v41 = vadd.f32 %v1265_v37, %v1113_v34  ;;  %2031 = vrot.lane.b32.xlu1 %v1958_v18, %s14217_s23  ;;  %2043 = vrot.lane.b32.xlu2 %v1964_v35, %s14217_s23  ;;  %1891 = vst.msk [vmem:[#allocation3 + $0x30] sm:$0xf] %vm1884_vm3, %v1854_v36  ;;  %v1042_v44 = vpop.f32.mrf.mxu0  ;;  %v13708_v29 = vld [vmem:[#allocation3 + $0x24] sm:$0xf]  ;;  %v13699_v36 = vld [vmem:[#allocation3 + $0x104] sm:$0xf0] }
 0x15e   : > { %v1118_v7 = vadd.f32 %v1117_v39, %v1042_v44  ;;  %v11496_v30 = vld [vmem:[#allocation3 + $0x28] sm:$0xf0]  ;;  %v11457_v37 = vld [vmem:[#allocation3 + $0x100] sm:$0xf] }
 0x15f   : > { %v1315_v43 = vadd.f32 %v14697_v49, %v1296_v41  ;;  %v1119_v60 = vpop.f32.mrf.mxu1  ;;  %v14817_v35 = vor.u32 %v13708_v29, %v11496_v30 }
 0x160   : > { %11427 = vmatmul.msk.bf16.gmra.mxu0 %vm988_vm4, %v14665_v17  ;;  %v13737_v17 = vld [vmem:[%s17761_s1 + $0xc0] sm:$0xff] }
 0x161   : > { %v1331_v45 = vmax.f32 %v1315_v43, 0.0  ;;  %2523 = vmatpush.bf16.msrb.mxu2 %v13737_v17 }
 0x162   : > { %v1819_v46 = vld [vmem:[#allocation2 + $0x6f] sm:$0xff] }
 0x163   : > { %v2180_v42 = vld [vmem:[#allocation2 + $0x69] sm:$0xff]  ;;  %v2181_v48 = vld [vmem:[#allocation2 + $0x71] sm:$0xff]  ;;  %1348 = vst [vmem:[#allocation2 + $0x88] sm:$0xff] %v1331_v45  ;;  %v1965_v51 = vpack.c.bf16 %v1331_v45, %v1331_v45  ;;  %v1855_v56 = vpack.c.bf16 %v1819_v46, %v1819_v46 }
 0x164   : > { %v2216_v54 = vpack.c.bf16 %v2180_v42, %v2180_v42  ;;  %v2217_v55 = vpack.c.bf16 %v2181_v48, %v2181_v48  ;;  %v1267_v57 = vpop.f32.mrf.mxu2  ;;  %v11458_v42 = vor.u32 %v13699_v36, %v11457_v37 }
 0x165   : > { %v1297_v61 = vadd.f32 %v1267_v57, %v1115_v50  ;;  %2045 = vrot.lane.b32.xlu2 %v1965_v51, %s14217_s23  ;;  %v1044_v63 = vpop.f32.mrf.mxu0  ;;  %1892 = vst.msk [vmem:[#allocation3 + $0x38] sm:$0xf] %vm1884_vm3, %v1855_v56 }
 0x166   : > { %2252 = vst.msk [vmem:[#allocation3 + $0x34] sm:$0xf] %vm1884_vm3, %v2216_v54  ;;  %v1120_v23 = vadd.f32 %v1119_v60, %v1044_v63  ;;  %v13725_v60 = vld [vmem:[%s17761_s1 + $0x70] sm:$0xff] }
 0x167   : > { %2253 = vst.msk [vmem:[#allocation3 + $0x3c] sm:$0xf] %vm1884_vm3, %v2217_v55  ;;  %v1316_v62 = vadd.f32 %v14697_v49, %v1297_v61  ;;  %v1122_v12 = vpop.f32.mrf.mxu1  ;;  %v13730_v61 = vld [vmem:[%s17761_s1 + $0x98] sm:$0xff]  ;;  %2703 = vmatpush.bf16.msra.mxu0 %v13725_v60 }
 0x168   : > { %2755 = vmatpush.bf16.msra.mxu1 %v13730_v61 }
 0x169   : > { %v1332_v4 = vmax.f32 %v1316_v62, 0.0  ;;  %11596 = vmatmul.msk.bf16.vlgmr.msrb.gmra.mxu3 %vm2494_vm5, %v14792_v1 }
 0x16a   : > { %v1820_v6 = vld [vmem:[#allocation2 + $0x87] sm:$0xff]  ;;  %11480 = vmatmul.msk.bf16.gmra.mxu1 %vm988_vm4, %v11454_v11  ;;  %v13735_v11 = vld [vmem:[%s17761_s1 + $0xb0] sm:$0xff] }
 0x16b   : > { %v14797_v5 = vpop.f32.mrf.mxu3  ;;  %1349 = vst [vmem:[#allocation2 + $0x90] sm:$0xff] %v1332_v4  ;;  %v1966_v9 = vpack.c.bf16 %v1332_v4, %v1332_v4  ;;  %v1856_v22 = vpack.c.bf16 %v1820_v6, %v1820_v6 }
 0x16c   : > { %v1270_v10 = vpop.f32.mrf.mxu2 }
 0x16d   : > { %v1298_v13 = vadd.f32 %v1270_v10, %v1118_v7  ;;  %2047 = vrot.lane.b32.xlu0 %v1966_v9, %s14217_s23  ;;  %1893 = vst.msk [vmem:[#allocation3 + $0x40] sm:$0xf] %vm1884_vm3, %v1856_v22  ;;  %v1047_v15 = vpop.f32.mrf.mxu0  ;;  %v13710_v3 = vld [vmem:[#allocation3 + $0x34] sm:$0xf] }
 0x16e   : > { %v1123_v43 = vadd.f32 %v1122_v12, %v1047_v15  ;;  %v11504_v4 = vld [vmem:[#allocation3 + $0x38] sm:$0xf0] }
 0x16f   : > { %v1317_v14 = vadd.f32 %v14697_v49, %v1298_v13  ;;  %v1124_v31 = vpop.f32.mrf.mxu1  ;;  %v14842_v22 = vor.u32 %v13710_v3, %v11504_v4  ;;  %v318_v4 = vld [vmem:[%s14257_s20 + $0x227] sm:$0xff] }
 0x170   : > { %11428 = vmatmul.msk.bf16.gmra.mxu0 %vm988_vm4, %v14680_v40  ;;  %v13736_v40 = vld [vmem:[%s17761_s1 + $0xb8] sm:$0xff] }
 0x171   : > { %v1333_v16 = vmax.f32 %v1317_v14, 0.0  ;;  %2524 = vmatpush.bf16.msrb.mxu2 %v13736_v40 }
 0x172   : > { %v1821_v19 = vld [vmem:[#allocation2 + $0x8f] sm:$0xff] }
 0x173   : > { %v14803_v18 = vpop.f32.mrf.mxu3  ;;  %v2182_v20 = vld [vmem:[#allocation2 + $0x89] sm:$0xff]  ;;  %v2183_v21 = vld [vmem:[#allocation2 + $0x91] sm:$0xff]  ;;  %1350 = vst [vmem:[#allocation2 + $0xa8] sm:$0xff] %v1333_v16  ;;  %v1967_v24 = vpack.c.bf16 %v1333_v16, %v1333_v16  ;;  %v1857_v28 = vpack.c.bf16 %v1821_v19, %v1821_v19 }
 0x174   : > { %v2218_v26 = vpack.c.bf16 %v2182_v20, %v2182_v20  ;;  %v2219_v27 = vpack.c.bf16 %v2183_v21, %v2183_v21  ;;  %v1272_v0 = vpop.f32.mrf.mxu2 }
 0x175   : > { %v1299_v32 = vadd.f32 %v1272_v0, %v1120_v23  ;;  %2049 = vrot.lane.b32.xlu1 %v1967_v24, %s14217_s23  ;;  %v1049_v34 = vpop.f32.mrf.mxu0  ;;  %1894 = vst.msk [vmem:[#allocation3 + $0x48] sm:$0xf] %vm1884_vm3, %v1857_v28  ;;  %2525 = vmatpush.bf16.msrb.mxu2 %v13735_v11 }
 0x176   : > { %2254 = vst.msk [vmem:[#allocation3 + $0x44] sm:$0xf] %vm1884_vm3, %v2218_v26  ;;  %v1125_v57 = vadd.f32 %v1124_v31, %v1049_v34 }
 0x177   : > { %2255 = vst.msk [vmem:[#allocation3 + $0x4c] sm:$0xf] %vm1884_vm3, %v2219_v27  ;;  %v1318_v33 = vadd.f32 %v14697_v49, %v1299_v32  ;;  %v1127_v48 = vpop.f32.mrf.mxu1 }
 0x179   : > { %v1334_v38 = vmax.f32 %v1318_v33, 0.0  ;;  %11597 = vmatmul.msk.bf16.gmra.mxu3 %vm2494_vm5, %v14817_v35 }
 0x17a   : > { %v1822_v41 = vld [vmem:[#allocation2 + $0xa7] sm:$0xff]  ;;  %11481 = vmatmul.msk.bf16.gmra.mxu1 %vm988_vm4, %v11458_v42 }
 0x17b   : > { %v14822_v39 = vpop.f32.mrf.mxu3  ;;  %1351 = vst [vmem:[#allocation2 + $0xb0] sm:$0xff] %v1334_v38  ;;  %v1968_v44 = vpack.c.bf16 %v1334_v38, %v1334_v38  ;;  %v1858_v45 = vpack.c.bf16 %v1822_v41, %v1822_v41 }
 0x17c   : > { %v1275_v46 = vpop.f32.mrf.mxu2 }
 0x17d   : > { %v1300_v50 = vadd.f32 %v1275_v46, %v1123_v43  ;;  %2051 = vrot.lane.b32.xlu2 %v1968_v44, %s14217_s23  ;;  %1895 = vst.msk [vmem:[#allocation3 + $0x50] sm:$0xf] %vm1884_vm3, %v1858_v45  ;;  %v1052_v52 = vpop.f32.mrf.mxu0  ;;  %v13712_v36 = vld [vmem:[#allocation3 + $0x44] sm:$0xf]  ;;  %v13724_v45 = vld [vmem:[%s17761_s1 + $0x68] sm:$0xff] }
 0x17e   : > { %v1128_v13 = vadd.f32 %v1127_v48, %v1052_v52  ;;  %v11512_v37 = vld [vmem:[#allocation3 + $0x48] sm:$0xf0]  ;;  %2704 = vmatpush.bf16.msra.mxu0 %v13724_v45 }
 0x17f   : > { %v1319_v51 = vadd.f32 %v14697_v49, %v1300_v50  ;;  %v1129_v6 = vpop.f32.mrf.mxu1  ;;  %v14864_v44 = vor.u32 %v13712_v36, %v11512_v37  ;;  %v13734_v46 = vld [vmem:[%s17761_s1 + $0xa8] sm:$0xff] }
 0x180   : > { %11429 = vmatmul.msk.bf16.gmra.mxu0 %vm988_vm4, %v14707_v8  ;;  %2526 = vmatpush.bf16.msrb.mxu2 %v13734_v46 }
 0x181   : > { %v1335_v53 = vmax.f32 %v1319_v51, 0.0 }
 0x182   : > { %v1823_v54 = vld [vmem:[#allocation2 + $0xaf] sm:$0xff] }
 0x183   : > { %v2184_v55 = vld [vmem:[#allocation2 + $0xa9] sm:$0xff]  ;;  %v2185_v56 = vld [vmem:[#allocation2 + $0xb1] sm:$0xff]  ;;  %v14828_v58 = vpop.f32.mrf.mxu3  ;;  %1352 = vst [vmem:[#allocation2 + $0xc8] sm:$0xff] %v1335_v53  ;;  %v1969_v59 = vpack.c.bf16 %v1335_v53, %v1335_v53  ;;  %v1859_v63 = vpack.c.bf16 %v1823_v54, %v1823_v54 }
 0x184   : > { %v2220_v17 = vpack.c.bf16 %v2184_v55, %v2184_v55  ;;  %v2221_v62 = vpack.c.bf16 %v2185_v56, %v2185_v56  ;;  %v1277_v2 = vpop.f32.mrf.mxu2 }
 0x185   : > { %v1301_v7 = vadd.f32 %v1277_v2, %v1125_v57  ;;  %2053 = vrot.lane.b32.xlu0 %v1969_v59, %s14217_s23  ;;  %v1054_v9 = vpop.f32.mrf.mxu0  ;;  %1896 = vst.msk [vmem:[#allocation3 + $0x58] sm:$0xf] %vm1884_vm3, %v1859_v63 }
 0x186   : > { %2256 = vst.msk [vmem:[#allocation3 + $0x54] sm:$0xf] %vm1884_vm3, %v2220_v17  ;;  %v1130_v29 = vadd.f32 %v1129_v6, %v1054_v9  ;;  %v319_v6 = vld [vmem:[%s14257_s20 + $0x22f] sm:$0xff] }
 0x187   : > { %2257 = vst.msk [vmem:[#allocation3 + $0x5c] sm:$0xf] %vm1884_vm3, %v2221_v62  ;;  %v1320_v8 = vadd.f32 %v14697_v49, %v1301_v7  ;;  %v1132_v20 = vpop.f32.mrf.mxu1 }
 0x189   : > { %v1336_v10 = vmax.f32 %v1320_v8, 0.0  ;;  %11598 = vmatmul.msk.bf16.gmra.mxu3 %vm2494_vm5, %v14842_v22 }
 0x18a   : > { %v1824_v12 = vld [vmem:[#allocation2 + $0xc7] sm:$0xff] }
 0x18b   : > { %1353 = vst [vmem:[#allocation2 + $0xd0] sm:$0xff] %v1336_v10  ;;  %v1970_v14 = vpack.c.bf16 %v1336_v10, %v1336_v10  ;;  %v1860_v15 = vpack.c.bf16 %v1824_v12, %v1824_v12 }
 0x18c   : > { %v1280_v16 = vpop.f32.mrf.mxu2  ;;  %v14850_v19 = vpop.f32.mrf.mxu3 }
 0x18d   : > { %v1302_v21 = vadd.f32 %v1280_v16, %v1128_v13  ;;  %2055 = vrot.lane.b32.xlu1 %v1970_v14, %s14217_s23  ;;  %1897 = vst.msk [vmem:[#allocation3 + $0x60] sm:$0xf] %vm1884_vm3, %v1860_v15  ;;  %v1057_v24 = vpop.f32.mrf.mxu0  ;;  %v13714_v11 = vld [vmem:[#allocation3 + $0x54] sm:$0xf]  ;;  %v354_v13 = vpack.c.bf16 %v318_v4, %v318_v4  ;;  %v355_v14 = vpack.c.bf16 %v319_v6, %v319_v6  ;;  %v2174_v6 = vld [vmem:[#allocation2 + $0x9] sm:$0xff] }
 0x18e   : > { %v1133_v50 = vadd.f32 %v1132_v20, %v1057_v24  ;;  %v11520_v12 = vld [vmem:[#allocation3 + $0x58] sm:$0xf0] }
 0x18f   : > { %v1321_v23 = vadd.f32 %v14697_v49, %v1302_v21  ;;  %v2034_v25 = vpop.permute.xlu2 %2033  ;;  %v1134_v38 = vpop.f32.mrf.mxu1  ;;  %391 = vst.msk [vmem:[#allocation3 + $0x110] sm:$0xf] %vm356_vm0, %v354_v13 }
 0x190   : > { %2140 = vst.msk [vmem:[#allocation3 + $0x10] sm:$0xf] %vm2137_vm6, %v2034_v25  ;;  %11430 = vmatmul.msk.bf16.gmra.mxu0 %vm988_vm4, %v14731_v47  ;;  %v14890_v25 = vor.u32 %v13714_v11, %v11520_v12  ;;  %v2175_v12 = vld [vmem:[#allocation2 + $0x11] sm:$0xff] }
 0x191   : > { %v1337_v26 = vmax.f32 %v1321_v23, 0.0  ;;  %392 = vst.msk [vmem:[#allocation3 + $0x118] sm:$0xf] %vm356_vm0, %v355_v14 }
 0x192   : > { %v1825_v27 = vld [vmem:[#allocation2 + $0xcf] sm:$0xff] }
 0x193   : > { %v2186_v28 = vld [vmem:[#allocation2 + $0xc9] sm:$0xff]  ;;  %v2187_v0 = vld [vmem:[#allocation2 + $0xd1] sm:$0xff]  ;;  %1354 = vst [vmem:[#allocation2 + $0xe8] sm:$0xff] %v1337_v26  ;;  %v1971_v30 = vpack.c.bf16 %v1337_v26, %v1337_v26  ;;  %v1861_v40 = vpack.c.bf16 %v1825_v27, %v1825_v27  ;;  %v13723_v27 = vld [vmem:[%s17761_s1 + $0x60] sm:$0xff] }
 0x194   : > { %v2222_v31 = vpack.c.bf16 %v2186_v28, %v2186_v28  ;;  %v2223_v32 = vpack.c.bf16 %v2187_v0, %v2187_v0  ;;  %v1282_v33 = vpop.f32.mrf.mxu2  ;;  %v14858_v34 = vpop.f32.mrf.mxu3  ;;  %v13729_v28 = vld [vmem:[%s17761_s1 + $0x90] sm:$0xff]  ;;  %2705 = vmatpush.bf16.msra.mxu0 %v13723_v27  ;;  %v2211_v27 = vpack.c.bf16 %v2175_v12, %v2175_v12 }
 0x195   : > { %v1303_v41 = vadd.f32 %v1282_v33, %v1130_v29  ;;  %2057 = vrot.lane.b32.xlu2 %v1971_v30, %s14217_s23  ;;  %v1059_v43 = vpop.f32.mrf.mxu0  ;;  %1898 = vst.msk [vmem:[#allocation3 + $0x68] sm:$0xf] %vm1884_vm3, %v1861_v40  ;;  %v13769_v30 = vld [vmem:[%s17761_s1 + $0x140] sm:$0xff]  ;;  %2756 = vmatpush.bf16.msra.mxu1 %v13729_v28 }
 0x196   : > { %2258 = vst.msk [vmem:[#allocation3 + $0x64] sm:$0xf] %vm1884_vm3, %v2222_v31  ;;  %v1135_v2 = vadd.f32 %v1134_v38, %v1059_v43  ;;  %v13773_v31 = vld [vmem:[%s17761_s1 + $0x160] sm:$0xff]  ;;  %3007 = vmatpush.bf16.msra.mxu2 %v13769_v30  ;;  %v13720_v30 = vld [vmem:[%s17761_s1 + $0x48] sm:$0xff] }
 0x197   : > { %2259 = vst.msk [vmem:[#allocation3 + $0x6c] sm:$0xf] %vm1884_vm3, %v2223_v32  ;;  %v1322_v47 = vadd.f32 %v14697_v49, %v1303_v41  ;;  %v1707_v55 = vpop.f32.mrf.mxu1  ;;  %3060 = vmatpush.bf16.msra.mxu3 %v13773_v31 }
 0x198   : > { %2247 = vst.msk [vmem:[#allocation3 + $0xc] sm:$0xf] %vm1884_vm3, %v2211_v27 }
 0x199   : > { %v1338_v42 = vmax.f32 %v1322_v47, 0.0  ;;  %11599 = vmatmul.msk.bf16.gmra.mxu3 %vm2494_vm5, %v14864_v44 }
 0x19a   : > { %v1826_v48 = vld [vmem:[#allocation2 + $0xe7] sm:$0xff] }
 0x19b   : > { %1355 = vst [vmem:[#allocation2 + $0xf0] sm:$0xff] %v1338_v42  ;;  %v1972_v51 = vpack.c.bf16 %v1338_v42, %v1338_v42  ;;  %v1862_v52 = vpack.c.bf16 %v1826_v48, %v1826_v48 }
 0x19c   : > { %v1285_v53 = vpop.f32.mrf.mxu2  ;;  %v14875_v54 = vpop.f32.mrf.mxu3 }
 0x19d   : > { %v1304_v56 = vadd.f32 %v1285_v53, %v1133_v50  ;;  %2059 = vrot.lane.b32.xlu0 %v1972_v51, %s14217_s23  ;;  %1899 = vst.msk [vmem:[#allocation3 + $0x70] sm:$0xf] %vm1884_vm3, %v1862_v52  ;;  %v1554_v59 = vpop.f32.mrf.mxu0 }
 0x19e   : > { %v1555_v60 = vadd.f32 %v1554_v59, %v14797_v5 }
 0x19f   : > { %v1323_v57 = vadd.f32 %v14697_v49, %v1304_v56  ;;  %v1709_v15 = vpop.f32.mrf.mxu1 }
 0x1a0   : > { %v1747_v62 = vadd.f32 %v1707_v55, %v1555_v60 }
 0x1a1   : > { %v1339_v61 = vmax.f32 %v1323_v57, 0.0 }
 0x1a2   : > { %v2188_v17 = vld [vmem:[#allocation2 + $0xe9] sm:$0xff]  ;;  %v2189_v63 = vld [vmem:[#allocation2 + $0xf1] sm:$0xff]  ;;  %v1763_v8 = vadd.f32 %v14697_v49, %v1747_v62 }
 0x1a3   : > { %1356 = vst [vmem:[#allocation2 + $0x108] sm:$0xff] %v1339_v61  ;;  %v1973_v3 = vpack.c.bf16 %v1339_v61, %v1339_v61  ;;  %v2224_v7 = vpack.c.bf16 %v2188_v17, %v2188_v17  ;;  %v1827_v5 = vld [vmem:[#allocation2 + $0xef] sm:$0xff]  ;;  %v2225_v21 = vpack.c.bf16 %v2189_v63, %v2189_v63 }
 0x1a4   : > { %v1287_v9 = vpop.f32.mrf.mxu2  ;;  %v14884_v10 = vpop.f32.mrf.mxu3  ;;  %v1779_v20 = vmax.f32 %v1763_v8, 0.0  ;;  %v1863_v32 = vpack.c.bf16 %v1827_v5, %v1827_v5  ;;  %v11528_v63 = vld [vmem:[#allocation3 + $0x68] sm:$0xf0] }
 0x1a5   : > { %v1305_v16 = vadd.f32 %v1287_v9, %v1135_v2  ;;  %2061 = vrot.lane.b32.xlu1 %v1973_v3, %s14217_s23  ;;  %2260 = vst.msk [vmem:[#allocation3 + $0x74] sm:$0xf] %vm1884_vm3, %v2224_v7  ;;  %v1556_v24 = vpop.f32.mrf.mxu0  ;;  %v13722_v2 = vld [vmem:[%s17761_s1 + $0x58] sm:$0xff]  ;;  %v11486_v7 = vld [vmem:[#allocation3 + $0x10] sm:$0xf] }
 0x1a6   : > { %1796 = vst [vmem:[#allocation2 + $0x128] sm:$0xff] %v1779_v20  ;;  %v1557_v0 = vadd.f32 %v1556_v24, %v14803_v18  ;;  %v1975_v29 = vpack.c.bf16 %v1779_v20, %v1779_v20  ;;  %2706 = vmatpush.bf16.msra.mxu0 %v13722_v2  ;;  %v13721_v24 = vld [vmem:[%s17761_s1 + $0x50] sm:$0xff] }
 0x1a7   : > { %v1324_v23 = vadd.f32 %v14697_v49, %v1305_v16  ;;  %v2040_v26 = vpop.permute.xlu2 %2039  ;;  %2261 = vst.msk [vmem:[#allocation3 + $0x7c] sm:$0xf] %vm1884_vm3, %v2225_v21  ;;  %v1712_v47 = vpop.f32.mrf.mxu1  ;;  %v13768_v21 = vld [vmem:[%s17761_s1 + $0x138] sm:$0xff] }
 0x1a8   : > { %2143 = vst.msk [vmem:[#allocation3 + $0x28] sm:$0xf] %vm2137_vm6, %v2040_v26  ;;  %v1748_v36 = vadd.f32 %v1709_v15, %v1557_v0  ;;  %2065 = vrot.lane.b32.xlu0 %v1975_v29, %s14217_s23  ;;  %3008 = vmatpush.bf16.msra.mxu2 %v13768_v21 }
 0x1a9   : > { %v1340_v40 = vmax.f32 %v1324_v23, 0.0  ;;  %11600 = vmatmul.msk.bf16.gmra.mxu3 %vm2494_vm5, %v14890_v25  ;;  %1900 = vst.msk [vmem:[#allocation3 + $0x78] sm:$0xf] %vm1884_vm3, %v1863_v32  ;;  %v13728_v32 = vld [vmem:[%s17761_s1 + $0x88] sm:$0xff] }
 0x1aa   : > { %v1828_v33 = vld [vmem:[#allocation2 + $0x107] sm:$0xff]  ;;  %v1764_v38 = vadd.f32 %v14697_v49, %v1748_v36  ;;  %2707 = vmatpush.bf16.msra.mxu0 %v13721_v24  ;;  %2757 = vmatpush.bf16.msra.mxu1 %v13728_v32 }
 0x1ab   : > { %1357 = vst [vmem:[#allocation2 + $0x110] sm:$0xff] %v1340_v40  ;;  %v1974_v18 = vpack.c.bf16 %v1340_v40, %v1340_v40  ;;  %v1864_v37 = vpack.c.bf16 %v1828_v33, %v1828_v33  ;;  %v4056_v24 = vld [vmem:[#allocation2 + $0x7] sm:$0xff] }
 0x1ac   : > { %v14912_v41 = vpop.f32.mrf.mxu3  ;;  %v1780_v43 = vmax.f32 %v1764_v38, 0.0 }
 0x1ad   : > { %2063 = vrot.lane.b32.xlu2 %v1974_v18, %s14217_s23  ;;  %1901 = vst.msk [vmem:[#allocation3 + $0x80] sm:$0xf] %vm1884_vm3, %v1864_v37  ;;  %v1559_v45 = vpop.f32.mrf.mxu0  ;;  %v1830_v42 = vld [vmem:[#allocation2 + $0x127] sm:$0xff] }
 0x1ae   : > { %1797 = vst [vmem:[#allocation2 + $0x130] sm:$0xff] %v1780_v43  ;;  %v1560_v48 = vadd.f32 %v1559_v45, %v14822_v39  ;;  %v1976_v51 = vpack.c.bf16 %v1780_v43, %v1780_v43  ;;  %v1866_v52 = vpack.c.bf16 %v1830_v42, %v1830_v42  ;;  %v13716_v39 = vld [vmem:[#allocation3 + $0x64] sm:$0xf]  ;;  %2708 = vmatpush.bf16.msra.mxu0 %v13720_v30 }
 0x1af   : > { %v2036_v46 = vpop.permute.xlu0 %2035  ;;  %v823_v50 = vpop.permute.xlu2 %822  ;;  %v14929_v9 = vor.u32 %v13716_v39, %v11528_v63 }
 0x1b0   : > { %2141 = vst.msk [vmem:[#allocation3 + $0x18] sm:$0xf] %vm2137_vm6, %v2036_v46  ;;  %v1749_v57 = vadd.f32 %v1712_v47, %v1560_v48  ;;  %2067 = vrot.lane.b32.xlu1 %v1976_v51, %s14217_s23  ;;  %v1714_v3 = vpop.f32.mrf.mxu1  ;;  %v13718_v48 = vld [vmem:[#allocation3 + $0x74] sm:$0xf]  ;;  %v13772_v51 = vld [vmem:[%s17761_s1 + $0x158] sm:$0xff] }
 0x1b1   : > { %1903 = vst.msk [vmem:[#allocation3 + $0x90] sm:$0xf] %vm1884_vm3, %v1866_v52  ;;  %3061 = vmatpush.bf16.msra.mxu3 %v13772_v51 }
 0x1b2   : > { %v1829_v53 = vld [vmem:[#allocation2 + $0x10f] sm:$0xff]  ;;  %v1765_v17 = vadd.f32 %v14697_v49, %v1749_v57 }
 0x1b3   : > { %v2190_v55 = vld [vmem:[#allocation2 + $0x109] sm:$0xff]  ;;  %v2191_v56 = vld [vmem:[#allocation2 + $0x111] sm:$0xff]  ;;  %v1865_v61 = vpack.c.bf16 %v1829_v53, %v1829_v53 }
 0x1b4   : > { %v2226_v59 = vpack.c.bf16 %v2190_v55, %v2190_v55  ;;  %v2227_v60 = vpack.c.bf16 %v2191_v56, %v2191_v56  ;;  %v14922_v62 = vpop.f32.mrf.mxu3  ;;  %v1781_v4 = vmax.f32 %v1765_v17, 0.0  ;;  %v1847_v55 = vld [vmem:[#allocation2 + $0x22f] sm:$0xff] }
 0x1b5   : > { %v1561_v8 = vpop.f32.mrf.mxu0  ;;  %1902 = vst.msk [vmem:[#allocation3 + $0x88] sm:$0xf] %vm1884_vm3, %v1865_v61  ;;  %v1831_v13 = vld [vmem:[#allocation2 + $0x12f] sm:$0xff]  ;;  %v1883_v63 = vpack.c.bf16 %v1847_v55, %v1847_v55 }
 0x1b6   : > { %2262 = vst.msk [vmem:[#allocation3 + $0x84] sm:$0xf] %vm1884_vm3, %v2226_v59  ;;  %v1562_v14 = vadd.f32 %v1561_v8, %v14828_v58  ;;  %v1977_v20 = vpack.c.bf16 %v1781_v4, %v1781_v4  ;;  %v2210_v58 = vpack.c.bf16 %v2174_v6, %v2174_v6  ;;  %v1867_v28 = vpack.c.bf16 %v1831_v13, %v1831_v13  ;;  %v2192_v37 = vld [vmem:[#allocation2 + $0x129] sm:$0xff] }
 0x1b7   : > { %2263 = vst.msk [vmem:[#allocation3 + $0x8c] sm:$0xf] %vm1884_vm3, %v2227_v60  ;;  %v2038_v11 = vpop.permute.xlu1 %2037  ;;  %v13707_v5 = vld [vmem:[#allocation3 + $0x14] sm:$0xf0]  ;;  %v2044_v15 = vpop.permute.xlu2 %2043  ;;  %v14975_v59 = vld [vmem:[#allocation3 + $0x8] sm:$0xf0] }
 0x1b8   : > { %1798 = vst [vmem:[#allocation2 + $0x148] sm:$0xff] %v1781_v4  ;;  %v570_v16 = vpop.permute.xlu0 %569  ;;  %v14939_v23 = vor.u32 %v13707_v5, %v11486_v7  ;;  %v1750_v26 = vadd.f32 %v1714_v3, %v1562_v14  ;;  %2069 = vrot.lane.b32.xlu2 %v1977_v20, %s14217_s23  ;;  %v1717_v31 = vpop.f32.mrf.mxu1  ;;  %v2193_v60 = vld [vmem:[#allocation2 + $0x131] sm:$0xff]  ;;  %v13709_v4 = vld [vmem:[#allocation3 + $0x24] sm:$0xf0] }
 0x1b9   : > { %11601 = vmatmul.msk.bf16.gmra.mxu3 %vm2494_vm5, %v14929_v9  ;;  %2142 = vst.msk [vmem:[#allocation3 + $0x20] sm:$0xf] %vm2137_vm6, %v2038_v11  ;;  %v13767_v13 = vld [vmem:[%s17761_s1 + $0x130] sm:$0xff] }
 0x1ba   : > { %2145 = vst.msk [vmem:[#allocation3 + $0x38] sm:$0xf] %vm2137_vm6, %v2044_v15  ;;  %2527 = vmatmul.bf16.vlgmr.msrb.gmra.mxu2 %v14939_v23  ;;  %v1766_v0 = vadd.f32 %v14697_v49, %v1750_v26  ;;  %v13771_v15 = vld [vmem:[%s17761_s1 + $0x150] sm:$0xff] }
 0x1bb   : > { %644 = vst.msk [vmem:[#allocation3 + $0x110] sm:$0xf] %vm609_vm1, %v570_v16  ;;  %v2229_v16 = vpack.c.bf16 %v2193_v60, %v2193_v60  ;;  %3009 = vmatpush.bf16.msra.mxu2 %v13767_v13  ;;  %3062 = vmatpush.bf16.msra.mxu3 %v13771_v15 }
 0x1bc   : > { %v14949_v29 = vpop.f32.mrf.mxu3  ;;  %897 = vst.msk [vmem:[#allocation3 + $0x110] sm:$0xf] %vm862_vm2, %v823_v50  ;;  %v1782_v40 = vmax.f32 %v1766_v0, 0.0  ;;  %v11536_v50 = vld [vmem:[#allocation3 + $0x78] sm:$0xf0] }
 0x1bd   : > { %2246 = vst.msk [vmem:[#allocation3 + $0x4] sm:$0xf] %vm1884_vm3, %v2210_v58  ;;  %v1564_v33 = vpop.f32.mrf.mxu0  ;;  %v14979_v2 = vor.u32 %v13718_v48, %v11536_v50 }
 0x1be   : > { %1904 = vst.msk [vmem:[#allocation3 + $0x98] sm:$0xf] %vm1884_vm3, %v1867_v28  ;;  %v1565_v38 = vadd.f32 %v1564_v33, %v14850_v19  ;;  %v1978_v43 = vpack.c.bf16 %v1782_v40, %v1782_v40  ;;  %v2228_v19 = vpack.c.bf16 %v2192_v37, %v2192_v37  ;;  %v11544_v51 = vld [vmem:[#allocation3 + $0x88] sm:$0xf0] }
 0x1bf   : > { %v572_v36 = vpop.permute.xlu1 %571  ;;  %v1832_v18 = vld [vmem:[#allocation2 + $0x147] sm:$0xff]  ;;  %1799 = vst [vmem:[#allocation2 + $0x150] sm:$0xff] %v1782_v40  ;;  %v2046_v47 = vpop.permute.xlu2 %2045  ;;  %v4092_v40 = vpack.c.bf16 %v4056_v24, %v4056_v24 }
 0x1c0   : > { %v825_v45 = vpop.permute.xlu0 %824  ;;  %v1868_v46 = vpack.c.bf16 %v1832_v18, %v1832_v18  ;;  %645 = vst.msk [vmem:[#allocation3 + $0x118] sm:$0xf] %vm609_vm1, %v572_v36  ;;  %v1751_v42 = vadd.f32 %v1717_v31, %v1565_v38  ;;  %2071 = vrot.lane.b32.xlu0 %v1978_v43, %s14217_s23  ;;  %v1719_v57 = vpop.f32.mrf.mxu1  ;;  %v11494_v17 = vld [vmem:[#allocation3 + $0x20] sm:$0xf] }
 0x1c1   : > { %2146 = vst.msk [vmem:[#allocation3 + $0x40] sm:$0xf] %vm2137_vm6, %v2046_v47  ;;  %v14989_v5 = vor.u32 %v13709_v4, %v11494_v17 }
 0x1c2   : > { %898 = vst.msk [vmem:[#allocation3 + $0x118] sm:$0xf] %vm862_vm2, %v825_v45  ;;  %v1767_v52 = vadd.f32 %v14697_v49, %v1751_v42  ;;  %v4057_v42 = vld [vmem:[#allocation2 + $0xf] sm:$0xff] }
 0x1c3   : > { %1905 = vst.msk [vmem:[#allocation3 + $0xa0] sm:$0xf] %vm1884_vm3, %v1868_v46  ;;  %v11461_v7 = vld [vmem:[#allocation3 + $0x110] sm:$0xf] }
 0x1c4   : > { %v14970_v53 = vpop.f32.mrf.mxu3  ;;  %v14972_v56 = vld [vmem:[#allocation3 + $0x4] sm:$0xf]  ;;  %v1783_v61 = vmax.f32 %v1767_v52, 0.0  ;;  %9352 = vst.msk [vmem:[#allocation3 + $0xc] sm:$0xf] %vm1884_vm3, %v2211_v27  ;;  %v4093_v52 = vpack.c.bf16 %v4057_v42, %v4057_v42 }
 0x1c5   : > { %9351 = vst.msk [vmem:[#allocation3 + $0x4] sm:$0xf] %vm1884_vm3, %v2210_v58  ;;  %v1566_v49 = vpop.f32.mrf.mxu0  ;;  %v13770_v58 = vld [vmem:[%s17761_s1 + $0x148] sm:$0xff]  ;;  %v15004_v27 = vld [vmem:[%s17762_s2] ss:$0 sm:$0xff] }
 0x1c6   : > { %v1833_v39 = vld [vmem:[#allocation2 + $0x14f] sm:$0xff]  ;;  %2264 = vst.msk [vmem:[#allocation3 + $0x94] sm:$0xf] %vm1884_vm3, %v2228_v19  ;;  %v1567_v8 = vadd.f32 %v1566_v49, %v14858_v34  ;;  %v1979_v11 = vpack.c.bf16 %v1783_v61, %v1783_v61  ;;  %3063 = vmatpush.bf16.msra.mxu3 %v13770_v58 }
 0x1c7   : > { %v2042_v3 = vpop.permute.xlu1 %2041  ;;  %v2194_v6 = vld [vmem:[#allocation2 + $0x149] sm:$0xff]  ;;  %1800 = vst [vmem:[#allocation2 + $0x168] sm:$0xff] %v1783_v61  ;;  %v1869_v14 = vpack.c.bf16 %v1833_v39, %v1833_v39  ;;  %v2195_v30 = vld [vmem:[#allocation2 + $0x151] sm:$0xff] }
 0x1c8   : > { %v2030_v12 = vpop.permute.xlu0 %2029  ;;  %2144 = vst.msk [vmem:[#allocation3 + $0x30] sm:$0xf] %vm2137_vm6, %v2042_v3  ;;  %v1752_v34 = vadd.f32 %v1719_v57, %v1567_v8  ;;  %2073 = vrot.lane.b32.xlu1 %v1979_v11, %s14217_s23  ;;  %v2230_v26 = vpack.c.bf16 %v2194_v6, %v2194_v6  ;;  %v1722_v31 = vpop.f32.mrf.mxu1  ;;  %v2231_v43 = vpack.c.bf16 %v2195_v30, %v2195_v30  ;;  %v13766_v11 = vld [vmem:[%s17761_s1 + $0x128] sm:$0xff] }
 0x1c9   : > { %11602 = vmatmul.msk.bf16.gmra.mxu3 %vm2494_vm5, %v14979_v2  ;;  %v13700_v20 = vld [vmem:[#allocation3 + $0x114] sm:$0xf0]  ;;  %2138 = vst.msk [vmem:[#allocation3] sm:$0xf] %vm2137_vm6, %v2030_v12  ;;  %v11611_v3 = vor.u32 %v14972_v56, %v14975_v59  ;;  %v13815_v56 = vld [vmem:[%s17761_s1 + $0x100] sm:$0xff]  ;;  %3010 = vmatpush.bf16.msra.mxu2 %v13766_v11 }
 0x1ca   : > { %1920 = vst.msk [vmem:[#allocation3 + $0x118] sm:$0xf] %vm1884_vm3, %v1883_v63  ;;  %2532 = vmatmul.bf16.gmra.mxu2 %v14989_v5  ;;  %v11462_v21 = vor.u32 %v13700_v20, %v11461_v7  ;;  %v1768_v28 = vadd.f32 %v15004_v27, %v1752_v34  ;;  %v13711_v7 = vld [vmem:[#allocation3 + $0x34] sm:$0xf0]  ;;  %3459 = vmatpush.bf16.msrb.mxu1 %v13815_v56 }
 0x1cb   : > { %1906 = vst.msk [vmem:[#allocation3 + $0xa8] sm:$0xf] %vm1884_vm3, %v1869_v14 }
 0x1cc   : > { %v15007_v0 = vpop.f32.mrf.mxu3  ;;  %11482 = vmatmul.msk.bf16.gmra.mxu1 %vm988_vm4, %v11462_v21  ;;  %2265 = vst.msk [vmem:[#allocation3 + $0x9c] sm:$0xf] %vm1884_vm3, %v2229_v16  ;;  %v1784_v32 = vmax.f32 %v1768_v28, 0.0 }
 0x1cd   : > { %v1569_v33 = vpop.f32.mrf.mxu0  ;;  %2266 = vst.msk [vmem:[#allocation3 + $0xa4] sm:$0xf] %vm1884_vm3, %v2230_v26 }
 0x1ce   : > { %v1834_v18 = vld [vmem:[#allocation2 + $0x167] sm:$0xff]  ;;  %1801 = vst [vmem:[#allocation2 + $0x170] sm:$0xff] %v1784_v32  ;;  %v1570_v37 = vadd.f32 %v1569_v33, %v14875_v54  ;;  %v1980_v38 = vpack.c.bf16 %v1784_v32, %v1784_v32 }
 0x1cf   : > { %v2032_v36 = vpop.permute.xlu1 %2031  ;;  %v1870_v47 = vpack.c.bf16 %v1834_v18, %v1834_v18  ;;  %v13732_v54 = vld [vmem:[#allocation3 + $0x84] sm:$0xf]  ;;  %2267 = vst.msk [vmem:[#allocation3 + $0xac] sm:$0xf] %vm1884_vm3, %v2231_v43  ;;  %v11502_v57 = vld [vmem:[#allocation3 + $0x30] sm:$0xf] }
 0x1d0   : > { %2139 = vst.msk [vmem:[#allocation3 + $0x8] sm:$0xf] %vm2137_vm6, %v2032_v36  ;;  %v11606_v45 = vld [vmem:[#allocation3] sm:$0xf]  ;;  %v1753_v46 = vadd.f32 %v1722_v31, %v1570_v37  ;;  %2075 = vrot.lane.b32.xlu2 %v1980_v38, %s14217_s23  ;;  %v1724_v19 = vpop.f32.mrf.mxu1  ;;  %v11547_v49 = vor.u32 %v13732_v54, %v11544_v51  ;;  %v15030_v14 = vor.u32 %v13711_v7, %v11502_v57  ;;  %v13746_v36 = vld [vmem:[#allocation3 + $0x24] sm:$0xf] }
 0x1d1   : > { %4129 = vst.msk [vmem:[#allocation3] sm:$0xf] %vm4128_vm7, %v4092_v40  ;;  %v11672_v18 = vld [vmem:[#allocation3 + $0x28] sm:$0xf0]  ;;  %v11510_v51 = vld [vmem:[#allocation3 + $0x40] sm:$0xf] }
 0x1d2   : > { %1907 = vst.msk [vmem:[#allocation3 + $0xb0] sm:$0xf] %vm1884_vm3, %v1870_v47  ;;  %v1769_v48 = vadd.f32 %v15004_v27, %v1753_v46 }
 0x1d4   : > { %v15019_v50 = vpop.f32.mrf.mxu3  ;;  %v1785_v55 = vmax.f32 %v1769_v48, 0.0 }
 0x1d5   : > { %v1835_v60 = vld [vmem:[#allocation2 + $0x16f] sm:$0xff]  ;;  %v1571_v39 = vpop.f32.mrf.mxu0 }
 0x1d6   : > { %v2196_v61 = vld [vmem:[#allocation2 + $0x169] sm:$0xff]  ;;  %v2197_v17 = vld [vmem:[#allocation2 + $0x171] sm:$0xff]  ;;  %1802 = vst [vmem:[#allocation2 + $0x188] sm:$0xff] %v1785_v55  ;;  %v1572_v4 = vadd.f32 %v1571_v39, %v14884_v10  ;;  %v1981_v8 = vpack.c.bf16 %v1785_v55, %v1785_v55  ;;  %v1871_v12 = vpack.c.bf16 %v1835_v60, %v1835_v60  ;;  %v13811_v10 = vld [vmem:[%s17761_s1 + $0xe0] sm:$0xff] }
 0x1d7   : > { %v2052_v63 = vpop.permute.xlu2 %2051  ;;  %v13705_v6 = vld [vmem:[#allocation3 + $0x4] sm:$0xf0]  ;;  %v2232_v13 = vpack.c.bf16 %v2196_v61, %v2196_v61  ;;  %v2233_v59 = vpack.c.bf16 %v2197_v17, %v2197_v17  ;;  %3406 = vmatpush.bf16.msrb.mxu0 %v13811_v10  ;;  %v13810_v17 = vld [vmem:[%s17761_s1 + $0xd8] sm:$0xff] }
 0x1d8   : > { %4130 = vst.msk [vmem:[#allocation3 + $0x8] sm:$0xf] %vm4128_vm7, %v4093_v52  ;;  %v11607_v15 = vor.u32 %v13705_v6, %v11606_v45  ;;  %v1754_v16 = vadd.f32 %v1724_v19, %v1572_v4  ;;  %2077 = vrot.lane.b32.xlu0 %v1981_v8, %s14217_s23  ;;  %v1727_v20 = vpop.f32.mrf.mxu1  ;;  %v13765_v52 = vld [vmem:[%s17761_s1 + $0x120] sm:$0xff]  ;;  %v11680_v10 = vld [vmem:[#allocation3 + $0x38] sm:$0xf0] }
 0x1d9   : > { %11603 = vmatmul.msk.bf16.gmra.mxu3 %vm2494_vm5, %v11547_v49  ;;  %2149 = vst.msk [vmem:[#allocation3 + $0x58] sm:$0xf] %vm2137_vm6, %v2052_v63  ;;  %3011 = vmatpush.bf16.msra.mxu2 %v13765_v52 }
 0x1da   : > { %2537 = vmatmul.bf16.gmra.mxu2 %v15030_v14  ;;  %2709 = vmatmul.bf16.vlgmr.msra.gmra.mxu0 %v11607_v15  ;;  %1908 = vst.msk [vmem:[#allocation3 + $0xb8] sm:$0xf] %vm1884_vm3, %v1871_v12  ;;  %v1770_v34 = vadd.f32 %v15004_v27, %v1754_v16  ;;  %v13748_v15 = vld [vmem:[#allocation3 + $0x34] sm:$0xf] }
 0x1db   : > { %2268 = vst.msk [vmem:[#allocation3 + $0xb4] sm:$0xf] %vm1884_vm3, %v2232_v13  ;;  %3407 = vmatpush.bf16.msrb.mxu0 %v13810_v17 }
 0x1dc   : > { %11660 = vmatmul.msk.bf16.vlgmr.msra.gmra.mxu1 %vm2494_vm5, %v11611_v3  ;;  %2269 = vst.msk [vmem:[#allocation3 + $0xbc] sm:$0xf] %vm1884_vm3, %v2233_v59  ;;  %v1786_v21 = vmax.f32 %v1770_v34, 0.0  ;;  %v15046_v24 = vpop.f32.mrf.mxu3 }
 0x1dd   : > { %v1574_v58 = vpop.f32.mrf.mxu0  ;;  %v1836_v28 = vld [vmem:[#allocation2 + $0x187] sm:$0xff] }
 0x1de   : > { %1803 = vst [vmem:[#allocation2 + $0x190] sm:$0xff] %v1786_v21  ;;  %v1575_v30 = vadd.f32 %v1574_v58, %v14912_v41  ;;  %v1982_v31 = vpack.c.bf16 %v1786_v21, %v1786_v21  ;;  %v1872_v32 = vpack.c.bf16 %v1836_v28, %v1836_v28  ;;  %v11675_v41 = vor.u32 %v13746_v36, %v11672_v18  ;;  %v13809_v18 = vld [vmem:[%s17761_s1 + $0xd0] sm:$0xff] }
 0x1df   : > { %v2048_v26 = vpop.permute.xlu0 %2047  ;;  %v11683_v21 = vor.u32 %v13748_v15, %v11680_v10  ;;  %3408 = vmatpush.bf16.msrb.mxu0 %v13809_v18  ;;  %v13808_v10 = vld [vmem:[%s17761_s1 + $0xc8] sm:$0xff] }
 0x1e0   : > { %2147 = vst.msk [vmem:[#allocation3 + $0x48] sm:$0xf] %vm2137_vm6, %v2048_v26  ;;  %v1755_v40 = vadd.f32 %v1727_v20, %v1575_v30  ;;  %2079 = vrot.lane.b32.xlu1 %v1982_v31, %s14217_s23  ;;  %v1729_v37 = vpop.f32.mrf.mxu1  ;;  %v13715_v28 = vld [vmem:[#allocation3 + $0x54] sm:$0xf0] }
 0x1e1   : > { %1909 = vst.msk [vmem:[#allocation3 + $0xc0] sm:$0xf] %vm1884_vm3, %v1872_v32  ;;  %v13764_v32 = vld [vmem:[%s17761_s1 + $0x118] sm:$0xff] }
 0x1e2   : > { %v1771_v33 = vadd.f32 %v15004_v27, %v1755_v40  ;;  %3012 = vmatpush.bf16.msra.mxu2 %v13764_v32 }
 0x1e3   : > { %3409 = vmatpush.bf16.msrb.mxu0 %v13808_v10  ;;  %v13758_v10 = vld [vmem:[#allocation3 + $0x84] sm:$0xf] }
 0x1e4   : > { %v1787_v38 = vmax.f32 %v1771_v33, 0.0  ;;  %v15053_v48 = vpop.f32.mrf.mxu3 }
 0x1e5   : > { %v1837_v47 = vld [vmem:[#allocation2 + $0x18f] sm:$0xff]  ;;  %v1576_v46 = vpop.f32.mrf.mxu0 }
 0x1e6   : > { %v2198_v43 = vld [vmem:[#allocation2 + $0x189] sm:$0xff]  ;;  %v2199_v45 = vld [vmem:[#allocation2 + $0x191] sm:$0xff]  ;;  %1804 = vst [vmem:[#allocation2 + $0x1a8] sm:$0xff] %v1787_v38  ;;  %v1577_v54 = vadd.f32 %v1576_v46, %v14922_v62  ;;  %v1983_v55 = vpack.c.bf16 %v1787_v38, %v1787_v38  ;;  %v1873_v57 = vpack.c.bf16 %v1837_v47, %v1837_v47 }
 0x1e7   : > { %v2050_v42 = vpop.permute.xlu1 %2049  ;;  %v13713_v19 = vld [vmem:[#allocation3 + $0x44] sm:$0xf0]  ;;  %v2234_v60 = vpack.c.bf16 %v2198_v43, %v2198_v43  ;;  %v2235_v62 = vpack.c.bf16 %v2199_v45, %v2199_v45 }
 0x1e8   : > { %2148 = vst.msk [vmem:[#allocation3 + $0x50] sm:$0xf] %vm2137_vm6, %v2050_v42  ;;  %v15061_v61 = vor.u32 %v13713_v19, %v11510_v51  ;;  %v1756_v39 = vadd.f32 %v1729_v37, %v1577_v54  ;;  %2081 = vrot.lane.b32.xlu2 %v1983_v55, %s14217_s23  ;;  %v1732_v63 = vpop.f32.mrf.mxu1 }
 0x1e9   : > { %11780 = vmatmul.msk.bf16.vlgmr.msra.gmra.mxu3 %vm2494_vm5, %v11675_v41  ;;  %1910 = vst.msk [vmem:[#allocation3 + $0xc8] sm:$0xf] %vm1884_vm3, %v1873_v57  ;;  %v13750_v57 = vld [vmem:[#allocation3 + $0x44] sm:$0xf] }
 0x1ea   : > { %2542 = vmatmul.bf16.gmra.mxu2 %v15061_v61  ;;  %2714 = vmatmul.bf16.gmra.mxu0 %v14939_v23  ;;  %2270 = vst.msk [vmem:[#allocation3 + $0xc4] sm:$0xf] %vm1884_vm3, %v2234_v60  ;;  %v1772_v49 = vadd.f32 %v15004_v27, %v1756_v39  ;;  %v11688_v60 = vld [vmem:[#allocation3 + $0x48] sm:$0xf0] }
 0x1eb   : > { %2271 = vst.msk [vmem:[#allocation3 + $0xcc] sm:$0xf] %vm1884_vm3, %v2235_v62 }
 0x1ec   : > { %11661 = vmatmul.msk.bf16.gmra.mxu1 %vm2494_vm5, %v14792_v1  ;;  %v1788_v3 = vmax.f32 %v1772_v49, 0.0  ;;  %v15077_v12 = vpop.f32.mrf.mxu3 }
 0x1ed   : > { %v1579_v4 = vpop.f32.mrf.mxu0  ;;  %v1838_v7 = vld [vmem:[#allocation2 + $0x1a7] sm:$0xff] }
 0x1ee   : > { %1805 = vst [vmem:[#allocation2 + $0x1b0] sm:$0xff] %v1788_v3  ;;  %v1580_v8 = vadd.f32 %v1579_v4, %v14949_v29  ;;  %v1984_v11 = vpack.c.bf16 %v1788_v3, %v1788_v3  ;;  %v1874_v23 = vpack.c.bf16 %v1838_v7, %v1838_v7  ;;  %v11691_v3 = vor.u32 %v13750_v57, %v11688_v60  ;;  %v13806_v60 = vld [vmem:[%s17761_s1 + $0xb8] sm:$0xff] }
 0x1ef   : > { %v2058_v6 = vpop.permute.xlu2 %2057  ;;  %v11518_v16 = vld [vmem:[#allocation3 + $0x50] sm:$0xf] }
 0x1f0   : > { %2152 = vst.msk [vmem:[#allocation3 + $0x70] sm:$0xf] %vm2137_vm6, %v2058_v6  ;;  %v1757_v13 = vadd.f32 %v1732_v63, %v1580_v8  ;;  %2083 = vrot.lane.b32.xlu0 %v1984_v11, %s14217_s23  ;;  %v1734_v56 = vpop.f32.mrf.mxu1  ;;  %v15088_v36 = vor.u32 %v13715_v28, %v11518_v16  ;;  %v13762_v16 = vld [vmem:[%s17761_s1 + $0x108] sm:$0xff]  ;;  %v11696_v28 = vld [vmem:[#allocation3 + $0x58] sm:$0xf0] }
 0x1f1   : > { %1911 = vst.msk [vmem:[#allocation3 + $0xd0] sm:$0xf] %vm1884_vm3, %v1874_v23 }
 0x1f2   : > { %v1773_v1 = vadd.f32 %v15004_v27, %v1757_v13 }
 0x1f4   : > { %v1789_v59 = vmax.f32 %v1773_v1, 0.0  ;;  %v15101_v47 = vpop.f32.mrf.mxu3 }
 0x1f5   : > { %v1839_v34 = vld [vmem:[#allocation2 + $0x1af] sm:$0xff]  ;;  %v1581_v58 = vpop.f32.mrf.mxu0 }
 0x1f6   : > { %v2200_v29 = vld [vmem:[#allocation2 + $0x1a9] sm:$0xff]  ;;  %v2201_v20 = vld [vmem:[#allocation2 + $0x1b1] sm:$0xff]  ;;  %1806 = vst [vmem:[#allocation2 + $0x1c8] sm:$0xff] %v1789_v59  ;;  %v1582_v30 = vadd.f32 %v1581_v58, %v14970_v53  ;;  %v1985_v31 = vpack.c.bf16 %v1789_v59, %v1789_v59  ;;  %v1875_v40 = vpack.c.bf16 %v1839_v34, %v1839_v34 }
 0x1f7   : > { %v2054_v26 = vpop.permute.xlu0 %2053  ;;  %v2236_v33 = vpack.c.bf16 %v2200_v29, %v2200_v29  ;;  %v13814_v53 = vld [vmem:[%s17761_s1 + $0xf8] sm:$0xff]  ;;  %v2237_v37 = vpack.c.bf16 %v2201_v20, %v2201_v20  ;;  %v11534_v18 = vld [vmem:[#allocation3 + $0x70] sm:$0xf] }
 0x1f8   : > { %2150 = vst.msk [vmem:[#allocation3 + $0x60] sm:$0xf] %vm2137_vm6, %v2054_v26  ;;  %2085 = vrot.lane.b32.xlu1 %v1985_v31, %s14217_s23  ;;  %v1758_v38 = vadd.f32 %v1734_v56, %v1582_v30  ;;  %3460 = vmatpush.bf16.msrb.mxu1 %v13814_v53  ;;  %v1737_v45 = vpop.f32.mrf.mxu1  ;;  %v13752_v26 = vld [vmem:[#allocation3 + $0x54] sm:$0xf] }
 0x1f9   : > { %11781 = vmatmul.msk.bf16.gmra.mxu3 %vm2494_vm5, %v11683_v21  ;;  %1912 = vst.msk [vmem:[#allocation3 + $0xd8] sm:$0xf] %vm1884_vm3, %v1875_v40  ;;  %v11699_v40 = vor.u32 %v13752_v26, %v11696_v28 }
 0x1fa   : > { %2547 = vmatmul.bf16.gmra.mxu2 %v15088_v36  ;;  %2719 = vmatmul.bf16.gmra.mxu0 %v14989_v5  ;;  %2272 = vst.msk [vmem:[#allocation3 + $0xd4] sm:$0xf] %vm1884_vm3, %v2236_v33  ;;  %v1774_v43 = vadd.f32 %v15004_v27, %v1758_v38  ;;  %v13763_v5 = vld [vmem:[%s17761_s1 + $0x110] sm:$0xff] }
 0x1fb   : > { %2273 = vst.msk [vmem:[#allocation3 + $0xdc] sm:$0xf] %vm1884_vm3, %v2237_v37  ;;  %3013 = vmatpush.bf16.msra.mxu2 %v13763_v5 }
 0x1fc   : > { %11662 = vmatmul.msk.bf16.gmra.mxu1 %vm2494_vm5, %v14817_v35  ;;  %v1790_v46 = vmax.f32 %v1774_v43, 0.0  ;;  %v15115_v17 = vpop.f32.mrf.mxu3 }
 0x1fd   : > { %v1584_v41 = vpop.f32.mrf.mxu0  ;;  %v1840_v54 = vld [vmem:[#allocation2 + $0x1c7] sm:$0xff] }
 0x1fe   : > { %1807 = vst [vmem:[#allocation2 + $0x1d0] sm:$0xff] %v1790_v46  ;;  %v1585_v51 = vadd.f32 %v1584_v41, %v15007_v0  ;;  %v1986_v19 = vpack.c.bf16 %v1790_v46, %v1790_v46  ;;  %v1876_v52 = vpack.c.bf16 %v1840_v54, %v1840_v54  ;;  %v13807_v46 = vld [vmem:[%s17761_s1 + $0xc0] sm:$0xff]  ;;  %v13813_v41 = vld [vmem:[%s17761_s1 + $0xf0] sm:$0xff] }
 0x1ff   : > { %v2056_v42 = vpop.permute.xlu1 %2055  ;;  %v11526_v7 = vld [vmem:[#allocation3 + $0x60] sm:$0xf]  ;;  %3014 = vmatpush.bf16.msra.mxu2 %v13762_v16  ;;  %3410 = vmatpush.bf16.msrb.mxu0 %v13807_v46  ;;  %v13754_v54 = vld [vmem:[#allocation3 + $0x64] sm:$0xf] }
 0x200   : > { %2151 = vst.msk [vmem:[#allocation3 + $0x68] sm:$0xf] %vm2137_vm6, %v2056_v42  ;;  %v1759_v55 = vadd.f32 %v1737_v45, %v1585_v51  ;;  %2087 = vrot.lane.b32.xlu2 %v1986_v19, %s14217_s23  ;;  %v1739_v39 = vpop.f32.mrf.mxu1  ;;  %3461 = vmatpush.bf16.msrb.mxu1 %v13813_v41  ;;  %v11704_v51 = vld [vmem:[#allocation3 + $0x68] sm:$0xf0]  ;;  %v13751_v41 = vld [vmem:[#allocation3 + $0x44] sm:$0xf0] }
 0x201   : > { %1913 = vst.msk [vmem:[#allocation3 + $0xe0] sm:$0xf] %vm1884_vm3, %v1876_v52 }
 0x202   : > { %v1775_v35 = vadd.f32 %v15004_v27, %v1759_v55  ;;  %v11707_v55 = vor.u32 %v13754_v54, %v11704_v51  ;;  %v11686_v51 = vld [vmem:[#allocation3 + $0x40] sm:$0xf] }
 0x203   : > { %3411 = vmatpush.bf16.msrb.mxu0 %v13806_v60 }
 0x204   : > { %v1791_v62 = vmax.f32 %v1775_v35, 0.0  ;;  %v15137_v58 = vpop.f32.mrf.mxu3 }
 0x205   : > { %v1841_v49 = vld [vmem:[#allocation2 + $0x1cf] sm:$0xff]  ;;  %v1586_v4 = vpop.f32.mrf.mxu0 }
 0x206   : > { %v2202_v0 = vld [vmem:[#allocation2 + $0x1c9] sm:$0xff]  ;;  %v2203_v63 = vld [vmem:[#allocation2 + $0x1d1] sm:$0xff]  ;;  %1808 = vst [vmem:[#allocation2 + $0x1e8] sm:$0xff] %v1791_v62  ;;  %v1587_v11 = vadd.f32 %v1586_v4, %v15019_v50  ;;  %v1987_v23 = vpack.c.bf16 %v1791_v62, %v1791_v62  ;;  %v1877_v13 = vpack.c.bf16 %v1841_v49, %v1841_v49  ;;  %v11712_v49 = vld [vmem:[#allocation3 + $0x78] sm:$0xf0] }
 0x207   : > { %v2064_v6 = vpop.permute.xlu2 %2063  ;;  %v13717_v8 = vld [vmem:[#allocation3 + $0x64] sm:$0xf0]  ;;  %v2238_v1 = vpack.c.bf16 %v2202_v0, %v2202_v0  ;;  %v2239_v56 = vpack.c.bf16 %v2203_v63, %v2203_v63  ;;  %v11670_v63 = vld [vmem:[#allocation3 + $0x20] sm:$0xf] }
 0x208   : > { %2155 = vst.msk [vmem:[#allocation3 + $0x88] sm:$0xf] %vm2137_vm6, %v2064_v6  ;;  %v15120_v15 = vor.u32 %v13717_v8, %v11526_v7  ;;  %v1760_v59 = vadd.f32 %v1739_v39, %v1587_v11  ;;  %2089 = vrot.lane.b32.xlu0 %v1987_v23, %s14217_s23  ;;  %v13756_v39 = vld [vmem:[#allocation3 + $0x74] sm:$0xf]  ;;  %v13747_v4 = vld [vmem:[#allocation3 + $0x24] sm:$0xf0] }
 0x209   : > { %11782 = vmatmul.msk.bf16.gmra.mxu3 %vm2494_vm5, %v11691_v3  ;;  %1914 = vst.msk [vmem:[#allocation3 + $0xe8] sm:$0xf] %vm1884_vm3, %v1877_v13  ;;  %v11715_v3 = vor.u32 %v13756_v39, %v11712_v49  ;;  %v13805_v8 = vld [vmem:[%s17761_s1 + $0xb0] sm:$0xff]  ;;  %v13812_v11 = vld [vmem:[%s17761_s1 + $0xe8] sm:$0xff]  ;;  %v13801_v23 = vld [vmem:[%s17761_s1 + $0xa0] sm:$0xff] }
 0x20a   : > { %2552 = vmatmul.bf16.gmra.mxu2 %v15120_v15  ;;  %2724 = vmatmul.bf16.gmra.mxu0 %v15030_v14  ;;  %2274 = vst.msk [vmem:[#allocation3 + $0xe4] sm:$0xf] %vm1884_vm3, %v2238_v1  ;;  %v1776_v50 = vadd.f32 %v15004_v27, %v1760_v59  ;;  %v13804_v13 = vld [vmem:[%s17761_s1 + $0xa8] sm:$0xff]  ;;  %v13800_v1 = vld [vmem:[%s17761_s1 + $0x98] sm:$0xff]  ;;  %v13776_v49 = vld [vmem:[#allocation3 + $0x94] sm:$0xf] }
 0x20b   : > { %2275 = vst.msk [vmem:[#allocation3 + $0xec] sm:$0xf] %vm1884_vm3, %v2239_v56  ;;  %3412 = vmatpush.bf16.msrb.mxu0 %v13805_v8  ;;  %3462 = vmatpush.bf16.msrb.mxu1 %v13812_v11  ;;  %v11720_v56 = vld [vmem:[#allocation3 + $0x88] sm:$0xf0] }
 0x20c   : > { %11663 = vmatmul.msk.bf16.gmra.mxu1 %vm2494_vm5, %v14842_v22  ;;  %v1792_v34 = vmax.f32 %v1776_v50, 0.0  ;;  %v15154_v42 = vpop.f32.mrf.mxu3  ;;  %3641 = vmatpush.bf16.msrb.mxu3 %v13801_v23  ;;  %v11678_v50 = vld [vmem:[#allocation3 + $0x30] sm:$0xf]  ;;  %v13796_v23 = vld [vmem:[%s17761_s1 + $0x78] sm:$0xff] }
 0x20d   : > { %v1842_v20 = vld [vmem:[#allocation2 + $0x1e7] sm:$0xff] }
 0x20e   : > { %1809 = vst [vmem:[#allocation2 + $0x1f0] sm:$0xff] %v1792_v34  ;;  %v1988_v14 = vpack.c.bf16 %v1792_v34, %v1792_v34  ;;  %v1878_v21 = vpack.c.bf16 %v1842_v20, %v1842_v20  ;;  %v11723_v34 = vor.u32 %v13758_v10, %v11720_v56  ;;  %v13799_v20 = vld [vmem:[%s17761_s1 + $0x90] sm:$0xff] }
 0x20f   : > { %v2060_v29 = vpop.permute.xlu0 %2059  ;;  %v13733_v35 = vld [vmem:[#allocation3 + $0x84] sm:$0xf0]  ;;  %3413 = vmatpush.bf16.msrb.mxu0 %v13804_v13 }
 0x210   : > { %2153 = vst.msk [vmem:[#allocation3 + $0x78] sm:$0xf] %vm2137_vm6, %v2060_v29  ;;  %2091 = vrot.lane.b32.xlu1 %v1988_v14, %s14217_s23  ;;  %3642 = vmatpush.bf16.msrb.mxu3 %v13800_v1  ;;  %v13749_v29 = vld [vmem:[#allocation3 + $0x34] sm:$0xf0] }
 0x211   : > { %1915 = vst.msk [vmem:[#allocation3 + $0xf0] sm:$0xf] %vm1884_vm3, %v1878_v21  ;;  %v11679_v21 = vor.u32 %v13749_v29, %v11678_v50 }
 0x212   : > { %v2070_v30 = vpop.permute.xlu2 %2069 }
 0x213   : > { %2158 = vst.msk [vmem:[#allocation3 + $0xa0] sm:$0xf] %vm2137_vm6, %v2070_v30 }
 0x214   : > { %v15163_v52 = vpop.f32.mrf.mxu3  ;;  %3643 = vmatpush.bf16.msrb.mxu3 %v13799_v20 }
 0x215   : > { %v1843_v22 = vld [vmem:[#allocation2 + $0x1ef] sm:$0xff] }
 0x216   : > { %v2204_v31 = vld [vmem:[#allocation2 + $0x1e9] sm:$0xff]  ;;  %v2205_v32 = vld [vmem:[#allocation2 + $0x1f1] sm:$0xff]  ;;  %v1879_v37 = vpack.c.bf16 %v1843_v22, %v1843_v22 }
 0x217   : > { %v2062_v33 = vpop.permute.xlu1 %2061  ;;  %v13719_v53 = vld [vmem:[#allocation3 + $0x74] sm:$0xf0]  ;;  %v2240_v38 = vpack.c.bf16 %v2204_v31, %v2204_v31  ;;  %v2241_v43 = vpack.c.bf16 %v2205_v32, %v2205_v32  ;;  %v13798_v22 = vld [vmem:[%s17761_s1 + $0x88] sm:$0xff] }
 0x218   : > { %2154 = vst.msk [vmem:[#allocation3 + $0x80] sm:$0xf] %vm2137_vm6, %v2062_v33  ;;  %v15145_v45 = vor.u32 %v13719_v53, %v11534_v18  ;;  %3644 = vmatpush.bf16.msrb.mxu3 %v13798_v22 }
 0x219   : > { %11783 = vmatmul.msk.bf16.gmra.mxu3 %vm2494_vm5, %v11699_v40  ;;  %1916 = vst.msk [vmem:[#allocation3 + $0xf8] sm:$0xf] %vm1884_vm3, %v1879_v37 }
 0x21a   : > { %2557 = vmatmul.bf16.gmra.mxu2 %v15145_v45  ;;  %2729 = vmatmul.bf16.gmra.mxu0 %v15061_v61  ;;  %2276 = vst.msk [vmem:[#allocation3 + $0xf4] sm:$0xf] %vm1884_vm3, %v2240_v38  ;;  %v2066_v5 = vpop.permute.xlu0 %2065 }
 0x21b   : > { %2277 = vst.msk [vmem:[#allocation3 + $0xfc] sm:$0xf] %vm1884_vm3, %v2241_v43  ;;  %v13760_v43 = vld [vmem:[#allocation3 + $0x94] sm:$0xf] }
 0x21c   : > { %2156 = vst.msk [vmem:[#allocation3 + $0x90] sm:$0xf] %vm2137_vm6, %v2066_v5  ;;  %11664 = vmatmul.msk.bf16.gmra.mxu1 %vm2494_vm5, %v14864_v44  ;;  %v15174_v62 = vpop.f32.mrf.mxu3 }
 0x21f   : > { %v11542_v61 = vld [vmem:[#allocation3 + $0x80] sm:$0xf] }
 0x220   : > { %v11543_v57 = vor.u32 %v13733_v35, %v11542_v61 }
 0x222   : > { %v2068_v19 = vpop.permute.xlu1 %2067 }
 0x223   : > { %2157 = vst.msk [vmem:[#allocation3 + $0x98] sm:$0xf] %vm2137_vm6, %v2068_v19  ;;  %v11790_v19 = vld [vmem:[#allocation3 + $0x90] sm:$0xf] }
 0x224   : > { %v15177_v6 = vpop.f32.mrf.mxu3 }
 0x229   : > { %11784 = vmatmul.msk.bf16.gmra.mxu3 %vm2494_vm5, %v11707_v55 }
 0x22a   : > { %2562 = vmatmul.bf16.gmra.mxu2 %v11543_v57  ;;  %2734 = vmatmul.bf16.gmra.mxu0 %v15088_v36  ;;  %v2076_v44 = vpop.permute.xlu2 %2075  ;;  %v11671_v36 = vor.u32 %v13747_v4, %v11670_v63  ;;  %v13777_v5 = vld [vmem:[#allocation3 + $0x94] sm:$0xf0]  ;;  %v13839_v4 = vld [vmem:[%s17761_s1 + $0x140] sm:$0xff] }
 0x22b   : > { %2161 = vst.msk [vmem:[#allocation3 + $0xb8] sm:$0xf] %vm2137_vm6, %v2076_v44  ;;  %v11687_v44 = vor.u32 %v13751_v41, %v11686_v51  ;;  %v15233_v39 = vor.u32 %v13777_v5, %v11790_v19  ;;  %3894 = vmatpush.bf16.msra.mxu0 %v13839_v4  ;;  %v13838_v41 = vld [vmem:[%s17761_s1 + $0x138] sm:$0xff]  ;;  %v13795_v19 = vld [vmem:[%s17761_s1 + $0x70] sm:$0xff] }
 0x22c   : > { %11665 = vmatmul.msk.bf16.gmra.mxu1 %vm2494_vm5, %v14890_v25 }
 0x22f   : > { %3895 = vmatpush.bf16.msra.mxu0 %v13838_v41  ;;  %v13836_v41 = vld [vmem:[%s17761_s1 + $0x128] sm:$0xff] }
 0x232   : > { %v2072_v0 = vpop.permute.xlu0 %2071 }
 0x233   : > { %2159 = vst.msk [vmem:[#allocation3 + $0xa8] sm:$0xf] %vm2137_vm6, %v2072_v0  ;;  %v11792_v0 = vld [vmem:[#allocation3 + $0x98] sm:$0xf0] }
 0x234   : > { %v15245_v8 = vor.u32 %v13776_v49, %v11792_v0 }
 0x239   : > { %11785 = vmatmul.msk.bf16.gmra.mxu3 %vm2494_vm5, %v11715_v3 }
 0x23a   : > { %2739 = vmatmul.bf16.gmra.mxu0 %v15120_v15  ;;  %3015 = vmatmul.bf16.vlgmr.msra.gmra.mxu2 %v11671_v36  ;;  %v2074_v7 = vpop.permute.xlu1 %2073  ;;  %v1589_v15 = vpop.f32.mrf.mxu0 }
 0x23b   : > { %2160 = vst.msk [vmem:[#allocation3 + $0xb0] sm:$0xf] %vm2137_vm6, %v2074_v7  ;;  %v1590_v14 = vadd.f32 %v1589_v15, %v15046_v24  ;;  %v13843_v7 = vld [vmem:[%s17761_s1 + $0x160] sm:$0xff] }
 0x23c   : > { %11666 = vmatmul.msk.bf16.gmra.mxu1 %vm2494_vm5, %v14929_v9  ;;  %v15196_v9 = vpop.f32.mrf.mxu3 }
 0x23d   : > { %v2528_v25 = vpop.f32.mrf.mxu2  ;;  %3947 = vmatpush.bf16.msra.mxu1 %v13843_v7  ;;  %v13781_v7 = vld [vmem:[#allocation3 + $0xb4] sm:$0xf0] }
 0x23e   : > { %v2578_v55 = vadd.f32 %v15077_v12, %v2528_v25 }
 0x242   : > { %v2082_v59 = vpop.permute.xlu2 %2081  ;;  %v1591_v24 = vpop.f32.mrf.mxu0 }
 0x243   : > { %2164 = vst.msk [vmem:[#allocation3 + $0xd0] sm:$0xf] %vm2137_vm6, %v2082_v59  ;;  %v1592_v18 = vadd.f32 %v1591_v24, %v15053_v48 }
 0x244   : > { %v15213_v31 = vpop.f32.mrf.mxu3 }
 0x245   : > { %v15202_v16 = vpop.f32.mrf.mxu2 }
 0x246   : > { %v2580_v1 = vadd.f32 %v15101_v47, %v15202_v16  ;;  %v11694_v47 = vld [vmem:[#allocation3 + $0x50] sm:$0xf]  ;;  %v13779_v16 = vld [vmem:[#allocation3 + $0xa4] sm:$0xf0] }
 0x249   : > { %11786 = vmatmul.msk.bf16.gmra.mxu3 %vm2494_vm5, %v11723_v34  ;;  %v1742_v26 = vpop.f32.mrf.mxu1 }
 0x24a   : > { %v1761_v28 = vadd.f32 %v1742_v26, %v1590_v14  ;;  %2744 = vmatmul.bf16.gmra.mxu0 %v15145_v45  ;;  %3020 = vmatmul.bf16.gmra.mxu2 %v11679_v21  ;;  %v2078_v30 = vpop.permute.xlu0 %2077  ;;  %v11728_v45 = vld [vmem:[#allocation3 + $0x98] sm:$0xf0] }
 0x24b   : > { %2162 = vst.msk [vmem:[#allocation3 + $0xc0] sm:$0xf] %vm2137_vm6, %v2078_v30  ;;  %v11731_v57 = vor.u32 %v13760_v43, %v11728_v45  ;;  %v11912_v30 = vld [vmem:[#allocation3 + $0x88] sm:$0xf0] }
 0x24c   : > { %v1777_v32 = vadd.f32 %v15004_v27, %v1761_v28  ;;  %11667 = vmatmul.msk.bf16.gmra.mxu1 %vm2494_vm5, %v14979_v2  ;;  %v13797_v2 = vld [vmem:[%s17761_s1 + $0x80] sm:$0xff]  ;;  %v15230_v61 = vpop.f32.mrf.mxu3  ;;  %v11800_v43 = vld [vmem:[#allocation3 + $0xa8] sm:$0xf0] }
 0x24d   : > { %v15219_v40 = vpop.f32.mrf.mxu2  ;;  %3588 = vmatpush.bf16.msrb.mxu2 %v13797_v2  ;;  %v13774_v28 = vld [vmem:[#allocation3 + $0x84] sm:$0xf] }
 0x24e   : > { %v1793_v33 = vmax.f32 %v1777_v32, 0.0  ;;  %v2583_v24 = vadd.f32 %v15115_v17, %v15219_v40 }
 0x250   : > { %1810 = vst [vmem:[#allocation2 + $0x208] sm:$0xff] %v1793_v33  ;;  %v1989_v53 = vpack.c.bf16 %v1793_v33, %v1793_v33  ;;  %v11915_v33 = vor.u32 %v13774_v28, %v11912_v30 }
 0x251   : > { %v1744_v37 = vpop.f32.mrf.mxu1  ;;  %3589 = vmatpush.bf16.msrb.mxu2 %v13796_v23  ;;  %v11808_v23 = vld [vmem:[#allocation3 + $0xb8] sm:$0xf0] }
 0x252   : > { %v1762_v38 = vadd.f32 %v1744_v37, %v1592_v18  ;;  %2093 = vrot.lane.b32.xlu2 %v1989_v53, %s14217_s23  ;;  %v2080_v46 = vpop.permute.xlu1 %2079  ;;  %v13778_v18 = vld [vmem:[#allocation3 + $0xa4] sm:$0xf]  ;;  %v13753_v53 = vld [vmem:[#allocation3 + $0x54] sm:$0xf0]  ;;  %v11798_v37 = vld [vmem:[#allocation3 + $0xa0] sm:$0xf] }
 0x253   : > { %2163 = vst.msk [vmem:[#allocation3 + $0xc8] sm:$0xf] %vm2137_vm6, %v2080_v46  ;;  %v11695_v46 = vor.u32 %v13753_v53, %v11694_v47  ;;  %v15268_v2 = vor.u32 %v13779_v16, %v11798_v37  ;;  %v11803_v40 = vor.u32 %v13778_v18, %v11800_v43  ;;  %v13757_v47 = vld [vmem:[#allocation3 + $0x74] sm:$0xf0]  ;;  %v11814_v16 = vld [vmem:[#allocation3 + $0xc0] sm:$0xf] }
 0x254   : > { %v1778_v54 = vadd.f32 %v15004_v27, %v1762_v38  ;;  %v15257_v50 = vpop.f32.mrf.mxu3  ;;  %v11710_v53 = vld [vmem:[#allocation3 + $0x70] sm:$0xf]  ;;  %v11816_v43 = vld [vmem:[#allocation3 + $0xc8] sm:$0xf0] }
 0x255   : > { %v15228_v48 = vpop.f32.mrf.mxu2  ;;  %3590 = vmatpush.bf16.msrb.mxu2 %v13795_v19 }
 0x256   : > { %v1794_v35 = vmax.f32 %v1778_v54, 0.0 }
 0x257   : > { %v2710_v60 = vpop.f32.mrf.mxu0  ;;  %v1844_v27 = vld [vmem:[#allocation2 + $0x207] sm:$0xff] }
 0x258   : > { %1811 = vst [vmem:[#allocation2 + $0x210] sm:$0xff] %v1794_v35  ;;  %v2711_v63 = vadd.f32 %v2710_v60, %v2578_v55  ;;  %v1990_v3 = vpack.c.bf16 %v1794_v35, %v1794_v35  ;;  %v1880_v36 = vpack.c.bf16 %v1844_v27, %v1844_v27  ;;  %v2585_v35 = vadd.f32 %v15137_v58, %v15228_v48  ;;  %v13755_v27 = vld [vmem:[#allocation3 + $0x64] sm:$0xf0] }
 0x259   : > { %11787 = vmatmul.msk.bf16.gmra.mxu3 %vm2494_vm5, %v11731_v57  ;;  %v2759_v12 = vpop.f32.mrf.mxu1 }
 0x25a   : > { %v15242_v25 = vadd.f32 %v2759_v12, %v2711_v63  ;;  %3025 = vmatmul.bf16.gmra.mxu2 %v11687_v44  ;;  %3414 = vmatmul.bf16.vlgmr.msrb.gmra.mxu0 %v15233_v39  ;;  %1917 = vst.msk [vmem:[#allocation3 + $0x100] sm:$0xf] %vm1884_vm3, %v1880_v36  ;;  %v2088_v11 = vpop.permute.xlu2 %2087  ;;  %v11806_v63 = vld [vmem:[#allocation3 + $0xb0] sm:$0xf]  ;;  %v13780_v36 = vld [vmem:[#allocation3 + $0xb4] sm:$0xf] }
 0x25b   : > { %2095 = vrot.lane.b32.xlu0 %v1990_v3, %s14217_s23  ;;  %2167 = vst.msk [vmem:[#allocation3 + $0xe8] sm:$0xf] %vm2137_vm6, %v2088_v11  ;;  %v11702_v12 = vld [vmem:[#allocation3 + $0x60] sm:$0xf] }
 0x25c   : > { %11900 = vmatmul.msk.bf16.vlgmr.msrb.gmra.mxu1 %vm2494_vm5, %v15245_v8  ;;  %v15273_v54 = vpop.f32.mrf.mxu3  ;;  %v11703_v48 = vor.u32 %v13755_v27, %v11702_v12  ;;  %v11718_v12 = vld [vmem:[#allocation3 + $0x80] sm:$0xf] }
 0x25d   : > { %v2538_v13 = vpop.f32.mrf.mxu2 }
 0x25e   : > { %v2588_v4 = vadd.f32 %v15154_v42, %v2538_v13  ;;  %v13842_v42 = vld [vmem:[%s17761_s1 + $0x158] sm:$0xff] }
 0x25f   : > { %v1845_v15 = vld [vmem:[#allocation2 + $0x20f] sm:$0xff]  ;;  %v2712_v59 = vpop.f32.mrf.mxu0  ;;  %3948 = vmatpush.bf16.msra.mxu1 %v13842_v42 }
 0x260   : > { %v2206_v10 = vld [vmem:[#allocation2 + $0x209] sm:$0xff]  ;;  %v2207_v56 = vld [vmem:[#allocation2 + $0x211] sm:$0xff]  ;;  %v2713_v34 = vadd.f32 %v2712_v59, %v2580_v1  ;;  %v1881_v21 = vpack.c.bf16 %v1845_v15, %v1845_v15  ;;  %v15292_v1 = vor.u32 %v13781_v7, %v11806_v63 }
 0x261   : > { %v2242_v29 = vpack.c.bf16 %v2206_v10, %v2206_v10  ;;  %v2243_v20 = vpack.c.bf16 %v2207_v56, %v2207_v56  ;;  %v2761_v14 = vpop.f32.mrf.mxu1  ;;  %v13837_v15 = vld [vmem:[%s17761_s1 + $0x130] sm:$0xff]  ;;  %v11811_v56 = vor.u32 %v13780_v36, %v11808_v23  ;;  %v13794_v59 = vld [vmem:[%s17761_s1 + $0x68] sm:$0xff]  ;;  %v13792_v63 = vld [vmem:[%s17761_s1 + $0x58] sm:$0xff] }
 0x262   : > { %v15259_v26 = vadd.f32 %v2761_v14, %v2713_v34  ;;  %v2084_v22 = vpop.permute.xlu0 %2083  ;;  %1918 = vst.msk [vmem:[#allocation3 + $0x108] sm:$0xf] %vm1884_vm3, %v1881_v21  ;;  %3896 = vmatpush.bf16.msra.mxu0 %v13837_v15  ;;  %3591 = vmatpush.bf16.msrb.mxu2 %v13794_v59  ;;  %v11822_v23 = vld [vmem:[#allocation3 + $0xd0] sm:$0xf] }
 0x263   : > { %2278 = vst.msk [vmem:[#allocation3 + $0x104] sm:$0xf] %vm1884_vm3, %v2242_v29 }
 0x264   : > { %2279 = vst.msk [vmem:[#allocation3 + $0x10c] sm:$0xf] %vm1884_vm3, %v2243_v20  ;;  %v15287_v0 = vpop.f32.mrf.mxu3 }
 0x265   : > { %2165 = vst.msk [vmem:[#allocation3 + $0xd8] sm:$0xf] %vm2137_vm6, %v2084_v22  ;;  %v2540_v32 = vpop.f32.mrf.mxu2 }
 0x266   : > { %v2590_v20 = vadd.f32 %v15163_v52, %v2540_v32  ;;  %v11711_v32 = vor.u32 %v13757_v47, %v11710_v53  ;;  %3897 = vmatpush.bf16.msra.mxu0 %v13836_v41  ;;  %v13787_v41 = vld [vmem:[#allocation3 + $0xe4] sm:$0xf0] }
 0x267   : > { %v2715_v38 = vpop.f32.mrf.mxu0 }
 0x268   : > { %v2716_v45 = vadd.f32 %v2715_v38, %v2583_v24  ;;  %v13783_v24 = vld [vmem:[#allocation3 + $0xc4] sm:$0xf0]  ;;  %v13782_v38 = vld [vmem:[#allocation3 + $0xc4] sm:$0xf] }
 0x269   : > { %11964 = vmatmul.msk.bf16.vlgmr.msrb.gmra.mxu3 %vm2494_vm5, %v11915_v33  ;;  %v2764_v5 = vpop.f32.mrf.mxu1 }
 0x26a   : > { %v15275_v17 = vadd.f32 %v2764_v5, %v2716_v45  ;;  %3030 = vmatmul.bf16.gmra.mxu2 %v11695_v46  ;;  %3419 = vmatmul.bf16.gmra.mxu0 %v15268_v2  ;;  %v2086_v51 = vpop.permute.xlu1 %2085  ;;  %v15318_v46 = vor.u32 %v13783_v24, %v11814_v16 }
 0x26b   : > { %2166 = vst.msk [vmem:[#allocation3 + $0xe0] sm:$0xf] %vm2137_vm6, %v2086_v51 }
 0x26c   : > { %11901 = vmatmul.msk.bf16.gmra.mxu1 %vm2494_vm5, %v11803_v40  ;;  %v15308_v29 = vpop.f32.mrf.mxu3 }
 0x26d   : > { %v2543_v55 = vpop.f32.mrf.mxu2 }
 0x26e   : > { %v2593_v18 = vadd.f32 %v15174_v62, %v2543_v55  ;;  %v11819_v62 = vor.u32 %v13782_v38, %v11816_v43 }
 0x26f   : > { %v2717_v57 = vpop.f32.mrf.mxu0 }
 0x270   : > { %v2718_v60 = vadd.f32 %v2717_v57, %v2585_v35 }
 0x271   : > { %v2766_v44 = vpop.f32.mrf.mxu1 }
 0x272   : > { %v15285_v49 = vadd.f32 %v2766_v44, %v2718_v60  ;;  %v11830_v53 = vld [vmem:[#allocation3 + $0xe0] sm:$0xf] }
 0x274   : > { %v15315_v45 = vpop.f32.mrf.mxu3 }
 0x275   : > { %v2545_v3 = vpop.f32.mrf.mxu2 }
 0x276   : > { %v2595_v55 = vadd.f32 %v15177_v6, %v2545_v3  ;;  %v13759_v3 = vld [vmem:[#allocation3 + $0x84] sm:$0xf0] }
 0x277   : > { %v2720_v11 = vpop.f32.mrf.mxu0  ;;  %v11719_v15 = vor.u32 %v13759_v3, %v11718_v12 }
 0x278   : > { %v2721_v58 = vadd.f32 %v2720_v11, %v2588_v4  ;;  %v13785_v4 = vld [vmem:[#allocation3 + $0xd4] sm:$0xf0]  ;;  %v13784_v11 = vld [vmem:[#allocation3 + $0xd4] sm:$0xf] }
 0x279   : > { %11965 = vmatmul.msk.bf16.gmra.mxu3 %vm2494_vm5, %v15245_v8  ;;  %v2769_v13 = vpop.f32.mrf.mxu1  ;;  %v15340_v42 = vor.u32 %v13785_v4, %v11822_v23 }
 0x27a   : > { %v15300_v10 = vadd.f32 %v2769_v13, %v2721_v58  ;;  %3035 = vmatmul.bf16.gmra.mxu2 %v11703_v48  ;;  %3424 = vmatmul.bf16.gmra.mxu0 %v15292_v1  ;;  %v2090_v8 = vpop.permute.xlu0 %2089  ;;  %v11824_v58 = vld [vmem:[#allocation3 + $0xd8] sm:$0xf0]  ;;  %v13835_v13 = vld [vmem:[%s17761_s1 + $0x120] sm:$0xff] }
 0x27b   : > { %2168 = vst.msk [vmem:[#allocation3 + $0xf0] sm:$0xf] %vm2137_vm6, %v2090_v8  ;;  %v13841_v8 = vld [vmem:[%s17761_s1 + $0x150] sm:$0xff]  ;;  %3898 = vmatpush.bf16.msra.mxu0 %v13835_v13  ;;  %v14197_v13 = vld [vmem:[#allocation2] sm:$0xff] }
 0x27c   : > { %11902 = vmatmul.msk.bf16.gmra.mxu1 %vm2494_vm5, %v11811_v56  ;;  %v15331_v44 = vpop.f32.mrf.mxu3 }
 0x27d   : > { %v2548_v34 = vpop.f32.mrf.mxu2  ;;  %3949 = vmatpush.bf16.msra.mxu1 %v13841_v8  ;;  %v15383_v8 = vpack.c.bf16 %v14197_v13, %v14197_v13 }
 0x27e   : > { %v2598_v7 = vadd.f32 %v15196_v9, %v2548_v34  ;;  %v13791_v9 = vld [vmem:[%s17761_s1 + $0x50] sm:$0xff] }
 0x27f   : > { %v2722_v14 = vpop.f32.mrf.mxu0  ;;  %4273 = vrot.lane.b32.xlu2 %v15383_v8, %s14215_s22  ;;  %4275 = vrot.lane.b32.xlu0 %v15383_v8, %s14215_s22 }
 0x280   : > { %v2723_v21 = vadd.f32 %v2722_v14, %v2590_v20  ;;  %v13790_v14 = vld [vmem:[%s17761_s1 + $0x48] sm:$0xff] }
 0x281   : > { %v2771_v28 = vpop.f32.mrf.mxu1 }
 0x282   : > { %v15311_v30 = vadd.f32 %v2771_v28, %v2723_v21  ;;  %v2092_v22 = vpop.permute.xlu1 %2091 }
 0x283   : > { %2169 = vst.msk [vmem:[#allocation3 + $0xf8] sm:$0xf] %vm2137_vm6, %v2092_v22 }
 0x284   : > { %v15354_v20 = vpop.f32.mrf.mxu3 }
 0x285   : > { %v2550_v33 = vpop.f32.mrf.mxu2 }
 0x286   : > { %v2600_v28 = vadd.f32 %v15213_v31, %v2550_v33 }
 0x287   : > { %v2725_v37 = vpop.f32.mrf.mxu0 }
 0x288   : > { %v2726_v52 = vadd.f32 %v2725_v37, %v2593_v18  ;;  %v13761_v18 = vld [vmem:[#allocation3 + $0x94] sm:$0xf0] }
 0x289   : > { %11966 = vmatmul.msk.bf16.gmra.mxu3 %vm2494_vm5, %v11803_v40  ;;  %v2774_v5 = vpop.f32.mrf.mxu1  ;;  %v13793_v40 = vld [vmem:[%s17761_s1 + $0x60] sm:$0xff] }
 0x28a   : > { %v15323_v51 = vadd.f32 %v2774_v5, %v2726_v52  ;;  %3040 = vmatmul.bf16.gmra.mxu2 %v11711_v32  ;;  %3429 = vmatmul.bf16.gmra.mxu0 %v15318_v46  ;;  %v13786_v52 = vld [vmem:[#allocation3 + $0xe4] sm:$0xf]  ;;  %v11726_v32 = vld [vmem:[#allocation3 + $0x90] sm:$0xf]  ;;  %v13789_v3 = vld [vmem:[#allocation3 + $0xf4] sm:$0xf0] }
 0x28b   : > { %3592 = vmatpush.bf16.msrb.mxu2 %v13793_v40  ;;  %v11832_v40 = vld [vmem:[#allocation3 + $0xe8] sm:$0xf0]  ;;  %v11727_v33 = vor.u32 %v13761_v18, %v11726_v32  ;;  %v15412_v32 = vld [vmem:[%s17762_s2 + $0x1] ss:$0 sm:$0xff] }
 0x28c   : > { %11903 = vmatmul.msk.bf16.gmra.mxu1 %vm2494_vm5, %v11819_v62  ;;  %v15363_v38 = vpop.f32.mrf.mxu3 }
 0x28d   : > { %v2553_v19 = vpop.f32.mrf.mxu2 }
 0x28e   : > { %v2603_v43 = vadd.f32 %v15230_v61, %v2553_v19  ;;  %v11835_v61 = vor.u32 %v13786_v52, %v11832_v40 }
 0x28f   : > { %v2727_v35 = vpop.f32.mrf.mxu0  ;;  %3593 = vmatpush.bf16.msrb.mxu2 %v13792_v63 }
 0x290   : > { %v2728_v57 = vadd.f32 %v2727_v35, %v2595_v55  ;;  %v15367_v55 = vor.u32 %v13787_v41, %v11830_v53  ;;  %v13834_v35 = vld [vmem:[%s17761_s1 + $0x118] sm:$0xff] }
 0x291   : > { %v2776_v60 = vpop.f32.mrf.mxu1  ;;  %3899 = vmatpush.bf16.msra.mxu0 %v13834_v35 }
 0x292   : > { %v15333_v27 = vadd.f32 %v2776_v60, %v2728_v57 }
 0x293   : > { %3594 = vmatpush.bf16.msrb.mxu2 %v13791_v9  ;;  %v13775_v9 = vld [vmem:[#allocation3 + $0x84] sm:$0xf0] }
 0x294   : > { %v15378_v12 = vpop.f32.mrf.mxu3 }
 0x295   : > { %v2555_v36 = vpop.f32.mrf.mxu2 }
 0x296   : > { %v2605_v63 = vadd.f32 %v15257_v50, %v2555_v36  ;;  %v11840_v50 = vld [vmem:[#allocation3 + $0xf8] sm:$0xf0] }
 0x297   : > { %v2730_v6 = vpop.f32.mrf.mxu0  ;;  %3595 = vmatpush.bf16.msrb.mxu2 %v13790_v14  ;;  %v13788_v14 = vld [vmem:[#allocation3 + $0xf4] sm:$0xf] }
 0x298   : > { %v2731_v48 = vadd.f32 %v2730_v6, %v2598_v7  ;;  %v11910_v6 = vld [vmem:[#allocation3 + $0x80] sm:$0xf]  ;;  %v15403_v18 = vor.u32 %v13788_v14, %v11840_v50 }
 0x299   : > { %11967 = vmatmul.msk.bf16.gmra.mxu3 %vm2494_vm5, %v11811_v56  ;;  %v2779_v59 = vpop.f32.mrf.mxu1  ;;  %v11827_v56 = vor.u32 %v13784_v11, %v11824_v58  ;;  %v11838_v58 = vld [vmem:[#allocation3 + $0xf0] sm:$0xf] }
 0x29a   : > { %v15351_v34 = vadd.f32 %v2779_v59, %v2731_v48  ;;  %3045 = vmatmul.bf16.gmra.mxu2 %v11719_v15  ;;  %3434 = vmatmul.bf16.gmra.mxu0 %v15340_v42 }
 0x29c   : > { %11904 = vmatmul.msk.bf16.gmra.mxu1 %vm2494_vm5, %v11827_v56 }
 0x29d   : > { %v2558_v21 = vpop.f32.mrf.mxu2 }
 0x29e   : > { %v2608_v15 = vadd.f32 %v15273_v54, %v2558_v21  ;;  %v13833_v54 = vld [vmem:[%s17761_s1 + $0x110] sm:$0xff]  ;;  %v13840_v21 = vld [vmem:[%s17761_s1 + $0x148] sm:$0xff] }
 0x29f   : > { %v2732_v22 = vpop.f32.mrf.mxu0  ;;  %3900 = vmatpush.bf16.msra.mxu0 %v13833_v54  ;;  %3950 = vmatpush.bf16.msra.mxu1 %v13840_v21 }
 0x2a0   : > { %v2733_v47 = vadd.f32 %v2732_v22, %v2600_v28  ;;  %v15386_v28 = vor.u32 %v13789_v3, %v11838_v58  ;;  %v11911_v22 = vor.u32 %v13775_v9, %v11910_v6 }
 0x2a1   : > { %v2781_v16 = vpop.f32.mrf.mxu1 }
 0x2a2   : > { %v15361_v24 = vadd.f32 %v2781_v16, %v2733_v47 }
 0x2a5   : > { %v2560_v37 = vpop.f32.mrf.mxu2 }
 0x2a7   : > { %v2735_v5 = vpop.f32.mrf.mxu0 }
 0x2a8   : > { %v2736_v31 = vadd.f32 %v2735_v5, %v2603_v43  ;;  %v2610_v43 = vadd.f32 %v15287_v0, %v2560_v37 }
 0x2a9   : > { %11968 = vmatmul.msk.bf16.gmra.mxu3 %vm2494_vm5, %v11819_v62  ;;  %v2784_v57 = vpop.f32.mrf.mxu1 }
 0x2aa   : > { %v15372_v60 = vadd.f32 %v2784_v57, %v2736_v31  ;;  %3050 = vmatmul.bf16.gmra.mxu2 %v11727_v33  ;;  %3439 = vmatmul.bf16.gmra.mxu0 %v15367_v55 }
 0x2ac   : > { %11905 = vmatmul.msk.bf16.gmra.mxu1 %vm2494_vm5, %v11835_v61  ;;  %v2094_v19 = vpop.permute.xlu2 %2093 }
 0x2ad   : > { %v2563_v62 = vpop.f32.mrf.mxu2  ;;  %2170 = vst.msk [vmem:[#allocation3 + $0x100] sm:$0xf] %vm2137_vm6, %v2094_v19 }
 0x2af   : > { %v2737_v4 = vpop.f32.mrf.mxu0 }
 0x2b0   : > { %v2738_v7 = vadd.f32 %v2737_v4, %v2605_v63 }
 0x2b1   : > { %v2786_v11 = vpop.f32.mrf.mxu1 }
 0x2b2   : > { %v15380_v23 = vadd.f32 %v2786_v11, %v2738_v7  ;;  %v13802_v7 = vld [vmem:[#allocation3 + $0x104] sm:$0xf]  ;;  %v11848_v11 = vld [vmem:[#allocation3 + $0x108] sm:$0xf0] }
 0x2b5   : > { %v2565_v48 = vpop.f32.mrf.mxu2 }
 0x2b7   : > { %v2740_v59 = vpop.f32.mrf.mxu0 }
 0x2b8   : > { %v2741_v36 = vadd.f32 %v2740_v59, %v2608_v15 }
 0x2b9   : > { %11969 = vmatmul.msk.bf16.gmra.mxu3 %vm2494_vm5, %v11827_v56  ;;  %v2789_v47 = vpop.f32.mrf.mxu1  ;;  %v15398_v56 = vpop.f32.mrf.mxu3 }
 0x2ba   : > { %v15400_v16 = vadd.f32 %v2789_v47, %v2741_v36  ;;  %3444 = vmatmul.bf16.gmra.mxu0 %v15386_v28  ;;  %3596 = vmatmul.bf16.vlgmr.msrb.gmra.mxu2 %v11911_v22 }
 0x2bc   : > { %11906 = vmatmul.msk.bf16.gmra.mxu1 %vm2494_vm5, %v15403_v18 }
 0x2bd   : > { %v3016_v53 = vpop.f32.mrf.mxu2 }
 0x2be   : > { %v3066_v52 = vadd.f32 %v15331_v44, %v3016_v53  ;;  %v2613_v44 = vadd.f32 %v15308_v29, %v2563_v62  ;;  %v11851_v62 = vor.u32 %v13802_v7, %v11848_v11 }
 0x2bf   : > { %v2742_v41 = vpop.f32.mrf.mxu0 }
 0x2c0   : > { %v3105_v5 = vadd.f32 %v3066_v52, %v15242_v25  ;;  %v2743_v40 = vadd.f32 %v2742_v41, %v2610_v43  ;;  %v13832_v25 = vld [vmem:[%s17761_s1 + $0x108] sm:$0xff] }
 0x2c1   : > { %v2791_v31 = vpop.f32.mrf.mxu1  ;;  %v15418_v57 = vpop.f32.mrf.mxu3  ;;  %3901 = vmatpush.bf16.msra.mxu0 %v13832_v25 }
 0x2c2   : > { %v3124_v33 = vadd.f32 %v15412_v32, %v3105_v5  ;;  %v15416_v35 = vadd.f32 %v2791_v31, %v2743_v40  ;;  %v11846_v5 = vld [vmem:[#allocation3 + $0x100] sm:$0xf] }
 0x2c4   : > { %v3140_v19 = vmax.f32 %v3124_v33, 0.0 }
 0x2c5   : > { %v3018_v0 = vpop.f32.mrf.mxu2 }
 0x2c6   : > { %3156 = vst [vmem:[#allocation2 + $0x28] sm:$0xff] %v3140_v19  ;;  %v3068_v37 = vadd.f32 %v15354_v20, %v3018_v0  ;;  %v4203_v63 = vpack.c.bf16 %v3140_v19, %v3140_v19 }
 0x2c7   : > { %v2745_v4 = vpop.f32.mrf.mxu0 }
 0x2c8   : > { %v3106_v6 = vadd.f32 %v3068_v37, %v15259_v26  ;;  %v2746_v3 = vadd.f32 %v2745_v4, %v2613_v44  ;;  %4277 = vrot.lane.b32.xlu1 %v4203_v63, %s14215_s22  ;;  %v2615_v26 = vadd.f32 %v15315_v45, %v2565_v48  ;;  %v4419_v45 = vld [vmem:[#allocation2 + $0x11] sm:$0xff]  ;;  %v13816_v44 = vld [vmem:[#allocation3 + $0xa4] sm:$0xf]  ;;  %v11976_v37 = vld [vmem:[#allocation3 + $0xa8] sm:$0xf0] }
 0x2c9   : > { %11970 = vmatmul.msk.bf16.gmra.mxu3 %vm2494_vm5, %v11835_v61  ;;  %v2794_v58 = vpop.f32.mrf.mxu1  ;;  %v15433_v59 = vpop.f32.mrf.mxu3  ;;  %v4455_v19 = vpack.c.bf16 %v4419_v45, %v4419_v45 }
 0x2ca   : > { %v3125_v29 = vadd.f32 %v15412_v32, %v3106_v6  ;;  %v15429_v20 = vadd.f32 %v2794_v58, %v2746_v3  ;;  %3601 = vmatmul.bf16.gmra.mxu2 %v15233_v39  ;;  %v11979_v58 = vor.u32 %v13816_v44, %v11976_v37 }
 0x2cc   : > { %v3141_v15 = vmax.f32 %v3125_v29, 0.0  ;;  %11907 = vmatmul.msk.bf16.gmra.mxu1 %vm2494_vm5, %v11851_v62 }
 0x2cd   : > { %v3021_v13 = vpop.f32.mrf.mxu2  ;;  %v2096_v9 = vpop.permute.xlu0 %2095  ;;  %v4058_v61 = vld [vmem:[#allocation2 + $0x27] sm:$0xff] }
 0x2ce   : > { %3157 = vst [vmem:[#allocation2 + $0x30] sm:$0xff] %v3141_v15  ;;  %v3071_v14 = vadd.f32 %v15363_v38, %v3021_v13  ;;  %v4204_v50 = vpack.c.bf16 %v3141_v15, %v3141_v15  ;;  %v4094_v36 = vpack.c.bf16 %v4058_v61, %v4058_v61 }
 0x2cf   : > { %v2747_v22 = vpop.f32.mrf.mxu0  ;;  %2171 = vst.msk [vmem:[#allocation3 + $0x108] sm:$0xf] %vm2137_vm6, %v2096_v9 }
 0x2d0   : > { %v3107_v39 = vadd.f32 %v3071_v14, %v15275_v17  ;;  %v2748_v54 = vadd.f32 %v2747_v22, %v2615_v26  ;;  %4279 = vrot.lane.b32.xlu2 %v4204_v50, %s14215_s22  ;;  %4131 = vst.msk [vmem:[#allocation3 + $0x10] sm:$0xf] %vm4128_vm7, %v4094_v36  ;;  %v13817_v50 = vld [vmem:[#allocation3 + $0xa4] sm:$0xf0] }
 0x2d1   : > { %v2796_v21 = vpop.f32.mrf.mxu1  ;;  %v15445_v4 = vpop.f32.mrf.mxu3 }
 0x2d2   : > { %v3126_v47 = vadd.f32 %v15412_v32, %v3107_v39  ;;  %v15442_v53 = vadd.f32 %v2796_v21, %v2748_v54  ;;  %v11974_v21 = vld [vmem:[#allocation3 + $0xa0] sm:$0xf] }
 0x2d4   : > { %v3142_v48 = vmax.f32 %v3126_v47, 0.0 }
 0x2d5   : > { %v3023_v38 = vpop.f32.mrf.mxu2  ;;  %v4421_v43 = vld [vmem:[#allocation2 + $0x31] sm:$0xff]  ;;  %v4420_v52 = vld [vmem:[#allocation2 + $0x29] sm:$0xff] }
 0x2d6   : > { %v4059_v41 = vld [vmem:[#allocation2 + $0x2f] sm:$0xff]  ;;  %3158 = vst [vmem:[#allocation2 + $0x48] sm:$0xff] %v3142_v48  ;;  %v13803_v40 = vld [vmem:[#allocation3 + $0x104] sm:$0xf0]  ;;  %v3073_v17 = vadd.f32 %v15378_v12, %v3023_v38  ;;  %v4457_v31 = vpack.c.bf16 %v4421_v43, %v4421_v43  ;;  %v4456_v33 = vpack.c.bf16 %v4420_v52, %v4420_v52  ;;  %v4205_v61 = vpack.c.bf16 %v3142_v48, %v3142_v48 }
 0x2d7   : > { %v3415_v0 = vpop.f32.mrf.mxu0  ;;  %v11847_v63 = vor.u32 %v13803_v40, %v11846_v5  ;;  %v4095_v25 = vpack.c.bf16 %v4059_v41, %v4059_v41  ;;  %v4418_v12 = vld [vmem:[#allocation2 + $0x9] sm:$0xff]  ;;  %v13818_v38 = vld [vmem:[#allocation3 + $0xb4] sm:$0xf]  ;;  %v11984_v41 = vld [vmem:[#allocation3 + $0xb8] sm:$0xf0]  ;;  %v11975_v5 = vor.u32 %v13817_v50, %v11974_v21 }
 0x2d8   : > { %v3108_v7 = vadd.f32 %v3073_v17, %v15285_v49  ;;  %4532 = vrot.lane.b32.xlu1 %v4457_v31, %s14217_s23  ;;  %4530 = vrot.lane.b32.xlu0 %v4456_v33, %s14217_s23  ;;  %v4454_v49 = vpack.c.bf16 %v4418_v12, %v4418_v12  ;;  %v13857_v43 = vld [vmem:[%s17761_s1 + $0x190] sm:$0xff]  ;;  %v13864_v40 = vld [vmem:[%s17761_s1 + $0x1c0] sm:$0xff]  ;;  %v11987_v44 = vor.u32 %v13818_v38, %v11984_v41 }
 0x2d9   : > { %11971 = vmatmul.msk.bf16.gmra.mxu3 %vm2494_vm5, %v15403_v18  ;;  %v3464_v11 = vpop.f32.mrf.mxu1  ;;  %3449 = vmatmul.bf16.gmra.mxu0 %v11847_v63  ;;  %4132 = vst.msk [vmem:[#allocation3 + $0x18] sm:$0xf] %vm4128_vm7, %v4095_v25  ;;  %v13878_v17 = vld [vmem:[%s17761_s1 + $0x1f0] sm:$0xff]  ;;  %v13856_v50 = vld [vmem:[%s17761_s1 + $0x188] sm:$0xff] }
 0x2da   : > { %v3127_v6 = vadd.f32 %v15412_v32, %v3108_v7  ;;  %v15454_v3 = vadd.f32 %v3464_v11, %v3415_v0  ;;  %3606 = vmatmul.bf16.gmra.mxu2 %v15268_v2  ;;  %4528 = vrot.lane.b32.xlu2 %v4455_v19, %s14217_s23  ;;  %v3085_v11 = vpop.f32.mrf.mxu3 }
 0x2db   : > { %4911 = vmatpush.bf16.msra.mxu3 %v13857_v43  ;;  %4818 = vmatpush.bf16.msra.mxu2 %v13864_v40 }
 0x2dc   : > { %v3143_v18 = vmax.f32 %v3127_v6, 0.0  ;;  %12084 = vmatmul.msk.bf16.vlgmr.msra.gmra.mxu1 %vm2494_vm5, %v11979_v58  ;;  %5088 = vmatpush.bf16.msrb.mxu0 %v13878_v17 }
 0x2dd   : > { %v3026_v29 = vpop.f32.mrf.mxu2  ;;  %v4060_v62 = vld [vmem:[#allocation2 + $0x47] sm:$0xff] }
 0x2de   : > { %3159 = vst [vmem:[#allocation2 + $0x50] sm:$0xff] %v3143_v18  ;;  %v3076_v15 = vadd.f32 %v15398_v56, %v3026_v29  ;;  %v4096_v13 = vpack.c.bf16 %v4060_v62, %v4060_v62  ;;  %v4206_v48 = vpack.c.bf16 %v3143_v18, %v3143_v18  ;;  %v11982_v18 = vld [vmem:[#allocation3 + $0xb0] sm:$0xf] }
 0x2df   : > { %v15460_v9 = vpop.f32.mrf.mxu0  ;;  %4912 = vmatpush.bf16.msra.mxu3 %v13856_v50  ;;  %v13855_v50 = vld [vmem:[%s17761_s1 + $0x180] sm:$0xff] }
 0x2e0   : > { %v3109_v26 = vadd.f32 %v3076_v15, %v15300_v10  ;;  %4526 = vrot.lane.b32.xlu1 %v4454_v49, %s14217_s23  ;;  %4133 = vst.msk [vmem:[#allocation3 + $0x20] sm:$0xf] %vm4128_vm7, %v4096_v13  ;;  %4281 = vrot.lane.b32.xlu0 %v4205_v61, %s14215_s22  ;;  %v13819_v13 = vld [vmem:[#allocation3 + $0xb4] sm:$0xf0] }
 0x2e1   : > { %v15465_v2 = vpop.f32.mrf.mxu1 }
 0x2e2   : > { %v3128_v14 = vadd.f32 %v15412_v32, %v3109_v26 }
 0x2e3   : > { %4913 = vmatpush.bf16.msra.mxu3 %v13855_v50 }
 0x2e4   : > { %v3144_v36 = vmax.f32 %v3128_v14, 0.0 }
 0x2e5   : > { %v4061_v22 = vld [vmem:[#allocation2 + $0x4f] sm:$0xff]  ;;  %v3028_v56 = vpop.f32.mrf.mxu2 }
 0x2e6   : > { %v4423_v39 = vld [vmem:[#allocation2 + $0x51] sm:$0xff]  ;;  %v4422_v54 = vld [vmem:[#allocation2 + $0x49] sm:$0xff]  ;;  %3160 = vst [vmem:[#allocation2 + $0x68] sm:$0xff] %v3144_v36  ;;  %v3078_v10 = vadd.f32 %v15418_v57, %v3028_v56  ;;  %v4097_v57 = vpack.c.bf16 %v4061_v22, %v4061_v22  ;;  %v4207_v6 = vpack.c.bf16 %v3144_v36, %v3144_v36  ;;  %v13820_v22 = vld [vmem:[#allocation3 + $0xc4] sm:$0xf] }
 0x2e7   : > { %v4459_v47 = vpack.c.bf16 %v4423_v39, %v4423_v39  ;;  %v4458_v45 = vpack.c.bf16 %v4422_v54, %v4422_v54  ;;  %v3420_v52 = vpop.f32.mrf.mxu0  ;;  %v11992_v56 = vld [vmem:[#allocation3 + $0xc8] sm:$0xf0]  ;;  %v11983_v39 = vor.u32 %v13819_v13, %v11982_v18  ;;  %v13863_v54 = vld [vmem:[%s17761_s1 + $0x1b8] sm:$0xff] }
 0x2e8   : > { %v3110_v31 = vadd.f32 %v3078_v10, %v15311_v30  ;;  %4283 = vrot.lane.b32.xlu1 %v4206_v48, %s14215_s22  ;;  %4134 = vst.msk [vmem:[#allocation3 + $0x28] sm:$0xf] %vm4128_vm7, %v4097_v57  ;;  %v11995_v38 = vor.u32 %v13820_v22, %v11992_v56  ;;  %4819 = vmatpush.bf16.msra.mxu2 %v13863_v54  ;;  %v13877_v18 = vld [vmem:[%s17761_s1 + $0x1e8] sm:$0xff] }
 0x2e9   : > { %4534 = vrot.lane.b32.xlu2 %v4458_v45, %s14217_s23  ;;  %v3469_v33 = vpop.f32.mrf.mxu1  ;;  %4536 = vrot.lane.b32.xlu0 %v4459_v47, %s14217_s23 }
 0x2ea   : > { %3902 = vmatmul.bf16.vlgmr.msra.gmra.mxu0 %v11975_v5  ;;  %v3129_v19 = vadd.f32 %v15412_v32, %v3110_v31  ;;  %v15485_v0 = vadd.f32 %v3469_v33, %v3420_v52  ;;  %3611 = vmatmul.bf16.gmra.mxu2 %v15292_v1 }
 0x2eb   : > { %5089 = vmatpush.bf16.msrb.mxu0 %v13877_v18 }
 0x2ec   : > { %v3145_v30 = vmax.f32 %v3129_v19, 0.0  ;;  %12085 = vmatmul.msk.bf16.gmra.mxu1 %vm2494_vm5, %v11987_v44  ;;  %v11990_v44 = vld [vmem:[#allocation3 + $0xc0] sm:$0xf] }
 0x2ed   : > { %v3031_v37 = vpop.f32.mrf.mxu2  ;;  %v4062_v63 = vld [vmem:[#allocation2 + $0x67] sm:$0xff] }
 0x2ee   : > { %3161 = vst [vmem:[#allocation2 + $0x70] sm:$0xff] %v3145_v30  ;;  %v3081_v25 = vadd.f32 %v15433_v59, %v3031_v37  ;;  %v4098_v7 = vpack.c.bf16 %v4062_v63, %v4062_v63  ;;  %v4208_v14 = vpack.c.bf16 %v3145_v30, %v3145_v30  ;;  %v13821_v30 = vld [vmem:[#allocation3 + $0xc4] sm:$0xf0] }
 0x2ef   : > { %v15490_v12 = vpop.f32.mrf.mxu0 }
 0x2f0   : > { %v3111_v58 = vadd.f32 %v3081_v25, %v15323_v51  ;;  %2097 = vrot.lane.b32.xlu1 %v15383_v8, %s14217_s23  ;;  %4135 = vst.msk [vmem:[#allocation3 + $0x30] sm:$0xf] %vm4128_vm7, %v4098_v7 }
 0x2f1   : > { %2099 = vrot.lane.b32.xlu2 %v15383_v8, %s14217_s23  ;;  %v15498_v1 = vpop.f32.mrf.mxu1  ;;  %4285 = vrot.lane.b32.xlu0 %v4207_v6, %s14215_s22 }
 0x2f2   : > { %v3130_v59 = vadd.f32 %v15412_v32, %v3111_v58 }
 0x2f4   : > { %v3146_v49 = vmax.f32 %v3130_v59, 0.0 }
 0x2f5   : > { %v4063_v29 = vld [vmem:[#allocation2 + $0x6f] sm:$0xff]  ;;  %v3033_v62 = vpop.f32.mrf.mxu2 }
 0x2f6   : > { %v4425_v15 = vld [vmem:[#allocation2 + $0x71] sm:$0xff]  ;;  %v4424_v51 = vld [vmem:[#allocation2 + $0x69] sm:$0xff]  ;;  %3162 = vst [vmem:[#allocation2 + $0x88] sm:$0xff] %v3146_v49  ;;  %v3083_v61 = vadd.f32 %v15445_v4, %v3033_v62  ;;  %v4099_v21 = vpack.c.bf16 %v4063_v29, %v4063_v29  ;;  %v3087_v4 = vpop.f32.mrf.mxu3  ;;  %v4209_v5 = vpack.c.bf16 %v3146_v49, %v3146_v49  ;;  %v12000_v62 = vld [vmem:[#allocation3 + $0xd8] sm:$0xf0] }
 0x2f7   : > { %v4461_v26 = vpack.c.bf16 %v4425_v15, %v4425_v15  ;;  %v4460_v8 = vpack.c.bf16 %v4424_v51, %v4424_v51  ;;  %v3425_v36 = vpop.f32.mrf.mxu0  ;;  %v13822_v29 = vld [vmem:[#allocation3 + $0xd4] sm:$0xf]  ;;  %v11991_v15 = vor.u32 %v13821_v30, %v11990_v44  ;;  %v13876_v44 = vld [vmem:[%s17761_s1 + $0x1e0] sm:$0xff] }
 0x2f8   : > { %v3112_v10 = vadd.f32 %v3083_v61, %v15333_v27  ;;  %4287 = vrot.lane.b32.xlu1 %v4208_v14, %s14215_s22  ;;  %4136 = vst.msk [vmem:[#allocation3 + $0x38] sm:$0xf] %vm4128_vm7, %v4099_v21  ;;  %v12003_v14 = vor.u32 %v13822_v29, %v12000_v62  ;;  %5090 = vmatpush.bf16.msrb.mxu0 %v13876_v44 }
 0x2f9   : > { %4538 = vrot.lane.b32.xlu2 %v4460_v8, %s14217_s23  ;;  %v3474_v47 = vpop.f32.mrf.mxu1  ;;  %4540 = vrot.lane.b32.xlu0 %v4461_v26, %s14217_s23 }
 0x2fa   : > { %3907 = vmatmul.bf16.gmra.mxu0 %v11983_v39  ;;  %v3131_v45 = vadd.f32 %v15412_v32, %v3112_v10  ;;  %v15515_v48 = vadd.f32 %v3474_v47, %v3425_v36  ;;  %3616 = vmatmul.bf16.gmra.mxu2 %v15318_v46 }
 0x2fc   : > { %v3147_v27 = vmax.f32 %v3131_v45, 0.0  ;;  %12086 = vmatmul.msk.bf16.gmra.mxu1 %vm2494_vm5, %v11995_v38  ;;  %v13823_v38 = vld [vmem:[#allocation3 + $0xd4] sm:$0xf0] }
 0x2fd   : > { %v3036_v43 = vpop.f32.mrf.mxu2  ;;  %v4064_v52 = vld [vmem:[#allocation2 + $0x87] sm:$0xff] }
 0x2fe   : > { %3163 = vst [vmem:[#allocation2 + $0x90] sm:$0xff] %v3147_v27  ;;  %v3086_v41 = vadd.f32 %v3085_v11, %v3036_v43  ;;  %v4210_v40 = vpack.c.bf16 %v3147_v27, %v3147_v27  ;;  %v4100_v17 = vpack.c.bf16 %v4064_v52, %v4064_v52  ;;  %v3090_v19 = vpop.f32.mrf.mxu3 }
 0x2ff   : > { %v15519_v57 = vpop.f32.mrf.mxu0 }
 0x300   : > { %v3113_v31 = vadd.f32 %v3086_v41, %v15351_v34  ;;  %4289 = vrot.lane.b32.xlu1 %v4209_v5, %s14215_s22  ;;  %4137 = vst.msk [vmem:[#allocation3 + $0x40] sm:$0xf] %vm4128_vm7, %v4100_v17 }
 0x301   : > { %4291 = vrot.lane.b32.xlu2 %v4210_v40, %s14215_s22  ;;  %v15525_v46 = vpop.f32.mrf.mxu1  ;;  %v11998_v40 = vld [vmem:[#allocation3 + $0xd0] sm:$0xf] }
 0x302   : > { %v3132_v33 = vadd.f32 %v15412_v32, %v3113_v31 }
 0x304   : > { %v3148_v37 = vmax.f32 %v3132_v33, 0.0 }
 0x305   : > { %v4065_v63 = vld [vmem:[#allocation2 + $0x8f] sm:$0xff]  ;;  %v3038_v25 = vpop.f32.mrf.mxu2 }
 0x306   : > { %v4427_v7 = vld [vmem:[#allocation2 + $0x91] sm:$0xff]  ;;  %v4426_v11 = vld [vmem:[#allocation2 + $0x89] sm:$0xff]  ;;  %3164 = vst [vmem:[#allocation2 + $0xa8] sm:$0xff] %v3148_v37  ;;  %v3088_v34 = vadd.f32 %v3087_v4, %v3038_v25  ;;  %v4211_v59 = vpack.c.bf16 %v3148_v37, %v3148_v37  ;;  %v4101_v51 = vpack.c.bf16 %v4065_v63, %v4065_v63  ;;  %v3092_v22 = vpop.f32.mrf.mxu3  ;;  %v13824_v63 = vld [vmem:[#allocation3 + $0xe4] sm:$0xf] }
 0x307   : > { %v4463_v6 = vpack.c.bf16 %v4427_v7, %v4427_v7  ;;  %v4462_v58 = vpack.c.bf16 %v4426_v11, %v4426_v11  ;;  %v3430_v49 = vpop.f32.mrf.mxu0  ;;  %v12008_v25 = vld [vmem:[#allocation3 + $0xe8] sm:$0xf0]  ;;  %v11999_v7 = vor.u32 %v13823_v38, %v11998_v40  ;;  %v13826_v38 = vld [vmem:[#allocation3 + $0xf4] sm:$0xf]  ;;  %v13854_v40 = vld [vmem:[%s17761_s1 + $0x178] sm:$0xff] }
 0x308   : > { %v3114_v13 = vadd.f32 %v3088_v34, %v15361_v24  ;;  %4138 = vst.msk [vmem:[#allocation3 + $0x48] sm:$0xf] %vm4128_vm7, %v4101_v51  ;;  %v13862_v24 = vld [vmem:[%s17761_s1 + $0x1b0] sm:$0xff]  ;;  %v12011_v18 = vor.u32 %v13824_v63, %v12008_v25  ;;  %4914 = vmatpush.bf16.msra.mxu3 %v13854_v40 }
 0x309   : > { %4544 = vrot.lane.b32.xlu1 %v4463_v6, %s14217_s23  ;;  %4542 = vrot.lane.b32.xlu0 %v4462_v58, %s14217_s23  ;;  %v3479_v61 = vpop.f32.mrf.mxu1 }
 0x30a   : > { %3912 = vmatmul.bf16.gmra.mxu0 %v11991_v15  ;;  %4293 = vrot.lane.b32.xlu2 %v4211_v59, %s14215_s22  ;;  %v3133_v26 = vadd.f32 %v15412_v32, %v3114_v13  ;;  %v15537_v8 = vadd.f32 %v3479_v61, %v3430_v49 }
 0x30b   : > { %3621 = vmatmul.bf16.gmra.mxu2 %v15340_v42 }
 0x30c   : > { %v3149_v36 = vmax.f32 %v3133_v26, 0.0  ;;  %12087 = vmatmul.msk.bf16.gmra.mxu1 %vm2494_vm5, %v12003_v14  ;;  %4820 = vmatpush.bf16.msra.mxu2 %v13862_v24  ;;  %v12006_v24 = vld [vmem:[#allocation3 + $0xe0] sm:$0xf] }
 0x30d   : > { %v3041_v56 = vpop.f32.mrf.mxu2  ;;  %v4066_v39 = vld [vmem:[#allocation2 + $0xa7] sm:$0xff] }
 0x30e   : > { %3165 = vst [vmem:[#allocation2 + $0xb0] sm:$0xff] %v3149_v36  ;;  %v3091_v42 = vadd.f32 %v3090_v19, %v3041_v56  ;;  %v4212_v54 = vpack.c.bf16 %v3149_v36, %v3149_v36  ;;  %v4102_v21 = vpack.c.bf16 %v4066_v39, %v4066_v39  ;;  %v4274_v19 = vpop.permute.xlu2 %4273  ;;  %v3095_v30 = vpop.f32.mrf.mxu3 }
 0x30f   : > { %v15547_v10 = vpop.f32.mrf.mxu0  ;;  %4382 = vst.msk [vmem:[#allocation3] sm:$0xf] %vm4381_vm8, %v4274_v19 }
 0x310   : > { %v3115_v4 = vadd.f32 %v3091_v42, %v15372_v60  ;;  %4139 = vst.msk [vmem:[#allocation3 + $0x50] sm:$0xf] %vm4128_vm7, %v4102_v21  ;;  %v13825_v42 = vld [vmem:[#allocation3 + $0xe4] sm:$0xf0] }
 0x311   : > { %4295 = vrot.lane.b32.xlu0 %v4212_v54, %s14215_s22  ;;  %v15552_v47 = vpop.f32.mrf.mxu1 }
 0x312   : > { %v3134_v45 = vadd.f32 %v15412_v32, %v3115_v4 }
 0x314   : > { %v3150_v27 = vmax.f32 %v3134_v45, 0.0 }
 0x315   : > { %v4067_v43 = vld [vmem:[#allocation2 + $0xaf] sm:$0xff]  ;;  %v3043_v52 = vpop.f32.mrf.mxu2 }
 0x316   : > { %v4429_v41 = vld [vmem:[#allocation2 + $0xb1] sm:$0xff]  ;;  %v4428_v5 = vld [vmem:[#allocation2 + $0xa9] sm:$0xff]  ;;  %3166 = vst [vmem:[#allocation2 + $0xc8] sm:$0xff] %v3150_v27  ;;  %v3093_v17 = vadd.f32 %v3092_v22, %v3043_v52  ;;  %v4213_v33 = vpack.c.bf16 %v3150_v27, %v3150_v27  ;;  %v4103_v11 = vpack.c.bf16 %v4067_v43, %v4067_v43  ;;  %v12016_v27 = vld [vmem:[#allocation3 + $0xf8] sm:$0xf0]  ;;  %v12007_v43 = vor.u32 %v13825_v42, %v12006_v24 }
 0x317   : > { %v4465_v31 = vpack.c.bf16 %v4429_v41, %v4429_v41  ;;  %v4464_v60 = vpack.c.bf16 %v4428_v5, %v4428_v5  ;;  %v3435_v37 = vpop.f32.mrf.mxu0  ;;  %v13861_v5 = vld [vmem:[%s17761_s1 + $0x1a8] sm:$0xff]  ;;  %v13828_v42 = vld [vmem:[#allocation3 + $0x104] sm:$0xf] }
 0x318   : > { %v3116_v34 = vadd.f32 %v3093_v17, %v15380_v23  ;;  %4140 = vst.msk [vmem:[#allocation3 + $0x58] sm:$0xf] %vm4128_vm7, %v4103_v11  ;;  %4821 = vmatpush.bf16.msra.mxu2 %v13861_v5  ;;  %v13852_v5 = vld [vmem:[%s17761_s1 + $0x168] sm:$0xff] }
 0x319   : > { %4548 = vrot.lane.b32.xlu2 %v4465_v31, %s14217_s23  ;;  %4546 = vrot.lane.b32.xlu1 %v4464_v60, %s14217_s23  ;;  %v3484_v6 = vpop.f32.mrf.mxu1 }
 0x31a   : > { %3917 = vmatmul.bf16.gmra.mxu0 %v11999_v7  ;;  %4297 = vrot.lane.b32.xlu0 %v4213_v33, %s14215_s22  ;;  %v3135_v58 = vadd.f32 %v15412_v32, %v3116_v34  ;;  %v15565_v59 = vadd.f32 %v3484_v6, %v3435_v37  ;;  %v12019_v33 = vor.u32 %v13826_v38, %v12016_v27 }
 0x31b   : > { %3626 = vmatmul.bf16.gmra.mxu2 %v15367_v55  ;;  %v3097_v55 = vpop.f32.mrf.mxu3 }
 0x31c   : > { %v3151_v49 = vmax.f32 %v3135_v58, 0.0  ;;  %12088 = vmatmul.msk.bf16.gmra.mxu1 %vm2494_vm5, %v12011_v18 }
 0x31d   : > { %v3046_v23 = vpop.f32.mrf.mxu2  ;;  %v4068_v29 = vld [vmem:[#allocation2 + $0xc7] sm:$0xff] }
 0x31e   : > { %3167 = vst [vmem:[#allocation2 + $0xd0] sm:$0xff] %v3151_v49  ;;  %v3096_v62 = vadd.f32 %v3095_v30, %v3046_v23  ;;  %v4214_v15 = vpack.c.bf16 %v3151_v49, %v3151_v49  ;;  %v4104_v51 = vpack.c.bf16 %v4068_v29, %v4068_v29  ;;  %v4276_v30 = vpop.permute.xlu0 %4275  ;;  %v13827_v49 = vld [vmem:[#allocation3 + $0xf4] sm:$0xf0]  ;;  %v12014_v23 = vld [vmem:[#allocation3 + $0xf0] sm:$0xf] }
 0x31f   : > { %v15569_v13 = vpop.f32.mrf.mxu0  ;;  %4383 = vst.msk [vmem:[#allocation3 + $0x8] sm:$0xf] %vm4381_vm8, %v4276_v30 }
 0x320   : > { %v3117_v61 = vadd.f32 %v3096_v62, %v15400_v16  ;;  %4141 = vst.msk [vmem:[#allocation3 + $0x60] sm:$0xf] %vm4128_vm7, %v4104_v51 }
 0x321   : > { %4299 = vrot.lane.b32.xlu1 %v4214_v15, %s14215_s22  ;;  %v15574_v26 = vpop.f32.mrf.mxu1 }
 0x322   : > { %v3136_v14 = vadd.f32 %v15412_v32, %v3117_v61 }
 0x323   : > { %v3100_v44 = vpop.f32.mrf.mxu3 }
 0x324   : > { %v3152_v50 = vmax.f32 %v3136_v14, 0.0 }
 0x325   : > { %v4069_v36 = vld [vmem:[#allocation2 + $0xcf] sm:$0xff]  ;;  %v3048_v22 = vpop.f32.mrf.mxu2 }
 0x326   : > { %v4431_v56 = vld [vmem:[#allocation2 + $0xd1] sm:$0xff]  ;;  %v4430_v39 = vld [vmem:[#allocation2 + $0xc9] sm:$0xff]  ;;  %3168 = vst [vmem:[#allocation2 + $0xe8] sm:$0xff] %v3152_v50  ;;  %v3098_v54 = vadd.f32 %v3097_v55, %v3048_v22  ;;  %v4215_v4 = vpack.c.bf16 %v3152_v50, %v3152_v50  ;;  %v4105_v52 = vpack.c.bf16 %v4069_v36, %v4069_v36  ;;  %v13860_v22 = vld [vmem:[%s17761_s1 + $0x1a0] sm:$0xff] }
 0x327   : > { %v4467_v21 = vpack.c.bf16 %v4431_v56, %v4431_v56  ;;  %v4466_v16 = vpack.c.bf16 %v4430_v39, %v4430_v39  ;;  %v3440_v45 = vpop.f32.mrf.mxu0  ;;  %v13853_v56 = vld [vmem:[%s17761_s1 + $0x170] sm:$0xff]  ;;  %4822 = vmatpush.bf16.msra.mxu2 %v13860_v22 }
 0x328   : > { %v3118_v41 = vadd.f32 %v3098_v54, %v15416_v35  ;;  %v13875_v35 = vld [vmem:[%s17761_s1 + $0x1d8] sm:$0xff]  ;;  %4142 = vst.msk [vmem:[#allocation3 + $0x68] sm:$0xf] %vm4128_vm7, %v4105_v52  ;;  %v12024_v54 = vld [vmem:[#allocation3 + $0x108] sm:$0xf0]  ;;  %4915 = vmatpush.bf16.msra.mxu3 %v13853_v56 }
 0x329   : > { %4552 = vrot.lane.b32.xlu0 %v4467_v21, %s14217_s23  ;;  %4550 = vrot.lane.b32.xlu2 %v4466_v16, %s14217_s23  ;;  %v3489_v17 = vpop.f32.mrf.mxu1  ;;  %v12015_v21 = vor.u32 %v13827_v49, %v12014_v23  ;;  %v4091_v56 = vld [vmem:[#allocation2 + $0x22f] sm:$0xff] }
 0x32a   : > { %3922 = vmatmul.bf16.gmra.mxu0 %v12007_v43  ;;  %4301 = vrot.lane.b32.xlu1 %v4215_v4, %s14215_s22  ;;  %v3137_v31 = vadd.f32 %v15412_v32, %v3118_v41  ;;  %v15592_v60 = vadd.f32 %v3489_v17, %v3440_v45  ;;  %v4280_v19 = vpop.permute.xlu2 %4279  ;;  %v12027_v43 = vor.u32 %v13828_v42, %v12024_v54  ;;  %v13874_v41 = vld [vmem:[%s17761_s1 + $0x1d0] sm:$0xff] }
 0x32b   : > { %3631 = vmatmul.bf16.gmra.mxu2 %v15386_v28  ;;  %4385 = vst.msk [vmem:[#allocation3 + $0x18] sm:$0xf] %vm4381_vm8, %v4280_v19  ;;  %5091 = vmatpush.bf16.msrb.mxu0 %v13875_v35  ;;  %v3102_v15 = vpop.f32.mrf.mxu3  ;;  %v4127_v42 = vpack.c.bf16 %v4091_v56, %v4091_v56 }
 0x32c   : > { %v3153_v37 = vmax.f32 %v3137_v31, 0.0  ;;  %12089 = vmatmul.msk.bf16.gmra.mxu1 %vm2494_vm5, %v12019_v33  ;;  %4916 = vmatpush.bf16.msra.mxu3 %v13852_v5 }
 0x32d   : > { %v3051_v63 = vpop.f32.mrf.mxu2  ;;  %v4070_v25 = vld [vmem:[#allocation2 + $0xe7] sm:$0xff] }
 0x32e   : > { %3169 = vst [vmem:[#allocation2 + $0xf0] sm:$0xff] %v3153_v37  ;;  %v3101_v7 = vadd.f32 %v3100_v44, %v3051_v63  ;;  %v4216_v11 = vpack.c.bf16 %v3153_v37, %v3153_v37  ;;  %v4106_v28 = vpack.c.bf16 %v4070_v25, %v4070_v25  ;;  %v1846_v37 = vld [vmem:[#allocation2 + $0x227] sm:$0xff] }
 0x32f   : > { %v15598_v34 = vpop.f32.mrf.mxu0  ;;  %5092 = vmatpush.bf16.msrb.mxu0 %v13874_v41  ;;  %v13829_v63 = vld [vmem:[#allocation3 + $0x104] sm:$0xf0]  ;;  %v15640_v25 = vpack.c.bf16 %v1846_v37, %v1846_v37 }
 0x330   : > { %v3119_v6 = vadd.f32 %v3101_v7, %v15429_v20  ;;  %4143 = vst.msk [vmem:[#allocation3 + $0x70] sm:$0xf] %vm4128_vm7, %v4106_v28 }
 0x331   : > { %4303 = vrot.lane.b32.xlu2 %v4216_v11, %s14215_s22  ;;  %v15603_v58 = vpop.f32.mrf.mxu1  ;;  %1919 = vst.msk [vmem:[#allocation3 + $0x110] sm:$0xf] %vm1884_vm3, %v15640_v25 }
 0x332   : > { %v3138_v18 = vadd.f32 %v15412_v32, %v3119_v6  ;;  %v12022_v6 = vld [vmem:[#allocation3 + $0x100] sm:$0xf] }
 0x333   : > { %v15636_v19 = vpop.f32.mrf.mxu3 }
 0x334   : > { %v3154_v29 = vmax.f32 %v3138_v18, 0.0  ;;  %v4529_v62 = vpop.permute.xlu2 %4528 }
 0x335   : > { %v4071_v51 = vld [vmem:[#allocation2 + $0xef] sm:$0xff]  ;;  %v3053_v61 = vpop.f32.mrf.mxu2  ;;  %4636 = vst.msk [vmem:[#allocation3 + $0x8] sm:$0xf] %vm4634_vm9, %v4529_v62 }
 0x336   : > { %v4433_v55 = vld [vmem:[#allocation2 + $0xf1] sm:$0xff]  ;;  %v4432_v14 = vld [vmem:[#allocation2 + $0xe9] sm:$0xff]  ;;  %3170 = vst [vmem:[#allocation2 + $0x108] sm:$0xff] %v3154_v29  ;;  %v3103_v20 = vadd.f32 %v3102_v15, %v3053_v61  ;;  %v4217_v36 = vpack.c.bf16 %v3154_v29, %v3154_v29  ;;  %v4107_v16 = vpack.c.bf16 %v4071_v51, %v4071_v51  ;;  %v12023_v29 = vor.u32 %v13829_v63, %v12022_v6 }
 0x337   : > { %v4469_v24 = vpack.c.bf16 %v4433_v55, %v4433_v55  ;;  %v4468_v50 = vpack.c.bf16 %v4432_v14, %v4432_v14  ;;  %v3445_v39 = vpop.f32.mrf.mxu0 }
 0x338   : > { %v3120_v4 = vadd.f32 %v3103_v20, %v15442_v53  ;;  %4144 = vst.msk [vmem:[#allocation3 + $0x78] sm:$0xf] %vm4128_vm7, %v4107_v16  ;;  %v13859_v53 = vld [vmem:[%s17761_s1 + $0x198] sm:$0xff]  ;;  %v2208_v20 = vld [vmem:[#allocation2 + $0x229] sm:$0xff] }
 0x339   : > { %4556 = vrot.lane.b32.xlu1 %v4469_v24, %s14217_s23  ;;  %4554 = vrot.lane.b32.xlu0 %v4468_v50, %s14217_s23  ;;  %v3494_v45 = vpop.f32.mrf.mxu1  ;;  %v2209_v24 = vld [vmem:[#allocation2 + $0x231] sm:$0xff]  ;;  %v15653_v50 = vpack.c.bf16 %v2208_v20, %v2208_v20 }
 0x33a   : > { %3927 = vmatmul.bf16.gmra.mxu0 %v12015_v21  ;;  %4305 = vrot.lane.b32.xlu2 %v4217_v36, %s14215_s22  ;;  %v3139_v38 = vadd.f32 %v15412_v32, %v3120_v4  ;;  %v15619_v27 = vadd.f32 %v3494_v45, %v3445_v39  ;;  %v4278_v52 = vpop.permute.xlu1 %4277  ;;  %v15655_v36 = vpack.c.bf16 %v2209_v24, %v2209_v24  ;;  %v13873_v39 = vld [vmem:[%s17761_s1 + $0x1c8] sm:$0xff] }
 0x33b   : > { %4384 = vst.msk [vmem:[#allocation3 + $0x10] sm:$0xf] %vm4381_vm8, %v4278_v52  ;;  %4823 = vmatpush.bf16.msra.mxu2 %v13859_v53  ;;  %v15649_v55 = vpop.f32.mrf.mxu3  ;;  %5093 = vmatpush.bf16.msrb.mxu0 %v13873_v39  ;;  %v5729_v53 = vld [vmem:[#allocation2 + $0x7] sm:$0xff] }
 0x33c   : > { %v3155_v40 = vmax.f32 %v3139_v38, 0.0  ;;  %12090 = vmatmul.msk.bf16.gmra.mxu1 %vm2494_vm5, %v12027_v43  ;;  %2280 = vst.msk [vmem:[#allocation3 + $0x114] sm:$0xf] %vm1884_vm3, %v15653_v50 }
 0x33d   : > { %v4072_v17 = vld [vmem:[#allocation2 + $0x107] sm:$0xff]  ;;  %v15632_v33 = vpop.f32.mrf.mxu2  ;;  %2281 = vst.msk [vmem:[#allocation3 + $0x11c] sm:$0xf] %vm1884_vm3, %v15655_v36 }
 0x33e   : > { %v4108_v35 = vpack.c.bf16 %v4072_v17, %v4072_v17  ;;  %3171 = vst [vmem:[#allocation2 + $0x110] sm:$0xff] %v3155_v40  ;;  %v4218_v31 = vpack.c.bf16 %v3155_v40, %v3155_v40 }
 0x33f   : > { %v15658_v22 = vpop.f32.mrf.mxu0 }
 0x340   : > { %4145 = vst.msk [vmem:[#allocation3 + $0x80] sm:$0xf] %vm4128_vm7, %v4108_v35 }
 0x341   : > { %4307 = vrot.lane.b32.xlu0 %v4218_v31, %s14215_s22  ;;  %v15638_v44 = vpop.f32.mrf.mxu1  ;;  %v5765_v31 = vpack.c.bf16 %v5729_v53, %v5729_v53 }
 0x343   : > { %v4535_v30 = vpop.permute.xlu2 %4534  ;;  %v15675_v5 = vpop.f32.mrf.mxu3  ;;  %v13830_v40 = vld [vmem:[#allocation3 + $0x114] sm:$0xf] }
 0x344   : > { %v12032_v35 = vld [vmem:[#allocation3 + $0x118] sm:$0xf0]  ;;  %9385 = vst.msk [vmem:[#allocation3 + $0x114] sm:$0xf] %vm1884_vm3, %v15653_v50 }
 0x345   : > { %v4073_v7 = vld [vmem:[#allocation2 + $0x10f] sm:$0xff]  ;;  %v15647_v62 = vpop.f32.mrf.mxu2  ;;  %v12035_v63 = vor.u32 %v13830_v40, %v12032_v35  ;;  %9386 = vst.msk [vmem:[#allocation3 + $0x11c] sm:$0xf] %vm1884_vm3, %v15655_v36 }
 0x346   : > { %v4435_v11 = vld [vmem:[#allocation2 + $0x111] sm:$0xff]  ;;  %v4434_v28 = vld [vmem:[#allocation2 + $0x109] sm:$0xff]  ;;  %v4109_v18 = vpack.c.bf16 %v4073_v7, %v4073_v7 }
 0x347   : > { %v4471_v49 = vpack.c.bf16 %v4435_v11, %v4435_v11  ;;  %v4470_v23 = vpack.c.bf16 %v4434_v28, %v4434_v28  ;;  %v13844_v7 = vld [vmem:[#allocation3 + $0x4] sm:$0xf0] }
 0x348   : > { %4146 = vst.msk [vmem:[#allocation3 + $0x88] sm:$0xf] %vm4128_vm7, %v4109_v18 }
 0x349   : > { %4560 = vrot.lane.b32.xlu2 %v4471_v49, %s14217_s23  ;;  %4558 = vrot.lane.b32.xlu1 %v4470_v23, %s14217_s23  ;;  %v3499_v15 = vpop.f32.mrf.mxu1 }
 0x34a   : > { %3932 = vmatmul.bf16.gmra.mxu0 %v12023_v29  ;;  %v4533_v51 = vpop.permute.xlu1 %4532  ;;  %v4531_v14 = vpop.permute.xlu0 %4530 }
 0x34b   : > { %v2100_v61 = vpop.permute.xlu2 %2099  ;;  %4638 = vst.msk [vmem:[#allocation3 + $0x18] sm:$0xf] %vm4634_vm9, %v4533_v51 }
 0x34c   : > { %4637 = vst.msk [vmem:[#allocation3 + $0x10] sm:$0xf] %vm4634_vm9, %v4531_v14  ;;  %12091 = vmatmul.msk.bf16.gmra.mxu1 %vm2494_vm5, %v12035_v63  ;;  %v3598_v14 = vadd.f32 %v15632_v33, %v15454_v3 }
 0x34d   : > { %2173 = vst.msk [vmem:[#allocation3 + $0x118] sm:$0xf] %vm2137_vm6, %v2100_v61  ;;  %v15672_v52 = vpop.f32.mrf.mxu2 }
 0x351   : > { %v15667_v54 = vpop.f32.mrf.mxu1 }
 0x352   : > { %v4527_v21 = vpop.permute.xlu1 %4526  ;;  %v13845_v4 = vld [vmem:[#allocation3 + $0x14] sm:$0xf0]  ;;  %v4282_v45 = vpop.permute.xlu0 %4281 }
 0x353   : > { %v4539_v16 = vpop.permute.xlu2 %4538  ;;  %4635 = vst.msk [vmem:[#allocation3] sm:$0xf] %vm4634_vm9, %v4527_v21  ;;  %v12095_v38 = vld [vmem:[#allocation3 + $0x10] sm:$0xf] }
 0x354   : > { %v15670_v43 = vld [vmem:[#allocation3 + $0x114] sm:$0xf0]  ;;  %4386 = vst.msk [vmem:[#allocation3 + $0x20] sm:$0xf] %vm4381_vm8, %v4282_v45  ;;  %v12096_v41 = vor.u32 %v13845_v4, %v12095_v38  ;;  %v3647_v4 = vadd.f32 %v15636_v19, %v3598_v14  ;;  %v3467_v45 = vadd.f32 %v15465_v2, %v15460_v9 }
 0x355   : > { %4164 = vst.msk [vmem:[#allocation3 + $0x118] sm:$0xf] %vm4128_vm7, %v4127_v42  ;;  %v15691_v23 = vpop.f32.mrf.mxu2 }
 0x356   : > { %4639 = vst.msk [vmem:[#allocation3 + $0x20] sm:$0xf] %vm4634_vm9, %v4535_v30  ;;  %12149 = vmatmul.msk.bf16.vlgmr.msra.gmra.mxu2 %vm4791_vm10, %v12096_v41  ;;  %v3450_v17 = vpop.f32.mrf.mxu0  ;;  %v3600_v35 = vadd.f32 %v15647_v62, %v3467_v45 }
 0x357   : > { %v15680_v37 = vadd.f32 %v3499_v15, %v3450_v17  ;;  %v15696_v15 = vpop.f32.mrf.mxu3 }
 0x359   : > { %v3952_v11 = vpop.f32.mrf.mxu1 }
 0x35a   : > { %v12159_v28 = vld [vmem:[#allocation3] sm:$0xf]  ;;  %v4284_v30 = vpop.permute.xlu1 %4283 }
 0x35b   : > { %v4292_v6 = vpop.permute.xlu2 %4291  ;;  %5801 = vst.msk [vmem:[#allocation3] sm:$0xf] %vm356_vm0, %v5765_v31  ;;  %v4537_v18 = vpop.permute.xlu0 %4536  ;;  %v12160_v49 = vor.u32 %v13844_v7, %v12159_v28  ;;  %v3649_v7 = vadd.f32 %v15649_v55, %v3600_v35  ;;  %v15735_v55 = vld [vmem:[%s17762_s2 + $0x1] ss:$0 sm:$0xff] }
 0x35c   : > { %4387 = vst.msk [vmem:[#allocation3 + $0x28] sm:$0xf] %vm4381_vm8, %v4284_v30 }
 0x35d   : > { %4640 = vst.msk [vmem:[#allocation3 + $0x28] sm:$0xf] %vm4634_vm9, %v4537_v18  ;;  %12185 = vmatmul.msk.bf16.vlgmr.msra.gmra.mxu3 %vm4791_vm10, %v12160_v49  ;;  %v12099_v24 = vld [vmem:[#allocation3 + $0x20] sm:$0xf]  ;;  %v15709_v33 = vpop.f32.mrf.mxu2 }
 0x35e   : > { %4391 = vst.msk [vmem:[#allocation3 + $0x48] sm:$0xf] %vm4381_vm8, %v4292_v6  ;;  %v15694_v29 = vpop.f32.mrf.mxu0 }
 0x35f   : > { %v15713_v38 = vpop.f32.mrf.mxu3 }
 0x361   : > { %v3954_v51 = vpop.f32.mrf.mxu1 }
 0x362   : > { %v2098_v61 = vpop.permute.xlu1 %2097 }
 0x363   : > { %2172 = vst.msk [vmem:[#allocation3 + $0x110] sm:$0xf] %vm2137_vm6, %v2098_v61  ;;  %v4286_v20 = vpop.permute.xlu0 %4285 }
 0x364   : > { %4388 = vst.msk [vmem:[#allocation3 + $0x30] sm:$0xf] %vm4381_vm8, %v4286_v20  ;;  %v13846_v56 = vld [vmem:[#allocation3 + $0x24] sm:$0xf0]  ;;  %v4294_v39 = vpop.permute.xlu2 %4293 }
 0x365   : > { %4641 = vst.msk [vmem:[#allocation3 + $0x30] sm:$0xf] %vm4634_vm9, %v4539_v16  ;;  %v15703_v42 = vor.u32 %v13846_v56, %v12099_v24 }
 0x366   : > { %4392 = vst.msk [vmem:[#allocation3 + $0x50] sm:$0xf] %vm4381_vm8, %v4294_v39  ;;  %v3472_v39 = vadd.f32 %v15498_v1, %v15490_v12 }
 0x367   : > { %v3903_v21 = vpop.f32.mrf.mxu0  ;;  %12150 = vmatmul.msk.bf16.gmra.mxu2 %vm4791_vm10, %v15703_v42  ;;  %v15729_v6 = vpop.f32.mrf.mxu3 }
 0x368   : > { %v3953_v3 = vadd.f32 %v3952_v11, %v3903_v21  ;;  %v13865_v21 = vld [vmem:[#allocation3 + $0x24] sm:$0xf0] }
 0x369   : > { %v3957_v53 = vpop.f32.mrf.mxu1 }
 0x36a   : > { %v3992_v16 = vadd.f32 %v3953_v3, %v3647_v4  ;;  %v12030_v40 = vld [vmem:[#allocation3 + $0x110] sm:$0xf]  ;;  %v4288_v17 = vpop.permute.xlu1 %4287 }
 0x36b   : > { %4163 = vst.msk [vmem:[#allocation3 + $0x110] sm:$0xf] %vm4128_vm7, %v15640_v25  ;;  %v4541_v19 = vpop.permute.xlu0 %4540  ;;  %v12031_v63 = vor.u32 %v15670_v43, %v12030_v40  ;;  %v15727_v43 = vpop.f32.mrf.mxu2 }
 0x36c   : > { %v4008_v31 = vadd.f32 %v15412_v32, %v3992_v16  ;;  %4389 = vst.msk [vmem:[#allocation3 + $0x38] sm:$0xf] %vm4381_vm8, %v4288_v17  ;;  %v3603_v32 = vadd.f32 %v15672_v52, %v15485_v0  ;;  %v12103_v18 = vld [vmem:[#allocation3 + $0x30] sm:$0xf]  ;;  %v12195_v17 = vld [vmem:[#allocation3 + $0x20] sm:$0xf] }
 0x36d   : > { %4642 = vst.msk [vmem:[#allocation3 + $0x38] sm:$0xf] %vm4634_vm9, %v4541_v19  ;;  %3937 = vmatmul.bf16.gmra.mxu0 %v12031_v63  ;;  %12186 = vmatmul.msk.bf16.gmra.mxu3 %vm4791_vm10, %v12096_v41  ;;  %v12196_v35 = vor.u32 %v13865_v21, %v12195_v17 }
 0x36e   : > { %v4024_v9 = vmax.f32 %v4008_v31, 0.0  ;;  %v3652_v0 = vadd.f32 %v15675_v5, %v3603_v32  ;;  %v3605_v5 = vadd.f32 %v15691_v23, %v3472_v39  ;;  %v13892_v32 = vld [vmem:[%s17761_s1 + $0x190] sm:$0xff] }
 0x36f   : > { %v3905_v2 = vpop.f32.mrf.mxu0  ;;  %v15753_v12 = vpop.f32.mrf.mxu3  ;;  %5440 = vmatpush.bf16.msrb.mxu2 %v13892_v32 }
 0x370   : > { %4040 = vst [vmem:[#allocation2 + $0x128] sm:$0xff] %v4024_v9  ;;  %v3955_v62 = vadd.f32 %v3954_v51, %v3905_v2  ;;  %v4219_v11 = vpack.c.bf16 %v4024_v9, %v4024_v9  ;;  %v3654_v23 = vadd.f32 %v15696_v15, %v3605_v5  ;;  %v13899_v15 = vld [vmem:[%s17761_s1 + $0x1c0] sm:$0xff] }
 0x371   : > { %v3959_v25 = vpop.f32.mrf.mxu1  ;;  %5347 = vmatpush.bf16.msrb.mxu1 %v13899_v15 }
 0x372   : > { %v3993_v28 = vadd.f32 %v3955_v62, %v3649_v7  ;;  %4309 = vrot.lane.b32.xlu0 %v4219_v11, %s14215_s22  ;;  %v4290_v30 = vpop.permute.xlu1 %4289 }
 0x373   : > { %4390 = vst.msk [vmem:[#allocation3 + $0x40] sm:$0xf] %vm4381_vm8, %v4290_v30  ;;  %v4549_v4 = vpop.permute.xlu2 %4548  ;;  %v15750_v19 = vpop.f32.mrf.mxu2 }
 0x374   : > { %v4009_v41 = vadd.f32 %v15735_v55, %v3993_v28  ;;  %v13847_v49 = vld [vmem:[#allocation3 + $0x34] sm:$0xf0] }
 0x375   : > { %v15738_v61 = vor.u32 %v13847_v49, %v12103_v18 }
 0x376   : > { %v4025_v51 = vmax.f32 %v4009_v41, 0.0 }
 0x377   : > { %v3908_v52 = vpop.f32.mrf.mxu0  ;;  %v4074_v14 = vld [vmem:[#allocation2 + $0x127] sm:$0xff]  ;;  %12151 = vmatmul.msk.bf16.gmra.mxu2 %vm4791_vm10, %v15738_v61  ;;  %v15782_v21 = vpop.f32.mrf.mxu3 }
 0x378   : > { %4041 = vst [vmem:[#allocation2 + $0x130] sm:$0xff] %v4025_v51  ;;  %v3958_v20 = vadd.f32 %v3957_v53, %v3908_v52  ;;  %v4220_v24 = vpack.c.bf16 %v4025_v51, %v4025_v51  ;;  %v4110_v56 = vpack.c.bf16 %v4074_v14, %v4074_v14 }
 0x379   : > { %v3962_v3 = vpop.f32.mrf.mxu1 }
 0x37a   : > { %v3994_v45 = vadd.f32 %v3958_v20, %v3652_v0  ;;  %4311 = vrot.lane.b32.xlu1 %v4220_v24, %s14215_s22  ;;  %4147 = vst.msk [vmem:[#allocation3 + $0x90] sm:$0xf] %vm4128_vm7, %v4110_v56 }
 0x37b   : > { %v4545_v16 = vpop.permute.xlu1 %4544  ;;  %v4543_v40 = vpop.permute.xlu0 %4542 }
 0x37c   : > { %4644 = vst.msk [vmem:[#allocation3 + $0x48] sm:$0xf] %vm4634_vm9, %v4545_v16  ;;  %v4010_v53 = vadd.f32 %v15735_v55, %v3994_v45  ;;  %v15780_v24 = vpop.f32.mrf.mxu2 }
 0x37d   : > { %4643 = vst.msk [vmem:[#allocation3 + $0x40] sm:$0xf] %vm4634_vm9, %v4543_v40  ;;  %12187 = vmatmul.msk.bf16.gmra.mxu3 %vm4791_vm10, %v15703_v42  ;;  %12249 = vmatmul.msk.bf16.vlgmr.msrb.gmra.mxu0 %vm4791_vm10, %v12196_v35  ;;  %v13913_v42 = vld [vmem:[%s17761_s1 + $0x1f0] sm:$0xff]  ;;  %v3477_v40 = vadd.f32 %v15525_v46, %v15519_v57 }
 0x37e   : > { %v4026_v1 = vmax.f32 %v4010_v53, 0.0  ;;  %5617 = vmatpush.bf16.msrb.mxu3 %v13913_v42 }
 0x37f   : > { %v4075_v31 = vld [vmem:[#allocation2 + $0x12f] sm:$0xff]  ;;  %v3910_v63 = vpop.f32.mrf.mxu0 }
 0x380   : > { %v4436_v9 = vld [vmem:[#allocation2 + $0x129] sm:$0xff]  ;;  %v4437_v2 = vld [vmem:[#allocation2 + $0x131] sm:$0xff]  ;;  %4042 = vst [vmem:[#allocation2 + $0x148] sm:$0xff] %v4026_v1  ;;  %v3960_v7 = vadd.f32 %v3959_v25, %v3910_v63  ;;  %v4221_v28 = vpack.c.bf16 %v4026_v1, %v4026_v1  ;;  %v4111_v30 = vpack.c.bf16 %v4075_v31, %v4075_v31  ;;  %v3608_v25 = vadd.f32 %v15709_v33, %v15515_v48 }
 0x381   : > { %v4472_v62 = vpack.c.bf16 %v4436_v9, %v4436_v9  ;;  %v4473_v11 = vpack.c.bf16 %v4437_v2, %v4437_v2  ;;  %v3964_v41 = vpop.f32.mrf.mxu1  ;;  %v12199_v1 = vld [vmem:[#allocation3 + $0x30] sm:$0xf] }
 0x382   : > { %v3995_v18 = vadd.f32 %v3960_v7, %v3654_v23  ;;  %4313 = vrot.lane.b32.xlu1 %v4221_v28, %s14215_s22  ;;  %4148 = vst.msk [vmem:[#allocation3 + $0x98] sm:$0xf] %vm4128_vm7, %v4111_v30  ;;  %v3657_v33 = vadd.f32 %v15713_v38, %v3608_v25  ;;  %v3610_v38 = vadd.f32 %v15727_v43, %v3477_v40  ;;  %v15808_v30 = vpop.f32.mrf.mxu3 }
 0x383   : > { %4562 = vrot.lane.b32.xlu2 %v4472_v62, %s14217_s23  ;;  %4564 = vrot.lane.b32.xlu0 %v4473_v11, %s14217_s23  ;;  %v4551_v49 = vpop.permute.xlu2 %4550  ;;  %v13848_v51 = vld [vmem:[#allocation3 + $0x44] sm:$0xf0]  ;;  %v4296_v0 = vpop.permute.xlu0 %4295  ;;  %v3613_v25 = vadd.f32 %v15750_v19, %v15537_v8  ;;  %v3482_v40 = vadd.f32 %v15552_v47, %v15547_v10 }
 0x384   : > { %v4011_v52 = vadd.f32 %v15735_v55, %v3995_v18  ;;  %v12107_v14 = vld [vmem:[#allocation3 + $0x40] sm:$0xf]  ;;  %4393 = vst.msk [vmem:[#allocation3 + $0x58] sm:$0xf] %vm4381_vm8, %v4296_v0  ;;  %v3659_v46 = vadd.f32 %v15729_v6, %v3610_v38  ;;  %v15803_v42 = vpop.f32.mrf.mxu2  ;;  %v13912_v6 = vld [vmem:[%s17761_s1 + $0x1e8] sm:$0xff] }
 0x385   : > { %v15776_v20 = vor.u32 %v13848_v51, %v12107_v14  ;;  %4646 = vst.msk [vmem:[#allocation3 + $0x58] sm:$0xf] %vm4634_vm9, %v4549_v4  ;;  %v13866_v4 = vld [vmem:[#allocation3 + $0x34] sm:$0xf0]  ;;  %5618 = vmatpush.bf16.msrb.mxu3 %v13912_v6  ;;  %v3662_v19 = vadd.f32 %v15753_v12, %v3613_v25  ;;  %v3615_v12 = vadd.f32 %v15780_v24, %v3482_v40 }
 0x386   : > { %v4027_v48 = vmax.f32 %v4011_v52, 0.0  ;;  %v12200_v31 = vor.u32 %v13866_v4, %v12199_v1  ;;  %v12203_v4 = vld [vmem:[#allocation3 + $0x40] sm:$0xf] }
 0x387   : > { %v3913_v56 = vpop.f32.mrf.mxu0  ;;  %v4076_v39 = vld [vmem:[#allocation2 + $0x147] sm:$0xff]  ;;  %12152 = vmatmul.msk.bf16.gmra.mxu2 %vm4791_vm10, %v15776_v20  ;;  %v3664_v47 = vadd.f32 %v15782_v21, %v3615_v12  ;;  %v3618_v21 = vadd.f32 %v15803_v42, %v15565_v59 }
 0x388   : > { %4043 = vst [vmem:[#allocation2 + $0x150] sm:$0xff] %v4027_v48  ;;  %v3963_v45 = vadd.f32 %v3962_v3, %v3913_v56  ;;  %v4222_v5 = vpack.c.bf16 %v4027_v48, %v4027_v48  ;;  %v4112_v16 = vpack.c.bf16 %v4076_v39, %v4076_v39 }
 0x389   : > { %v3967_v17 = vpop.f32.mrf.mxu1 }
 0x38a   : > { %v3996_v53 = vadd.f32 %v3963_v45, %v3657_v33  ;;  %4149 = vst.msk [vmem:[#allocation3 + $0xa0] sm:$0xf] %vm4128_vm7, %v4112_v16 }
 0x38b   : > { %4315 = vrot.lane.b32.xlu2 %v4222_v5, %s14215_s22  ;;  %v4547_v35 = vpop.permute.xlu1 %4546  ;;  %v4304_v23 = vpop.permute.xlu2 %4303 }
 0x38c   : > { %4645 = vst.msk [vmem:[#allocation3 + $0x50] sm:$0xf] %vm4634_vm9, %v4547_v35  ;;  %v4012_v3 = vadd.f32 %v15735_v55, %v3996_v53  ;;  %v4298_v63 = vpop.permute.xlu0 %4297  ;;  %v13849_v0 = vld [vmem:[#allocation3 + $0x54] sm:$0xf0]  ;;  %v13867_v53 = vld [vmem:[#allocation3 + $0x44] sm:$0xf0]  ;;  %v3619_v35 = vpop.f32.mrf.mxu2 }
 0x38d   : > { %4394 = vst.msk [vmem:[#allocation3 + $0x60] sm:$0xf] %vm4381_vm8, %v4298_v63  ;;  %12188 = vmatmul.msk.bf16.gmra.mxu3 %vm4791_vm10, %v15738_v61  ;;  %12250 = vmatmul.msk.bf16.gmra.mxu0 %vm4791_vm10, %v12200_v31  ;;  %v13891_v61 = vld [vmem:[%s17761_s1 + $0x188] sm:$0xff] }
 0x38e   : > { %v4028_v57 = vmax.f32 %v4012_v3, 0.0  ;;  %4647 = vst.msk [vmem:[#allocation3 + $0x60] sm:$0xf] %vm4634_vm9, %v4551_v49  ;;  %5441 = vmatpush.bf16.msrb.mxu2 %v13891_v61  ;;  %v12204_v3 = vor.u32 %v13867_v53, %v12203_v4 }
 0x38f   : > { %v4077_v43 = vld [vmem:[#allocation2 + $0x14f] sm:$0xff]  ;;  %4397 = vst.msk [vmem:[#allocation3 + $0x78] sm:$0xf] %vm4381_vm8, %v4304_v23  ;;  %v3915_v9 = vpop.f32.mrf.mxu0  ;;  %v3668_v23 = vpop.f32.mrf.mxu3 }
 0x390   : > { %v4439_v2 = vld [vmem:[#allocation2 + $0x151] sm:$0xff]  ;;  %v4438_v7 = vld [vmem:[#allocation2 + $0x149] sm:$0xff]  ;;  %4044 = vst [vmem:[#allocation2 + $0x168] sm:$0xff] %v4028_v57  ;;  %v3965_v62 = vadd.f32 %v3964_v41, %v3915_v9  ;;  %v4223_v32 = vpack.c.bf16 %v4028_v57, %v4028_v57  ;;  %v4113_v15 = vpack.c.bf16 %v4077_v43, %v4077_v43 }
 0x391   : > { %v4475_v11 = vpack.c.bf16 %v4439_v2, %v4439_v2  ;;  %v4474_v28 = vpack.c.bf16 %v4438_v7, %v4438_v7  ;;  %v13898_v41 = vld [vmem:[%s17761_s1 + $0x1b8] sm:$0xff]  ;;  %v3969_v49 = vpop.f32.mrf.mxu1 }
 0x392   : > { %v3997_v18 = vadd.f32 %v3965_v62, %v3659_v46  ;;  %4150 = vst.msk [vmem:[#allocation3 + $0xa8] sm:$0xf] %vm4128_vm7, %v4113_v15  ;;  %5348 = vmatpush.bf16.msrb.mxu1 %v13898_v41 }
 0x393   : > { %4568 = vrot.lane.b32.xlu1 %v4475_v11, %s14217_s23  ;;  %4566 = vrot.lane.b32.xlu0 %v4474_v28, %s14217_s23  ;;  %v12111_v51 = vld [vmem:[#allocation3 + $0x50] sm:$0xf]  ;;  %v4300_v52 = vpop.permute.xlu1 %4299 }
 0x394   : > { %4317 = vrot.lane.b32.xlu2 %v4223_v32, %s14215_s22  ;;  %v4013_v14 = vadd.f32 %v15735_v55, %v3997_v18  ;;  %v15820_v48 = vor.u32 %v13849_v0, %v12111_v51  ;;  %4395 = vst.msk [vmem:[#allocation3 + $0x68] sm:$0xf] %vm4381_vm8, %v4300_v52  ;;  %v4306_v33 = vpop.permute.xlu2 %4305  ;;  %v3622_v18 = vpop.f32.mrf.mxu2 }
 0x395   : > { %4398 = vst.msk [vmem:[#allocation3 + $0x80] sm:$0xf] %vm4381_vm8, %v4306_v33  ;;  %v12115_v32 = vld [vmem:[#allocation3 + $0x60] sm:$0xf]  ;;  %v3487_v33 = vadd.f32 %v15574_v26, %v15569_v13 }
 0x396   : > { %v4029_v8 = vmax.f32 %v4013_v14, 0.0 }
 0x397   : > { %v3918_v56 = vpop.f32.mrf.mxu0  ;;  %v4078_v39 = vld [vmem:[#allocation2 + $0x167] sm:$0xff]  ;;  %12153 = vmatmul.msk.bf16.gmra.mxu2 %vm4791_vm10, %v15820_v48  ;;  %v15851_v41 = vpop.f32.mrf.mxu3 }
 0x398   : > { %4045 = vst [vmem:[#allocation2 + $0x170] sm:$0xff] %v4029_v8  ;;  %v3968_v45 = vadd.f32 %v3967_v17, %v3918_v56  ;;  %v4224_v5 = vpack.c.bf16 %v4029_v8, %v4029_v8  ;;  %v4114_v16 = vpack.c.bf16 %v4078_v39, %v4078_v39  ;;  %v12207_v8 = vld [vmem:[#allocation3 + $0x50] sm:$0xf] }
 0x399   : > { %v3972_v63 = vpop.f32.mrf.mxu1 }
 0x39a   : > { %v3998_v38 = vadd.f32 %v3968_v45, %v3662_v19  ;;  %4151 = vst.msk [vmem:[#allocation3 + $0xb0] sm:$0xf] %vm4128_vm7, %v4114_v16  ;;  %v13868_v45 = vld [vmem:[#allocation3 + $0x54] sm:$0xf0] }
 0x39b   : > { %4319 = vrot.lane.b32.xlu0 %v4224_v5, %s14215_s22  ;;  %v4553_v1 = vpop.permute.xlu0 %4552  ;;  %v12208_v16 = vor.u32 %v13868_v45, %v12207_v8 }
 0x39c   : > { %4648 = vst.msk [vmem:[#allocation3 + $0x68] sm:$0xf] %vm4634_vm9, %v4553_v1  ;;  %v4014_v17 = vadd.f32 %v15735_v55, %v3998_v38  ;;  %v4302_v31 = vpop.permute.xlu1 %4301  ;;  %v3624_v26 = vpop.f32.mrf.mxu2 }
 0x39d   : > { %4396 = vst.msk [vmem:[#allocation3 + $0x70] sm:$0xf] %vm4381_vm8, %v4302_v31  ;;  %12189 = vmatmul.msk.bf16.gmra.mxu3 %vm4791_vm10, %v15776_v20  ;;  %12251 = vmatmul.msk.bf16.gmra.mxu0 %vm4791_vm10, %v12204_v3  ;;  %v13890_v20 = vld [vmem:[%s17761_s1 + $0x180] sm:$0xff] }
 0x39e   : > { %v4030_v10 = vmax.f32 %v4014_v17, 0.0  ;;  %5442 = vmatpush.bf16.msrb.mxu2 %v13890_v20 }
 0x39f   : > { %v4079_v24 = vld [vmem:[#allocation2 + $0x16f] sm:$0xff]  ;;  %v3920_v57 = vpop.f32.mrf.mxu0 }
 0x3a0   : > { %v4441_v46 = vld [vmem:[#allocation2 + $0x171] sm:$0xff]  ;;  %v4440_v43 = vld [vmem:[#allocation2 + $0x169] sm:$0xff]  ;;  %4046 = vst [vmem:[#allocation2 + $0x188] sm:$0xff] %v4030_v10  ;;  %v3970_v9 = vadd.f32 %v3969_v49, %v3920_v57  ;;  %v4225_v62 = vpack.c.bf16 %v4030_v10, %v4030_v10  ;;  %v4115_v11 = vpack.c.bf16 %v4079_v24, %v4079_v24  ;;  %v3667_v49 = vadd.f32 %v15808_v30, %v3618_v21 }
 0x3a1   : > { %v4477_v2 = vpack.c.bf16 %v4441_v46, %v4441_v46  ;;  %v4476_v7 = vpack.c.bf16 %v4440_v43, %v4440_v43  ;;  %v3974_v51 = vpop.f32.mrf.mxu1  ;;  %v3620_v30 = vadd.f32 %v3619_v35, %v3487_v33  ;;  %v3673_v35 = vpop.f32.mrf.mxu3  ;;  %v3623_v57 = vadd.f32 %v3622_v18, %v15592_v60  ;;  %v13888_v60 = vld [vmem:[%s17761_s1 + $0x170] sm:$0xff] }
 0x3a2   : > { %v3999_v28 = vadd.f32 %v3970_v9, %v3664_v47  ;;  %4152 = vst.msk [vmem:[#allocation3 + $0xb8] sm:$0xf] %vm4128_vm7, %v4115_v11  ;;  %v3492_v18 = vadd.f32 %v15603_v58, %v15598_v34 }
 0x3a3   : > { %4572 = vrot.lane.b32.xlu2 %v4477_v2, %s14217_s23  ;;  %4570 = vrot.lane.b32.xlu1 %v4476_v7, %s14217_s23  ;;  %v13850_v61 = vld [vmem:[#allocation3 + $0x64] sm:$0xf0]  ;;  %v3669_v13 = vadd.f32 %v3668_v23, %v3620_v30  ;;  %v13889_v23 = vld [vmem:[%s17761_s1 + $0x178] sm:$0xff]  ;;  %v4561_v9 = vpop.permute.xlu2 %4560 }
 0x3a4   : > { %4321 = vrot.lane.b32.xlu0 %v4225_v62, %s14215_s22  ;;  %v4015_v6 = vadd.f32 %v15735_v55, %v3999_v28  ;;  %v15849_v15 = vor.u32 %v13850_v61, %v12115_v32  ;;  %5443 = vmatpush.bf16.msrb.mxu2 %v13889_v23  ;;  %v3672_v28 = vadd.f32 %v15851_v41, %v3623_v57 }
 0x3a5   : > { %v3625_v41 = vadd.f32 %v3624_v26, %v3492_v18  ;;  %v3497_v57 = vadd.f32 %v15638_v44, %v15658_v22 }
 0x3a6   : > { %v4031_v25 = vmax.f32 %v4015_v6, 0.0 }
 0x3a7   : > { %v3923_v0 = vpop.f32.mrf.mxu0  ;;  %v4080_v59 = vld [vmem:[#allocation2 + $0x187] sm:$0xff]  ;;  %12154 = vmatmul.msk.bf16.gmra.mxu2 %vm4791_vm10, %v15849_v15  ;;  %v3674_v34 = vadd.f32 %v3673_v35, %v3625_v41 }
 0x3a8   : > { %4047 = vst [vmem:[#allocation2 + $0x190] sm:$0xff] %v4031_v25  ;;  %v3973_v42 = vadd.f32 %v3972_v63, %v3923_v0  ;;  %v4226_v52 = vpack.c.bf16 %v4031_v25, %v4031_v25  ;;  %v4116_v14 = vpack.c.bf16 %v4080_v59, %v4080_v59  ;;  %v13911_v63 = vld [vmem:[%s17761_s1 + $0x1e0] sm:$0xff]  ;;  %v3627_v25 = vpop.f32.mrf.mxu2  ;;  %5444 = vmatpush.bf16.msrb.mxu2 %v13888_v60 }
 0x3a9   : > { %v3977_v10 = vpop.f32.mrf.mxu1  ;;  %5619 = vmatpush.bf16.msrb.mxu3 %v13911_v63 }
 0x3aa   : > { %v4000_v19 = vadd.f32 %v3973_v42, %v3667_v49  ;;  %4153 = vst.msk [vmem:[#allocation3 + $0xc0] sm:$0xf] %vm4128_vm7, %v4116_v14  ;;  %v13869_v49 = vld [vmem:[#allocation3 + $0x64] sm:$0xf0] }
 0x3ab   : > { %4323 = vrot.lane.b32.xlu1 %v4226_v52, %s14215_s22  ;;  %v4557_v56 = vpop.permute.xlu1 %4556  ;;  %v4555_v39 = vpop.permute.xlu0 %4554  ;;  %v12211_v52 = vld [vmem:[#allocation3 + $0x60] sm:$0xf] }
 0x3ac   : > { %4650 = vst.msk [vmem:[#allocation3 + $0x78] sm:$0xf] %vm4634_vm9, %v4557_v56  ;;  %v4016_v5 = vadd.f32 %v15735_v55, %v4000_v19  ;;  %v12212_v33 = vor.u32 %v13869_v49, %v12211_v52 }
 0x3ad   : > { %4649 = vst.msk [vmem:[#allocation3 + $0x70] sm:$0xf] %vm4634_vm9, %v4555_v39  ;;  %12190 = vmatmul.msk.bf16.gmra.mxu3 %vm4791_vm10, %v15820_v48  ;;  %12252 = vmatmul.msk.bf16.gmra.mxu0 %vm4791_vm10, %v12208_v16  ;;  %v13897_v48 = vld [vmem:[%s17761_s1 + $0x1b0] sm:$0xff] }
 0x3ae   : > { %v4032_v40 = vmax.f32 %v4016_v5, 0.0  ;;  %5349 = vmatpush.bf16.msrb.mxu1 %v13897_v48 }
 0x3af   : > { %v4081_v4 = vld [vmem:[#allocation2 + $0x18f] sm:$0xff]  ;;  %v3925_v53 = vpop.f32.mrf.mxu0 }
 0x3b0   : > { %v4442_v38 = vld [vmem:[#allocation2 + $0x189] sm:$0xff]  ;;  %v4443_v12 = vld [vmem:[#allocation2 + $0x191] sm:$0xff]  ;;  %4048 = vst [vmem:[#allocation2 + $0x1a8] sm:$0xff] %v4032_v40  ;;  %v3975_v1 = vadd.f32 %v3974_v51, %v3925_v53  ;;  %v4227_v31 = vpack.c.bf16 %v4032_v40, %v4032_v40  ;;  %v4117_v47 = vpack.c.bf16 %v4081_v4, %v4081_v4  ;;  %v3676_v51 = vpop.f32.mrf.mxu3  ;;  %v3628_v53 = vadd.f32 %v3627_v25, %v15619_v27 }
 0x3b1   : > { %v4478_v17 = vpack.c.bf16 %v4442_v38, %v4442_v38  ;;  %v4479_v3 = vpack.c.bf16 %v4443_v12, %v4443_v12  ;;  %v3979_v59 = vpop.f32.mrf.mxu1  ;;  %v13887_v40 = vld [vmem:[%s17761_s1 + $0x168] sm:$0xff]  ;;  %v3629_v38 = vpop.f32.mrf.mxu2 }
 0x3b2   : > { %v4001_v24 = vadd.f32 %v3975_v1, %v3669_v13  ;;  %4154 = vst.msk [vmem:[#allocation3 + $0xc8] sm:$0xf] %vm4128_vm7, %v4117_v47  ;;  %v13896_v13 = vld [vmem:[%s17761_s1 + $0x1a8] sm:$0xff]  ;;  %5445 = vmatpush.bf16.msrb.mxu2 %v13887_v40  ;;  %v3677_v48 = vadd.f32 %v3676_v51, %v3628_v53 }
 0x3b3   : > { %4574 = vrot.lane.b32.xlu2 %v4478_v17, %s14217_s23  ;;  %4576 = vrot.lane.b32.xlu0 %v4479_v3, %s14217_s23  ;;  %v13851_v46 = vld [vmem:[#allocation3 + $0x74] sm:$0xf0]  ;;  %v4308_v43 = vpop.permute.xlu0 %4307 }
 0x3b4   : > { %4325 = vrot.lane.b32.xlu1 %v4227_v31, %s14215_s22  ;;  %v4017_v2 = vadd.f32 %v15735_v55, %v4001_v24  ;;  %v12119_v7 = vld [vmem:[#allocation3 + $0x70] sm:$0xf]  ;;  %4399 = vst.msk [vmem:[#allocation3 + $0x88] sm:$0xf] %vm4381_vm8, %v4308_v43  ;;  %5350 = vmatpush.bf16.msrb.mxu1 %v13896_v13  ;;  %v13870_v43 = vld [vmem:[#allocation3 + $0x74] sm:$0xf0] }
 0x3b5   : > { %v15882_v62 = vor.u32 %v13851_v46, %v12119_v7  ;;  %4652 = vst.msk [vmem:[#allocation3 + $0x88] sm:$0xf] %vm4634_vm9, %v4561_v9  ;;  %v12215_v46 = vld [vmem:[#allocation3 + $0x70] sm:$0xf] }
 0x3b6   : > { %v4033_v11 = vmax.f32 %v4017_v2, 0.0  ;;  %v3630_v2 = vadd.f32 %v3629_v38, %v3497_v57  ;;  %v12216_v60 = vor.u32 %v13870_v43, %v12215_v46  ;;  %v3502_v46 = vadd.f32 %v15667_v54, %v15694_v29 }
 0x3b7   : > { %v3928_v20 = vpop.f32.mrf.mxu0  ;;  %v4082_v21 = vld [vmem:[#allocation2 + $0x1a7] sm:$0xff]  ;;  %12155 = vmatmul.msk.bf16.gmra.mxu2 %vm4791_vm10, %v15882_v62 }
 0x3b8   : > { %4049 = vst [vmem:[#allocation2 + $0x1b0] sm:$0xff] %v4033_v11  ;;  %v3978_v32 = vadd.f32 %v3977_v10, %v3928_v20  ;;  %v4228_v61 = vpack.c.bf16 %v4033_v11, %v4033_v11  ;;  %v4118_v6 = vpack.c.bf16 %v4082_v21, %v4082_v21  ;;  %v3678_v1 = vpop.f32.mrf.mxu3 }
 0x3b9   : > { %v3982_v31 = vpop.f32.mrf.mxu1  ;;  %v15921_v11 = vpop.f32.mrf.mxu2  ;;  %v3679_v44 = vadd.f32 %v3678_v1, %v3630_v2  ;;  %v13895_v1 = vld [vmem:[%s17761_s1 + $0x1a0] sm:$0xff] }
 0x3ba   : > { %v4002_v0 = vadd.f32 %v3978_v32, %v3672_v28  ;;  %4155 = vst.msk [vmem:[#allocation3 + $0xd0] sm:$0xf] %vm4128_vm7, %v4118_v6  ;;  %5351 = vmatpush.bf16.msrb.mxu1 %v13895_v1  ;;  %v13939_v1 = vld [vmem:[%s17761_s1 + $0x238] sm:$0xff] }
 0x3bb   : > { %4327 = vrot.lane.b32.xlu2 %v4228_v61, %s14215_s22  ;;  %v4559_v42 = vpop.permute.xlu1 %4558  ;;  %6688 = vmatpush.bf16.msra.mxu2 %v13939_v1 }
 0x3bc   : > { %4651 = vst.msk [vmem:[#allocation3 + $0x80] sm:$0xf] %vm4634_vm9, %v4559_v42  ;;  %v4018_v14 = vadd.f32 %v15735_v55, %v4002_v0  ;;  %v13858_v35 = vld [vmem:[#allocation3 + $0x84] sm:$0xf0]  ;;  %v13909_v42 = vld [vmem:[%s17761_s1 + $0x1d0] sm:$0xff] }
 0x3bd   : > { %12191 = vmatmul.msk.bf16.gmra.mxu3 %vm4791_vm10, %v15849_v15  ;;  %12253 = vmatmul.msk.bf16.gmra.mxu0 %vm4791_vm10, %v12212_v33  ;;  %v13910_v15 = vld [vmem:[%s17761_s1 + $0x1d8] sm:$0xff]  ;;  %v13879_v52 = vld [vmem:[#allocation3 + $0x84] sm:$0xf0] }
 0x3be   : > { %v4034_v8 = vmax.f32 %v4018_v14, 0.0  ;;  %5620 = vmatpush.bf16.msrb.mxu3 %v13910_v15 }
 0x3bf   : > { %v4083_v58 = vld [vmem:[#allocation2 + $0x1af] sm:$0xff]  ;;  %v3930_v19 = vpop.f32.mrf.mxu0 }
 0x3c0   : > { %v4445_v30 = vld [vmem:[#allocation2 + $0x1b1] sm:$0xff]  ;;  %v4444_v56 = vld [vmem:[#allocation2 + $0x1a9] sm:$0xff]  ;;  %4050 = vst [vmem:[#allocation2 + $0x1c8] sm:$0xff] %v4034_v8  ;;  %v3980_v39 = vadd.f32 %v3979_v59, %v3930_v19  ;;  %v4229_v16 = vpack.c.bf16 %v4034_v8, %v4034_v8  ;;  %v4119_v26 = vpack.c.bf16 %v4083_v58, %v4083_v58  ;;  %v15923_v28 = vpop.f32.mrf.mxu3  ;;  %v14199_v8 = vld [vmem:[#allocation2] sm:$0xff] }
 0x3c1   : > { %v4481_v45 = vpack.c.bf16 %v4445_v30, %v4445_v30  ;;  %v4480_v5 = vpack.c.bf16 %v4444_v56, %v4444_v56  ;;  %v3984_v22 = vpop.f32.mrf.mxu1  ;;  %v3634_v58 = vpop.f32.mrf.mxu2 }
 0x3c2   : > { %v4003_v4 = vadd.f32 %v3980_v39, %v3674_v34  ;;  %4156 = vst.msk [vmem:[#allocation3 + $0xd8] sm:$0xf] %vm4128_vm7, %v4119_v26  ;;  %v15936_v34 = vpack.c.bf16 %v14199_v8, %v14199_v8  ;;  %5621 = vmatpush.bf16.msrb.mxu3 %v13909_v42 }
 0x3c3   : > { %4580 = vrot.lane.b32.xlu1 %v4481_v45, %s14217_s23  ;;  %4578 = vrot.lane.b32.xlu0 %v4480_v5, %s14217_s23  ;;  %v12123_v12 = vld [vmem:[#allocation3 + $0x80] sm:$0xf]  ;;  %v13871_v5 = vld [vmem:[#allocation3 + $0x84] sm:$0xf0] }
 0x3c4   : > { %4329 = vrot.lane.b32.xlu2 %v4229_v16, %s14215_s22  ;;  %v4019_v17 = vadd.f32 %v15735_v55, %v4003_v4  ;;  %v12124_v3 = vor.u32 %v13858_v35, %v12123_v12  ;;  %v12219_v45 = vld [vmem:[#allocation3 + $0x80] sm:$0xf] }
 0x3c5   : > { %v12220_v16 = vor.u32 %v13871_v5, %v12219_v45 }
 0x3c6   : > { %v4035_v63 = vmax.f32 %v4019_v17, 0.0 }
 0x3c7   : > { %v3933_v23 = vpop.f32.mrf.mxu0  ;;  %v4084_v10 = vld [vmem:[#allocation2 + $0x1c7] sm:$0xff]  ;;  %12156 = vmatmul.msk.bf16.gmra.mxu2 %vm4791_vm10, %v12124_v3 }
 0x3c8   : > { %4051 = vst [vmem:[#allocation2 + $0x1d0] sm:$0xff] %v4035_v63  ;;  %v3983_v27 = vadd.f32 %v3982_v31, %v3933_v23  ;;  %v4230_v47 = vpack.c.bf16 %v4035_v63, %v4035_v63  ;;  %v4120_v24 = vpack.c.bf16 %v4084_v10, %v4084_v10  ;;  %v3683_v39 = vpop.f32.mrf.mxu3  ;;  %v13894_v31 = vld [vmem:[%s17761_s1 + $0x198] sm:$0xff]  ;;  %v3633_v63 = vadd.f32 %v15921_v11, %v15680_v37 }
 0x3c9   : > { %5352 = vmatpush.bf16.msrb.mxu1 %v13894_v31 }
 0x3ca   : > { %v4004_v9 = vadd.f32 %v3983_v27, %v3677_v48  ;;  %4157 = vst.msk [vmem:[#allocation3 + $0xe0] sm:$0xf] %vm4128_vm7, %v4120_v24  ;;  %v3987_v48 = vpop.f32.mrf.mxu1 }
 0x3cb   : > { %4331 = vrot.lane.b32.xlu0 %v4230_v47, %s14215_s22  ;;  %v3682_v47 = vadd.f32 %v15923_v28, %v3633_v63 }
 0x3cc   : > { %v4020_v7 = vadd.f32 %v15735_v55, %v4004_v9  ;;  %v3635_v9 = vadd.f32 %v3634_v58, %v3502_v46 }
 0x3cd   : > { %12192 = vmatmul.msk.bf16.gmra.mxu3 %vm4791_vm10, %v15882_v62  ;;  %12254 = vmatmul.msk.bf16.gmra.mxu0 %vm4791_vm10, %v12216_v60  ;;  %v12323_v62 = vld [vmem:[#allocation3 + $0x80] sm:$0xf] }
 0x3ce   : > { %v4036_v20 = vmax.f32 %v4020_v7, 0.0  ;;  %v12324_v33 = vor.u32 %v13879_v52, %v12323_v62 }
 0x3cf   : > { %v4085_v21 = vld [vmem:[#allocation2 + $0x1cf] sm:$0xff]  ;;  %v3935_v32 = vpop.f32.mrf.mxu0 }
 0x3d0   : > { %v4447_v61 = vld [vmem:[#allocation2 + $0x1d1] sm:$0xff]  ;;  %v4446_v6 = vld [vmem:[#allocation2 + $0x1c9] sm:$0xff]  ;;  %4052 = vst [vmem:[#allocation2 + $0x1e8] sm:$0xff] %v4036_v20  ;;  %v3985_v18 = vadd.f32 %v3984_v22, %v3935_v32  ;;  %v4231_v51 = vpack.c.bf16 %v4036_v20, %v4036_v20  ;;  %v4121_v0 = vpack.c.bf16 %v4085_v21, %v4085_v21  ;;  %v3684_v20 = vadd.f32 %v3683_v39, %v3635_v9 }
 0x3d1   : > { %v4483_v25 = vpack.c.bf16 %v4447_v61, %v4447_v61  ;;  %v4482_v49 = vpack.c.bf16 %v4446_v6, %v4446_v6 }
 0x3d2   : > { %v4005_v41 = vadd.f32 %v3985_v18, %v3679_v44  ;;  %4158 = vst.msk [vmem:[#allocation3 + $0xe8] sm:$0xf] %vm4128_vm7, %v4121_v0  ;;  %v3989_v60 = vpop.f32.mrf.mxu1  ;;  %v15985_v18 = vld [vmem:[%s17762_s2 + $0x2] ss:$0 sm:$0xff] }
 0x3d3   : > { %4584 = vrot.lane.b32.xlu2 %v4483_v25, %s14217_s23  ;;  %4582 = vrot.lane.b32.xlu1 %v4482_v49, %s14217_s23 }
 0x3d4   : > { %4333 = vrot.lane.b32.xlu0 %v4231_v51, %s14215_s22  ;;  %v4021_v59 = vadd.f32 %v15735_v55, %v4005_v41 }
 0x3d6   : > { %v4037_v14 = vmax.f32 %v4021_v59, 0.0 }
 0x3d7   : > { %v4086_v19 = vld [vmem:[#allocation2 + $0x1e7] sm:$0xff]  ;;  %12349 = vmatmul.msk.bf16.vlgmr.msrb.gmra.mxu2 %vm4791_vm10, %v12324_v33 }
 0x3d8   : > { %4053 = vst [vmem:[#allocation2 + $0x1f0] sm:$0xff] %v4037_v14  ;;  %v4232_v30 = vpack.c.bf16 %v4037_v14, %v4037_v14  ;;  %v4122_v56 = vpack.c.bf16 %v4086_v19, %v4086_v19 }
 0x3d9   : > { %v4825_v13 = vpop.f32.mrf.mxu2 }
 0x3da   : > { %4159 = vst.msk [vmem:[#allocation3 + $0xf0] sm:$0xf] %vm4128_vm7, %v4122_v56 }
 0x3db   : > { %4341 = vrot.lane.b32.xlu2 %v15936_v34, %s14215_s22  ;;  %4335 = vrot.lane.b32.xlu1 %v4232_v30, %s14215_s22 }
 0x3dd   : > { %v4563_v40 = vpop.permute.xlu2 %4562  ;;  %12255 = vmatmul.msk.bf16.gmra.mxu0 %vm4791_vm10, %v12220_v16 }
 0x3df   : > { %v4087_v15 = vld [vmem:[#allocation2 + $0x1ef] sm:$0xff] }
 0x3e0   : > { %v4448_v26 = vld [vmem:[#allocation2 + $0x1e9] sm:$0xff]  ;;  %v4449_v4 = vld [vmem:[#allocation2 + $0x1f1] sm:$0xff]  ;;  %v4123_v12 = vpack.c.bf16 %v4087_v15, %v4087_v15  ;;  %v4918_v35 = vpop.f32.mrf.mxu3 }
 0x3e1   : > { %v4484_v53 = vpack.c.bf16 %v4448_v26, %v4448_v26  ;;  %v4485_v38 = vpack.c.bf16 %v4449_v4, %v4449_v4  ;;  %v4827_v23 = vpop.f32.mrf.mxu2  ;;  %v4919_v61 = vadd.f32 %v4918_v35, %v4825_v13 }
 0x3e2   : > { %4160 = vst.msk [vmem:[#allocation3 + $0xf8] sm:$0xf] %vm4128_vm7, %v4123_v12 }
 0x3e3   : > { %4586 = vrot.lane.b32.xlu2 %v4484_v53, %s14217_s23  ;;  %4588 = vrot.lane.b32.xlu0 %v4485_v38, %s14217_s23 }
 0x3e4   : > { %4594 = vrot.lane.b32.xlu1 %v15653_v50, %s14217_s23  ;;  %v4310_v3 = vpop.permute.xlu0 %4309  ;;  %v13908_v50 = vld [vmem:[%s17761_s1 + $0x1c8] sm:$0xff] }
 0x3e5   : > { %v4316_v17 = vpop.permute.xlu2 %4315  ;;  %4400 = vst.msk [vmem:[#allocation3 + $0x90] sm:$0xf] %vm4381_vm8, %v4310_v3  ;;  %5622 = vmatpush.bf16.msrb.mxu3 %v13908_v50  ;;  %v13924_v3 = vld [vmem:[%s17761_s1 + $0x208] sm:$0xff] }
 0x3e6   : > { %4403 = vst.msk [vmem:[#allocation3 + $0xa8] sm:$0xf] %vm4381_vm8, %v4316_v17  ;;  %v13928_v17 = vld [vmem:[%s17761_s1 + $0x220] sm:$0xff]  ;;  %6535 = vmatpush.bf16.msra.mxu1 %v13924_v3 }
 0x3e7   : > { %4653 = vst.msk [vmem:[#allocation3 + $0x90] sm:$0xf] %vm4634_vm9, %v4563_v40  ;;  %6460 = vmatpush.bf16.msra.mxu0 %v13928_v17 }
 0x3e8   : > { %v4920_v10 = vpop.f32.mrf.mxu3 }
 0x3e9   : > { %v4921_v19 = vadd.f32 %v4920_v10, %v4827_v23 }
 0x3ea   : > { %v3938_v27 = vpop.f32.mrf.mxu0  ;;  %v15975_v11 = vpop.f32.mrf.mxu2 }
 0x3eb   : > { %4343 = vrot.lane.b32.xlu0 %v15936_v34, %s14215_s22  ;;  %4596 = vrot.lane.b32.xlu2 %v15655_v36, %s14217_s23  ;;  %v3988_v24 = vadd.f32 %v3987_v48, %v3938_v27 }
 0x3ec   : > { %v4312_v37 = vpop.permute.xlu1 %4311 }
 0x3ed   : > { %4401 = vst.msk [vmem:[#allocation3 + $0x98] sm:$0xf] %vm4381_vm8, %v4312_v37  ;;  %v4006_v43 = vadd.f32 %v3988_v24, %v3682_v47 }
 0x3ee   : > { %v4318_v57 = vpop.permute.xlu2 %4317  ;;  %v12223_v51 = vld [vmem:[#allocation3 + $0x90] sm:$0xf] }
 0x3ef   : > { %4404 = vst.msk [vmem:[#allocation3 + $0xb0] sm:$0xf] %vm4381_vm8, %v4318_v57  ;;  %v4022_v2 = vadd.f32 %v15735_v55, %v4006_v43  ;;  %v12259_v0 = vld [vmem:[#allocation3 + $0x90] sm:$0xf] }
 0x3f0   : > { %v15973_v7 = vpop.f32.mrf.mxu3 }
 0x3f1   : > { %v4038_v36 = vmax.f32 %v4022_v2, 0.0  ;;  %v4924_v63 = vadd.f32 %v15973_v7, %v15975_v11 }
 0x3f2   : > { %v3940_v28 = vpop.f32.mrf.mxu0  ;;  %v15989_v14 = vpop.f32.mrf.mxu2 }
 0x3f3   : > { %4054 = vst [vmem:[#allocation2 + $0x208] sm:$0xff] %v4038_v36  ;;  %v3990_v44 = vadd.f32 %v3989_v60, %v3940_v28  ;;  %v4233_v21 = vpack.c.bf16 %v4038_v36, %v4038_v36 }
 0x3f4   : > { %v4314_v54 = vpop.permute.xlu1 %4313 }
 0x3f5   : > { %v4565_v22 = vpop.permute.xlu0 %4564  ;;  %v4007_v29 = vadd.f32 %v3990_v44, %v3684_v20  ;;  %4337 = vrot.lane.b32.xlu1 %v4233_v21, %s14215_s22  ;;  %4402 = vst.msk [vmem:[#allocation3 + $0xa0] sm:$0xf] %vm4381_vm8, %v4314_v54 }
 0x3f6   : > { %4654 = vst.msk [vmem:[#allocation3 + $0x98] sm:$0xf] %vm4634_vm9, %v4565_v22 }
 0x3f7   : > { %v4023_v32 = vadd.f32 %v15735_v55, %v4007_v29 }
 0x3f8   : > { %v15987_v25 = vpop.f32.mrf.mxu3 }
 0x3f9   : > { %v4039_v6 = vmax.f32 %v4023_v32, 0.0  ;;  %v4926_v20 = vadd.f32 %v15987_v25, %v15989_v14  ;;  %v6090_v25 = vld [vmem:[#allocation2 + $0x11] sm:$0xff] }
 0x3fa   : > { %v5095_v49 = vpop.f32.mrf.mxu0  ;;  %v4088_v41 = vld [vmem:[#allocation2 + $0x207] sm:$0xff]  ;;  %v16013_v12 = vpop.f32.mrf.mxu2 }
 0x3fb   : > { %4055 = vst [vmem:[#allocation2 + $0x210] sm:$0xff] %v4039_v6  ;;  %v5135_v62 = vadd.f32 %v5095_v49, %v4919_v61  ;;  %v4234_v55 = vpack.c.bf16 %v4039_v6, %v4039_v6  ;;  %v4124_v52 = vpack.c.bf16 %v4088_v41, %v4088_v41  ;;  %v6089_v49 = vld [vmem:[#allocation2 + $0x9] sm:$0xff] }
 0x3fd   : > { %v13872_v59 = vld [vmem:[#allocation3 + $0x94] sm:$0xf0]  ;;  %v5154_v58 = vadd.f32 %v15985_v18, %v5135_v62  ;;  %4339 = vrot.lane.b32.xlu2 %v4234_v55, %s14215_s22  ;;  %4161 = vst.msk [vmem:[#allocation3 + $0x100] sm:$0xf] %vm4128_vm7, %v4124_v52  ;;  %v4573_v56 = vpop.permute.xlu2 %4572  ;;  %v6125_v55 = vpack.c.bf16 %v6089_v49, %v6089_v49 }
 0x3fe   : > { %v13880_v42 = vld [vmem:[#allocation3 + $0x94] sm:$0xf0]  ;;  %v12224_v33 = vor.u32 %v13872_v59, %v12223_v51 }
 0x3ff   : > { %v12260_v8 = vor.u32 %v13880_v42, %v12259_v0  ;;  %5171 = vst.msk [vmem:[%s15996_s11] sm:$0xff] %vm5170_vm11, %v5154_v58  ;;  %v5875_v10 = vpack.c.bf16 %v5154_v58, %v5154_v58  ;;  %v6126_v42 = vpack.c.bf16 %v6090_v25, %v6090_v25 }
 0x400   : > { %12256 = vmatmul.msk.bf16.gmra.mxu0 %vm4791_vm10, %v12224_v33  ;;  %5187 = vst [vmem:[#allocation2 + $0x28] sm:$0xff] %v5154_v58  ;;  %v16006_v53 = vpop.f32.mrf.mxu3 }
 0x401   : > { %12313 = vmatmul.msk.bf16.vlgmr.msrb.gmra.mxu1 %vm4791_vm10, %v12260_v8  ;;  %12350 = vmatmul.msk.bf16.gmra.mxu2 %vm4791_vm10, %v12260_v8  ;;  %v4929_v59 = vadd.f32 %v16006_v53, %v16013_v12 }
 0x402   : > { %v4089_v30 = vld [vmem:[#allocation2 + $0x20f] sm:$0xff]  ;;  %v5097_v39 = vpop.f32.mrf.mxu0  ;;  %v4837_v60 = vpop.f32.mrf.mxu2 }
 0x403   : > { %v4451_v45 = vld [vmem:[#allocation2 + $0x211] sm:$0xff]  ;;  %v4450_v5 = vld [vmem:[#allocation2 + $0x209] sm:$0xff]  ;;  %v5136_v16 = vadd.f32 %v5097_v39, %v4921_v19  ;;  %v4125_v4 = vpack.c.bf16 %v4089_v30, %v4089_v30 }
 0x404   : > { %v4487_v40 = vpack.c.bf16 %v4451_v45, %v4451_v45  ;;  %v4486_v15 = vpack.c.bf16 %v4450_v5, %v4450_v5 }
 0x405   : > { %v4569_v13 = vpop.permute.xlu1 %4568  ;;  %v4567_v26 = vpop.permute.xlu0 %4566  ;;  %v5155_v38 = vadd.f32 %v15985_v18, %v5136_v16  ;;  %5947 = vrot.lane.b32.xlu2 %v15936_v34, %s14214_s21  ;;  %4162 = vst.msk [vmem:[#allocation3 + $0x108] sm:$0xf] %vm4128_vm7, %v4125_v4 }
 0x406   : > { %4656 = vst.msk [vmem:[#allocation3 + $0xa8] sm:$0xf] %vm4634_vm9, %v4569_v13  ;;  %4592 = vrot.lane.b32.xlu1 %v4487_v40, %s14217_s23  ;;  %4590 = vrot.lane.b32.xlu0 %v4486_v15, %s14217_s23 }
 0x407   : > { %4655 = vst.msk [vmem:[#allocation3 + $0xa0] sm:$0xf] %vm4634_vm9, %v4567_v26  ;;  %v5731_v35 = vld [vmem:[#allocation2 + $0x27] sm:$0xff]  ;;  %v5876_v21 = vpack.c.bf16 %v5155_v38, %v5155_v38 }
 0x408   : > { %5172 = vst.msk [vmem:[%s15996_s11 + $0x8] sm:$0xff] %vm5170_vm11, %v5155_v38  ;;  %v5767_v31 = vpack.c.bf16 %v5731_v35, %v5731_v35  ;;  %v16038_v2 = vpop.f32.mrf.mxu3 }
 0x409   : > { %5188 = vst [vmem:[#allocation2 + $0x30] sm:$0xff] %v5155_v38  ;;  %v4931_v53 = vadd.f32 %v16038_v2, %v4837_v60 }
 0x40a   : > { %v5100_v48 = vpop.f32.mrf.mxu0  ;;  %5803 = vst.msk [vmem:[#allocation3 + $0x10] sm:$0xf] %vm356_vm0, %v5767_v31  ;;  %v4840_v52 = vpop.f32.mrf.mxu2 }
 0x40b   : > { %v5137_v23 = vadd.f32 %v5100_v48, %v4924_v63 }
 0x40d   : > { %v4575_v50 = vpop.permute.xlu2 %4574  ;;  %v13900_v27 = vld [vmem:[#allocation3 + $0xa4] sm:$0xf0]  ;;  %v4320_v24 = vpop.permute.xlu0 %4319  ;;  %v5156_v46 = vadd.f32 %v15985_v18, %v5137_v23 }
 0x40e   : > { %v13881_v47 = vld [vmem:[#allocation3 + $0xa4] sm:$0xf0]  ;;  %v12359_v37 = vld [vmem:[#allocation3 + $0xa0] sm:$0xf]  ;;  %4405 = vst.msk [vmem:[#allocation3 + $0xb8] sm:$0xf] %vm4381_vm8, %v4320_v24  ;;  %5945 = vrot.lane.b32.xlu1 %v15936_v34, %s14214_s21  ;;  %5949 = vrot.lane.b32.xlu0 %v5875_v10, %s14214_s21 }
 0x40f   : > { %v12263_v57 = vld [vmem:[#allocation3 + $0xa0] sm:$0xf]  ;;  %v12360_v43 = vor.u32 %v13900_v27, %v12359_v37  ;;  %4658 = vst.msk [vmem:[#allocation3 + $0xb8] sm:$0xf] %vm4634_vm9, %v4573_v56  ;;  %v5877_v62 = vpack.c.bf16 %v5156_v46, %v5156_v46 }
 0x410   : > { %v12264_v9 = vor.u32 %v13881_v47, %v12263_v57  ;;  %5173 = vst.msk [vmem:[%s15996_s11 + $0x10] sm:$0xff] %vm5170_vm11, %v5156_v46  ;;  %v6091_v7 = vld [vmem:[#allocation2 + $0x29] sm:$0xff]  ;;  %v6092_v11 = vld [vmem:[#allocation2 + $0x31] sm:$0xff]  ;;  %v4933_v0 = vpop.f32.mrf.mxu3 }
 0x411   : > { %12413 = vmatmul.msk.bf16.vlgmr.msrb.gmra.mxu3 %vm4791_vm10, %v12360_v43  ;;  %v5732_v36 = vld [vmem:[#allocation2 + $0x2f] sm:$0xff]  ;;  %5189 = vst [vmem:[#allocation2 + $0x48] sm:$0xff] %v5156_v46  ;;  %v6127_v34 = vpack.c.bf16 %v6091_v7, %v6091_v7  ;;  %v6128_v54 = vpack.c.bf16 %v6092_v11, %v6092_v11 }
 0x412   : > { %12314 = vmatmul.msk.bf16.gmra.mxu1 %vm4791_vm10, %v12264_v9  ;;  %12351 = vmatmul.msk.bf16.gmra.mxu2 %vm4791_vm10, %v12264_v9  ;;  %v5768_v28 = vpack.c.bf16 %v5732_v36, %v5732_v36  ;;  %v5102_v44 = vpop.f32.mrf.mxu0  ;;  %v4842_v31 = vpop.f32.mrf.mxu2 }
 0x413   : > { %6201 = vrot.lane.b32.xlu2 %v6127_v34, %s14215_s22  ;;  %v5138_v22 = vadd.f32 %v5102_v44, %v4926_v20 }
 0x414   : > { %5804 = vst.msk [vmem:[#allocation3 + $0x18] sm:$0xf] %vm356_vm0, %v5768_v28 }
 0x415   : > { %v4571_v29 = vpop.permute.xlu1 %4570  ;;  %v4328_v32 = vpop.permute.xlu2 %4327  ;;  %v5157_v6 = vadd.f32 %v15985_v18, %v5138_v22 }
 0x416   : > { %4657 = vst.msk [vmem:[#allocation3 + $0xb0] sm:$0xf] %vm4634_vm9, %v4571_v29  ;;  %v4322_v61 = vpop.permute.xlu0 %4321  ;;  %5951 = vrot.lane.b32.xlu1 %v5876_v21, %s14214_s21  ;;  %6203 = vrot.lane.b32.xlu0 %v6128_v54, %s14215_s22  ;;  %v13882_v33 = vld [vmem:[#allocation3 + $0xb4] sm:$0xf0]  ;;  %v13938_v54 = vld [vmem:[%s17761_s1 + $0x230] sm:$0xff] }
 0x417   : > { %4409 = vst.msk [vmem:[#allocation3 + $0xd8] sm:$0xf] %vm4381_vm8, %v4328_v32  ;;  %v13901_v30 = vld [vmem:[#allocation3 + $0xb4] sm:$0xf0]  ;;  %v5878_v17 = vpack.c.bf16 %v5157_v6, %v5157_v6  ;;  %6689 = vmatpush.bf16.msra.mxu2 %v13938_v54 }
 0x418   : > { %4406 = vst.msk [vmem:[#allocation3 + $0xc0] sm:$0xf] %vm4381_vm8, %v4322_v61  ;;  %v5733_v51 = vld [vmem:[#allocation2 + $0x47] sm:$0xff]  ;;  %v4935_v38 = vpop.f32.mrf.mxu3 }
 0x419   : > { %5174 = vst.msk [vmem:[%s15996_s11 + $0x18] sm:$0xff] %vm5170_vm11, %v5157_v6  ;;  %v5769_v41 = vpack.c.bf16 %v5733_v51, %v5733_v51  ;;  %v4936_v29 = vadd.f32 %v4935_v38, %v4842_v31 }
 0x41a   : > { %5190 = vst [vmem:[#allocation2 + $0x50] sm:$0xff] %v5157_v6  ;;  %v5105_v14 = vpop.f32.mrf.mxu0  ;;  %v4845_v11 = vpop.f32.mrf.mxu2 }
 0x41b   : > { %4659 = vst.msk [vmem:[#allocation3 + $0xc0] sm:$0xf] %vm4634_vm9, %v4575_v50  ;;  %5953 = vrot.lane.b32.xlu2 %v5877_v62, %s14214_s21  ;;  %v5139_v8 = vadd.f32 %v5105_v14, %v4929_v59  ;;  %v4934_v50 = vadd.f32 %v4933_v0, %v4840_v52  ;;  %v13927_v14 = vld [vmem:[%s17761_s1 + $0x218] sm:$0xff] }
 0x41c   : > { %5805 = vst.msk [vmem:[#allocation3 + $0x20] sm:$0xf] %vm356_vm0, %v5769_v41  ;;  %6461 = vmatpush.bf16.msra.mxu0 %v13927_v14  ;;  %v5763_v14 = vld [vmem:[#allocation2 + $0x227] sm:$0xff] }
 0x41d   : > { %v12267_v58 = vld [vmem:[#allocation3 + $0xb0] sm:$0xf]  ;;  %v4324_v56 = vpop.permute.xlu1 %4323  ;;  %v5158_v16 = vadd.f32 %v15985_v18, %v5139_v8 }
 0x41e   : > { %v12363_v19 = vld [vmem:[#allocation3 + $0xb0] sm:$0xf]  ;;  %v12268_v39 = vor.u32 %v13882_v33, %v12267_v58  ;;  %v4330_v5 = vpop.permute.xlu2 %4329  ;;  %4407 = vst.msk [vmem:[#allocation3 + $0xc8] sm:$0xf] %vm4381_vm8, %v4324_v56  ;;  %6199 = vrot.lane.b32.xlu1 %v6126_v42, %s14215_s22  ;;  %6197 = vrot.lane.b32.xlu0 %v6125_v55, %s14215_s22  ;;  %v13923_v33 = vld [vmem:[%s17761_s1 + $0x200] sm:$0xff] }
 0x41f   : > { %v12364_v45 = vor.u32 %v13901_v30, %v12363_v19  ;;  %4410 = vst.msk [vmem:[#allocation3 + $0xe0] sm:$0xf] %vm4381_vm8, %v4330_v5  ;;  %v5879_v37 = vpack.c.bf16 %v5158_v16, %v5158_v16  ;;  %6536 = vmatpush.bf16.msra.mxu1 %v13923_v33 }
 0x420   : > { %5175 = vst.msk [vmem:[%s15996_s11 + $0x20] sm:$0xff] %vm5170_vm11, %v5158_v16  ;;  %v4938_v7 = vpop.f32.mrf.mxu3 }
 0x421   : > { %12414 = vmatmul.msk.bf16.gmra.mxu3 %vm4791_vm10, %v12364_v45  ;;  %v5734_v40 = vld [vmem:[#allocation2 + $0x4f] sm:$0xff]  ;;  %5191 = vst [vmem:[#allocation2 + $0x68] sm:$0xff] %v5158_v16  ;;  %v4939_v8 = vadd.f32 %v4938_v7, %v4845_v11 }
 0x422   : > { %12315 = vmatmul.msk.bf16.gmra.mxu1 %vm4791_vm10, %v12268_v39  ;;  %v6094_v15 = vld [vmem:[#allocation2 + $0x51] sm:$0xff]  ;;  %12352 = vmatmul.msk.bf16.gmra.mxu2 %vm4791_vm10, %v12268_v39  ;;  %v5770_v13 = vpack.c.bf16 %v5734_v40, %v5734_v40  ;;  %v6093_v4 = vld [vmem:[#allocation2 + $0x49] sm:$0xff]  ;;  %v5107_v12 = vpop.f32.mrf.mxu0  ;;  %v12271_v47 = vld [vmem:[#allocation3 + $0xc0] sm:$0xf]  ;;  %v4847_v55 = vpop.f32.mrf.mxu2 }
 0x423   : > { %v6130_v26 = vpack.c.bf16 %v6094_v15, %v6094_v15  ;;  %v5140_v35 = vadd.f32 %v5107_v12, %v4931_v53  ;;  %v6129_v1 = vpack.c.bf16 %v6093_v4, %v6093_v4  ;;  %v12367_v9 = vld [vmem:[#allocation3 + $0xc0] sm:$0xf] }
 0x424   : > { %5806 = vst.msk [vmem:[#allocation3 + $0x28] sm:$0xf] %vm356_vm0, %v5770_v13 }
 0x425   : > { %6207 = vrot.lane.b32.xlu2 %v6130_v26, %s14215_s22  ;;  %v4577_v3 = vpop.permute.xlu0 %4576  ;;  %v5159_v48 = vadd.f32 %v15985_v18, %v5140_v35 }
 0x426   : > { %4660 = vst.msk [vmem:[#allocation3 + $0xc8] sm:$0xf] %vm4634_vm9, %v4577_v3  ;;  %v4326_v63 = vpop.permute.xlu1 %4325  ;;  %6205 = vrot.lane.b32.xlu1 %v6129_v1, %s14215_s22  ;;  %5955 = vrot.lane.b32.xlu0 %v5878_v17, %s14214_s21 }
 0x427   : > { %4408 = vst.msk [vmem:[#allocation3 + $0xd0] sm:$0xf] %vm4381_vm8, %v4326_v63  ;;  %v5880_v46 = vpack.c.bf16 %v5159_v48, %v5159_v48 }
 0x428   : > { %5176 = vst.msk [vmem:[%s15996_s11 + $0x28] sm:$0xff] %vm5170_vm11, %v5159_v48  ;;  %v5735_v23 = vld [vmem:[#allocation2 + $0x67] sm:$0xff]  ;;  %v4940_v62 = vpop.f32.mrf.mxu3 }
 0x429   : > { %5192 = vst [vmem:[#allocation2 + $0x70] sm:$0xff] %v5159_v48  ;;  %v5771_v10 = vpack.c.bf16 %v5735_v23, %v5735_v23  ;;  %v4941_v17 = vadd.f32 %v4940_v62, %v4847_v55 }
 0x42a   : > { %v5110_v27 = vpop.f32.mrf.mxu0  ;;  %v4850_v3 = vpop.f32.mrf.mxu2 }
 0x42b   : > { %5807 = vst.msk [vmem:[#allocation3 + $0x30] sm:$0xf] %vm356_vm0, %v5771_v10  ;;  %v5141_v24 = vadd.f32 %v5110_v27, %v4934_v50 }
 0x42d   : > { %v16083_v57 = vpop.permute.xlu2 %4584  ;;  %v13883_v43 = vld [vmem:[#allocation3 + $0xc4] sm:$0xf0]  ;;  %v5160_v34 = vadd.f32 %v15985_v18, %v5141_v24 }
 0x42e   : > { %v13902_v2 = vld [vmem:[#allocation3 + $0xc4] sm:$0xf0]  ;;  %v12272_v36 = vor.u32 %v13883_v43, %v12271_v47  ;;  %5957 = vrot.lane.b32.xlu0 %v5879_v37, %s14214_s21  ;;  %5959 = vrot.lane.b32.xlu1 %v5880_v46, %s14214_s21  ;;  %v5730_v37 = vld [vmem:[#allocation2 + $0xf] sm:$0xff] }
 0x42f   : > { %v12368_v60 = vor.u32 %v13902_v2, %v12367_v9  ;;  %5177 = vst.msk [vmem:[%s15996_s11 + $0x30] sm:$0xff] %vm5170_vm11, %v5160_v34  ;;  %v5881_v51 = vpack.c.bf16 %v5160_v34, %v5160_v34  ;;  %v16133_v46 = vpack.c.bf16 %v5730_v37, %v5730_v37 }
 0x430   : > { %v5736_v28 = vld [vmem:[#allocation2 + $0x6f] sm:$0xff]  ;;  %5193 = vst [vmem:[#allocation2 + $0x88] sm:$0xff] %v5160_v34  ;;  %v4943_v38 = vpop.f32.mrf.mxu3 }
 0x431   : > { %v6095_v20 = vld [vmem:[#allocation2 + $0x69] sm:$0xff]  ;;  %12415 = vmatmul.msk.bf16.gmra.mxu3 %vm4791_vm10, %v12368_v60  ;;  %v5772_v44 = vpack.c.bf16 %v5736_v28, %v5736_v28  ;;  %v6096_v21 = vld [vmem:[#allocation2 + $0x71] sm:$0xff]  ;;  %5802 = vst.msk [vmem:[#allocation3 + $0x8] sm:$0xf] %vm356_vm0, %v16133_v46 }
 0x432   : > { %12316 = vmatmul.msk.bf16.gmra.mxu1 %vm4791_vm10, %v12272_v36  ;;  %v6131_v22 = vpack.c.bf16 %v6095_v20, %v6095_v20  ;;  %12353 = vmatmul.msk.bf16.gmra.mxu2 %vm4791_vm10, %v12272_v36  ;;  %v5112_v32 = vpop.f32.mrf.mxu0  ;;  %v6132_v6 = vpack.c.bf16 %v6096_v21, %v6096_v21  ;;  %v4852_v11 = vpop.f32.mrf.mxu2 }
 0x433   : > { %5808 = vst.msk [vmem:[#allocation3 + $0x38] sm:$0xf] %vm356_vm0, %v5772_v44  ;;  %v5142_v61 = vadd.f32 %v5112_v32, %v4936_v29 }
 0x434   : > { %6209 = vrot.lane.b32.xlu2 %v6131_v22, %s14215_s22 }
 0x435   : > { %v4342_v25 = vpop.permute.xlu2 %4341  ;;  %v4581_v49 = vpop.permute.xlu1 %4580  ;;  %v5161_v41 = vadd.f32 %v15985_v18, %v5142_v61 }
 0x436   : > { %4416 = vst.msk [vmem:[#allocation3 + $0x110] sm:$0xf] %vm4381_vm8, %v4342_v25  ;;  %v4579_v0 = vpop.permute.xlu0 %4578  ;;  %6211 = vrot.lane.b32.xlu0 %v6132_v6, %s14215_s22  ;;  %5961 = vrot.lane.b32.xlu1 %v5881_v51, %s14214_s21 }
 0x437   : > { %4662 = vst.msk [vmem:[#allocation3 + $0xd8] sm:$0xf] %vm4634_vm9, %v4581_v49  ;;  %v5737_v59 = vld [vmem:[#allocation2 + $0x87] sm:$0xff]  ;;  %v5882_v42 = vpack.c.bf16 %v5161_v41, %v5161_v41 }
 0x438   : > { %4661 = vst.msk [vmem:[#allocation3 + $0xd0] sm:$0xf] %vm4634_vm9, %v4579_v0  ;;  %v5773_v52 = vpack.c.bf16 %v5737_v59, %v5737_v59  ;;  %v4945_v43 = vpop.f32.mrf.mxu3 }
 0x439   : > { %5178 = vst.msk [vmem:[%s15996_s11 + $0x38] sm:$0xff] %vm5170_vm11, %v5161_v41  ;;  %v4946_v51 = vadd.f32 %v4945_v43, %v4852_v11 }
 0x43a   : > { %5194 = vst [vmem:[#allocation2 + $0x90] sm:$0xff] %v5161_v41  ;;  %v5115_v58 = vpop.f32.mrf.mxu0 }
 0x43b   : > { %5809 = vst.msk [vmem:[#allocation3 + $0x40] sm:$0xf] %vm356_vm0, %v5773_v52  ;;  %v5143_v19 = vadd.f32 %v5115_v58, %v4939_v8  ;;  %v4855_v52 = vpop.f32.mrf.mxu2 }
 0x43c   : > { %5963 = vrot.lane.b32.xlu2 %v5882_v42, %s14214_s21 }
 0x43d   : > { %v5162_v45 = vadd.f32 %v15985_v18, %v5143_v19  ;;  %v4587_v10 = vpop.permute.xlu2 %4586 }
 0x43e   : > { %v13884_v30 = vld [vmem:[#allocation3 + $0xd4] sm:$0xf0]  ;;  %v4332_v39 = vpop.permute.xlu0 %4331 }
 0x43f   : > { %v13903_v56 = vld [vmem:[#allocation3 + $0xd4] sm:$0xf0]  ;;  %v12275_v5 = vld [vmem:[#allocation3 + $0xd0] sm:$0xf]  ;;  %4411 = vst.msk [vmem:[#allocation3 + $0xe8] sm:$0xf] %vm4381_vm8, %v4332_v39  ;;  %v5883_v53 = vpack.c.bf16 %v5162_v45, %v5162_v45 }
 0x440   : > { %v12371_v16 = vld [vmem:[#allocation3 + $0xd0] sm:$0xf]  ;;  %v12276_v40 = vor.u32 %v13884_v30, %v12275_v5  ;;  %4664 = vst.msk [vmem:[#allocation3 + $0xe8] sm:$0xf] %vm4634_vm9, %v16083_v57  ;;  %v4944_v57 = vadd.f32 %v4943_v38, %v4850_v3  ;;  %v4948_v59 = vpop.f32.mrf.mxu3  ;;  %v13937_v39 = vld [vmem:[%s17761_s1 + $0x228] sm:$0xff]  ;;  %v13922_v5 = vld [vmem:[%s17761_s1 + $0x1f8] sm:$0xff] }
 0x441   : > { %v12372_v15 = vor.u32 %v13903_v56, %v12371_v16  ;;  %5179 = vst.msk [vmem:[%s15996_s11 + $0x40] sm:$0xff] %vm5170_vm11, %v5162_v45  ;;  %v5738_v13 = vld [vmem:[#allocation2 + $0x8f] sm:$0xff]  ;;  %v4949_v30 = vadd.f32 %v4948_v59, %v4855_v52  ;;  %v5799_v56 = vpack.c.bf16 %v5763_v14, %v5763_v14  ;;  %6690 = vmatpush.bf16.msra.mxu2 %v13937_v39 }
 0x442   : > { %v6098_v26 = vld [vmem:[#allocation2 + $0x91] sm:$0xff]  ;;  %v6097_v4 = vld [vmem:[#allocation2 + $0x89] sm:$0xff]  ;;  %5195 = vst [vmem:[#allocation2 + $0xa8] sm:$0xff] %v5162_v45  ;;  %v5774_v12 = vpack.c.bf16 %v5738_v13, %v5738_v13  ;;  %12317 = vmatmul.msk.bf16.gmra.mxu1 %vm4791_vm10, %v12276_v40  ;;  %12354 = vmatmul.msk.bf16.gmra.mxu2 %vm4791_vm10, %v12276_v40  ;;  %v5117_v31 = vpop.f32.mrf.mxu0 }
 0x443   : > { %v6134_v35 = vpack.c.bf16 %v6098_v26, %v6098_v26  ;;  %v6133_v1 = vpack.c.bf16 %v6097_v4, %v6097_v4  ;;  %12416 = vmatmul.msk.bf16.gmra.mxu3 %vm4791_vm10, %v12372_v15  ;;  %v5144_v63 = vadd.f32 %v5117_v31, %v4941_v17  ;;  %v13926_v45 = vld [vmem:[%s17761_s1 + $0x210] sm:$0xff]  ;;  %6537 = vmatpush.bf16.msra.mxu1 %v13922_v5 }
 0x444   : > { %5810 = vst.msk [vmem:[#allocation3 + $0x48] sm:$0xf] %vm356_vm0, %v5774_v12  ;;  %5965 = vrot.lane.b32.xlu2 %v5883_v53, %s14214_s21  ;;  %6462 = vmatpush.bf16.msra.mxu0 %v13926_v45 }
 0x445   : > { %6215 = vrot.lane.b32.xlu1 %v6134_v35, %s14215_s22  ;;  %6213 = vrot.lane.b32.xlu0 %v6133_v1, %s14215_s22  ;;  %v4583_v48 = vpop.permute.xlu1 %4582  ;;  %v5163_v50 = vadd.f32 %v15985_v18, %v5144_v63  ;;  %v4597_v21 = vpop.permute.xlu2 %4596 }
 0x446   : > { %4663 = vst.msk [vmem:[#allocation3 + $0xe0] sm:$0xf] %vm4634_vm9, %v4583_v48  ;;  %v4334_v23 = vpop.permute.xlu0 %4333  ;;  %v4857_v48 = vpop.f32.mrf.mxu2 }
 0x447   : > { %4412 = vst.msk [vmem:[#allocation3 + $0xf0] sm:$0xf] %vm4381_vm8, %v4334_v23  ;;  %v5884_v47 = vpack.c.bf16 %v5163_v50, %v5163_v50  ;;  %v13885_v2 = vld [vmem:[#allocation3 + $0xe4] sm:$0xf0] }
 0x448   : > { %4665 = vst.msk [vmem:[#allocation3 + $0xf0] sm:$0xf] %vm4634_vm9, %v4587_v10  ;;  %v13904_v20 = vld [vmem:[#allocation3 + $0xe4] sm:$0xf0]  ;;  %v4950_v17 = vpop.f32.mrf.mxu3 }
 0x449   : > { %5180 = vst.msk [vmem:[%s15996_s11 + $0x48] sm:$0xff] %vm5170_vm11, %v5163_v50  ;;  %v5739_v27 = vld [vmem:[#allocation2 + $0xa7] sm:$0xff] }
 0x44a   : > { %5196 = vst [vmem:[#allocation2 + $0xb0] sm:$0xff] %v5163_v50  ;;  %v5775_v24 = vpack.c.bf16 %v5739_v27, %v5739_v27  ;;  %v5120_v9 = vpop.f32.mrf.mxu0 }
 0x44b   : > { %v5145_v7 = vadd.f32 %v5120_v9, %v4944_v57 }
 0x44c   : > { %5811 = vst.msk [vmem:[#allocation3 + $0x50] sm:$0xf] %vm356_vm0, %v5775_v24 }
 0x44d   : > { %5967 = vrot.lane.b32.xlu0 %v5884_v47, %s14214_s21  ;;  %v12279_v36 = vld [vmem:[#allocation3 + $0xe0] sm:$0xf]  ;;  %v4336_v34 = vpop.permute.xlu1 %4335  ;;  %v5164_v44 = vadd.f32 %v15985_v18, %v5145_v7  ;;  %v4951_v47 = vadd.f32 %v4950_v17, %v4857_v48 }
 0x44e   : > { %v12375_v60 = vld [vmem:[#allocation3 + $0xe0] sm:$0xf]  ;;  %v12280_v28 = vor.u32 %v13885_v2, %v12279_v36  ;;  %4413 = vst.msk [vmem:[#allocation3 + $0xf8] sm:$0xf] %vm4381_vm8, %v4336_v34 }
 0x44f   : > { %v12376_v22 = vor.u32 %v13904_v20, %v12375_v60  ;;  %5181 = vst.msk [vmem:[%s15996_s11 + $0x50] sm:$0xff] %vm5170_vm11, %v5164_v44  ;;  %v5885_v61 = vpack.c.bf16 %v5164_v44, %v5164_v44  ;;  %v12283_v15 = vld [vmem:[#allocation3 + $0xf0] sm:$0xf]  ;;  %v4860_v60 = vpop.f32.mrf.mxu2 }
 0x450   : > { %5197 = vst [vmem:[#allocation2 + $0xc8] sm:$0xff] %v5164_v44  ;;  %v12379_v38 = vld [vmem:[#allocation3 + $0xf0] sm:$0xf] }
 0x451   : > { %v5740_v54 = vld [vmem:[#allocation2 + $0xaf] sm:$0xff] }
 0x452   : > { %v6100_v29 = vld [vmem:[#allocation2 + $0xb1] sm:$0xff]  ;;  %v6099_v32 = vld [vmem:[#allocation2 + $0xa9] sm:$0xff]  ;;  %v5776_v6 = vpack.c.bf16 %v5740_v54, %v5740_v54  ;;  %12318 = vmatmul.msk.bf16.gmra.mxu1 %vm4791_vm10, %v12280_v28  ;;  %12355 = vmatmul.msk.bf16.gmra.mxu2 %vm4791_vm10, %v12280_v28  ;;  %v5122_v0 = vpop.f32.mrf.mxu0 }
 0x453   : > { %v6136_v25 = vpack.c.bf16 %v6100_v29, %v6100_v29  ;;  %v6135_v49 = vpack.c.bf16 %v6099_v32, %v6099_v32  ;;  %12417 = vmatmul.msk.bf16.gmra.mxu3 %vm4791_vm10, %v12376_v22  ;;  %v5146_v41 = vadd.f32 %v5122_v0, %v4946_v51  ;;  %v4953_v22 = vpop.f32.mrf.mxu3 }
 0x454   : > { %5812 = vst.msk [vmem:[#allocation3 + $0x58] sm:$0xf] %vm356_vm0, %v5776_v6 }
 0x455   : > { %6219 = vrot.lane.b32.xlu2 %v6136_v25, %s14215_s22  ;;  %6217 = vrot.lane.b32.xlu1 %v6135_v49, %s14215_s22  ;;  %v4589_v62 = vpop.permute.xlu0 %4588  ;;  %v5165_v55 = vadd.f32 %v15985_v18, %v5146_v41 }
 0x456   : > { %5969 = vrot.lane.b32.xlu0 %v5885_v61, %s14214_s21  ;;  %4666 = vst.msk [vmem:[#allocation3 + $0xf8] sm:$0xf] %vm4634_vm9, %v4589_v62  ;;  %v4595_v42 = vpop.permute.xlu1 %4594  ;;  %v4954_v61 = vadd.f32 %v4953_v22, %v4860_v60 }
 0x457   : > { %4669 = vst.msk [vmem:[#allocation3 + $0x110] sm:$0xf] %vm4634_vm9, %v4595_v42  ;;  %v5741_v33 = vld [vmem:[#allocation2 + $0xc7] sm:$0xff]  ;;  %v4340_v8 = vpop.permute.xlu2 %4339  ;;  %v5886_v58 = vpack.c.bf16 %v5165_v55, %v5165_v55 }
 0x458   : > { %5182 = vst.msk [vmem:[%s15996_s11 + $0x58] sm:$0xff] %vm5170_vm11, %v5165_v55  ;;  %v5777_v19 = vpack.c.bf16 %v5741_v33, %v5741_v33 }
 0x459   : > { %5198 = vst [vmem:[#allocation2 + $0xd0] sm:$0xff] %v5165_v55 }
 0x45a   : > { %4415 = vst.msk [vmem:[#allocation3 + $0x108] sm:$0xf] %vm4381_vm8, %v4340_v8  ;;  %v5125_v16 = vpop.f32.mrf.mxu0 }
 0x45b   : > { %5813 = vst.msk [vmem:[#allocation3 + $0x60] sm:$0xf] %vm356_vm0, %v5777_v19  ;;  %v5147_v40 = vadd.f32 %v5125_v16, %v4949_v30  ;;  %v4955_v51 = vpop.f32.mrf.mxu3 }
 0x45d   : > { %5971 = vrot.lane.b32.xlu1 %v5886_v58, %s14214_s21  ;;  %v13886_v13 = vld [vmem:[#allocation3 + $0xf4] sm:$0xf0]  ;;  %v4344_v4 = vpop.permute.xlu0 %4343  ;;  %v5166_v35 = vadd.f32 %v15985_v18, %v5147_v40 }
 0x45e   : > { %v13905_v26 = vld [vmem:[#allocation3 + $0xf4] sm:$0xf0]  ;;  %v12284_v53 = vor.u32 %v13886_v13, %v12283_v15  ;;  %v16167_v12 = vld [vmem:[#allocation3 + $0x110] sm:$0xf]  ;;  %4417 = vst.msk [vmem:[#allocation3 + $0x118] sm:$0xf] %vm4381_vm8, %v4344_v4 }
 0x45f   : > { %v12380_v1 = vor.u32 %v13905_v26, %v12379_v38  ;;  %5835 = vst.msk [vmem:[#allocation3 + $0x110] sm:$0xf] %vm356_vm0, %v5799_v56  ;;  %v5948_v27 = vpop.permute.xlu2 %5947  ;;  %v5887_v7 = vpack.c.bf16 %v5166_v35, %v5166_v35 }
 0x460   : > { %4670 = vst.msk [vmem:[#allocation3 + $0x118] sm:$0xf] %vm4634_vm9, %v4597_v21  ;;  %v5742_v3 = vld [vmem:[#allocation2 + $0xcf] sm:$0xff]  ;;  %v4862_v21 = vpop.f32.mrf.mxu2 }
 0x461   : > { %5183 = vst.msk [vmem:[%s15996_s11 + $0x60] sm:$0xff] %vm5170_vm11, %v5166_v35  ;;  %v6101_v31 = vld [vmem:[#allocation2 + $0xc9] sm:$0xff]  ;;  %v6102_v63 = vld [vmem:[#allocation2 + $0xd1] sm:$0xff]  ;;  %v5778_v23 = vpack.c.bf16 %v5742_v3, %v5742_v3  ;;  %v4956_v58 = vadd.f32 %v4955_v51, %v4862_v21 }
 0x462   : > { %5199 = vst [vmem:[#allocation2 + $0xe8] sm:$0xff] %v5166_v35  ;;  %v6137_v10 = vpack.c.bf16 %v6101_v31, %v6101_v31  ;;  %v6138_v50 = vpack.c.bf16 %v6102_v63, %v6102_v63  ;;  %12319 = vmatmul.msk.bf16.gmra.mxu1 %vm4791_vm10, %v12284_v53  ;;  %12356 = vmatmul.msk.bf16.gmra.mxu2 %vm4791_vm10, %v12284_v53  ;;  %v5127_v24 = vpop.f32.mrf.mxu0 }
 0x463   : > { %12418 = vmatmul.msk.bf16.gmra.mxu3 %vm4791_vm10, %v12380_v1  ;;  %6054 = vst.msk [vmem:[#allocation3 + $0x8] sm:$0xf] %vm609_vm1, %v5948_v27  ;;  %v5148_v37 = vadd.f32 %v5127_v24, %v4951_v47 }
 0x464   : > { %5814 = vst.msk [vmem:[#allocation3 + $0x68] sm:$0xf] %vm356_vm0, %v5778_v23  ;;  %6221 = vrot.lane.b32.xlu2 %v6137_v10, %s14215_s22  ;;  %6223 = vrot.lane.b32.xlu0 %v6138_v50, %s14215_s22  ;;  %v7252_v23 = vld [vmem:[#allocation2 + $0x7] sm:$0xff] }
 0x465   : > { %v5167_v57 = vadd.f32 %v15985_v18, %v5148_v37  ;;  %v7288_v37 = vpack.c.bf16 %v7252_v23, %v7252_v23 }
 0x467   : > { %5184 = vst.msk [vmem:[%s15996_s11 + $0x68] sm:$0xff] %vm5170_vm11, %v5167_v57  ;;  %v4338_v9 = vpop.permute.xlu1 %4337  ;;  %v5888_v2 = vpack.c.bf16 %v5167_v57, %v5167_v57  ;;  %v13907_v53 = vld [vmem:[#allocation3 + $0x114] sm:$0xf0] }
 0x468   : > { %5200 = vst [vmem:[#allocation2 + $0xf0] sm:$0xff] %v5167_v57  ;;  %v5447_v0 = vpop.f32.mrf.mxu2  ;;  %v12388_v63 = vor.u32 %v13907_v53, %v16167_v12 }
 0x469   : > { %v5743_v43 = vld [vmem:[#allocation2 + $0xe7] sm:$0xff]  ;;  %4414 = vst.msk [vmem:[#allocation3 + $0x100] sm:$0xf] %vm4381_vm8, %v4338_v9 }
 0x46a   : > { %v5779_v36 = vpack.c.bf16 %v5743_v43, %v5743_v43 }
 0x46c   : > { %5973 = vrot.lane.b32.xlu2 %v5887_v7, %s14214_s21  ;;  %5815 = vst.msk [vmem:[#allocation3 + $0x70] sm:$0xf] %vm356_vm0, %v5779_v36  ;;  %5975 = vrot.lane.b32.xlu0 %v5888_v2, %s14214_s21 }
 0x46d   : > { %v6202_v34 = vpop.permute.xlu2 %6201 }
 0x46f   : > { %v5744_v11 = vld [vmem:[#allocation2 + $0xef] sm:$0xff] }
 0x470   : > { %v6103_v28 = vld [vmem:[#allocation2 + $0xe9] sm:$0xff]  ;;  %v5780_v20 = vpack.c.bf16 %v5744_v11, %v5744_v11  ;;  %v5449_v40 = vpop.f32.mrf.mxu2 }
 0x471   : > { %v6139_v44 = vpack.c.bf16 %v6103_v28, %v6103_v28 }
 0x472   : > { %5816 = vst.msk [vmem:[#allocation3 + $0x78] sm:$0xf] %vm356_vm0, %v5780_v20 }
 0x473   : > { %6225 = vrot.lane.b32.xlu1 %v6139_v44, %s14215_s22 }
 0x475   : > { %v5954_v54 = vpop.permute.xlu2 %5953 }
 0x476   : > { %6057 = vst.msk [vmem:[#allocation3 + $0x20] sm:$0xf] %vm609_vm1, %v5954_v54 }
 0x478   : > { %v4593_v29 = vpop.permute.xlu1 %4592  ;;  %v4591_v32 = vpop.permute.xlu0 %4590 }
 0x479   : > { %4668 = vst.msk [vmem:[#allocation3 + $0x108] sm:$0xf] %vm4634_vm9, %v4593_v29 }
 0x47a   : > { %4667 = vst.msk [vmem:[#allocation3 + $0x100] sm:$0xf] %vm4634_vm9, %v4591_v32 }
 0x47d   : > { %v5130_v6 = vpop.f32.mrf.mxu0 }
 0x47e   : > { %v5354_v25 = vpop.f32.mrf.mxu1  ;;  %v5149_v49 = vadd.f32 %v5130_v6, %v4954_v61 }
 0x47f   : > { %v6208_v30 = vpop.permute.xlu2 %6207  ;;  %v5448_v3 = vadd.f32 %v5447_v0, %v5354_v25 }
 0x480   : > { %v5946_v41 = vpop.permute.xlu1 %5945  ;;  %v5950_v62 = vpop.permute.xlu0 %5949  ;;  %v16195_v59 = vadd.f32 %v15985_v18, %v5149_v49  ;;  %v13893_v42 = vld [vmem:[#allocation3 + $0x104] sm:$0xf0] }
 0x481   : > { %v13906_v55 = vld [vmem:[#allocation3 + $0x104] sm:$0xf0]  ;;  %6053 = vst.msk [vmem:[#allocation3] sm:$0xf] %vm609_vm1, %v5946_v41  ;;  %v12287_v52 = vld [vmem:[#allocation3 + $0x100] sm:$0xf] }
 0x482   : > { %v12383_v14 = vld [vmem:[#allocation3 + $0x100] sm:$0xf]  ;;  %6055 = vst.msk [vmem:[#allocation3 + $0x10] sm:$0xf] %vm609_vm1, %v5950_v62  ;;  %v12288_v33 = vor.u32 %v13893_v42, %v12287_v52  ;;  %v6104_v41 = vld [vmem:[#allocation2 + $0xf1] sm:$0xff] }
 0x483   : > { %v12384_v8 = vor.u32 %v13906_v55, %v12383_v14  ;;  %6307 = vst.msk [vmem:[#allocation3 + $0x10] sm:$0xf] %vm862_vm2, %v6202_v34 }
 0x484   : > { %5185 = vst.msk [vmem:[%s15996_s11 + $0x70] sm:$0xff] %vm5170_vm11, %v16195_v59  ;;  %12320 = vmatmul.msk.bf16.gmra.mxu1 %vm4791_vm10, %v12288_v33  ;;  %v5452_v31 = vpop.f32.mrf.mxu2 }
 0x485   : > { %12419 = vmatmul.msk.bf16.gmra.mxu3 %vm4791_vm10, %v12384_v8  ;;  %v5132_v19 = vpop.f32.mrf.mxu0  ;;  %5201 = vst [vmem:[#allocation2 + $0x108] sm:$0xff] %v16195_v59 }
 0x486   : > { %v5150_v56 = vadd.f32 %v5132_v19, %v4956_v58  ;;  %v5356_v39 = vpop.f32.mrf.mxu1 }
 0x487   : > { %v5450_v36 = vadd.f32 %v5449_v40, %v5356_v39  ;;  %v6140_v39 = vpack.c.bf16 %v6104_v41, %v6104_v41 }
 0x488   : > { %v16207_v45 = vadd.f32 %v15985_v18, %v5150_v56  ;;  %v5952_v5 = vpop.permute.xlu1 %5951  ;;  %v6204_v16 = vpop.permute.xlu0 %6203 }
 0x489   : > { %6056 = vst.msk [vmem:[#allocation3 + $0x18] sm:$0xf] %vm609_vm1, %v5952_v5 }
 0x48a   : > { %6308 = vst.msk [vmem:[#allocation3 + $0x18] sm:$0xf] %vm862_vm2, %v6204_v16  ;;  %v12440_v1 = vld [vmem:[#allocation3 + $0x10] sm:$0xf] }
 0x48b   : > { %5186 = vst.msk [vmem:[%s15996_s11 + $0x78] sm:$0xff] %vm5170_vm11, %v16207_v45 }
 0x48c   : > { %5202 = vst [vmem:[#allocation2 + $0x110] sm:$0xff] %v16207_v45  ;;  %v5745_v15 = vld [vmem:[#allocation2 + $0x107] sm:$0xff]  ;;  %v5454_v28 = vpop.f32.mrf.mxu2 }
 0x48d   : > { %v5781_v26 = vpack.c.bf16 %v5745_v15, %v5745_v15 }
 0x48e   : > { %v6210_v13 = vpop.permute.xlu2 %6209 }
 0x48f   : > { %v5359_v4 = vpop.f32.mrf.mxu1  ;;  %5817 = vst.msk [vmem:[#allocation3 + $0x80] sm:$0xf] %vm356_vm0, %v5781_v26 }
 0x490   : > { %v6200_v38 = vpop.permute.xlu1 %6199  ;;  %v6198_v35 = vpop.permute.xlu0 %6197  ;;  %v5453_v29 = vadd.f32 %v5452_v31, %v5359_v4  ;;  %v16265_v4 = vld [vmem:[%s17762_s2 + $0x2] ss:$0 sm:$0xff]  ;;  %v5889_v31 = vpack.c.bf16 %v16195_v59, %v16195_v59 }
 0x491   : > { %6306 = vst.msk [vmem:[#allocation3 + $0x8] sm:$0xf] %vm862_vm2, %v6200_v38  ;;  %v13915_v17 = vld [vmem:[#allocation3 + $0x14] sm:$0xf0] }
 0x492   : > { %6305 = vst.msk [vmem:[#allocation3] sm:$0xf] %vm862_vm2, %v6198_v35  ;;  %v16219_v48 = vor.u32 %v13915_v17, %v12440_v1  ;;  %v5890_v1 = vpack.c.bf16 %v16207_v45, %v16207_v45 }
 0x493   : > { %v5746_v50 = vld [vmem:[#allocation2 + $0x10f] sm:$0xff] }
 0x494   : > { %v5624_v10 = vpop.f32.mrf.mxu3  ;;  %12482 = vmatmul.msk.bf16.vlgmr.msra.gmra.mxu0 %vm988_vm4, %v16219_v48  ;;  %v5782_v47 = vpack.c.bf16 %v5746_v50, %v5746_v50 }
 0x495   : > { %12420 = vmatmul.msk.bf16.gmra.mxu3 %vm4791_vm10, %v12388_v63  ;;  %v5664_v27 = vadd.f32 %v5624_v10, %v5448_v3  ;;  %v5457_v55 = vpop.f32.mrf.mxu2 }
 0x496   : > { %v5964_v24 = vpop.permute.xlu2 %5963  ;;  %5818 = vst.msk [vmem:[#allocation3 + $0x88] sm:$0xf] %vm356_vm0, %v5782_v47 }
 0x497   : > { %v5680_v57 = vadd.f32 %v15985_v18, %v5664_v27  ;;  %6062 = vst.msk [vmem:[#allocation3 + $0x48] sm:$0xf] %vm609_vm1, %v5964_v24  ;;  %v5361_v60 = vpop.f32.mrf.mxu1 }
 0x498   : > { %v13914_v12 = vld [vmem:[#allocation3 + $0x4] sm:$0xf0]  ;;  %v6206_v43 = vpop.permute.xlu1 %6205  ;;  %v5956_v9 = vpop.permute.xlu0 %5955  ;;  %v5455_v15 = vadd.f32 %v5454_v28, %v5361_v60  ;;  %v13954_v28 = vld [vmem:[%s17761_s1 + $0x220] sm:$0xff] }
 0x499   : > { %12421 = vst.msk [vmem:[%s15996_s11 + $0x80] sm:$0xff] %vm5170_vm11, %v5680_v57  ;;  %v5891_v2 = vpack.c.bf16 %v5680_v57, %v5680_v57  ;;  %v12492_v7 = vld [vmem:[#allocation3] sm:$0xf]  ;;  %6916 = vmatpush.bf16.msra.mxu3 %v13954_v28 }
 0x49a   : > { %7325 = vst.msk [vmem:[#allocation3 + $0x8] sm:$0xf] %vm4128_vm7, %v16133_v46  ;;  %v12493_v34 = vor.u32 %v13914_v12, %v12492_v7 }
 0x49b   : > { %7324 = vst.msk [vmem:[#allocation3] sm:$0xf] %vm4128_vm7, %v7288_v37  ;;  %5981 = vrot.lane.b32.xlu1 %v5891_v2, %s14214_s21 }
 0x49c   : > { %5713 = vst [vmem:[#allocation2 + $0x128] sm:$0xff] %v5680_v57  ;;  %v5626_v11 = vpop.f32.mrf.mxu3  ;;  %12506 = vmatmul.msk.bf16.vlgmr.msra.gmra.mxu1 %vm988_vm4, %v12493_v34 }
 0x49d   : > { %6309 = vst.msk [vmem:[#allocation3 + $0x20] sm:$0xf] %vm862_vm2, %v6206_v43  ;;  %v5665_v20 = vadd.f32 %v5626_v11, %v5450_v36  ;;  %v5459_v38 = vpop.f32.mrf.mxu2 }
 0x49e   : > { %6058 = vst.msk [vmem:[#allocation3 + $0x28] sm:$0xf] %vm609_vm1, %v5956_v9  ;;  %v5966_v44 = vpop.permute.xlu2 %5965 }
 0x49f   : > { %6310 = vst.msk [vmem:[#allocation3 + $0x28] sm:$0xf] %vm862_vm2, %v6208_v30  ;;  %v5681_v46 = vadd.f32 %v15985_v18, %v5665_v20  ;;  %v5364_v51 = vpop.f32.mrf.mxu1 }
 0x4a0   : > { %6063 = vst.msk [vmem:[#allocation3 + $0x50] sm:$0xf] %vm609_vm1, %v5966_v44  ;;  %v5958_v22 = vpop.permute.xlu0 %5957  ;;  %v5960_v21 = vpop.permute.xlu1 %5959  ;;  %v5458_v23 = vadd.f32 %v5457_v55, %v5364_v51 }
 0x4a1   : > { %12422 = vst.msk [vmem:[%s15996_s11 + $0x88] sm:$0xff] %vm5170_vm11, %v5681_v46  ;;  %v5892_v54 = vpack.c.bf16 %v5681_v46, %v5681_v46 }
 0x4a2   : > { %5714 = vst [vmem:[#allocation2 + $0x130] sm:$0xff] %v5681_v46 }
 0x4a3   : > { %6059 = vst.msk [vmem:[#allocation3 + $0x30] sm:$0xf] %vm609_vm1, %v5958_v22  ;;  %v5747_v32 = vld [vmem:[#allocation2 + $0x127] sm:$0xff]  ;;  %5983 = vrot.lane.b32.xlu2 %v5892_v54, %s14214_s21  ;;  %v13965_v54 = vld [vmem:[%s17761_s1 + $0x238] sm:$0xff] }
 0x4a4   : > { %6311 = vst.msk [vmem:[#allocation3 + $0x30] sm:$0xf] %vm862_vm2, %v6210_v13  ;;  %v12444_v61 = vld [vmem:[#allocation3 + $0x20] sm:$0xf]  ;;  %v5783_v25 = vpack.c.bf16 %v5747_v32, %v5747_v32  ;;  %v5629_v49 = vpop.f32.mrf.mxu3  ;;  %7144 = vmatpush.bf16.msrb.mxu1 %v13965_v54 }
 0x4a5   : > { %v12516_v6 = vld [vmem:[#allocation3 + $0x20] sm:$0xf]  ;;  %6060 = vst.msk [vmem:[#allocation3 + $0x38] sm:$0xf] %vm609_vm1, %v5960_v21  ;;  %v5666_v0 = vadd.f32 %v5629_v49, %v5453_v29  ;;  %v5462_v20 = vpop.f32.mrf.mxu2  ;;  %v13950_v21 = vld [vmem:[%s17761_s1 + $0x208] sm:$0xff] }
 0x4a6   : > { %v13916_v62 = vld [vmem:[#allocation3 + $0x24] sm:$0xf0]  ;;  %5819 = vst.msk [vmem:[#allocation3 + $0x90] sm:$0xf] %vm356_vm0, %v5783_v25  ;;  %6991 = vmatpush.bf16.msrb.mxu0 %v13950_v21 }
 0x4a7   : > { %v13929_v42 = vld [vmem:[#allocation3 + $0x24] sm:$0xf0]  ;;  %v16246_v52 = vor.u32 %v13916_v62, %v12444_v61  ;;  %v5682_v33 = vadd.f32 %v15985_v18, %v5666_v0  ;;  %v5366_v26 = vpop.f32.mrf.mxu1 }
 0x4a8   : > { %v12517_v14 = vor.u32 %v13929_v42, %v12516_v6  ;;  %v6212_v8 = vpop.permute.xlu0 %6211  ;;  %v5962_v58 = vpop.permute.xlu1 %5961  ;;  %v5460_v46 = vadd.f32 %v5459_v38, %v5366_v26  ;;  %v6106_v6 = vld [vmem:[#allocation2 + $0x111] sm:$0xff]  ;;  %v6105_v25 = vld [vmem:[#allocation2 + $0x109] sm:$0xff] }
 0x4a9   : > { %12483 = vmatmul.msk.bf16.gmra.mxu0 %vm988_vm4, %v16246_v52  ;;  %12423 = vst.msk [vmem:[%s15996_s11 + $0x90] sm:$0xff] %vm5170_vm11, %v5682_v33  ;;  %v5748_v19 = vld [vmem:[#allocation2 + $0x12f] sm:$0xff]  ;;  %v6142_v51 = vpack.c.bf16 %v6106_v6, %v6106_v6  ;;  %v6141_v0 = vpack.c.bf16 %v6105_v25, %v6105_v25 }
 0x4aa   : > { %12558 = vmatmul.msk.bf16.vlgmr.msra.gmra.mxu2 %vm988_vm4, %v12517_v14  ;;  %v6107_v30 = vld [vmem:[#allocation2 + $0x129] sm:$0xff]  ;;  %v6108_v56 = vld [vmem:[#allocation2 + $0x131] sm:$0xff]  ;;  %5715 = vst [vmem:[#allocation2 + $0x148] sm:$0xff] %v5682_v33  ;;  %v5784_v5 = vpack.c.bf16 %v5748_v19, %v5748_v19 }
 0x4ab   : > { %v6143_v16 = vpack.c.bf16 %v6107_v30, %v6107_v30  ;;  %v6144_v40 = vpack.c.bf16 %v6108_v56, %v6108_v56  ;;  %6312 = vst.msk [vmem:[#allocation3 + $0x38] sm:$0xf] %vm862_vm2, %v6212_v8  ;;  %6227 = vrot.lane.b32.xlu2 %v6140_v39, %s14215_s22  ;;  %v12448_v10 = vld [vmem:[#allocation3 + $0x30] sm:$0xf] }
 0x4ac   : > { %6061 = vst.msk [vmem:[#allocation3 + $0x40] sm:$0xf] %vm609_vm1, %v5962_v58  ;;  %v5631_v18 = vpop.f32.mrf.mxu3  ;;  %12507 = vmatmul.msk.bf16.gmra.mxu1 %vm988_vm4, %v16219_v48  ;;  %v5893_v48 = vpack.c.bf16 %v5682_v33, %v5682_v33  ;;  %v12520_v50 = vld [vmem:[#allocation3 + $0x30] sm:$0xf] }
 0x4ad   : > { %6233 = vrot.lane.b32.xlu0 %v6143_v16, %s14215_s22  ;;  %6235 = vrot.lane.b32.xlu1 %v6144_v40, %s14215_s22  ;;  %5820 = vst.msk [vmem:[#allocation3 + $0x98] sm:$0xf] %vm356_vm0, %v5784_v5  ;;  %v5667_v13 = vadd.f32 %v5631_v18, %v5455_v15  ;;  %v5464_v8 = vpop.f32.mrf.mxu2 }
 0x4af   : > { %v5683_v53 = vadd.f32 %v16265_v4, %v5667_v13  ;;  %v6220_v27 = vpop.permute.xlu2 %6219  ;;  %v5369_v43 = vpop.f32.mrf.mxu1 }
 0x4b0   : > { %v5463_v58 = vadd.f32 %v5462_v20, %v5369_v43 }
 0x4b1   : > { %12424 = vst.msk [vmem:[%s15996_s11 + $0x98] sm:$0xff] %vm5170_vm11, %v5683_v53  ;;  %v5749_v35 = vld [vmem:[#allocation2 + $0x147] sm:$0xff]  ;;  %v5894_v34 = vpack.c.bf16 %v5683_v53, %v5683_v53 }
 0x4b2   : > { %5716 = vst [vmem:[#allocation2 + $0x150] sm:$0xff] %v5683_v53  ;;  %v13917_v17 = vld [vmem:[#allocation3 + $0x34] sm:$0xf0]  ;;  %v5785_v63 = vpack.c.bf16 %v5749_v35, %v5749_v35 }
 0x4b3   : > { %v13930_v3 = vld [vmem:[#allocation3 + $0x34] sm:$0xf0]  ;;  %5979 = vrot.lane.b32.xlu2 %v5890_v1, %s14214_s21  ;;  %v16278_v47 = vor.u32 %v13917_v17, %v12448_v10 }
 0x4b4   : > { %5821 = vst.msk [vmem:[#allocation3 + $0xa0] sm:$0xf] %vm356_vm0, %v5785_v63  ;;  %v5634_v45 = vpop.f32.mrf.mxu3  ;;  %v12521_v24 = vor.u32 %v13930_v3, %v12520_v50 }
 0x4b5   : > { %5977 = vrot.lane.b32.xlu1 %v5889_v31, %s14214_s21  ;;  %5985 = vrot.lane.b32.xlu0 %v5893_v48, %s14214_s21  ;;  %v5668_v59 = vadd.f32 %v5634_v45, %v5458_v23  ;;  %v5467_v63 = vpop.f32.mrf.mxu2 }
 0x4b7   : > { %v6216_v37 = vpop.permute.xlu1 %6215  ;;  %v6214_v57 = vpop.permute.xlu0 %6213  ;;  %v5684_v12 = vadd.f32 %v16265_v4, %v5668_v59 }
 0x4b8   : > { %6314 = vst.msk [vmem:[#allocation3 + $0x48] sm:$0xf] %vm862_vm2, %v6216_v37  ;;  %v5371_v62 = vpop.f32.mrf.mxu1 }
 0x4b9   : > { %6313 = vst.msk [vmem:[#allocation3 + $0x40] sm:$0xf] %vm862_vm2, %v6214_v57  ;;  %12484 = vmatmul.msk.bf16.gmra.mxu0 %vm988_vm4, %v16278_v47  ;;  %v5750_v9 = vld [vmem:[#allocation2 + $0x14f] sm:$0xff]  ;;  %v5465_v3 = vadd.f32 %v5464_v8, %v5371_v62 }
 0x4ba   : > { %12559 = vmatmul.msk.bf16.gmra.mxu2 %vm988_vm4, %v12521_v24  ;;  %12425 = vst.msk [vmem:[%s15996_s11 + $0xa0] sm:$0xff] %vm5170_vm11, %v5684_v12  ;;  %v6110_v2 = vld [vmem:[#allocation2 + $0x151] sm:$0xff]  ;;  %v6109_v7 = vld [vmem:[#allocation2 + $0x149] sm:$0xff]  ;;  %v5786_v36 = vpack.c.bf16 %v5750_v9, %v5750_v9 }
 0x4bb   : > { %5717 = vst [vmem:[#allocation2 + $0x168] sm:$0xff] %v5684_v12  ;;  %v6146_v60 = vpack.c.bf16 %v6110_v2, %v6110_v2  ;;  %v6145_v11 = vpack.c.bf16 %v6109_v7, %v6109_v7 }
 0x4bc   : > { %5822 = vst.msk [vmem:[#allocation3 + $0xa8] sm:$0xf] %vm356_vm0, %v5786_v36  ;;  %v5636_v44 = vpop.f32.mrf.mxu3  ;;  %12508 = vmatmul.msk.bf16.gmra.mxu1 %vm988_vm4, %v16246_v52  ;;  %v5895_v52 = vpack.c.bf16 %v5684_v12, %v5684_v12 }
 0x4bd   : > { %6239 = vrot.lane.b32.xlu0 %v6146_v60, %s14215_s22  ;;  %5987 = vrot.lane.b32.xlu1 %v5894_v34, %s14214_s21  ;;  %v5669_v22 = vadd.f32 %v5636_v44, %v5460_v46  ;;  %v5469_v34 = vpop.f32.mrf.mxu2 }
 0x4be   : > { %6237 = vrot.lane.b32.xlu2 %v6145_v11, %s14215_s22  ;;  %v6222_v29 = vpop.permute.xlu2 %6221 }
 0x4bf   : > { %v5968_v32 = vpop.permute.xlu0 %5967  ;;  %v5685_v61 = vadd.f32 %v16265_v4, %v5669_v22  ;;  %v13918_v42 = vld [vmem:[#allocation3 + $0x44] sm:$0xf0] }
 0x4c0   : > { %6064 = vst.msk [vmem:[#allocation3 + $0x58] sm:$0xf] %vm609_vm1, %v5968_v32  ;;  %v13931_v55 = vld [vmem:[#allocation3 + $0x44] sm:$0xf0]  ;;  %v12452_v14 = vld [vmem:[#allocation3 + $0x40] sm:$0xf]  ;;  %v5374_v17 = vpop.f32.mrf.mxu1 }
 0x4c1   : > { %6316 = vst.msk [vmem:[#allocation3 + $0x58] sm:$0xf] %vm862_vm2, %v6220_v27  ;;  %v12524_v33 = vld [vmem:[#allocation3 + $0x40] sm:$0xf]  ;;  %v16313_v56 = vor.u32 %v13918_v42, %v12452_v14  ;;  %v5896_v13 = vpack.c.bf16 %v5685_v61, %v5685_v61  ;;  %v5468_v37 = vadd.f32 %v5467_v63, %v5374_v17 }
 0x4c2   : > { %12426 = vst.msk [vmem:[%s15996_s11 + $0xa8] sm:$0xff] %vm5170_vm11, %v5685_v61  ;;  %v5751_v49 = vld [vmem:[#allocation2 + $0x167] sm:$0xff]  ;;  %v12525_v39 = vor.u32 %v13931_v55, %v12524_v33 }
 0x4c3   : > { %5718 = vst [vmem:[#allocation2 + $0x170] sm:$0xff] %v5685_v61  ;;  %v5787_v41 = vpack.c.bf16 %v5751_v49, %v5751_v49  ;;  %v13949_v17 = vld [vmem:[%s17761_s1 + $0x200] sm:$0xff] }
 0x4c4   : > { %6992 = vmatpush.bf16.msrb.mxu0 %v13949_v17 }
 0x4c5   : > { %6231 = vrot.lane.b32.xlu1 %v6142_v51, %s14215_s22  ;;  %6229 = vrot.lane.b32.xlu0 %v6141_v0, %s14215_s22  ;;  %5823 = vst.msk [vmem:[#allocation3 + $0xb0] sm:$0xf] %vm356_vm0, %v5787_v41  ;;  %v5472_v51 = vpop.f32.mrf.mxu2  ;;  %v13953_v0 = vld [vmem:[%s17761_s1 + $0x218] sm:$0xff] }
 0x4c6   : > { %5989 = vrot.lane.b32.xlu2 %v5895_v52, %s14214_s21  ;;  %v5974_v30 = vpop.permute.xlu2 %5973  ;;  %v5639_v5 = vpop.f32.mrf.mxu3  ;;  %6917 = vmatpush.bf16.msra.mxu3 %v13953_v0 }
 0x4c7   : > { %v6218_v19 = vpop.permute.xlu1 %6217  ;;  %6067 = vst.msk [vmem:[#allocation3 + $0x70] sm:$0xf] %vm609_vm1, %v5974_v30  ;;  %v5670_v16 = vadd.f32 %v5639_v5, %v5463_v58 }
 0x4c8   : > { %6315 = vst.msk [vmem:[#allocation3 + $0x50] sm:$0xf] %vm862_vm2, %v6218_v19  ;;  %v5970_v40 = vpop.permute.xlu0 %5969  ;;  %v13919_v12 = vld [vmem:[#allocation3 + $0x54] sm:$0xf0]  ;;  %v5376_v9 = vpop.f32.mrf.mxu1 }
 0x4c9   : > { %12485 = vmatmul.msk.bf16.gmra.mxu0 %vm988_vm4, %v16313_v56  ;;  %6065 = vst.msk [vmem:[#allocation3 + $0x60] sm:$0xf] %vm609_vm1, %v5970_v40  ;;  %v5686_v53 = vadd.f32 %v16265_v4, %v5670_v16  ;;  %v13932_v43 = vld [vmem:[#allocation3 + $0x54] sm:$0xf0] }
 0x4ca   : > { %12560 = vmatmul.msk.bf16.gmra.mxu2 %vm988_vm4, %v12525_v39  ;;  %v5752_v15 = vld [vmem:[#allocation2 + $0x16f] sm:$0xff]  ;;  %6317 = vst.msk [vmem:[#allocation3 + $0x60] sm:$0xf] %vm862_vm2, %v6222_v29  ;;  %v5470_v29 = vadd.f32 %v5469_v34, %v5376_v9 }
 0x4cb   : > { %v6111_v18 = vld [vmem:[#allocation2 + $0x169] sm:$0xff]  ;;  %v6112_v26 = vld [vmem:[#allocation2 + $0x171] sm:$0xff]  ;;  %v5788_v38 = vpack.c.bf16 %v5752_v15, %v5752_v15  ;;  %12427 = vst.msk [vmem:[%s15996_s11 + $0xb0] sm:$0xff] %vm5170_vm11, %v5686_v53  ;;  %v5897_v50 = vpack.c.bf16 %v5686_v53, %v5686_v53 }
 0x4cc   : > { %v6147_v35 = vpack.c.bf16 %v6111_v18, %v6111_v18  ;;  %v6148_v1 = vpack.c.bf16 %v6112_v26, %v6112_v26  ;;  %5719 = vst [vmem:[#allocation2 + $0x188] sm:$0xff] %v5686_v53  ;;  %12509 = vmatmul.msk.bf16.gmra.mxu1 %vm988_vm4, %v16278_v47 }
 0x4cd   : > { %5991 = vrot.lane.b32.xlu0 %v5896_v13, %s14214_s21  ;;  %5824 = vst.msk [vmem:[#allocation3 + $0xb8] sm:$0xf] %vm356_vm0, %v5788_v38  ;;  %v5474_v26 = vpop.f32.mrf.mxu2 }
 0x4ce   : > { %6241 = vrot.lane.b32.xlu1 %v6147_v35, %s14215_s22  ;;  %6243 = vrot.lane.b32.xlu2 %v6148_v1, %s14215_s22  ;;  %v5641_v48 = vpop.f32.mrf.mxu3 }
 0x4cf   : > { %v5972_v31 = vpop.permute.xlu1 %5971  ;;  %v5671_v23 = vadd.f32 %v5641_v48, %v5465_v3  ;;  %v12456_v45 = vld [vmem:[#allocation3 + $0x50] sm:$0xf] }
 0x4d0   : > { %6066 = vst.msk [vmem:[#allocation3 + $0x68] sm:$0xf] %vm609_vm1, %v5972_v31  ;;  %v12528_v27 = vld [vmem:[#allocation3 + $0x50] sm:$0xf]  ;;  %v12457_v2 = vor.u32 %v13919_v12, %v12456_v45  ;;  %v5379_v25 = vpop.f32.mrf.mxu1 }
 0x4d1   : > { %v5687_v10 = vadd.f32 %v16265_v4, %v5671_v23  ;;  %v12529_v7 = vor.u32 %v13932_v43, %v12528_v27  ;;  %v5473_v14 = vadd.f32 %v5472_v51, %v5379_v25  ;;  %v12460_v33 = vld [vmem:[#allocation3 + $0x60] sm:$0xf]  ;;  %v13964_v3 = vld [vmem:[%s17761_s1 + $0x230] sm:$0xff] }
 0x4d2   : > { %v12532_v58 = vld [vmem:[#allocation3 + $0x60] sm:$0xf]  ;;  %7145 = vmatpush.bf16.msrb.mxu1 %v13964_v3 }
 0x4d3   : > { %12428 = vst.msk [vmem:[%s15996_s11 + $0xb8] sm:$0xff] %vm5170_vm11, %v5687_v10  ;;  %v5753_v24 = vld [vmem:[#allocation2 + $0x187] sm:$0xff]  ;;  %v5898_v47 = vpack.c.bf16 %v5687_v10, %v5687_v10 }
 0x4d4   : > { %5720 = vst [vmem:[#allocation2 + $0x190] sm:$0xff] %v5687_v10  ;;  %v5789_v59 = vpack.c.bf16 %v5753_v24, %v5753_v24 }
 0x4d5   : > { %5993 = vrot.lane.b32.xlu0 %v5897_v50, %s14214_s21  ;;  %v5477_v43 = vpop.f32.mrf.mxu2 }
 0x4d6   : > { %v6224_v57 = vpop.permute.xlu0 %6223  ;;  %5995 = vrot.lane.b32.xlu1 %v5898_v47, %s14214_s21  ;;  %v5644_v36 = vpop.f32.mrf.mxu3  ;;  %5825 = vst.msk [vmem:[#allocation3 + $0xc0] sm:$0xf] %vm356_vm0, %v5789_v59 }
 0x4d7   : > { %6318 = vst.msk [vmem:[#allocation3 + $0x68] sm:$0xf] %vm862_vm2, %v6224_v57  ;;  %v5672_v60 = vadd.f32 %v5644_v36, %v5468_v37 }
 0x4d8   : > { %v5381_v16 = vpop.f32.mrf.mxu1 }
 0x4d9   : > { %12486 = vmatmul.msk.bf16.gmra.mxu0 %vm988_vm4, %v12457_v2  ;;  %v5688_v11 = vadd.f32 %v16265_v4, %v5672_v60  ;;  %v5475_v1 = vadd.f32 %v5474_v26, %v5381_v16 }
 0x4da   : > { %12561 = vmatmul.msk.bf16.gmra.mxu2 %vm988_vm4, %v12529_v7 }
 0x4db   : > { %12429 = vst.msk [vmem:[%s15996_s11 + $0xc0] sm:$0xff] %vm5170_vm11, %v5688_v11  ;;  %v5754_v28 = vld [vmem:[#allocation2 + $0x18f] sm:$0xff]  ;;  %v5899_v44 = vpack.c.bf16 %v5688_v11, %v5688_v11 }
 0x4dc   : > { %v6114_v20 = vld [vmem:[#allocation2 + $0x191] sm:$0xff]  ;;  %v6113_v46 = vld [vmem:[#allocation2 + $0x189] sm:$0xff]  ;;  %5721 = vst [vmem:[#allocation2 + $0x1a8] sm:$0xff] %v5688_v11  ;;  %12510 = vmatmul.msk.bf16.gmra.mxu1 %vm988_vm4, %v16313_v56  ;;  %v5790_v22 = vpack.c.bf16 %v5754_v28, %v5754_v28 }
 0x4dd   : > { %v6150_v21 = vpack.c.bf16 %v6114_v20, %v6114_v20  ;;  %v6149_v54 = vpack.c.bf16 %v6113_v46, %v6113_v46  ;;  %v5479_v34 = vpop.f32.mrf.mxu2 }
 0x4de   : > { %v5976_v32 = vpop.permute.xlu0 %5975  ;;  %5997 = vrot.lane.b32.xlu1 %v5899_v44, %s14214_s21  ;;  %5826 = vst.msk [vmem:[#allocation3 + $0xc8] sm:$0xf] %vm356_vm0, %v5790_v22  ;;  %v5646_v61 = vpop.f32.mrf.mxu3  ;;  %v13920_v41 = vld [vmem:[#allocation3 + $0x64] sm:$0xf0] }
 0x4df   : > { %6247 = vrot.lane.b32.xlu0 %v6150_v21, %s14215_s22  ;;  %6245 = vrot.lane.b32.xlu2 %v6149_v54, %s14215_s22  ;;  %v5673_v6 = vadd.f32 %v5646_v61, %v5470_v29  ;;  %6068 = vst.msk [vmem:[#allocation3 + $0x78] sm:$0xf] %vm609_vm1, %v5976_v32  ;;  %v13933_v62 = vld [vmem:[#allocation3 + $0x64] sm:$0xf0]  ;;  %v12461_v19 = vor.u32 %v13920_v41, %v12460_v33 }
 0x4e0   : > { %v12533_v30 = vor.u32 %v13933_v62, %v12532_v58  ;;  %v5384_v45 = vpop.f32.mrf.mxu1  ;;  %v13952_v62 = vld [vmem:[%s17761_s1 + $0x210] sm:$0xff] }
 0x4e1   : > { %v5689_v49 = vadd.f32 %v16265_v4, %v5673_v6  ;;  %v5478_v7 = vadd.f32 %v5477_v43, %v5384_v45  ;;  %6918 = vmatpush.bf16.msra.mxu3 %v13952_v62 }
 0x4e3   : > { %12430 = vst.msk [vmem:[%s15996_s11 + $0xc8] sm:$0xff] %vm5170_vm11, %v5689_v49  ;;  %v5755_v42 = vld [vmem:[#allocation2 + $0x1a7] sm:$0xff]  ;;  %v5900_v55 = vpack.c.bf16 %v5689_v49, %v5689_v49 }
 0x4e4   : > { %5722 = vst [vmem:[#allocation2 + $0x1b0] sm:$0xff] %v5689_v49  ;;  %v5791_v52 = vpack.c.bf16 %v5755_v42, %v5755_v42 }
 0x4e5   : > { %v6226_v8 = vpop.permute.xlu1 %6225  ;;  %v5482_v0 = vpop.f32.mrf.mxu2 }
 0x4e6   : > { %6319 = vst.msk [vmem:[#allocation3 + $0x70] sm:$0xf] %vm862_vm2, %v6226_v8  ;;  %v5649_v56 = vpop.f32.mrf.mxu3 }
 0x4e7   : > { %5999 = vrot.lane.b32.xlu2 %v5900_v55, %s14214_s21  ;;  %5827 = vst.msk [vmem:[#allocation3 + $0xd0] sm:$0xf] %vm356_vm0, %v5791_v52  ;;  %v5674_v39 = vadd.f32 %v5649_v56, %v5473_v14 }
 0x4e8   : > { %v5386_v9 = vpop.f32.mrf.mxu1 }
 0x4e9   : > { %12487 = vmatmul.msk.bf16.gmra.mxu0 %vm988_vm4, %v12461_v19  ;;  %v5690_v5 = vadd.f32 %v16265_v4, %v5674_v39  ;;  %v5480_v6 = vadd.f32 %v5479_v34, %v5386_v9  ;;  %v13948_v39 = vld [vmem:[%s17761_s1 + $0x1f8] sm:$0xff] }
 0x4ea   : > { %12562 = vmatmul.msk.bf16.gmra.mxu2 %vm988_vm4, %v12533_v30  ;;  %6993 = vmatpush.bf16.msrb.mxu0 %v13948_v39 }
 0x4eb   : > { %12431 = vst.msk [vmem:[%s15996_s11 + $0xd0] sm:$0xff] %vm5170_vm11, %v5690_v5  ;;  %v5756_v40 = vld [vmem:[#allocation2 + $0x1af] sm:$0xff]  ;;  %v5901_v13 = vpack.c.bf16 %v5690_v5, %v5690_v5 }
 0x4ec   : > { %v6116_v15 = vld [vmem:[#allocation2 + $0x1b1] sm:$0xff]  ;;  %v6115_v18 = vld [vmem:[#allocation2 + $0x1a9] sm:$0xff]  ;;  %5723 = vst [vmem:[#allocation2 + $0x1c8] sm:$0xff] %v5690_v5  ;;  %12511 = vmatmul.msk.bf16.gmra.mxu1 %vm988_vm4, %v12457_v2  ;;  %v5792_v53 = vpack.c.bf16 %v5756_v40, %v5756_v40 }
 0x4ed   : > { %v6152_v38 = vpack.c.bf16 %v6116_v15, %v6116_v15  ;;  %v6151_v35 = vpack.c.bf16 %v6115_v18, %v6115_v18  ;;  %v12464_v20 = vld [vmem:[#allocation3 + $0x70] sm:$0xf]  ;;  %v13963_v5 = vld [vmem:[%s17761_s1 + $0x228] sm:$0xff]  ;;  %v5484_v16 = vpop.f32.mrf.mxu2 }
 0x4ee   : > { %5828 = vst.msk [vmem:[#allocation3 + $0xd8] sm:$0xf] %vm356_vm0, %v5792_v53  ;;  %v5651_v31 = vpop.f32.mrf.mxu3  ;;  %v12536_v46 = vld [vmem:[#allocation3 + $0x70] sm:$0xf]  ;;  %7146 = vmatpush.bf16.msrb.mxu1 %v13963_v5 }
 0x4ef   : > { %6251 = vrot.lane.b32.xlu1 %v6152_v38, %s14215_s22  ;;  %6249 = vrot.lane.b32.xlu0 %v6151_v35, %s14215_s22  ;;  %v5675_v63 = vadd.f32 %v5651_v31, %v5475_v1 }
 0x4f0   : > { %6001 = vrot.lane.b32.xlu2 %v5901_v13, %s14214_s21 }
 0x4f1   : > { %v5691_v48 = vadd.f32 %v16265_v4, %v5675_v63 }
 0x4f3   : > { %12432 = vst.msk [vmem:[%s15996_s11 + $0xd8] sm:$0xff] %vm5170_vm11, %v5691_v48  ;;  %v5757_v23 = vld [vmem:[#allocation2 + $0x1c7] sm:$0xff]  ;;  %v5902_v10 = vpack.c.bf16 %v5691_v48, %v5691_v48 }
 0x4f4   : > { %5724 = vst [vmem:[#allocation2 + $0x1d0] sm:$0xff] %v5691_v48  ;;  %v5793_v50 = vpack.c.bf16 %v5757_v23, %v5757_v23 }
 0x4f6   : > { %5829 = vst.msk [vmem:[#allocation3 + $0xe0] sm:$0xf] %vm356_vm0, %v5793_v50  ;;  %v14201_v50 = vld [vmem:[#allocation2] sm:$0xff] }
 0x4f7   : > { %6003 = vrot.lane.b32.xlu0 %v5902_v10, %s14214_s21  ;;  %v16420_v45 = vpack.c.bf16 %v14201_v50, %v14201_v50 }
 0x4fb   : > { %v5758_v27 = vld [vmem:[#allocation2 + $0x1cf] sm:$0xff] }
 0x4fc   : > { %v6117_v24 = vld [vmem:[#allocation2 + $0x1c9] sm:$0xff]  ;;  %v6118_v47 = vld [vmem:[#allocation2 + $0x1d1] sm:$0xff]  ;;  %v5794_v59 = vpack.c.bf16 %v5758_v27, %v5758_v27  ;;  %12512 = vmatmul.msk.bf16.gmra.mxu1 %vm988_vm4, %v12461_v19 }
 0x4fd   : > { %v6153_v37 = vpack.c.bf16 %v6117_v24, %v6117_v24  ;;  %v6154_v57 = vpack.c.bf16 %v6118_v47, %v6118_v47  ;;  %v5984_v12 = vpop.permute.xlu2 %5983 }
 0x4fe   : > { %6072 = vst.msk [vmem:[#allocation3 + $0x98] sm:$0xf] %vm609_vm1, %v5984_v12 }
 0x4ff   : > { %5830 = vst.msk [vmem:[#allocation3 + $0xe8] sm:$0xf] %vm356_vm0, %v5794_v59  ;;  %6253 = vrot.lane.b32.xlu1 %v6153_v37, %s14215_s22  ;;  %6255 = vrot.lane.b32.xlu2 %v6154_v57, %s14215_s22 }
 0x501   : > { %v5389_v36 = vpop.f32.mrf.mxu1 }
 0x502   : > { %v5483_v14 = vadd.f32 %v5482_v0, %v5389_v36 }
 0x505   : > { %v6228_v2 = vpop.permute.xlu2 %6227 }
 0x506   : > { %6320 = vst.msk [vmem:[#allocation3 + $0x78] sm:$0xf] %vm862_vm2, %v6228_v2  ;;  %v16436_v2 = vld [vmem:[%s17762_s2 + $0x3] ss:$0 sm:$0xff] }
 0x508   : > { %v5654_v60 = vpop.f32.mrf.mxu3 }
 0x509   : > { %v5676_v11 = vadd.f32 %v5654_v60, %v5478_v7  ;;  %v5391_v51 = vpop.f32.mrf.mxu1 }
 0x50a   : > { %v5485_v17 = vadd.f32 %v5484_v16, %v5391_v51 }
 0x50b   : > { %v5692_v28 = vadd.f32 %v16265_v4, %v5676_v11 }
 0x50d   : > { %12433 = vst.msk [vmem:[%s15996_s11 + $0xe0] sm:$0xff] %vm5170_vm11, %v5692_v28  ;;  %v5903_v44 = vpack.c.bf16 %v5692_v28, %v5692_v28  ;;  %v5982_v22 = vpop.permute.xlu1 %5981  ;;  %v5980_v21 = vpop.permute.xlu2 %5979  ;;  %v13921_v54 = vld [vmem:[#allocation3 + $0x74] sm:$0xf0] }
 0x50e   : > { %v13934_v29 = vld [vmem:[#allocation3 + $0x74] sm:$0xf0]  ;;  %5725 = vst [vmem:[#allocation2 + $0x1e8] sm:$0xff] %v5692_v28  ;;  %v12465_v32 = vor.u32 %v13921_v54, %v12464_v20 }
 0x50f   : > { %v12537_v61 = vor.u32 %v13934_v29, %v12536_v46  ;;  %6005 = vrot.lane.b32.xlu0 %v5903_v44, %s14214_s21  ;;  %6071 = vst.msk [vmem:[#allocation3 + $0x90] sm:$0xf] %vm609_vm1, %v5982_v22 }
 0x510   : > { %v5656_v25 = vpop.f32.mrf.mxu3  ;;  %6070 = vst.msk [vmem:[#allocation3 + $0x88] sm:$0xf] %vm609_vm1, %v5980_v21  ;;  %12488 = vmatmul.msk.bf16.gmra.mxu0 %vm988_vm4, %v12465_v32  ;;  %12513 = vmatmul.msk.bf16.gmra.mxu1 %vm988_vm4, %v12465_v32 }
 0x511   : > { %v5677_v49 = vadd.f32 %v5656_v25, %v5480_v6  ;;  %12563 = vmatmul.msk.bf16.gmra.mxu2 %vm988_vm4, %v12537_v61  ;;  %v6464_v8 = vpop.f32.mrf.mxu0  ;;  %v7613_v61 = vld [vmem:[#allocation2 + $0x11] sm:$0xff]  ;;  %v7612_v6 = vld [vmem:[#allocation2 + $0x9] sm:$0xff] }
 0x512   : > { %v7649_v0 = vpack.c.bf16 %v7613_v61, %v7613_v61 }
 0x513   : > { %v5693_v41 = vadd.f32 %v16265_v4, %v5677_v49 }
 0x515   : > { %12434 = vst.msk [vmem:[%s15996_s11 + $0xe8] sm:$0xff] %vm5170_vm11, %v5693_v41  ;;  %v5759_v42 = vld [vmem:[#allocation2 + $0x1e7] sm:$0xff]  ;;  %v5904_v55 = vpack.c.bf16 %v5693_v41, %v5693_v41 }
 0x516   : > { %5726 = vst [vmem:[#allocation2 + $0x1f0] sm:$0xff] %v5693_v41  ;;  %v5795_v52 = vpack.c.bf16 %v5759_v42, %v5759_v42  ;;  %v7648_v41 = vpack.c.bf16 %v7612_v6, %v7612_v6 }
 0x517   : > { %6007 = vrot.lane.b32.xlu1 %v5904_v55, %s14214_s21 }
 0x518   : > { %v6238_v33 = vpop.permute.xlu2 %6237  ;;  %5831 = vst.msk [vmem:[#allocation3 + $0xf0] sm:$0xf] %vm356_vm0, %v5795_v52  ;;  %v5659_v58 = vpop.f32.mrf.mxu3 }
 0x519   : > { %v5678_v19 = vadd.f32 %v5659_v58, %v5483_v14  ;;  %v6539_v30 = vpop.f32.mrf.mxu1  ;;  %v6466_v48 = vpop.f32.mrf.mxu0 }
 0x51a   : > { %v6540_v9 = vadd.f32 %v6539_v30, %v6464_v8 }
 0x51b   : > { %v5694_v56 = vadd.f32 %v16265_v4, %v5678_v19 }
 0x51d   : > { %12435 = vst.msk [vmem:[%s15996_s11 + $0xf0] sm:$0xff] %vm5170_vm11, %v5694_v56  ;;  %v5760_v40 = vld [vmem:[#allocation2 + $0x1ef] sm:$0xff]  ;;  %v5905_v13 = vpack.c.bf16 %v5694_v56, %v5694_v56 }
 0x51e   : > { %v6120_v15 = vld [vmem:[#allocation2 + $0x1f1] sm:$0xff]  ;;  %v6119_v18 = vld [vmem:[#allocation2 + $0x1e9] sm:$0xff]  ;;  %5727 = vst [vmem:[#allocation2 + $0x208] sm:$0xff] %v5694_v56  ;;  %v5796_v26 = vpack.c.bf16 %v5760_v40, %v5760_v40 }
 0x51f   : > { %v6156_v53 = vpack.c.bf16 %v6120_v15, %v6120_v15  ;;  %v6155_v38 = vpack.c.bf16 %v6119_v18, %v6119_v18  ;;  %v6234_v35 = vpop.permute.xlu0 %6233  ;;  %v6236_v1 = vpop.permute.xlu1 %6235  ;;  %6009 = vrot.lane.b32.xlu1 %v5905_v13, %s14214_s21 }
 0x520   : > { %6323 = vst.msk [vmem:[#allocation3 + $0x90] sm:$0xf] %vm862_vm2, %v6234_v35  ;;  %v5990_v3 = vpop.permute.xlu2 %5989  ;;  %v5661_v31 = vpop.f32.mrf.mxu3 }
 0x521   : > { %5832 = vst.msk [vmem:[#allocation3 + $0xf8] sm:$0xf] %vm356_vm0, %v5796_v26  ;;  %6259 = vrot.lane.b32.xlu0 %v6156_v53, %s14215_s22  ;;  %6257 = vrot.lane.b32.xlu2 %v6155_v38, %s14215_s22  ;;  %v5679_v63 = vadd.f32 %v5661_v31, %v5485_v17  ;;  %v6541_v23 = vpop.f32.mrf.mxu1 }
 0x522   : > { %6324 = vst.msk [vmem:[#allocation3 + $0x98] sm:$0xf] %vm862_vm2, %v6236_v1  ;;  %v6542_v25 = vadd.f32 %v6541_v23, %v6466_v48 }
 0x523   : > { %6075 = vst.msk [vmem:[#allocation3 + $0xb0] sm:$0xf] %vm609_vm1, %v5990_v3  ;;  %v5695_v10 = vadd.f32 %v16265_v4, %v5679_v63 }
 0x525   : > { %12436 = vst.msk [vmem:[%s15996_s11 + $0xf8] sm:$0xff] %vm5170_vm11, %v5695_v10  ;;  %v5761_v27 = vld [vmem:[#allocation2 + $0x207] sm:$0xff]  ;;  %v5906_v24 = vpack.c.bf16 %v5695_v10, %v5695_v10 }
 0x526   : > { %5728 = vst [vmem:[#allocation2 + $0x210] sm:$0xff] %v5695_v10  ;;  %v5797_v47 = vpack.c.bf16 %v5761_v27, %v5761_v27  ;;  %v6469_v7 = vpop.f32.mrf.mxu0 }
 0x527   : > { %v5978_v59 = vpop.permute.xlu1 %5977  ;;  %v12568_v37 = vld [vmem:[#allocation3 + $0x90] sm:$0xf]  ;;  %v5986_v57 = vpop.permute.xlu0 %5985 }
 0x528   : > { %6069 = vst.msk [vmem:[#allocation3 + $0x80] sm:$0xf] %vm609_vm1, %v5978_v59  ;;  %v6244_v32 = vpop.permute.xlu2 %6243 }
 0x529   : > { %5833 = vst.msk [vmem:[#allocation3 + $0x100] sm:$0xf] %vm356_vm0, %v5797_v47  ;;  %7470 = vrot.lane.b32.xlu0 %v16420_v45, %s14215_s22  ;;  %v13941_v4 = vld [vmem:[#allocation3 + $0x94] sm:$0xf0]  ;;  %6011 = vrot.lane.b32.xlu2 %v5906_v24, %s14214_s21  ;;  %v6544_v43 = vpop.f32.mrf.mxu1 }
 0x52a   : > { %6073 = vst.msk [vmem:[#allocation3 + $0xa0] sm:$0xf] %vm609_vm1, %v5986_v57  ;;  %v16430_v12 = vor.u32 %v13941_v4, %v12568_v37  ;;  %v6545_v40 = vadd.f32 %v6544_v43, %v6469_v7 }
 0x52b   : > { %6325 = vst.msk [vmem:[#allocation3 + $0xa0] sm:$0xf] %vm862_vm2, %v6238_v33 }
 0x52c   : > { %12610 = vmatmul.msk.bf16.vlgmr.msra.gmra.mxu3 %vm988_vm4, %v16430_v12 }
 0x52d   : > { %v6692_v36 = vpop.f32.mrf.mxu2  ;;  %v5762_v34 = vld [vmem:[#allocation2 + $0x20f] sm:$0xff] }
 0x52e   : > { %v6732_v60 = vadd.f32 %v6692_v36, %v6540_v9  ;;  %v6122_v11 = vld [vmem:[#allocation2 + $0x211] sm:$0xff]  ;;  %v6121_v28 = vld [vmem:[#allocation2 + $0x209] sm:$0xff]  ;;  %v5798_v20 = vpack.c.bf16 %v5762_v34, %v5762_v34  ;;  %v6471_v42 = vpop.f32.mrf.mxu0 }
 0x52f   : > { %v6158_v46 = vpack.c.bf16 %v6122_v11, %v6122_v11  ;;  %v6157_v44 = vpack.c.bf16 %v6121_v28, %v6121_v28  ;;  %v5988_v22 = vpop.permute.xlu1 %5987  ;;  %v6240_v54 = vpop.permute.xlu0 %6239 }
 0x530   : > { %v6751_v21 = vadd.f32 %v16436_v2, %v6732_v60  ;;  %6074 = vst.msk [vmem:[#allocation3 + $0xa8] sm:$0xf] %vm609_vm1, %v5988_v22 }
 0x531   : > { %6263 = vrot.lane.b32.xlu1 %v6158_v46, %s14215_s22  ;;  %5834 = vst.msk [vmem:[#allocation3 + $0x108] sm:$0xf] %vm356_vm0, %v5798_v20  ;;  %6261 = vrot.lane.b32.xlu0 %v6157_v44, %s14215_s22  ;;  %v6546_v51 = vpop.f32.mrf.mxu1 }
 0x532   : > { %v6767_v29 = vmax.f32 %v6751_v21, 0.0  ;;  %6326 = vst.msk [vmem:[#allocation3 + $0xa8] sm:$0xf] %vm862_vm2, %v6240_v54  ;;  %7468 = vrot.lane.b32.xlu2 %v16420_v45, %s14215_s22  ;;  %v12572_v33 = vld [vmem:[#allocation3 + $0xa0] sm:$0xf]  ;;  %v6547_v57 = vadd.f32 %v6546_v51, %v6471_v42 }
 0x533   : > { %v12644_v8 = vld [vmem:[#allocation3 + $0xa0] sm:$0xf]  ;;  %v13936_v42 = vld [vmem:[#allocation3 + $0x94] sm:$0xf0] }
 0x534   : > { %6783 = vst [vmem:[#allocation2 + $0x28] sm:$0xff] %v6767_v29  ;;  %v7398_v38 = vpack.c.bf16 %v6767_v29, %v6767_v29 }
 0x535   : > { %v6694_v49 = vpop.f32.mrf.mxu2 }
 0x536   : > { %v6733_v62 = vadd.f32 %v6694_v49, %v6542_v25  ;;  %v6474_v23 = vpop.f32.mrf.mxu0 }
 0x537   : > { %v6232_v55 = vpop.permute.xlu1 %6231  ;;  %v6230_v14 = vpop.permute.xlu0 %6229 }
 0x538   : > { %v6752_v52 = vadd.f32 %v16436_v2, %v6733_v62  ;;  %6322 = vst.msk [vmem:[#allocation3 + $0x88] sm:$0xf] %vm862_vm2, %v6232_v55  ;;  %v12544_v62 = vld [vmem:[#allocation3 + $0x90] sm:$0xf] }
 0x539   : > { %7722 = vrot.lane.b32.xlu1 %v7649_v0, %s14217_s23  ;;  %7720 = vrot.lane.b32.xlu0 %v7648_v41, %s14217_s23  ;;  %6321 = vst.msk [vmem:[#allocation3 + $0x80] sm:$0xf] %vm862_vm2, %v6230_v14  ;;  %v13942_v58 = vld [vmem:[#allocation3 + $0xa4] sm:$0xf0]  ;;  %v6246_v56 = vpop.permute.xlu2 %6245  ;;  %v6549_v53 = vpop.f32.mrf.mxu1 }
 0x53a   : > { %v13955_v19 = vld [vmem:[#allocation3 + $0xa4] sm:$0xf0]  ;;  %v6768_v30 = vmax.f32 %v6752_v52, 0.0  ;;  %v16453_v39 = vor.u32 %v13942_v58, %v12572_v33  ;;  %v6550_v49 = vadd.f32 %v6549_v53, %v6474_v23 }
 0x53b   : > { %v12645_v5 = vor.u32 %v13955_v19, %v12644_v8  ;;  %v7254_v16 = vld [vmem:[#allocation2 + $0x27] sm:$0xff]  ;;  %v12545_v8 = vor.u32 %v13936_v42, %v12544_v62 }
 0x53c   : > { %6784 = vst [vmem:[#allocation2 + $0x30] sm:$0xff] %v6768_v30  ;;  %12611 = vmatmul.msk.bf16.gmra.mxu3 %vm988_vm4, %v16453_v39  ;;  %v7399_v15 = vpack.c.bf16 %v6768_v30, %v6768_v30  ;;  %v7290_v18 = vpack.c.bf16 %v7254_v16, %v7254_v16 }
 0x53d   : > { %12686 = vmatmul.msk.bf16.vlgmr.msrb.gmra.mxu1 %vm988_vm4, %v12645_v5  ;;  %v6697_v13 = vpop.f32.mrf.mxu2 }
 0x53e   : > { %v6734_v26 = vadd.f32 %v6697_v13, %v6545_v40  ;;  %7474 = vrot.lane.b32.xlu2 %v7399_v15, %s14215_s22  ;;  %7326 = vst.msk [vmem:[#allocation3 + $0x10] sm:$0xf] %vm4128_vm7, %v7290_v18  ;;  %v6476_v61 = vpop.f32.mrf.mxu0 }
 0x53f   : > { %v13925_v1 = vld [vmem:[#allocation3 + $0x84] sm:$0xf0]  ;;  %v5992_v31 = vpop.permute.xlu0 %5991 }
 0x540   : > { %v6242_v35 = vpop.permute.xlu1 %6241  ;;  %v13935_v17 = vld [vmem:[#allocation3 + $0x84] sm:$0xf0]  ;;  %v6753_v3 = vadd.f32 %v16436_v2, %v6734_v26  ;;  %v12468_v63 = vld [vmem:[#allocation3 + $0x80] sm:$0xf]  ;;  %6076 = vst.msk [vmem:[#allocation3 + $0xb8] sm:$0xf] %vm609_vm1, %v5992_v31 }
 0x541   : > { %6327 = vst.msk [vmem:[#allocation3 + $0xb0] sm:$0xf] %vm862_vm2, %v6242_v35  ;;  %v12540_v48 = vld [vmem:[#allocation3 + $0x80] sm:$0xf]  ;;  %7472 = vrot.lane.b32.xlu1 %v7398_v38, %s14215_s22  ;;  %v12469_v10 = vor.u32 %v13925_v1, %v12468_v63  ;;  %v6000_v24 = vpop.permute.xlu2 %5999  ;;  %v6551_v46 = vpop.f32.mrf.mxu1  ;;  %v13940_v14 = vld [vmem:[#allocation3 + $0x84] sm:$0xf0] }
 0x542   : > { %v12541_v50 = vor.u32 %v13935_v17, %v12540_v48  ;;  %v6769_v27 = vmax.f32 %v6753_v3, 0.0  ;;  %6328 = vst.msk [vmem:[#allocation3 + $0xb8] sm:$0xf] %vm862_vm2, %v6244_v32  ;;  %v12620_v52 = vld [vmem:[#allocation3 + $0x80] sm:$0xf]  ;;  %v6552_v18 = vadd.f32 %v6551_v46, %v6476_v61  ;;  %v6123_v17 = vld [vmem:[#allocation2 + $0x229] sm:$0xff] }
 0x543   : > { %v7615_v47 = vld [vmem:[#allocation2 + $0x31] sm:$0xff]  ;;  %12489 = vmatmul.msk.bf16.gmra.mxu0 %vm988_vm4, %v12469_v10  ;;  %v7614_v59 = vld [vmem:[#allocation2 + $0x29] sm:$0xff]  ;;  %6080 = vst.msk [vmem:[#allocation3 + $0xd8] sm:$0xf] %vm609_vm1, %v6000_v24  ;;  %v12621_v58 = vor.u32 %v13940_v14, %v12620_v52  ;;  %v6159_v10 = vpack.c.bf16 %v6123_v17, %v6123_v17 }
 0x544   : > { %12564 = vmatmul.msk.bf16.gmra.mxu2 %vm988_vm4, %v12541_v50  ;;  %v7255_v37 = vld [vmem:[#allocation2 + $0x2f] sm:$0xff]  ;;  %6785 = vst [vmem:[#allocation2 + $0x48] sm:$0xff] %v6769_v27  ;;  %v7651_v4 = vpack.c.bf16 %v7615_v47, %v7615_v47  ;;  %v7650_v43 = vpack.c.bf16 %v7614_v59, %v7614_v59  ;;  %v7400_v60 = vpack.c.bf16 %v6769_v27, %v6769_v27 }
 0x545   : > { %v6699_v9 = vpop.f32.mrf.mxu2  ;;  %v7291_v7 = vpack.c.bf16 %v7255_v37, %v7255_v37  ;;  %v6124_v31 = vld [vmem:[#allocation2 + $0x231] sm:$0xff] }
 0x546   : > { %v6735_v36 = vadd.f32 %v6699_v9, %v6547_v57  ;;  %7726 = vrot.lane.b32.xlu0 %v7651_v4, %s14217_s23  ;;  %7724 = vrot.lane.b32.xlu2 %v7650_v43, %s14217_s23  ;;  %v6479_v38 = vpop.f32.mrf.mxu0  ;;  %v6160_v37 = vpack.c.bf16 %v6124_v31, %v6124_v31 }
 0x547   : > { %7327 = vst.msk [vmem:[#allocation3 + $0x18] sm:$0xf] %vm4128_vm7, %v7291_v7  ;;  %v5994_v20 = vpop.permute.xlu0 %5993 }
 0x548   : > { %v12576_v34 = vld [vmem:[#allocation3 + $0xb0] sm:$0xf]  ;;  %v6754_v28 = vadd.f32 %v16436_v2, %v6735_v36  ;;  %6077 = vst.msk [vmem:[#allocation3 + $0xc0] sm:$0xf] %vm609_vm1, %v5994_v20  ;;  %v5996_v21 = vpop.permute.xlu1 %5995 }
 0x549   : > { %v12648_v11 = vld [vmem:[#allocation3 + $0xb0] sm:$0xf]  ;;  %7476 = vrot.lane.b32.xlu1 %v7400_v60, %s14215_s22  ;;  %v13943_v44 = vld [vmem:[#allocation3 + $0xb4] sm:$0xf0]  ;;  %6329 = vst.msk [vmem:[#allocation3 + $0xc0] sm:$0xf] %vm862_vm2, %v6246_v56  ;;  %v6554_v5 = vpop.f32.mrf.mxu1 }
 0x54a   : > { %v13956_v22 = vld [vmem:[#allocation3 + $0xb4] sm:$0xf0]  ;;  %v6770_v54 = vmax.f32 %v6754_v28, 0.0  ;;  %v16475_v29 = vor.u32 %v13943_v44, %v12576_v34  ;;  %6078 = vst.msk [vmem:[#allocation3 + $0xc8] sm:$0xf] %vm609_vm1, %v5996_v21  ;;  %v6002_v25 = vpop.permute.xlu2 %6001  ;;  %v6555_v57 = vadd.f32 %v6554_v5, %v6479_v38 }
 0x54b   : > { %v12649_v32 = vor.u32 %v13956_v22, %v12648_v11  ;;  %v7256_v6 = vld [vmem:[#allocation2 + $0x47] sm:$0xff]  ;;  %6081 = vst.msk [vmem:[#allocation3 + $0xe0] sm:$0xf] %vm609_vm1, %v6002_v25 }
 0x54c   : > { %6786 = vst [vmem:[#allocation2 + $0x50] sm:$0xff] %v6770_v54  ;;  %v7292_v51 = vpack.c.bf16 %v7256_v6, %v7256_v6  ;;  %12612 = vmatmul.msk.bf16.gmra.mxu3 %vm988_vm4, %v16475_v29  ;;  %v7401_v0 = vpack.c.bf16 %v6770_v54, %v6770_v54 }
 0x54d   : > { %12687 = vmatmul.msk.bf16.gmra.mxu1 %vm988_vm4, %v12649_v32  ;;  %v6702_v41 = vpop.f32.mrf.mxu2 }
 0x54e   : > { %v6736_v55 = vadd.f32 %v6702_v41, %v6550_v49  ;;  %7328 = vst.msk [vmem:[#allocation3 + $0x20] sm:$0xf] %vm4128_vm7, %v7292_v51  ;;  %6015 = vrot.lane.b32.xlu0 %v16420_v45, %s14214_s21  ;;  %7478 = vrot.lane.b32.xlu2 %v7401_v0, %s14215_s22  ;;  %v6481_v36 = vpop.f32.mrf.mxu0  ;;  %v13979_v49 = vld [vmem:[%s17761_s1 + $0x268] sm:$0xff] }
 0x54f   : > { %8103 = vmatpush.bf16.msrb.mxu3 %v13979_v49  ;;  %v13999_v49 = vld [vmem:[%s17761_s1 + $0x2c0] sm:$0xff] }
 0x550   : > { %v6755_v33 = vadd.f32 %v16436_v2, %v6736_v55  ;;  %v5998_v19 = vpop.permute.xlu1 %5997  ;;  %v12580_v63 = vld [vmem:[#allocation3 + $0xc0] sm:$0xf] }
 0x551   : > { %v6248_v56 = vpop.permute.xlu0 %6247  ;;  %6079 = vst.msk [vmem:[#allocation3 + $0xd0] sm:$0xf] %vm609_vm1, %v5998_v19  ;;  %v12652_v48 = vld [vmem:[#allocation3 + $0xc0] sm:$0xf]  ;;  %v6556_v9 = vpop.f32.mrf.mxu1 }
 0x552   : > { %v6771_v30 = vmax.f32 %v6755_v33, 0.0  ;;  %6330 = vst.msk [vmem:[#allocation3 + $0xc8] sm:$0xf] %vm862_vm2, %v6248_v56  ;;  %v6557_v22 = vadd.f32 %v6556_v9, %v6481_v36 }
 0x553   : > { %v7257_v16 = vld [vmem:[#allocation2 + $0x4f] sm:$0xff]  ;;  %12634 = vmatmul.msk.bf16.vlgmr.msrb.gmra.mxu0 %vm988_vm4, %v12621_v58 }
 0x554   : > { %v7617_v40 = vld [vmem:[#allocation2 + $0x51] sm:$0xff]  ;;  %v7616_v15 = vld [vmem:[#allocation2 + $0x49] sm:$0xff]  ;;  %12565 = vmatmul.msk.bf16.gmra.mxu2 %vm988_vm4, %v12545_v8  ;;  %6787 = vst [vmem:[#allocation2 + $0x68] sm:$0xff] %v6771_v30  ;;  %v7293_v13 = vpack.c.bf16 %v7257_v16, %v7257_v16  ;;  %v7402_v43 = vpack.c.bf16 %v6771_v30, %v6771_v30 }
 0x555   : > { %v7653_v26 = vpack.c.bf16 %v7617_v40, %v7617_v40  ;;  %v7652_v53 = vpack.c.bf16 %v7616_v15, %v7616_v15  ;;  %v6704_v35 = vpop.f32.mrf.mxu2 }
 0x556   : > { %v6737_v1 = vadd.f32 %v6704_v35, %v6552_v18  ;;  %7329 = vst.msk [vmem:[#allocation3 + $0x28] sm:$0xf] %vm4128_vm7, %v7293_v13  ;;  %6013 = vrot.lane.b32.xlu2 %v16420_v45, %s14214_s21  ;;  %v6484_v41 = vpop.f32.mrf.mxu0 }
 0x557   : > { %7730 = vrot.lane.b32.xlu1 %v7653_v26, %s14217_s23  ;;  %7728 = vrot.lane.b32.xlu0 %v7652_v53, %s14217_s23 }
 0x558   : > { %v6756_v3 = vadd.f32 %v16436_v2, %v6737_v1 }
 0x559   : > { %v13944_v50 = vld [vmem:[#allocation3 + $0xc4] sm:$0xf0]  ;;  %v6559_v51 = vpop.f32.mrf.mxu1  ;;  %v6256_v8 = vpop.permute.xlu2 %6255 }
 0x55a   : > { %v6772_v23 = vmax.f32 %v6756_v3, 0.0  ;;  %v13957_v27 = vld [vmem:[#allocation3 + $0xc4] sm:$0xf0]  ;;  %v16497_v47 = vor.u32 %v13944_v50, %v12580_v63  ;;  %v6560_v33 = vadd.f32 %v6559_v51, %v6484_v41  ;;  %v13977_v51 = vld [vmem:[%s17761_s1 + $0x258] sm:$0xff] }
 0x55b   : > { %v7258_v24 = vld [vmem:[#allocation2 + $0x67] sm:$0xff]  ;;  %v12653_v59 = vor.u32 %v13957_v27, %v12652_v48 }
 0x55c   : > { %6788 = vst [vmem:[#allocation2 + $0x70] sm:$0xff] %v6772_v23  ;;  %v7294_v4 = vpack.c.bf16 %v7258_v24, %v7258_v24  ;;  %12613 = vmatmul.msk.bf16.gmra.mxu3 %vm988_vm4, %v16497_v47  ;;  %v7403_v54 = vpack.c.bf16 %v6772_v23, %v6772_v23 }
 0x55d   : > { %v6707_v45 = vpop.f32.mrf.mxu2  ;;  %12688 = vmatmul.msk.bf16.gmra.mxu1 %vm988_vm4, %v12653_v59 }
 0x55e   : > { %v6738_v7 = vadd.f32 %v6707_v45, %v6555_v57  ;;  %7330 = vst.msk [vmem:[#allocation3 + $0x30] sm:$0xf] %vm4128_vm7, %v7294_v4  ;;  %6267 = vrot.lane.b32.xlu2 %v6160_v37, %s14215_s22  ;;  %v6486_v35 = vpop.f32.mrf.mxu0 }
 0x55f   : > { %6265 = vrot.lane.b32.xlu1 %v6159_v10, %s14215_s22  ;;  %7480 = vrot.lane.b32.xlu0 %v7402_v43, %s14215_s22  ;;  %v14000_v10 = vld [vmem:[%s17761_s1 + $0x2c8] sm:$0xff] }
 0x560   : > { %v6757_v60 = vadd.f32 %v16436_v2, %v6738_v7  ;;  %8280 = vmatpush.bf16.msra.mxu0 %v14000_v10 }
 0x561   : > { %v6252_v11 = vpop.permute.xlu1 %6251  ;;  %v6250_v28 = vpop.permute.xlu0 %6249 }
 0x562   : > { %v6773_v34 = vmax.f32 %v6757_v60, 0.0  ;;  %6332 = vst.msk [vmem:[#allocation3 + $0xd8] sm:$0xf] %vm862_vm2, %v6252_v11  ;;  %v6561_v26 = vpop.f32.mrf.mxu1  ;;  %v13985_v11 = vld [vmem:[%s17761_s1 + $0x290] sm:$0xff] }
 0x563   : > { %v7259_v20 = vld [vmem:[#allocation2 + $0x6f] sm:$0xff]  ;;  %12635 = vmatmul.msk.bf16.gmra.mxu0 %vm988_vm4, %v16430_v12  ;;  %6331 = vst.msk [vmem:[#allocation3 + $0xd0] sm:$0xf] %vm862_vm2, %v6250_v28  ;;  %v13986_v12 = vld [vmem:[%s17761_s1 + $0x298] sm:$0xff]  ;;  %v6562_v31 = vadd.f32 %v6561_v26, %v6486_v35  ;;  %v13978_v28 = vld [vmem:[%s17761_s1 + $0x260] sm:$0xff] }
 0x564   : > { %v7619_v46 = vld [vmem:[#allocation2 + $0x71] sm:$0xff]  ;;  %v7618_v44 = vld [vmem:[#allocation2 + $0x69] sm:$0xff]  ;;  %6789 = vst [vmem:[#allocation2 + $0x88] sm:$0xff] %v6773_v34  ;;  %v7295_v21 = vpack.c.bf16 %v7259_v20, %v7259_v20  ;;  %8010 = vmatpush.bf16.msrb.mxu2 %v13986_v12  ;;  %v7404_v19 = vpack.c.bf16 %v6773_v34, %v6773_v34  ;;  %8104 = vmatpush.bf16.msrb.mxu3 %v13978_v28 }
 0x565   : > { %v7655_v32 = vpack.c.bf16 %v7619_v46, %v7619_v46  ;;  %v6709_v61 = vpop.f32.mrf.mxu2  ;;  %v7654_v6 = vpack.c.bf16 %v7618_v44, %v7618_v44  ;;  %8281 = vmatpush.bf16.msra.mxu0 %v13999_v49 }
 0x566   : > { %v6739_v25 = vadd.f32 %v6709_v61, %v6557_v22  ;;  %7331 = vst.msk [vmem:[#allocation3 + $0x38] sm:$0xf] %vm4128_vm7, %v7295_v21  ;;  %v6489_v41 = vpop.f32.mrf.mxu0 }
 0x567   : > { %7482 = vrot.lane.b32.xlu1 %v7403_v54, %s14215_s22  ;;  %7734 = vrot.lane.b32.xlu0 %v7655_v32, %s14217_s23 }
 0x568   : > { %7732 = vrot.lane.b32.xlu2 %v7654_v6, %s14217_s23  ;;  %v6758_v0 = vadd.f32 %v16436_v2, %v6739_v25  ;;  %8011 = vmatpush.bf16.msrb.mxu2 %v13985_v11 }
 0x569   : > { %v13945_v42 = vld [vmem:[#allocation3 + $0xd4] sm:$0xf0]  ;;  %v6004_v52 = vpop.permute.xlu0 %6003  ;;  %8105 = vmatpush.bf16.msrb.mxu3 %v13977_v51 }
 0x56a   : > { %v6774_v62 = vmax.f32 %v6758_v0, 0.0  ;;  %v13958_v55 = vld [vmem:[#allocation3 + $0xd4] sm:$0xf0]  ;;  %6082 = vst.msk [vmem:[#allocation3 + $0xe8] sm:$0xf] %vm609_vm1, %v6004_v52  ;;  %v6564_v20 = vpop.f32.mrf.mxu1  ;;  %v13984_v0 = vld [vmem:[%s17761_s1 + $0x288] sm:$0xff] }
 0x56b   : > { %v7260_v14 = vld [vmem:[#allocation2 + $0x87] sm:$0xff]  ;;  %v12584_v30 = vld [vmem:[#allocation3 + $0xd0] sm:$0xf]  ;;  %6334 = vst.msk [vmem:[#allocation3 + $0xe8] sm:$0xf] %vm862_vm2, %v6256_v8  ;;  %v6565_v52 = vadd.f32 %v6564_v20, %v6489_v41 }
 0x56c   : > { %6790 = vst [vmem:[#allocation2 + $0x90] sm:$0xff] %v6774_v62  ;;  %v7296_v58 = vpack.c.bf16 %v7260_v14, %v7260_v14  ;;  %v12656_v56 = vld [vmem:[#allocation3 + $0xd0] sm:$0xf]  ;;  %v7405_v5 = vpack.c.bf16 %v6774_v62, %v6774_v62  ;;  %v16523_v40 = vor.u32 %v13945_v42, %v12584_v30  ;;  %8012 = vmatpush.bf16.msrb.mxu2 %v13984_v0  ;;  %v13983_v8 = vld [vmem:[%s17761_s1 + $0x280] sm:$0xff]  ;;  %v13975_v30 = vld [vmem:[%s17761_s1 + $0x248] sm:$0xff] }
 0x56d   : > { %v6712_v16 = vpop.f32.mrf.mxu2  ;;  %v12657_v15 = vor.u32 %v13958_v55, %v12656_v56  ;;  %v13982_v56 = vld [vmem:[%s17761_s1 + $0x278] sm:$0xff]  ;;  %v13996_v41 = vld [vmem:[%s17761_s1 + $0x2a8] sm:$0xff] }
 0x56e   : > { %v6740_v18 = vadd.f32 %v6712_v16, %v6560_v33  ;;  %7332 = vst.msk [vmem:[#allocation3 + $0x40] sm:$0xf] %vm4128_vm7, %v7296_v58  ;;  %12614 = vmatmul.msk.bf16.gmra.mxu3 %vm988_vm4, %v16523_v40  ;;  %v13976_v33 = vld [vmem:[%s17761_s1 + $0x250] sm:$0xff] }
 0x56f   : > { %7484 = vrot.lane.b32.xlu1 %v7404_v19, %s14215_s22  ;;  %12689 = vmatmul.msk.bf16.gmra.mxu1 %vm988_vm4, %v12657_v15 }
 0x570   : > { %v6759_v13 = vadd.f32 %v16436_v2, %v6740_v18  ;;  %7486 = vrot.lane.b32.xlu2 %v7405_v5, %s14215_s22  ;;  %8106 = vmatpush.bf16.msrb.mxu3 %v13976_v33  ;;  %v6491_v18 = vpop.f32.mrf.mxu0 }
 0x571   : > { %v6254_v38 = vpop.permute.xlu1 %6253  ;;  %8013 = vmatpush.bf16.msrb.mxu2 %v13983_v8 }
 0x572   : > { %v6775_v53 = vmax.f32 %v6759_v13, 0.0  ;;  %6333 = vst.msk [vmem:[#allocation3 + $0xe0] sm:$0xf] %vm862_vm2, %v6254_v38  ;;  %v13946_v59 = vld [vmem:[#allocation3 + $0xe4] sm:$0xf0]  ;;  %v6566_v25 = vpop.f32.mrf.mxu1  ;;  %v13974_v38 = vld [vmem:[%s17761_s1 + $0x240] sm:$0xff] }
 0x573   : > { %v7261_v1 = vld [vmem:[#allocation2 + $0x8f] sm:$0xff]  ;;  %12636 = vmatmul.msk.bf16.gmra.mxu0 %vm988_vm4, %v16453_v39  ;;  %v13959_v37 = vld [vmem:[#allocation3 + $0xe4] sm:$0xf0]  ;;  %v6567_v35 = vadd.f32 %v6566_v25, %v6491_v18 }
 0x574   : > { %v7621_v17 = vld [vmem:[#allocation2 + $0x91] sm:$0xff]  ;;  %v7620_v3 = vld [vmem:[#allocation2 + $0x89] sm:$0xff]  ;;  %6791 = vst [vmem:[#allocation2 + $0xa8] sm:$0xff] %v6775_v53  ;;  %v7297_v63 = vpack.c.bf16 %v7261_v1, %v7261_v1  ;;  %v7406_v27 = vpack.c.bf16 %v6775_v53, %v6775_v53  ;;  %8107 = vmatpush.bf16.msrb.mxu3 %v13975_v30 }
 0x575   : > { %v7657_v48 = vpack.c.bf16 %v7621_v17, %v7621_v17  ;;  %v7656_v23 = vpack.c.bf16 %v7620_v3, %v7620_v3  ;;  %v6714_v50 = vpop.f32.mrf.mxu2  ;;  %8014 = vmatpush.bf16.msrb.mxu2 %v13982_v56 }
 0x576   : > { %v6741_v24 = vadd.f32 %v6714_v50, %v6562_v31  ;;  %7333 = vst.msk [vmem:[#allocation3 + $0x48] sm:$0xf] %vm4128_vm7, %v7297_v63  ;;  %v13981_v31 = vld [vmem:[%s17761_s1 + $0x270] sm:$0xff] }
 0x577   : > { %7738 = vrot.lane.b32.xlu1 %v7657_v48, %s14217_s23  ;;  %7736 = vrot.lane.b32.xlu0 %v7656_v23, %s14217_s23  ;;  %v5764_v63 = vld [vmem:[#allocation2 + $0x22f] sm:$0xff] }
 0x578   : > { %v6760_v39 = vadd.f32 %v16436_v2, %v6741_v24  ;;  %7488 = vrot.lane.b32.xlu2 %v7406_v27, %s14215_s22  ;;  %v5800_v10 = vpack.c.bf16 %v5764_v63, %v5764_v63  ;;  %8108 = vmatpush.bf16.msrb.mxu3 %v13974_v38 }
 0x579   : > { %v12588_v4 = vld [vmem:[#allocation3 + $0xe0] sm:$0xf]  ;;  %8015 = vmatpush.bf16.msrb.mxu2 %v13981_v31 }
 0x57a   : > { %v6776_v57 = vmax.f32 %v6760_v39, 0.0  ;;  %v12660_v43 = vld [vmem:[#allocation3 + $0xe0] sm:$0xf]  ;;  %v16544_v7 = vor.u32 %v13946_v59, %v12588_v4  ;;  %v16576_v42 = vpop.f32.mrf.mxu1  ;;  %5836 = vst.msk [vmem:[#allocation3 + $0x118] sm:$0xf] %vm356_vm0, %v5800_v10 }
 0x57b   : > { %v6258_v9 = vpop.permute.xlu2 %6257  ;;  %v7262_v45 = vld [vmem:[#allocation2 + $0xa7] sm:$0xff]  ;;  %v12661_v36 = vor.u32 %v13959_v37, %v12660_v43 }
 0x57c   : > { %6792 = vst [vmem:[#allocation2 + $0xb0] sm:$0xff] %v6776_v57  ;;  %v7298_v60 = vpack.c.bf16 %v7262_v45, %v7262_v45  ;;  %v7407_v34 = vpack.c.bf16 %v6776_v57, %v6776_v57  ;;  %v13998_v57 = vld [vmem:[%s17761_s1 + $0x2b8] sm:$0xff] }
 0x57d   : > { %8282 = vmatpush.bf16.msra.mxu0 %v13998_v57 }
 0x57e   : > { %7334 = vst.msk [vmem:[#allocation3 + $0x50] sm:$0xf] %vm4128_vm7, %v7298_v60  ;;  %12615 = vmatmul.msk.bf16.gmra.mxu3 %vm988_vm4, %v16544_v7 }
 0x57f   : > { %7490 = vrot.lane.b32.xlu0 %v7407_v34, %s14215_s22  ;;  %12690 = vmatmul.msk.bf16.gmra.mxu1 %vm988_vm4, %v12661_v36 }
 0x581   : > { %v6006_v46 = vpop.permute.xlu0 %6005 }
 0x582   : > { %6083 = vst.msk [vmem:[#allocation3 + $0xf0] sm:$0xf] %vm609_vm1, %v6006_v46  ;;  %v16605_v48 = vpop.f32.mrf.mxu1 }
 0x583   : > { %v7263_v44 = vld [vmem:[#allocation2 + $0xaf] sm:$0xff]  ;;  %12637 = vmatmul.msk.bf16.gmra.mxu0 %vm988_vm4, %v16475_v29  ;;  %v6012_v54 = vpop.permute.xlu2 %6011  ;;  %6335 = vst.msk [vmem:[#allocation3 + $0xf0] sm:$0xf] %vm862_vm2, %v6258_v9 }
 0x584   : > { %v7622_v22 = vld [vmem:[#allocation2 + $0xa9] sm:$0xff]  ;;  %v7623_v21 = vld [vmem:[#allocation2 + $0xb1] sm:$0xff]  ;;  %v7299_v32 = vpack.c.bf16 %v7263_v44, %v7263_v44  ;;  %6086 = vst.msk [vmem:[#allocation3 + $0x108] sm:$0xf] %vm609_vm1, %v6012_v54 }
 0x585   : > { %v7658_v61 = vpack.c.bf16 %v7622_v22, %v7622_v22  ;;  %v7659_v6 = vpack.c.bf16 %v7623_v21, %v7623_v21 }
 0x586   : > { %7335 = vst.msk [vmem:[#allocation3 + $0x58] sm:$0xf] %vm4128_vm7, %v7299_v32 }
 0x587   : > { %7740 = vrot.lane.b32.xlu1 %v7658_v61, %s14217_s23  ;;  %7742 = vrot.lane.b32.xlu2 %v7659_v6, %s14217_s23 }
 0x589   : > { %v6008_v12 = vpop.permute.xlu1 %6007 }
 0x58a   : > { %6084 = vst.msk [vmem:[#allocation3 + $0xf8] sm:$0xf] %vm609_vm1, %v6008_v12  ;;  %v12592_v5 = vld [vmem:[#allocation3 + $0xf0] sm:$0xf] }
 0x58b   : > { %v12664_v16 = vld [vmem:[#allocation3 + $0xf0] sm:$0xf] }
 0x58c   : > { %v7469_v29 = vpop.permute.xlu2 %7468  ;;  %v13997_v12 = vld [vmem:[%s17761_s1 + $0x2b0] sm:$0xff] }
 0x58d   : > { %7576 = vst.msk [vmem:[#allocation3] sm:$0xf] %vm4381_vm8, %v7469_v29  ;;  %v16621_v45 = vpop.f32.mrf.mxu1  ;;  %v6494_v32 = vpop.f32.mrf.mxu0  ;;  %8283 = vmatpush.bf16.msra.mxu0 %v13997_v12 }
 0x591   : > { %v6010_v62 = vpop.permute.xlu1 %6009  ;;  %8284 = vmatpush.bf16.msra.mxu0 %v13996_v41 }
 0x592   : > { %6085 = vst.msk [vmem:[#allocation3 + $0x100] sm:$0xf] %vm609_vm1, %v6010_v62 }
 0x593   : > { %v6260_v55 = vpop.permute.xlu0 %6259  ;;  %12638 = vmatmul.msk.bf16.gmra.mxu0 %vm988_vm4, %v16497_v47 }
 0x594   : > { %6336 = vst.msk [vmem:[#allocation3 + $0xf8] sm:$0xf] %vm862_vm2, %v6260_v55  ;;  %v6717_v14 = vpop.f32.mrf.mxu2 }
 0x595   : > { %v6742_v58 = vadd.f32 %v6717_v14, %v6565_v52  ;;  %v16637_v49 = vpop.f32.mrf.mxu1  ;;  %v6496_v55 = vpop.f32.mrf.mxu0 }
 0x597   : > { %v6761_v47 = vadd.f32 %v16436_v2, %v6742_v58 }
 0x598   : > { %v7475_v19 = vpop.permute.xlu2 %7474 }
 0x599   : > { %7579 = vst.msk [vmem:[#allocation3 + $0x18] sm:$0xf] %vm4381_vm8, %v7475_v19  ;;  %v6777_v15 = vmax.f32 %v6761_v47, 0.0 }
 0x59b   : > { %v7471_v13 = vpop.permute.xlu0 %7470  ;;  %v13947_v26 = vld [vmem:[#allocation3 + $0xf4] sm:$0xf0]  ;;  %v7408_v3 = vpack.c.bf16 %v6777_v15, %v6777_v15  ;;  %6793 = vst [vmem:[#allocation2 + $0xc8] sm:$0xff] %v6777_v15 }
 0x59c   : > { %v13960_v53 = vld [vmem:[#allocation3 + $0xf4] sm:$0xf0]  ;;  %7577 = vst.msk [vmem:[#allocation3 + $0x8] sm:$0xf] %vm4381_vm8, %v7471_v13  ;;  %v16600_v1 = vor.u32 %v13947_v26, %v12592_v5  ;;  %v6719_v23 = vpop.f32.mrf.mxu2 }
 0x59d   : > { %v12665_v17 = vor.u32 %v13960_v53, %v12664_v16  ;;  %v6743_v50 = vadd.f32 %v6719_v23, %v6567_v35  ;;  %7492 = vrot.lane.b32.xlu0 %v7408_v3, %s14215_s22  ;;  %v6570_v53 = vadd.f32 %v16576_v42, %v6494_v32 }
 0x59e   : > { %12616 = vmatmul.msk.bf16.gmra.mxu3 %vm988_vm4, %v16600_v1 }
 0x59f   : > { %12691 = vmatmul.msk.bf16.gmra.mxu1 %vm988_vm4, %v12665_v17  ;;  %v6762_v24 = vadd.f32 %v16436_v2, %v6743_v50 }
 0x5a0   : > { %v7725_v27 = vpop.permute.xlu2 %7724 }
 0x5a1   : > { %v6778_v39 = vmax.f32 %v6762_v24, 0.0 }
 0x5a2   : > { %v7264_v4 = vld [vmem:[#allocation2 + $0xc7] sm:$0xff] }
 0x5a3   : > { %v6264_v59 = vpop.permute.xlu1 %6263  ;;  %v6262_v37 = vpop.permute.xlu0 %6261  ;;  %12639 = vmatmul.msk.bf16.gmra.mxu0 %vm988_vm4, %v16523_v40  ;;  %v7409_v43 = vpack.c.bf16 %v6778_v39, %v6778_v39  ;;  %v7300_v9 = vpack.c.bf16 %v7264_v4, %v7264_v4  ;;  %6794 = vst [vmem:[#allocation2 + $0xd0] sm:$0xff] %v6778_v39 }
 0x5a4   : > { %6338 = vst.msk [vmem:[#allocation3 + $0x108] sm:$0xf] %vm862_vm2, %v6264_v59 }
 0x5a5   : > { %6337 = vst.msk [vmem:[#allocation3 + $0x100] sm:$0xf] %vm862_vm2, %v6262_v37  ;;  %7494 = vrot.lane.b32.xlu1 %v7409_v43, %s14215_s22 }
 0x5a6   : > { %7336 = vst.msk [vmem:[#allocation3 + $0x60] sm:$0xf] %vm4128_vm7, %v7300_v9 }
 0x5a8   : > { %v7479_v40 = vpop.permute.xlu2 %7478 }
 0x5a9   : > { %7581 = vst.msk [vmem:[#allocation3 + $0x28] sm:$0xf] %vm4381_vm8, %v7479_v40 }
 0x5aa   : > { %v7265_v22 = vld [vmem:[#allocation2 + $0xcf] sm:$0xff] }
 0x5ab   : > { %v7723_v36 = vpop.permute.xlu1 %7722  ;;  %v7721_v60 = vpop.permute.xlu0 %7720  ;;  %v13951_v34 = vld [vmem:[#allocation3 + $0x104] sm:$0xf0]  ;;  %v7625_v21 = vld [vmem:[#allocation2 + $0xd1] sm:$0xff]  ;;  %v7301_v61 = vpack.c.bf16 %v7265_v22, %v7265_v22 }
 0x5ac   : > { %v13961_v11 = vld [vmem:[#allocation3 + $0x104] sm:$0xf0]  ;;  %7829 = vst.msk [vmem:[#allocation3 + $0x8] sm:$0xf] %vm4634_vm9, %v7723_v36  ;;  %v12596_v28 = vld [vmem:[#allocation3 + $0x100] sm:$0xf]  ;;  %v7661_v6 = vpack.c.bf16 %v7625_v21, %v7625_v21 }
 0x5ad   : > { %v12668_v20 = vld [vmem:[#allocation3 + $0x100] sm:$0xf]  ;;  %7828 = vst.msk [vmem:[#allocation3] sm:$0xf] %vm4634_vm9, %v7721_v60  ;;  %v12597_v46 = vor.u32 %v13951_v34, %v12596_v28  ;;  %v7624_v54 = vld [vmem:[#allocation2 + $0xc9] sm:$0xff] }
 0x5ae   : > { %v12669_v44 = vor.u32 %v13961_v11, %v12668_v20  ;;  %v7660_v25 = vpack.c.bf16 %v7624_v54, %v7624_v54  ;;  %7337 = vst.msk [vmem:[#allocation3 + $0x68] sm:$0xf] %vm4128_vm7, %v7301_v61  ;;  %7746 = vrot.lane.b32.xlu0 %v7661_v6, %s14217_s23 }
 0x5af   : > { %12617 = vmatmul.msk.bf16.gmra.mxu3 %vm988_vm4, %v12597_v46  ;;  %v16632_v29 = vpop.f32.mrf.mxu3 }
 0x5b0   : > { %12692 = vmatmul.msk.bf16.gmra.mxu1 %vm988_vm4, %v12669_v44  ;;  %7744 = vrot.lane.b32.xlu2 %v7660_v25, %s14217_s23  ;;  %v6014_v51 = vpop.permute.xlu2 %6013 }
 0x5b1   : > { %6087 = vst.msk [vmem:[#allocation3 + $0x110] sm:$0xf] %vm609_vm1, %v6014_v51 }
 0x5b3   : > { %v7473_v0 = vpop.permute.xlu1 %7472  ;;  %12640 = vmatmul.msk.bf16.gmra.mxu0 %vm988_vm4, %v16544_v7  ;;  %v13966_v58 = vld [vmem:[#allocation3 + $0x4] sm:$0xf0]  ;;  %v13995_v7 = vld [vmem:[%s17761_s1 + $0x2a0] sm:$0xff] }
 0x5b4   : > { %7578 = vst.msk [vmem:[#allocation3 + $0x10] sm:$0xf] %vm4381_vm8, %v7473_v0  ;;  %v12761_v8 = vld [vmem:[#allocation3] sm:$0xf]  ;;  %8285 = vmatpush.bf16.msra.mxu0 %v13995_v7 }
 0x5b5   : > { %7830 = vst.msk [vmem:[#allocation3 + $0x10] sm:$0xf] %vm4634_vm9, %v7725_v27  ;;  %v12762_v47 = vor.u32 %v13966_v58, %v12761_v8 }
 0x5b7   : > { %v16647_v62 = vpop.f32.mrf.mxu3 }
 0x5b8   : > { %v7727_v52 = vpop.permute.xlu0 %7726  ;;  %v6268_v33 = vpop.permute.xlu2 %6267 }
 0x5b9   : > { %7831 = vst.msk [vmem:[#allocation3 + $0x18] sm:$0xf] %vm4634_vm9, %v7727_v52 }
 0x5ba   : > { %v7148_v14 = vpop.f32.mrf.mxu1 }
 0x5bb   : > { %v7477_v19 = vpop.permute.xlu1 %7476 }
 0x5bc   : > { %7580 = vst.msk [vmem:[#allocation3 + $0x20] sm:$0xf] %vm4381_vm8, %v7477_v19  ;;  %v12697_v5 = vld [vmem:[#allocation3 + $0x10] sm:$0xf] }
 0x5bf   : > { %12787 = vmatmul.msk.bf16.vlgmr.msrb.gmra.mxu3 %vm4791_vm10, %v12762_v47  ;;  %v16655_v30 = vpop.f32.mrf.mxu3 }
 0x5c0   : > { %v6016_v56 = vpop.permute.xlu0 %6015  ;;  %v13967_v16 = vld [vmem:[#allocation3 + $0x14] sm:$0xf0]  ;;  %v6499_v15 = vpop.f32.mrf.mxu0 }
 0x5c1   : > { %6088 = vst.msk [vmem:[#allocation3 + $0x118] sm:$0xf] %vm609_vm1, %v6016_v56  ;;  %v12698_v18 = vor.u32 %v13967_v16, %v12697_v5  ;;  %v6575_v22 = vadd.f32 %v16621_v45, %v6499_v15 }
 0x5c2   : > { %v7733_v13 = vpop.permute.xlu2 %7732  ;;  %6340 = vst.msk [vmem:[#allocation3 + $0x118] sm:$0xf] %vm862_vm2, %v6268_v33  ;;  %v16660_v26 = vpop.f32.mrf.mxu1 }
 0x5c3   : > { %12751 = vmatmul.msk.bf16.vlgmr.msrb.gmra.mxu2 %vm4791_vm10, %v12698_v18  ;;  %12641 = vmatmul.msk.bf16.gmra.mxu0 %vm988_vm4, %v16600_v1  ;;  %v6572_v1 = vadd.f32 %v16605_v48, %v6496_v55 }
 0x5c7   : > { %v6722_v38 = vpop.f32.mrf.mxu2  ;;  %v16667_v63 = vpop.f32.mrf.mxu3 }
 0x5c8   : > { %v6744_v35 = vadd.f32 %v6722_v38, %v6570_v53  ;;  %v6501_v23 = vpop.f32.mrf.mxu0 }
 0x5c9   : > { %v7731_v17 = vpop.permute.xlu1 %7730  ;;  %v7729_v3 = vpop.permute.xlu0 %7728  ;;  %v13962_v61 = vld [vmem:[#allocation3 + $0x114] sm:$0xf0]  ;;  %v6577_v8 = vadd.f32 %v16637_v49, %v6501_v23 }
 0x5ca   : > { %7833 = vst.msk [vmem:[#allocation3 + $0x28] sm:$0xf] %vm4634_vm9, %v7731_v17  ;;  %v6763_v31 = vadd.f32 %v16436_v2, %v6744_v35  ;;  %v7487_v10 = vpop.permute.xlu2 %7486  ;;  %v16672_v42 = vpop.f32.mrf.mxu1 }
 0x5cb   : > { %7832 = vst.msk [vmem:[#allocation3 + $0x20] sm:$0xf] %vm4634_vm9, %v7729_v3 }
 0x5cc   : > { %v6779_v50 = vmax.f32 %v6763_v31, 0.0  ;;  %7585 = vst.msk [vmem:[#allocation3 + $0x48] sm:$0xf] %vm4381_vm8, %v7487_v10 }
 0x5ce   : > { %6795 = vst [vmem:[#allocation2 + $0xe8] sm:$0xff] %v6779_v50  ;;  %v7410_v27 = vpack.c.bf16 %v6779_v50, %v6779_v50 }
 0x5cf   : > { %v6724_v24 = vpop.f32.mrf.mxu2  ;;  %12788 = vmatmul.msk.bf16.gmra.mxu3 %vm4791_vm10, %v12698_v18  ;;  %v16681_v20 = vpop.f32.mrf.mxu3 }
 0x5d0   : > { %v6745_v39 = vadd.f32 %v6724_v24, %v6572_v1  ;;  %7496 = vrot.lane.b32.xlu1 %v7410_v27, %s14215_s22  ;;  %v6995_v48 = vpop.f32.mrf.mxu0 }
 0x5d1   : > { %v6266_v59 = vpop.permute.xlu1 %6265  ;;  %v7481_v37 = vpop.permute.xlu0 %7480  ;;  %v13968_v57 = vld [vmem:[#allocation3 + $0x24] sm:$0xf0]  ;;  %v6996_v60 = vadd.f32 %v6995_v48, %v16632_v29 }
 0x5d2   : > { %v13987_v4 = vld [vmem:[#allocation3 + $0x24] sm:$0xf0]  ;;  %6339 = vst.msk [vmem:[#allocation3 + $0x110] sm:$0xf] %vm862_vm2, %v6266_v59  ;;  %v12701_v43 = vld [vmem:[#allocation3 + $0x20] sm:$0xf]  ;;  %v6764_v9 = vadd.f32 %v16436_v2, %v6745_v39  ;;  %v7489_v34 = vpop.permute.xlu2 %7488  ;;  %v16688_v25 = vpop.f32.mrf.mxu1 }
 0x5d3   : > { %v12797_v40 = vld [vmem:[#allocation3 + $0x20] sm:$0xf]  ;;  %7582 = vst.msk [vmem:[#allocation3 + $0x30] sm:$0xf] %vm4381_vm8, %v7481_v37  ;;  %v12702_v36 = vor.u32 %v13968_v57, %v12701_v43  ;;  %v7188_v46 = vadd.f32 %v7148_v14, %v6996_v60 }
 0x5d4   : > { %v12798_v11 = vor.u32 %v13987_v4, %v12797_v40  ;;  %7834 = vst.msk [vmem:[#allocation3 + $0x30] sm:$0xf] %vm4634_vm9, %v7733_v13  ;;  %v6780_v28 = vmax.f32 %v6764_v9, 0.0 }
 0x5d5   : > { %12752 = vmatmul.msk.bf16.gmra.mxu2 %vm4791_vm10, %v12702_v36  ;;  %7586 = vst.msk [vmem:[#allocation3 + $0x50] sm:$0xf] %vm4381_vm8, %v7489_v34  ;;  %v7266_v44 = vld [vmem:[#allocation2 + $0xe7] sm:$0xff]  ;;  %v7204_v32 = vadd.f32 %v16436_v2, %v7188_v46 }
 0x5d6   : > { %12851 = vmatmul.msk.bf16.vlgmr.msra.gmra.mxu0 %vm4791_vm10, %v12798_v11  ;;  %6796 = vst [vmem:[#allocation2 + $0xf0] sm:$0xff] %v6780_v28  ;;  %v7302_v21 = vpack.c.bf16 %v7266_v44, %v7266_v44  ;;  %v7411_v54 = vpack.c.bf16 %v6780_v28, %v6780_v28  ;;  %v14014_v28 = vld [vmem:[%s17761_s1 + $0x268] sm:$0xff] }
 0x5d7   : > { %v6727_v6 = vpop.f32.mrf.mxu2  ;;  %v16692_v29 = vmax.f32 %v7204_v32, 0.0  ;;  %v16702_v56 = vpop.f32.mrf.mxu3  ;;  %v14035_v46 = vld [vmem:[%s17761_s1 + $0x2c8] sm:$0xff]  ;;  %8631 = vmatpush.bf16.msra.mxu2 %v14014_v28 }
 0x5d8   : > { %v6746_v12 = vadd.f32 %v6727_v6, %v6575_v22  ;;  %7338 = vst.msk [vmem:[#allocation3 + $0x70] sm:$0xf] %vm4128_vm7, %v7302_v21  ;;  %7498 = vrot.lane.b32.xlu2 %v7411_v54, %s14215_s22  ;;  %v6997_v52 = vpop.f32.mrf.mxu0  ;;  %8808 = vmatpush.bf16.msra.mxu3 %v14035_v46 }
 0x5d9   : > { %v7483_v51 = vpop.permute.xlu1 %7482  ;;  %v7735_v0 = vpop.permute.xlu0 %7734  ;;  %v12672_v41 = vld [vmem:[#allocation3 + $0x110] sm:$0xf]  ;;  %7236 = vst [vmem:[#allocation2 + $0x128] sm:$0xff] %v16692_v29  ;;  %v6998_v14 = vadd.f32 %v6997_v52, %v16647_v62 }
 0x5da   : > { %7583 = vst.msk [vmem:[#allocation3 + $0x38] sm:$0xf] %vm4381_vm8, %v7483_v51  ;;  %v12673_v45 = vor.u32 %v13962_v61, %v12672_v41  ;;  %v6765_v55 = vadd.f32 %v16436_v2, %v6746_v12  ;;  %v16720_v23 = vpop.f32.mrf.mxu1 }
 0x5db   : > { %7835 = vst.msk [vmem:[#allocation3 + $0x38] sm:$0xf] %vm4634_vm9, %v7735_v0  ;;  %v7189_v58 = vadd.f32 %v16660_v26, %v6998_v14  ;;  %v12705_v38 = vld [vmem:[#allocation3 + $0x30] sm:$0xf] }
 0x5dc   : > { %12693 = vmatmul.msk.bf16.gmra.mxu1 %vm988_vm4, %v12673_v45  ;;  %v6781_v33 = vmax.f32 %v6765_v55, 0.0  ;;  %v12801_v3 = vld [vmem:[#allocation3 + $0x30] sm:$0xf] }
 0x5dd   : > { %v7627_v7 = vld [vmem:[#allocation2 + $0xf1] sm:$0xff]  ;;  %v7626_v47 = vld [vmem:[#allocation2 + $0xe9] sm:$0xff]  ;;  %v7205_v62 = vadd.f32 %v16436_v2, %v7189_v58  ;;  %v16716_v2 = vld [vmem:[%s17762_s2 + $0x3] ss:$0 sm:$0xff] }
 0x5de   : > { %v7267_v19 = vld [vmem:[#allocation2 + $0xef] sm:$0xff]  ;;  %6797 = vst [vmem:[#allocation2 + $0x108] sm:$0xff] %v6781_v33  ;;  %v7663_v5 = vpack.c.bf16 %v7627_v7, %v7627_v7  ;;  %v7662_v15 = vpack.c.bf16 %v7626_v47, %v7626_v47  ;;  %v7412_v18 = vpack.c.bf16 %v6781_v33, %v6781_v33  ;;  %v14021_v47 = vld [vmem:[%s17761_s1 + $0x298] sm:$0xff] }
 0x5df   : > { %v7303_v16 = vpack.c.bf16 %v7267_v19, %v7267_v19  ;;  %v6729_v13 = vpop.f32.mrf.mxu2  ;;  %12789 = vmatmul.msk.bf16.gmra.mxu3 %vm4791_vm10, %v12702_v36  ;;  %v16708_v49 = vmax.f32 %v7205_v62, 0.0  ;;  %8538 = vmatpush.bf16.msra.mxu1 %v14021_v47 }
 0x5e0   : > { %v6747_v53 = vadd.f32 %v6729_v13, %v6577_v8  ;;  %7750 = vrot.lane.b32.xlu1 %v7663_v5, %s14217_s23  ;;  %7748 = vrot.lane.b32.xlu0 %v7662_v15, %s14217_s23  ;;  %v7000_v17 = vpop.f32.mrf.mxu0  ;;  %v7270_v31 = vld [vmem:[#allocation2 + $0x127] sm:$0xff]  ;;  %v7414_v13 = vpack.c.bf16 %v16692_v29, %v16692_v29 }
 0x5e1   : > { %7339 = vst.msk [vmem:[#allocation3 + $0x78] sm:$0xf] %vm4128_vm7, %v7303_v16  ;;  %v7485_v26 = vpop.permute.xlu1 %7484  ;;  %7500 = vrot.lane.b32.xlu2 %v7412_v18, %s14215_s22  ;;  %v7001_v50 = vadd.f32 %v7000_v17, %v16655_v30  ;;  %v7306_v27 = vpack.c.bf16 %v7270_v31, %v7270_v31  ;;  %v16728_v30 = vpop.f32.mrf.mxu3 }
 0x5e2   : > { %7584 = vst.msk [vmem:[#allocation3 + $0x40] sm:$0xf] %vm4381_vm8, %v7485_v26  ;;  %v6766_v35 = vadd.f32 %v16716_v2, %v6747_v53  ;;  %v13969_v10 = vld [vmem:[#allocation3 + $0x34] sm:$0xf0]  ;;  %v7160_v44 = vpop.f32.mrf.mxu1  ;;  %v7743_v33 = vpop.permute.xlu2 %7742 }
 0x5e3   : > { %7237 = vst [vmem:[#allocation2 + $0x130] sm:$0xff] %v16708_v49  ;;  %v13988_v1 = vld [vmem:[#allocation3 + $0x34] sm:$0xf0]  ;;  %v12706_v24 = vor.u32 %v13969_v10, %v12705_v38  ;;  %v7190_v37 = vadd.f32 %v16672_v42, %v7001_v50 }
 0x5e4   : > { %v6782_v39 = vmax.f32 %v6766_v35, 0.0  ;;  %v12802_v59 = vor.u32 %v13988_v1, %v12801_v3  ;;  %7342 = vst.msk [vmem:[#allocation3 + $0x90] sm:$0xf] %vm4128_vm7, %v7306_v27 }
 0x5e5   : > { %v7268_v57 = vld [vmem:[#allocation2 + $0x107] sm:$0xff]  ;;  %12753 = vmatmul.msk.bf16.gmra.mxu2 %vm4791_vm10, %v12706_v24  ;;  %v7206_v9 = vadd.f32 %v16716_v2, %v7190_v37 }
 0x5e6   : > { %6798 = vst [vmem:[#allocation2 + $0x110] sm:$0xff] %v6782_v39  ;;  %12852 = vmatmul.msk.bf16.gmra.mxu0 %vm4791_vm10, %v12802_v59  ;;  %v7304_v4 = vpack.c.bf16 %v7268_v57, %v7268_v57  ;;  %v7413_v43 = vpack.c.bf16 %v6782_v39, %v6782_v39 }
 0x5e7   : > { %v7222_v48 = vmax.f32 %v7206_v9, 0.0 }
 0x5e8   : > { %7340 = vst.msk [vmem:[#allocation3 + $0x80] sm:$0xf] %vm4128_vm7, %v7304_v4  ;;  %7502 = vrot.lane.b32.xlu0 %v7413_v43, %s14215_s22  ;;  %v7002_v42 = vpop.f32.mrf.mxu0 }
 0x5e9   : > { %v7739_v40 = vpop.permute.xlu1 %7738  ;;  %v7737_v36 = vpop.permute.xlu0 %7736  ;;  %7238 = vst [vmem:[#allocation2 + $0x148] sm:$0xff] %v7222_v48  ;;  %v7003_v34 = vadd.f32 %v7002_v42, %v16667_v63  ;;  %v7416_v51 = vpack.c.bf16 %v7222_v48, %v7222_v48 }
 0x5ea   : > { %7837 = vst.msk [vmem:[#allocation3 + $0x48] sm:$0xf] %vm4634_vm9, %v7739_v40  ;;  %v7271_v60 = vld [vmem:[#allocation2 + $0x12f] sm:$0xff]  ;;  %v16749_v55 = vpop.f32.mrf.mxu3 }
 0x5eb   : > { %v7307_v11 = vpack.c.bf16 %v7271_v60, %v7271_v60  ;;  %7836 = vst.msk [vmem:[#allocation3 + $0x40] sm:$0xf] %vm4634_vm9, %v7737_v36  ;;  %v7191_v22 = vadd.f32 %v16688_v25, %v7003_v34  ;;  %v7630_v39 = vld [vmem:[#allocation2 + $0x129] sm:$0xff]  ;;  %v14013_v34 = vld [vmem:[%s17761_s1 + $0x260] sm:$0xff]  ;;  %v7631_v28 = vld [vmem:[#allocation2 + $0x131] sm:$0xff] }
 0x5ec   : > { %v7163_v18 = vpop.f32.mrf.mxu1  ;;  %v7666_v60 = vpack.c.bf16 %v7630_v39, %v7630_v39  ;;  %8632 = vmatpush.bf16.msra.mxu2 %v14013_v34 }
 0x5ed   : > { %v7629_v21 = vld [vmem:[#allocation2 + $0x111] sm:$0xff]  ;;  %v7628_v32 = vld [vmem:[#allocation2 + $0x109] sm:$0xff]  ;;  %7343 = vst.msk [vmem:[#allocation3 + $0x98] sm:$0xf] %vm4128_vm7, %v7307_v11  ;;  %v7207_v12 = vadd.f32 %v16716_v2, %v7191_v22  ;;  %v14034_v11 = vld [vmem:[%s17761_s1 + $0x2c0] sm:$0xff] }
 0x5ee   : > { %v7269_v54 = vld [vmem:[#allocation2 + $0x10f] sm:$0xff]  ;;  %v7665_v63 = vpack.c.bf16 %v7629_v21, %v7629_v21  ;;  %v7664_v6 = vpack.c.bf16 %v7628_v32, %v7628_v32  ;;  %v7667_v21 = vpack.c.bf16 %v7631_v28, %v7631_v28  ;;  %8809 = vmatpush.bf16.msra.mxu3 %v14034_v11 }
 0x5ef   : > { %v7305_v61 = vpack.c.bf16 %v7269_v54, %v7269_v54  ;;  %12790 = vmatmul.msk.bf16.gmra.mxu3 %vm4791_vm10, %v12706_v24  ;;  %v7223_v25 = vmax.f32 %v7207_v12, 0.0 }
 0x5f0   : > { %7754 = vrot.lane.b32.xlu2 %v7665_v63, %s14217_s23  ;;  %7752 = vrot.lane.b32.xlu1 %v7664_v6, %s14217_s23  ;;  %v7005_v52 = vpop.f32.mrf.mxu0  ;;  %v7272_v14 = vld [vmem:[#allocation2 + $0x147] sm:$0xff] }
 0x5f1   : > { %7341 = vst.msk [vmem:[#allocation3 + $0x88] sm:$0xf] %vm4128_vm7, %v7305_v61  ;;  %v13970_v0 = vld [vmem:[#allocation3 + $0x44] sm:$0xf0]  ;;  %v7491_v41 = vpop.permute.xlu0 %7490  ;;  %7508 = vrot.lane.b32.xlu0 %v7416_v51, %s14215_s22  ;;  %v7006_v58 = vadd.f32 %v7005_v52, %v16681_v20  ;;  %v7308_v19 = vpack.c.bf16 %v7272_v14, %v7272_v14  ;;  %v7415_v20 = vpack.c.bf16 %v16708_v49, %v16708_v49 }
 0x5f2   : > { %v13989_v45 = vld [vmem:[#allocation3 + $0x44] sm:$0xf0]  ;;  %7587 = vst.msk [vmem:[#allocation3 + $0x58] sm:$0xf] %vm4381_vm8, %v7491_v41  ;;  %v12709_v8 = vld [vmem:[#allocation3 + $0x40] sm:$0xf]  ;;  %v16770_v10 = vpop.f32.mrf.mxu3  ;;  %v7417_v27 = vpack.c.bf16 %v7223_v25, %v7223_v25 }
 0x5f3   : > { %7239 = vst [vmem:[#allocation2 + $0x150] sm:$0xff] %v7223_v25  ;;  %v12805_v7 = vld [vmem:[#allocation3 + $0x40] sm:$0xf]  ;;  %v12710_v5 = vor.u32 %v13970_v0, %v12709_v8  ;;  %v7192_v15 = vadd.f32 %v16720_v23, %v7006_v58  ;;  %v14020_v0 = vld [vmem:[%s17761_s1 + $0x290] sm:$0xff] }
 0x5f4   : > { %7839 = vst.msk [vmem:[#allocation3 + $0x58] sm:$0xf] %vm4634_vm9, %v7743_v33  ;;  %v12806_v16 = vor.u32 %v13989_v45, %v12805_v7  ;;  %v7165_v59 = vpop.f32.mrf.mxu1  ;;  %8539 = vmatpush.bf16.msra.mxu1 %v14020_v0 }
 0x5f5   : > { %7344 = vst.msk [vmem:[#allocation3 + $0xa0] sm:$0xf] %vm4128_vm7, %v7308_v19  ;;  %12754 = vmatmul.msk.bf16.gmra.mxu2 %vm4791_vm10, %v12710_v5  ;;  %v7208_v62 = vadd.f32 %v16716_v2, %v7192_v15 }
 0x5f6   : > { %12853 = vmatmul.msk.bf16.gmra.mxu0 %vm4791_vm10, %v12806_v16 }
 0x5f7   : > { %v7224_v53 = vmax.f32 %v7208_v62, 0.0 }
 0x5f8   : > { %7506 = vrot.lane.b32.xlu2 %v7415_v20, %s14215_s22  ;;  %7504 = vrot.lane.b32.xlu1 %v7414_v13, %s14215_s22  ;;  %v7007_v38 = vpop.f32.mrf.mxu0 }
 0x5f9   : > { %v7741_v26 = vpop.permute.xlu1 %7740  ;;  %7240 = vst [vmem:[#allocation2 + $0x168] sm:$0xff] %v7224_v53  ;;  %v7008_v49 = vadd.f32 %v7007_v38, %v16702_v56 }
 0x5fa   : > { %7838 = vst.msk [vmem:[#allocation3 + $0x50] sm:$0xf] %vm4634_vm9, %v7741_v26  ;;  %v7273_v35 = vld [vmem:[#allocation2 + $0x14f] sm:$0xff] }
 0x5fb   : > { %v7633_v17 = vld [vmem:[#allocation2 + $0x151] sm:$0xff]  ;;  %v7309_v3 = vpack.c.bf16 %v7273_v35, %v7273_v35  ;;  %v7632_v31 = vld [vmem:[#allocation2 + $0x149] sm:$0xff]  ;;  %v7193_v29 = vadd.f32 %v7160_v44, %v7008_v49  ;;  %v6942_v44 = vpop.f32.mrf.mxu3 }
 0x5fc   : > { %v7669_v23 = vpack.c.bf16 %v7633_v17, %v7633_v17  ;;  %v7668_v50 = vpack.c.bf16 %v7632_v31, %v7632_v31  ;;  %v13971_v24 = vld [vmem:[#allocation3 + $0x54] sm:$0xf0]  ;;  %v7168_v61 = vpop.f32.mrf.mxu1 }
 0x5fd   : > { %7345 = vst.msk [vmem:[#allocation3 + $0xa8] sm:$0xf] %vm4128_vm7, %v7309_v3  ;;  %v7209_v1 = vadd.f32 %v16716_v2, %v7193_v29  ;;  %v13990_v56 = vld [vmem:[#allocation3 + $0x54] sm:$0xf0] }
 0x5fe   : > { %7762 = vrot.lane.b32.xlu0 %v7669_v23, %s14217_s23 }
 0x5ff   : > { %12791 = vmatmul.msk.bf16.gmra.mxu3 %vm4791_vm10, %v12710_v5  ;;  %v7225_v37 = vmax.f32 %v7209_v1, 0.0  ;;  %v14033_v1 = vld [vmem:[%s17761_s1 + $0x2b8] sm:$0xff] }
 0x600   : > { %7760 = vrot.lane.b32.xlu2 %v7668_v50, %s14217_s23  ;;  %7510 = vrot.lane.b32.xlu1 %v7417_v27, %s14215_s22  ;;  %v7010_v9 = vpop.f32.mrf.mxu0  ;;  %v7274_v40 = vld [vmem:[#allocation2 + $0x167] sm:$0xff]  ;;  %v14012_v50 = vld [vmem:[%s17761_s1 + $0x258] sm:$0xff] }
 0x601   : > { %v12713_v57 = vld [vmem:[#allocation3 + $0x50] sm:$0xf]  ;;  %7241 = vst [vmem:[#allocation2 + $0x170] sm:$0xff] %v7225_v37  ;;  %v7011_v36 = vadd.f32 %v7010_v9, %v16728_v30  ;;  %v7310_v42 = vpack.c.bf16 %v7274_v40, %v7274_v40  ;;  %v7418_v30 = vpack.c.bf16 %v7224_v53, %v7224_v53  ;;  %v7419_v25 = vpack.c.bf16 %v7225_v37, %v7225_v37  ;;  %v14019_v27 = vld [vmem:[%s17761_s1 + $0x288] sm:$0xff] }
 0x602   : > { %v12809_v4 = vld [vmem:[#allocation3 + $0x50] sm:$0xf]  ;;  %v12714_v43 = vor.u32 %v13971_v24, %v12713_v57  ;;  %8633 = vmatpush.bf16.msra.mxu2 %v14012_v50  ;;  %8810 = vmatpush.bf16.msra.mxu3 %v14033_v1 }
 0x603   : > { %v12810_v48 = vor.u32 %v13990_v56, %v12809_v4  ;;  %v7194_v46 = vadd.f32 %v7163_v18, %v7011_v36  ;;  %7346 = vst.msk [vmem:[#allocation3 + $0xb0] sm:$0xf] %vm4128_vm7, %v7310_v42  ;;  %v6945_v8 = vpop.f32.mrf.mxu3  ;;  %8540 = vmatpush.bf16.msra.mxu1 %v14019_v27 }
 0x604   : > { %v7170_v15 = vpop.f32.mrf.mxu1 }
 0x605   : > { %12755 = vmatmul.msk.bf16.gmra.mxu2 %vm4791_vm10, %v12714_v43  ;;  %v7210_v22 = vadd.f32 %v16716_v2, %v7194_v46 }
 0x606   : > { %7756 = vrot.lane.b32.xlu0 %v7666_v60, %s14217_s23  ;;  %12854 = vmatmul.msk.bf16.gmra.mxu0 %vm4791_vm10, %v12810_v48 }
 0x607   : > { %v7226_v54 = vmax.f32 %v7210_v22, 0.0 }
 0x608   : > { %7512 = vrot.lane.b32.xlu2 %v7418_v30, %s14215_s22  ;;  %7758 = vrot.lane.b32.xlu1 %v7667_v21, %s14217_s23  ;;  %v7012_v32 = vpop.f32.mrf.mxu0  ;;  %v7275_v63 = vld [vmem:[#allocation2 + $0x16f] sm:$0xff] }
 0x609   : > { %7242 = vst [vmem:[#allocation2 + $0x188] sm:$0xff] %v7226_v54  ;;  %v7013_v6 = vadd.f32 %v7012_v32, %v16749_v55  ;;  %v7311_v12 = vpack.c.bf16 %v7275_v63, %v7275_v63  ;;  %v7635_v51 = vld [vmem:[#allocation2 + $0x171] sm:$0xff]  ;;  %v7634_v41 = vld [vmem:[#allocation2 + $0x169] sm:$0xff]  ;;  %v7420_v16 = vpack.c.bf16 %v7226_v54, %v7226_v54 }
 0x60a   : > { %v7671_v52 = vpack.c.bf16 %v7635_v51, %v7635_v51  ;;  %v7670_v33 = vpack.c.bf16 %v7634_v41, %v7634_v41  ;;  %v7745_v20 = vpop.permute.xlu2 %7744 }
 0x60b   : > { %v7195_v45 = vadd.f32 %v7165_v59, %v7013_v6  ;;  %7347 = vst.msk [vmem:[#allocation3 + $0xb8] sm:$0xf] %vm4128_vm7, %v7311_v12  ;;  %v6947_v38 = vpop.f32.mrf.mxu3 }
 0x60d   : > { %v7211_v14 = vadd.f32 %v16716_v2, %v7195_v45  ;;  %v14011_v45 = vld [vmem:[%s17761_s1 + $0x250] sm:$0xff] }
 0x60e   : > { %7514 = vrot.lane.b32.xlu0 %v7419_v25, %s14215_s22  ;;  %8634 = vmatpush.bf16.msra.mxu2 %v14011_v45 }
 0x60f   : > { %12792 = vmatmul.msk.bf16.gmra.mxu3 %vm4791_vm10, %v12714_v43  ;;  %v7227_v55 = vmax.f32 %v7211_v14, 0.0  ;;  %v7493_v19 = vpop.permute.xlu0 %7492 }
 0x610   : > { %7766 = vrot.lane.b32.xlu2 %v7671_v52, %s14217_s23  ;;  %7764 = vrot.lane.b32.xlu1 %v7670_v33, %s14217_s23  ;;  %v7015_v58 = vpop.f32.mrf.mxu0  ;;  %v7276_v7 = vld [vmem:[#allocation2 + $0x187] sm:$0xff]  ;;  %7588 = vst.msk [vmem:[#allocation3 + $0x60] sm:$0xf] %vm4381_vm8, %v7493_v19  ;;  %v14032_v33 = vld [vmem:[%s17761_s1 + $0x2b0] sm:$0xff] }
 0x611   : > { %7243 = vst [vmem:[#allocation2 + $0x190] sm:$0xff] %v7227_v55  ;;  %v7016_v47 = vadd.f32 %v7015_v58, %v16770_v10  ;;  %v7312_v5 = vpack.c.bf16 %v7276_v7, %v7276_v7  ;;  %v7421_v13 = vpack.c.bf16 %v7227_v55, %v7227_v55  ;;  %8811 = vmatpush.bf16.msra.mxu3 %v14032_v33 }
 0x612   : > { %7840 = vst.msk [vmem:[#allocation3 + $0x60] sm:$0xf] %vm4634_vm9, %v7745_v20 }
 0x613   : > { %v7196_v18 = vadd.f32 %v7168_v61, %v7016_v47  ;;  %7348 = vst.msk [vmem:[#allocation3 + $0xc0] sm:$0xf] %vm4128_vm7, %v7312_v5 }
 0x615   : > { %v7212_v62 = vadd.f32 %v16716_v2, %v7196_v18 }
 0x616   : > { %7516 = vrot.lane.b32.xlu0 %v7420_v16, %s14215_s22 }
 0x617   : > { %v7228_v53 = vmax.f32 %v7212_v62, 0.0  ;;  %v7495_v26 = vpop.permute.xlu1 %7494 }
 0x618   : > { %7518 = vrot.lane.b32.xlu1 %v7421_v13, %s14215_s22  ;;  %v7017_v35 = vpop.f32.mrf.mxu0  ;;  %v7277_v17 = vld [vmem:[#allocation2 + $0x18f] sm:$0xff]  ;;  %7589 = vst.msk [vmem:[#allocation3 + $0x68] sm:$0xf] %vm4381_vm8, %v7495_v26 }
 0x619   : > { %v7636_v49 = vld [vmem:[#allocation2 + $0x189] sm:$0xff]  ;;  %v7637_v3 = vld [vmem:[#allocation2 + $0x191] sm:$0xff]  ;;  %7244 = vst [vmem:[#allocation2 + $0x1a8] sm:$0xff] %v7228_v53  ;;  %v7018_v31 = vadd.f32 %v7017_v35, %v6942_v44  ;;  %v7313_v23 = vpack.c.bf16 %v7277_v17, %v7277_v17  ;;  %v7422_v59 = vpack.c.bf16 %v7228_v53, %v7228_v53  ;;  %v12717_v28 = vld [vmem:[#allocation3 + $0x60] sm:$0xf] }
 0x61a   : > { %v7672_v10 = vpack.c.bf16 %v7636_v49, %v7636_v49  ;;  %v7673_v29 = vpack.c.bf16 %v7637_v3, %v7637_v3  ;;  %v12813_v46 = vld [vmem:[#allocation3 + $0x60] sm:$0xf] }
 0x61b   : > { %v7197_v56 = vadd.f32 %v7170_v15, %v7018_v31  ;;  %7349 = vst.msk [vmem:[#allocation3 + $0xc8] sm:$0xf] %vm4128_vm7, %v7313_v23 }
 0x61c   : > { %v7173_v24 = vpop.f32.mrf.mxu1  ;;  %7768 = vrot.lane.b32.xlu2 %v7672_v10, %s14217_s23 }
 0x61d   : > { %v7213_v39 = vadd.f32 %v16716_v2, %v7197_v56 }
 0x61e   : > { %7770 = vrot.lane.b32.xlu0 %v7673_v29, %s14217_s23 }
 0x61f   : > { %v7229_v37 = vmax.f32 %v7213_v39, 0.0 }
 0x620   : > { %7520 = vrot.lane.b32.xlu1 %v7422_v59, %s14215_s22  ;;  %v7020_v4 = vpop.f32.mrf.mxu0  ;;  %v7278_v43 = vld [vmem:[#allocation2 + $0x1a7] sm:$0xff]  ;;  %v7747_v40 = vpop.permute.xlu0 %7746 }
 0x621   : > { %v6950_v57 = vpop.f32.mrf.mxu3  ;;  %7245 = vst [vmem:[#allocation2 + $0x1b0] sm:$0xff] %v7229_v37  ;;  %v7021_v9 = vadd.f32 %v7020_v4, %v6945_v8  ;;  %v7314_v48 = vpack.c.bf16 %v7278_v43, %v7278_v43  ;;  %v7423_v36 = vpack.c.bf16 %v7229_v37, %v7229_v37  ;;  %v14018_v8 = vld [vmem:[%s17761_s1 + $0x280] sm:$0xff] }
 0x622   : > { %7841 = vst.msk [vmem:[#allocation3 + $0x68] sm:$0xf] %vm4634_vm9, %v7747_v40  ;;  %8541 = vmatpush.bf16.msra.mxu1 %v14018_v8 }
 0x623   : > { %v7198_v42 = vadd.f32 %v7173_v24, %v7021_v9  ;;  %7350 = vst.msk [vmem:[#allocation3 + $0xd0] sm:$0xf] %vm4128_vm7, %v7314_v48  ;;  %v14010_v9 = vld [vmem:[%s17761_s1 + $0x248] sm:$0xff] }
 0x624   : > { %7522 = vrot.lane.b32.xlu2 %v7423_v36, %s14215_s22  ;;  %v7175_v60 = vpop.f32.mrf.mxu1  ;;  %v14031_v48 = vld [vmem:[%s17761_s1 + $0x2a8] sm:$0xff]  ;;  %8635 = vmatpush.bf16.msra.mxu2 %v14010_v9 }
 0x625   : > { %v7214_v34 = vadd.f32 %v16716_v2, %v7198_v42  ;;  %8812 = vmatpush.bf16.msra.mxu3 %v14031_v48 }
 0x627   : > { %v7230_v11 = vmax.f32 %v7214_v34, 0.0 }
 0x628   : > { %v7022_v30 = vpop.f32.mrf.mxu0  ;;  %v7279_v22 = vld [vmem:[#allocation2 + $0x1af] sm:$0xff] }
 0x629   : > { %v6952_v44 = vpop.f32.mrf.mxu3  ;;  %v7639_v21 = vld [vmem:[#allocation2 + $0x1b1] sm:$0xff]  ;;  %v7638_v54 = vld [vmem:[#allocation2 + $0x1a9] sm:$0xff]  ;;  %7246 = vst [vmem:[#allocation2 + $0x1c8] sm:$0xff] %v7230_v11  ;;  %v7023_v32 = vadd.f32 %v7022_v30, %v6947_v38  ;;  %v7315_v63 = vpack.c.bf16 %v7279_v22, %v7279_v22  ;;  %v7424_v25 = vpack.c.bf16 %v7230_v11, %v7230_v11 }
 0x62a   : > { %v7675_v61 = vpack.c.bf16 %v7639_v21, %v7639_v21  ;;  %v7674_v6 = vpack.c.bf16 %v7638_v54, %v7638_v54  ;;  %v13972_v12 = vld [vmem:[#allocation3 + $0x64] sm:$0xf0]  ;;  %v16877_v54 = vld [vmem:[%s17762_s2 + $0x4] ss:$0 sm:$0xff] }
 0x62b   : > { %v13991_v51 = vld [vmem:[#allocation3 + $0x64] sm:$0xf0]  ;;  %v12718_v0 = vor.u32 %v13972_v12, %v12717_v28  ;;  %v7199_v52 = vadd.f32 %v7175_v60, %v7023_v32  ;;  %7351 = vst.msk [vmem:[#allocation3 + $0xd8] sm:$0xf] %vm4128_vm7, %v7315_v63 }
 0x62c   : > { %v12814_v41 = vor.u32 %v13991_v51, %v12813_v46  ;;  %7774 = vrot.lane.b32.xlu1 %v7675_v61, %s14217_s23  ;;  %7772 = vrot.lane.b32.xlu0 %v7674_v6, %s14217_s23 }
 0x62d   : > { %7524 = vrot.lane.b32.xlu2 %v7424_v25, %s14215_s22  ;;  %12756 = vmatmul.msk.bf16.gmra.mxu2 %vm4791_vm10, %v12718_v0  ;;  %v7215_v14 = vadd.f32 %v16716_v2, %v7199_v52  ;;  %v7178_v55 = vpop.f32.mrf.mxu1 }
 0x62e   : > { %12793 = vmatmul.msk.bf16.gmra.mxu3 %vm4791_vm10, %v12718_v0  ;;  %12855 = vmatmul.msk.bf16.gmra.mxu0 %vm4791_vm10, %v12814_v41 }
 0x62f   : > { %v7231_v58 = vmax.f32 %v7215_v14, 0.0 }
 0x630   : > { %v7025_v7 = vpop.f32.mrf.mxu0  ;;  %v7280_v19 = vld [vmem:[#allocation2 + $0x1c7] sm:$0xff] }
 0x631   : > { %7247 = vst [vmem:[#allocation2 + $0x1d0] sm:$0xff] %v7231_v58  ;;  %v7026_v16 = vadd.f32 %v7025_v7, %v6950_v57  ;;  %v7316_v15 = vpack.c.bf16 %v7280_v19, %v7280_v19  ;;  %v7425_v20 = vpack.c.bf16 %v7231_v58, %v7231_v58  ;;  %v14009_v7 = vld [vmem:[%s17761_s1 + $0x240] sm:$0xff] }
 0x632   : > { %v7499_v47 = vpop.permute.xlu2 %7498  ;;  %v16845_v5 = vpop.f32.mrf.mxu3  ;;  %8636 = vmatpush.bf16.msra.mxu2 %v14009_v7 }
 0x633   : > { %7591 = vst.msk [vmem:[#allocation3 + $0x78] sm:$0xf] %vm4381_vm8, %v7499_v47  ;;  %v7200_v18 = vadd.f32 %v7178_v55, %v7026_v16 }
 0x634   : > { %7352 = vst.msk [vmem:[#allocation3 + $0xe0] sm:$0xf] %vm4128_vm7, %v7316_v15  ;;  %7526 = vrot.lane.b32.xlu0 %v7425_v20, %s14215_s22 }
 0x635   : > { %v7216_v62 = vadd.f32 %v16716_v2, %v7200_v18  ;;  %v7180_v29 = vpop.f32.mrf.mxu1 }
 0x637   : > { %v7232_v13 = vmax.f32 %v7216_v62, 0.0 }
 0x638   : > { %v7027_v53 = vpop.f32.mrf.mxu0  ;;  %v7281_v26 = vld [vmem:[#allocation2 + $0x1cf] sm:$0xff] }
 0x639   : > { %v7641_v38 = vld [vmem:[#allocation2 + $0x1d1] sm:$0xff]  ;;  %v7640_v35 = vld [vmem:[#allocation2 + $0x1c9] sm:$0xff]  ;;  %7248 = vst [vmem:[#allocation2 + $0x1e8] sm:$0xff] %v7232_v13  ;;  %v7028_v49 = vadd.f32 %v7027_v53, %v6952_v44  ;;  %v7317_v3 = vpack.c.bf16 %v7281_v26, %v7281_v26  ;;  %v7426_v50 = vpack.c.bf16 %v7232_v13, %v7232_v13 }
 0x63a   : > { %v16851_v17 = vpop.f32.mrf.mxu3  ;;  %v7677_v31 = vpack.c.bf16 %v7641_v38, %v7641_v38  ;;  %v7676_v23 = vpack.c.bf16 %v7640_v35, %v7640_v35  ;;  %v14017_v44 = vld [vmem:[%s17761_s1 + $0x278] sm:$0xff]  ;;  %v14016_v53 = vld [vmem:[%s17761_s1 + $0x270] sm:$0xff] }
 0x63b   : > { %v7501_v10 = vpop.permute.xlu2 %7500  ;;  %v7201_v1 = vadd.f32 %v7180_v29, %v7028_v49  ;;  %7353 = vst.msk [vmem:[#allocation3 + $0xe8] sm:$0xf] %vm4128_vm7, %v7317_v3  ;;  %8542 = vmatpush.bf16.msra.mxu1 %v14017_v44 }
 0x63c   : > { %7592 = vst.msk [vmem:[#allocation3 + $0x80] sm:$0xf] %vm4381_vm8, %v7501_v10  ;;  %7778 = vrot.lane.b32.xlu2 %v7677_v31, %s14217_s23  ;;  %7776 = vrot.lane.b32.xlu1 %v7676_v23, %s14217_s23 }
 0x63d   : > { %7528 = vrot.lane.b32.xlu0 %v7426_v50, %s14215_s22  ;;  %v7217_v27 = vadd.f32 %v16716_v2, %v7201_v1 }
 0x63f   : > { %v7233_v24 = vmax.f32 %v7217_v27, 0.0  ;;  %8543 = vmatpush.bf16.msra.mxu1 %v14016_v53 }
 0x640   : > { %v7030_v56 = vpop.f32.mrf.mxu0  ;;  %v7282_v39 = vld [vmem:[#allocation2 + $0x1e7] sm:$0xff] }
 0x641   : > { %7249 = vst [vmem:[#allocation2 + $0x1f0] sm:$0xff] %v7233_v24  ;;  %v7318_v57 = vpack.c.bf16 %v7282_v39, %v7282_v39  ;;  %v7427_v4 = vpack.c.bf16 %v7233_v24, %v7233_v24  ;;  %v7031_v41 = vadd.f32 %v7030_v56, %v16845_v5  ;;  %v14030_v5 = vld [vmem:[%s17761_s1 + $0x2a0] sm:$0xff] }
 0x642   : > { %v7497_v59 = vpop.permute.xlu1 %7496  ;;  %v8110_v37 = vpop.f32.mrf.mxu3  ;;  %8813 = vmatpush.bf16.msra.mxu3 %v14030_v5 }
 0x643   : > { %7590 = vst.msk [vmem:[#allocation3 + $0x70] sm:$0xf] %vm4381_vm8, %v7497_v59 }
 0x644   : > { %7354 = vst.msk [vmem:[#allocation3 + $0xf0] sm:$0xf] %vm4128_vm7, %v7318_v57  ;;  %7530 = vrot.lane.b32.xlu1 %v7427_v4, %s14215_s22 }
 0x646   : > { %v8017_v43 = vpop.f32.mrf.mxu2 }
 0x647   : > { %v8111_v21 = vadd.f32 %v8110_v37, %v8017_v43 }
 0x648   : > { %v7032_v40 = vpop.f32.mrf.mxu0  ;;  %v7283_v42 = vld [vmem:[#allocation2 + $0x1ef] sm:$0xff] }
 0x649   : > { %v7642_v60 = vld [vmem:[#allocation2 + $0x1e9] sm:$0xff]  ;;  %v7643_v34 = vld [vmem:[#allocation2 + $0x1f1] sm:$0xff]  ;;  %v7319_v11 = vpack.c.bf16 %v7283_v42, %v7283_v42  ;;  %v7033_v49 = vadd.f32 %v7032_v40, %v16851_v17 }
 0x64a   : > { %v7755_v36 = vpop.permute.xlu2 %7754  ;;  %v7678_v28 = vpack.c.bf16 %v7642_v60, %v7642_v60  ;;  %v7679_v46 = vpack.c.bf16 %v7643_v34, %v7643_v34  ;;  %v8112_v30 = vpop.f32.mrf.mxu3 }
 0x64b   : > { %7355 = vst.msk [vmem:[#allocation3 + $0xf8] sm:$0xf] %vm4128_vm7, %v7319_v11 }
 0x64c   : > { %7780 = vrot.lane.b32.xlu2 %v7678_v28, %s14217_s23  ;;  %7782 = vrot.lane.b32.xlu0 %v7679_v46, %s14217_s23 }
 0x64e   : > { %v8019_v22 = vpop.f32.mrf.mxu2 }
 0x64f   : > { %v8113_v52 = vadd.f32 %v8112_v30, %v8019_v22 }
 0x652   : > { %v7751_v63 = vpop.permute.xlu1 %7750  ;;  %v7749_v6 = vpop.permute.xlu0 %7748 }
 0x653   : > { %v8287_v32 = vpop.f32.mrf.mxu0  ;;  %7843 = vst.msk [vmem:[#allocation3 + $0x78] sm:$0xf] %vm4634_vm9, %v7751_v63  ;;  %v7507_v12 = vpop.permute.xlu2 %7506 }
 0x654   : > { %v8327_v61 = vadd.f32 %v8287_v32, %v8111_v21  ;;  %7842 = vst.msk [vmem:[#allocation3 + $0x70] sm:$0xf] %vm4634_vm9, %v7749_v6  ;;  %v8115_v25 = vpop.f32.mrf.mxu3 }
 0x655   : > { %7595 = vst.msk [vmem:[#allocation3 + $0x98] sm:$0xf] %vm4381_vm8, %v7507_v12 }
 0x656   : > { %v8346_v51 = vadd.f32 %v16877_v54, %v8327_v61 }
 0x658   : > { %v16883_v0 = vmax.f32 %v8346_v51, 0.0  ;;  %v8022_v45 = vpop.f32.mrf.mxu2 }
 0x659   : > { %v7183_v14 = vpop.f32.mrf.mxu1  ;;  %v8116_v1 = vadd.f32 %v8115_v25, %v8022_v45 }
 0x65a   : > { %8378 = vst [vmem:[#allocation2 + $0x28] sm:$0xff] %v16883_v0  ;;  %v7202_v33 = vadd.f32 %v7183_v14, %v7031_v41  ;;  %v13973_v55 = vld [vmem:[#allocation3 + $0x74] sm:$0xf0]  ;;  %v7503_v15 = vpop.permute.xlu0 %7502 }
 0x65b   : > { %v8289_v8 = vpop.f32.mrf.mxu0  ;;  %v13992_v58 = vld [vmem:[#allocation3 + $0x74] sm:$0xf0]  ;;  %v12721_v47 = vld [vmem:[#allocation3 + $0x70] sm:$0xf]  ;;  %v7761_v18 = vpop.permute.xlu2 %7760  ;;  %7593 = vst.msk [vmem:[#allocation3 + $0x88] sm:$0xf] %vm4381_vm8, %v7503_v15 }
 0x65c   : > { %v8328_v19 = vadd.f32 %v8289_v8, %v8113_v52  ;;  %v12817_v16 = vld [vmem:[#allocation3 + $0x70] sm:$0xf]  ;;  %v7218_v20 = vadd.f32 %v16716_v2, %v7202_v33  ;;  %v12722_v62 = vor.u32 %v13973_v55, %v12721_v47  ;;  %7845 = vst.msk [vmem:[#allocation3 + $0x88] sm:$0xf] %vm4634_vm9, %v7755_v36  ;;  %v8117_v3 = vpop.f32.mrf.mxu3  ;;  %v14203_v8 = vld [vmem:[#allocation2] sm:$0xff] }
 0x65d   : > { %v12818_v13 = vor.u32 %v13992_v58, %v12817_v16  ;;  %v16926_v55 = vpack.c.bf16 %v14203_v8, %v14203_v8 }
 0x65e   : > { %v8347_v26 = vadd.f32 %v16877_v54, %v8328_v19  ;;  %v7234_v38 = vmax.f32 %v7218_v20, 0.0  ;;  %12757 = vmatmul.msk.bf16.gmra.mxu2 %vm4791_vm10, %v12722_v62  ;;  %12794 = vmatmul.msk.bf16.gmra.mxu3 %vm4791_vm10, %v12722_v62  ;;  %v7646_v62 = vld [vmem:[#allocation2 + $0x229] sm:$0xff] }
 0x65f   : > { %12856 = vmatmul.msk.bf16.gmra.mxu0 %vm4791_vm10, %v12818_v13 }
 0x660   : > { %v16902_v35 = vmax.f32 %v8347_v26, 0.0  ;;  %7250 = vst [vmem:[#allocation2 + $0x208] sm:$0xff] %v7234_v38  ;;  %v8024_v31 = vpop.f32.mrf.mxu2  ;;  %v7428_v23 = vpack.c.bf16 %v7234_v38, %v7234_v38  ;;  %v7647_v38 = vld [vmem:[#allocation2 + $0x231] sm:$0xff] }
 0x661   : > { %v8921_v10 = vld [vmem:[#allocation2 + $0x27] sm:$0xff]  ;;  %v7185_v29 = vpop.f32.mrf.mxu1  ;;  %v8118_v11 = vadd.f32 %v8117_v3, %v8024_v31  ;;  %v7682_v3 = vpack.c.bf16 %v7646_v62, %v7646_v62 }
 0x662   : > { %8379 = vst [vmem:[#allocation2 + $0x30] sm:$0xff] %v16902_v35  ;;  %v8957_v50 = vpack.c.bf16 %v8921_v10, %v8921_v10  ;;  %v7203_v27 = vadd.f32 %v7185_v29, %v7033_v49  ;;  %7532 = vrot.lane.b32.xlu1 %v7428_v23, %s14215_s22  ;;  %v7753_v59 = vpop.permute.xlu1 %7752  ;;  %v7683_v10 = vpack.c.bf16 %v7647_v38, %v7647_v38 }
 0x663   : > { %v8292_v24 = vpop.f32.mrf.mxu0  ;;  %v7513_v17 = vpop.permute.xlu2 %7512  ;;  %7844 = vst.msk [vmem:[#allocation3 + $0x80] sm:$0xf] %vm4634_vm9, %v7753_v59  ;;  %v13980_v32 = vld [vmem:[#allocation3 + $0x84] sm:$0xf0] }
 0x664   : > { %8993 = vst.msk [vmem:[#allocation3 + $0x10] sm:$0xf] %vm1884_vm3, %v8957_v50  ;;  %v7219_v56 = vadd.f32 %v16716_v2, %v7203_v27  ;;  %v8329_v39 = vadd.f32 %v8292_v24, %v8116_v1  ;;  %v7509_v37 = vpop.permute.xlu0 %7508  ;;  %v8120_v28 = vpop.f32.mrf.mxu3  ;;  %v13993_v63 = vld [vmem:[#allocation3 + $0x84] sm:$0xf0] }
 0x665   : > { %7598 = vst.msk [vmem:[#allocation3 + $0xb0] sm:$0xf] %vm4381_vm8, %v7513_v17 }
 0x666   : > { %v7235_v57 = vmax.f32 %v7219_v56, 0.0  ;;  %v8348_v4 = vadd.f32 %v16877_v54, %v8329_v39  ;;  %7596 = vst.msk [vmem:[#allocation3 + $0xa0] sm:$0xf] %vm4381_vm8, %v7509_v37 }
 0x667   : > { %v7284_v43 = vld [vmem:[#allocation2 + $0x207] sm:$0xff]  ;;  %7848 = vst.msk [vmem:[#allocation3 + $0xa0] sm:$0xf] %vm4634_vm9, %v7761_v18 }
 0x668   : > { %7251 = vst [vmem:[#allocation2 + $0x210] sm:$0xff] %v7235_v57  ;;  %v16914_v9 = vmax.f32 %v8348_v4, 0.0  ;;  %v7320_v48 = vpack.c.bf16 %v7284_v43, %v7284_v43  ;;  %v7429_v40 = vpack.c.bf16 %v7235_v57, %v7235_v57  ;;  %v8027_v60 = vpop.f32.mrf.mxu2  ;;  %v14001_v43 = vld [vmem:[#allocation3 + $0x84] sm:$0xf0] }
 0x669   : > { %v8922_v2 = vld [vmem:[#allocation2 + $0x2f] sm:$0xff]  ;;  %v8121_v15 = vadd.f32 %v8120_v28, %v8027_v60 }
 0x66a   : > { %v9281_v36 = vld [vmem:[#allocation2 + $0x29] sm:$0xff]  ;;  %v9282_v42 = vld [vmem:[#allocation2 + $0x31] sm:$0xff]  ;;  %v8958_v34 = vpack.c.bf16 %v8922_v2, %v8922_v2  ;;  %8380 = vst [vmem:[#allocation2 + $0x48] sm:$0xff] %v16914_v9  ;;  %7534 = vrot.lane.b32.xlu2 %v7429_v40, %s14215_s22  ;;  %v7505_v21 = vpop.permute.xlu1 %7504  ;;  %v12725_v61 = vld [vmem:[#allocation3 + $0x80] sm:$0xf] }
 0x66b   : > { %v9317_v46 = vpack.c.bf16 %v9281_v36, %v9281_v36  ;;  %7356 = vst.msk [vmem:[#allocation3 + $0x100] sm:$0xf] %vm4128_vm7, %v7320_v48  ;;  %v8294_v44 = vpop.f32.mrf.mxu0  ;;  %v9318_v30 = vpack.c.bf16 %v9282_v42, %v9282_v42  ;;  %v12821_v6 = vld [vmem:[#allocation3 + $0x80] sm:$0xf]  ;;  %v12726_v51 = vor.u32 %v13980_v32, %v12725_v61  ;;  %v16924_v41 = vpop.permute.xlu2 %7766 }
 0x66c   : > { %v8330_v22 = vadd.f32 %v8294_v44, %v8118_v11  ;;  %8994 = vst.msk [vmem:[#allocation3 + $0x18] sm:$0xf] %vm1884_vm3, %v8958_v34  ;;  %v12822_v25 = vor.u32 %v13993_v63, %v12821_v6  ;;  %v8122_v13 = vpop.f32.mrf.mxu3  ;;  %v12925_v17 = vld [vmem:[#allocation3 + $0x80] sm:$0xf]  ;;  %v9065_v44 = vpack.c.bf16 %v16883_v0, %v16883_v0 }
 0x66d   : > { %7594 = vst.msk [vmem:[#allocation3 + $0x90] sm:$0xf] %vm4381_vm8, %v7505_v21  ;;  %v12926_v60 = vor.u32 %v14001_v43, %v12925_v17  ;;  %v14063_v21 = vld [vmem:[%s17761_s1 + $0x328] sm:$0xff]  ;;  %v14072_v43 = vld [vmem:[%s17761_s1 + $0x360] sm:$0xff] }
 0x66e   : > { %v8349_v12 = vadd.f32 %v16877_v54, %v8330_v22  ;;  %9353 = vst.msk [vmem:[#allocation3 + $0x14] sm:$0xf] %vm1884_vm3, %v9317_v46  ;;  %12758 = vmatmul.msk.bf16.gmra.mxu2 %vm4791_vm10, %v12726_v51  ;;  %v12961_v40 = vld [vmem:[#allocation3 + $0xa0] sm:$0xf]  ;;  %v14059_v22 = vld [vmem:[%s17761_s1 + $0x308] sm:$0xff]  ;;  %9858 = vmatpush.bf16.msrb.mxu3 %v14063_v21 }
 0x66f   : > { %v7285_v45 = vld [vmem:[#allocation2 + $0x20f] sm:$0xff]  ;;  %9354 = vst.msk [vmem:[#allocation3 + $0x1c] sm:$0xf] %vm1884_vm3, %v9318_v30  ;;  %12857 = vmatmul.msk.bf16.gmra.mxu0 %vm4791_vm10, %v12822_v25  ;;  %9805 = vmatpush.bf16.msrb.mxu2 %v14059_v22  ;;  %v14057_v22 = vld [vmem:[%s17761_s1 + $0x2f8] sm:$0xff]  ;;  %v14062_v21 = vld [vmem:[%s17761_s1 + $0x320] sm:$0xff] }
 0x670   : > { %v7645_v52 = vld [vmem:[#allocation2 + $0x211] sm:$0xff]  ;;  %v7644_v14 = vld [vmem:[#allocation2 + $0x209] sm:$0xff]  ;;  %v7763_v33 = vpop.permute.xlu0 %7762  ;;  %v16929_v58 = vmax.f32 %v8349_v12, 0.0  ;;  %v7321_v7 = vpack.c.bf16 %v7285_v45, %v7285_v45  ;;  %v8029_v20 = vpop.f32.mrf.mxu2 }
 0x671   : > { %v7681_v19 = vpack.c.bf16 %v7645_v52, %v7645_v52  ;;  %v7680_v47 = vpack.c.bf16 %v7644_v14, %v7644_v14  ;;  %v8923_v16 = vld [vmem:[#allocation2 + $0x47] sm:$0xff]  ;;  %v8123_v24 = vadd.f32 %v8122_v13, %v8029_v20 }
 0x672   : > { %8381 = vst [vmem:[#allocation2 + $0x50] sm:$0xff] %v16929_v58  ;;  %v8959_v5 = vpack.c.bf16 %v8923_v16, %v8923_v16  ;;  %7536 = vrot.lane.b32.xlu2 %v16926_v55, %s14215_s22  ;;  %v7511_v26 = vpop.permute.xlu1 %7510  ;;  %v9066_v16 = vpack.c.bf16 %v16902_v35, %v16902_v35  ;;  %v9068_v20 = vpack.c.bf16 %v16929_v58, %v16929_v58 }
 0x673   : > { %7786 = vrot.lane.b32.xlu1 %v7681_v19, %s14217_s23  ;;  %7784 = vrot.lane.b32.xlu0 %v7680_v47, %s14217_s23  ;;  %7357 = vst.msk [vmem:[#allocation3 + $0x108] sm:$0xf] %vm4128_vm7, %v7321_v7  ;;  %v8297_v18 = vpop.f32.mrf.mxu0  ;;  %v14077_v7 = vld [vmem:[%s17761_s1 + $0x388] sm:$0xff]  ;;  %v9067_v47 = vpack.c.bf16 %v16914_v9, %v16914_v9 }
 0x674   : > { %v8331_v53 = vadd.f32 %v8297_v18, %v8121_v15  ;;  %8995 = vst.msk [vmem:[#allocation3 + $0x20] sm:$0xf] %vm1884_vm3, %v8959_v5  ;;  %v8125_v36 = vpop.f32.mrf.mxu3  ;;  %9676 = vmatpush.bf16.msrb.mxu1 %v14077_v7  ;;  %9859 = vmatpush.bf16.msrb.mxu3 %v14062_v21 }
 0x675   : > { %7597 = vst.msk [vmem:[#allocation3 + $0xa8] sm:$0xf] %vm4381_vm8, %v7511_v26 }
 0x676   : > { %v8350_v49 = vadd.f32 %v16877_v54, %v8331_v53  ;;  %7849 = vst.msk [vmem:[#allocation3 + $0xa8] sm:$0xf] %vm4634_vm9, %v7763_v33  ;;  %v16943_v31 = vpop.permute.xlu2 %7768 }
 0x678   : > { %v7757_v23 = vpop.permute.xlu0 %7756  ;;  %v16945_v29 = vmax.f32 %v8350_v49, 0.0  ;;  %v8032_v48 = vpop.f32.mrf.mxu2 }
 0x679   : > { %7846 = vst.msk [vmem:[#allocation3 + $0x90] sm:$0xf] %vm4634_vm9, %v7757_v23  ;;  %v8924_v50 = vld [vmem:[#allocation2 + $0x4f] sm:$0xff]  ;;  %v8126_v32 = vadd.f32 %v8125_v36, %v8032_v48 }
 0x67a   : > { %v9283_v1 = vld [vmem:[#allocation2 + $0x49] sm:$0xff]  ;;  %v9284_v27 = vld [vmem:[#allocation2 + $0x51] sm:$0xff]  ;;  %8382 = vst [vmem:[#allocation2 + $0x68] sm:$0xff] %v16945_v29  ;;  %v8960_v56 = vpack.c.bf16 %v8924_v50, %v8924_v50  ;;  %7790 = vrot.lane.b32.xlu2 %v7683_v10, %s14217_s23  ;;  %v7759_v4 = vpop.permute.xlu1 %7758 }
 0x67b   : > { %7788 = vrot.lane.b32.xlu1 %v7682_v3, %s14217_s23  ;;  %7538 = vrot.lane.b32.xlu0 %v16926_v55, %s14215_s22  ;;  %v8299_v39 = vpop.f32.mrf.mxu0  ;;  %v9319_v59 = vpack.c.bf16 %v9283_v1, %v9283_v1  ;;  %v9320_v37 = vpack.c.bf16 %v9284_v27, %v9284_v27  ;;  %7847 = vst.msk [vmem:[#allocation3 + $0x98] sm:$0xf] %vm4634_vm9, %v7759_v4 }
 0x67c   : > { %v8332_v57 = vadd.f32 %v8299_v39, %v8123_v24  ;;  %8996 = vst.msk [vmem:[#allocation3 + $0x28] sm:$0xf] %vm1884_vm3, %v8960_v56  ;;  %v8127_v5 = vpop.f32.mrf.mxu3  ;;  %v9069_v24 = vpack.c.bf16 %v16945_v29, %v16945_v29  ;;  %v14058_v56 = vld [vmem:[%s17761_s1 + $0x300] sm:$0xff] }
 0x67d   : > { %v14022_v2 = vld [vmem:[#allocation3 + $0xa4] sm:$0xf0]  ;;  %9355 = vst.msk [vmem:[#allocation3 + $0x24] sm:$0xf] %vm1884_vm3, %v9319_v59  ;;  %9806 = vmatpush.bf16.msrb.mxu2 %v14058_v56  ;;  %v12865_v29 = vld [vmem:[#allocation3 + $0xa0] sm:$0xf] }
 0x67e   : > { %v8351_v42 = vadd.f32 %v16877_v54, %v8332_v57  ;;  %v12962_v34 = vor.u32 %v14022_v2, %v12961_v40  ;;  %v7523_v28 = vpop.permute.xlu2 %7522  ;;  %9356 = vst.msk [vmem:[#allocation3 + $0x2c] sm:$0xf] %vm1884_vm3, %v9320_v37  ;;  %12951 = vmatmul.msk.bf16.vlgmr.msra.gmra.mxu2 %vm4791_vm10, %v12926_v60  ;;  %v14003_v37 = vld [vmem:[#allocation3 + $0xa4] sm:$0xf0] }
 0x67f   : > { %7603 = vst.msk [vmem:[#allocation3 + $0xd8] sm:$0xf] %vm4381_vm8, %v7523_v28  ;;  %v12866_v4 = vor.u32 %v14003_v37, %v12865_v29 }
 0x680   : > { %v7515_v11 = vpop.permute.xlu0 %7514  ;;  %v16958_v46 = vmax.f32 %v8351_v42, 0.0  ;;  %13015 = vmatmul.msk.bf16.vlgmr.msra.gmra.mxu3 %vm4791_vm10, %v12962_v34  ;;  %v12825_v61 = vld [vmem:[#allocation3 + $0x90] sm:$0xf]  ;;  %v8034_v33 = vpop.f32.mrf.mxu2 }
 0x681   : > { %7599 = vst.msk [vmem:[#allocation3 + $0xb8] sm:$0xf] %vm4381_vm8, %v7515_v11  ;;  %v8925_v30 = vld [vmem:[#allocation2 + $0x67] sm:$0xff]  ;;  %v12861_v6 = vld [vmem:[#allocation3 + $0x90] sm:$0xf]  ;;  %v8128_v13 = vadd.f32 %v8127_v5, %v8034_v33  ;;  %9807 = vmatpush.bf16.msrb.mxu2 %v14057_v22 }
 0x682   : > { %7851 = vst.msk [vmem:[#allocation3 + $0xb8] sm:$0xf] %vm4634_vm9, %v16924_v41  ;;  %v8961_v63 = vpack.c.bf16 %v8925_v30, %v8925_v30  ;;  %9139 = vrot.lane.b32.xlu2 %v9065_v44, %s14217_s23  ;;  %v7765_v51 = vpop.permute.xlu1 %7764  ;;  %v13994_v25 = vld [vmem:[#allocation3 + $0x94] sm:$0xf0]  ;;  %v9070_v27 = vpack.c.bf16 %v16958_v46, %v16958_v46 }
 0x683   : > { %8383 = vst [vmem:[#allocation2 + $0x70] sm:$0xff] %v16958_v46  ;;  %9137 = vrot.lane.b32.xlu1 %v16926_v55, %s14217_s23  ;;  %9135 = vrot.lane.b32.xlu0 %v16926_v55, %s14217_s23  ;;  %v8302_v0 = vpop.f32.mrf.mxu0  ;;  %v14002_v41 = vld [vmem:[#allocation3 + $0x94] sm:$0xf0]  ;;  %v12826_v45 = vor.u32 %v13994_v25, %v12825_v61  ;;  %v14073_v55 = vld [vmem:[%s17761_s1 + $0x368] sm:$0xff] }
 0x684   : > { %v8333_v12 = vadd.f32 %v8302_v0, %v8126_v32  ;;  %8997 = vst.msk [vmem:[#allocation3 + $0x30] sm:$0xf] %vm1884_vm3, %v8961_v63  ;;  %v12862_v52 = vor.u32 %v14002_v41, %v12861_v6  ;;  %9623 = vmatpush.bf16.msrb.mxu0 %v14073_v55  ;;  %v14071_v32 = vld [vmem:[%s17761_s1 + $0x358] sm:$0xff]  ;;  %v8130_v25 = vpop.f32.mrf.mxu3 }
 0x685   : > { %7850 = vst.msk [vmem:[#allocation3 + $0xb0] sm:$0xf] %vm4634_vm9, %v7765_v51  ;;  %12858 = vmatmul.msk.bf16.gmra.mxu0 %vm4791_vm10, %v12826_v45  ;;  %v14076_v51 = vld [vmem:[%s17761_s1 + $0x380] sm:$0xff] }
 0x686   : > { %v8352_v14 = vadd.f32 %v16877_v54, %v8333_v12  ;;  %12915 = vmatmul.msk.bf16.vlgmr.msra.gmra.mxu1 %vm4791_vm10, %v12862_v52  ;;  %v7286_v45 = vld [vmem:[#allocation2 + $0x227] sm:$0xff] }
 0x687   : > { %v7525_v15 = vpop.permute.xlu2 %7524  ;;  %9677 = vmatpush.bf16.msrb.mxu1 %v14076_v51 }
 0x688   : > { %v7517_v8 = vpop.permute.xlu0 %7516  ;;  %v8368_v19 = vmax.f32 %v8352_v14, 0.0  ;;  %7604 = vst.msk [vmem:[#allocation3 + $0xe0] sm:$0xf] %vm4381_vm8, %v7525_v15  ;;  %9624 = vmatpush.bf16.msrb.mxu0 %v14072_v43  ;;  %v8037_v6 = vpop.f32.mrf.mxu2 }
 0x689   : > { %7600 = vst.msk [vmem:[#allocation3 + $0xc0] sm:$0xf] %vm4381_vm8, %v7517_v8  ;;  %v14004_v0 = vld [vmem:[#allocation3 + $0xb4] sm:$0xf0]  ;;  %v8131_v14 = vadd.f32 %v8130_v25, %v8037_v6 }
 0x68a   : > { %7852 = vst.msk [vmem:[#allocation3 + $0xc0] sm:$0xf] %vm4634_vm9, %v16943_v31  ;;  %v8926_v18 = vld [vmem:[#allocation2 + $0x6f] sm:$0xff]  ;;  %9145 = vrot.lane.b32.xlu2 %v9068_v20, %s14217_s23  ;;  %v7519_v49 = vpop.permute.xlu1 %7518  ;;  %v14023_v31 = vld [vmem:[#allocation3 + $0xb4] sm:$0xf0]  ;;  %v9071_v17 = vpack.c.bf16 %v8368_v19, %v8368_v19 }
 0x68b   : > { %v9285_v62 = vld [vmem:[#allocation2 + $0x69] sm:$0xff]  ;;  %8384 = vst [vmem:[#allocation2 + $0x88] sm:$0xff] %v8368_v19  ;;  %9143 = vrot.lane.b32.xlu1 %v9067_v47, %s14217_s23  ;;  %9141 = vrot.lane.b32.xlu0 %v9066_v16, %s14217_s23  ;;  %v8962_v35 = vpack.c.bf16 %v8926_v18, %v8926_v18  ;;  %v9286_v9 = vld [vmem:[#allocation2 + $0x71] sm:$0xff]  ;;  %v8304_v53 = vpop.f32.mrf.mxu0 }
 0x68c   : > { %v9321_v26 = vpack.c.bf16 %v9285_v62, %v9285_v62  ;;  %v9322_v38 = vpack.c.bf16 %v9286_v9, %v9286_v9  ;;  %v8334_v58 = vadd.f32 %v8304_v53, %v8128_v13  ;;  %v12965_v3 = vld [vmem:[#allocation3 + $0xb0] sm:$0xf]  ;;  %7601 = vst.msk [vmem:[#allocation3 + $0xc8] sm:$0xf] %vm4381_vm8, %v7519_v49  ;;  %9625 = vmatpush.bf16.msrb.mxu0 %v14071_v32 }
 0x68d   : > { %8998 = vst.msk [vmem:[#allocation3 + $0x38] sm:$0xf] %vm1884_vm3, %v8962_v35  ;;  %v12966_v23 = vor.u32 %v14023_v31, %v12965_v3  ;;  %v12869_v63 = vld [vmem:[#allocation3 + $0xb0] sm:$0xf]  ;;  %v8132_v35 = vpop.f32.mrf.mxu3 }
 0x68e   : > { %v8353_v10 = vadd.f32 %v16877_v54, %v8334_v58  ;;  %9357 = vst.msk [vmem:[#allocation3 + $0x34] sm:$0xf] %vm1884_vm3, %v9321_v26  ;;  %12952 = vmatmul.msk.bf16.gmra.mxu2 %vm4791_vm10, %v12862_v52  ;;  %v12870_v61 = vor.u32 %v14004_v0, %v12869_v63  ;;  %v17051_v52 = vpack.c.bf16 %v7286_v45, %v7286_v45  ;;  %v14056_v20 = vld [vmem:[%s17761_s1 + $0x2f0] sm:$0xff]  ;;  %v14075_v63 = vld [vmem:[%s17761_s1 + $0x378] sm:$0xff]  ;;  %v8919_v45 = vld [vmem:[#allocation2 + $0x7] sm:$0xff] }
 0x68f   : > { %9358 = vst.msk [vmem:[#allocation3 + $0x3c] sm:$0xf] %vm1884_vm3, %v9322_v38  ;;  %v14070_v18 = vld [vmem:[%s17761_s1 + $0x350] sm:$0xff]  ;;  %9808 = vmatpush.bf16.msrb.mxu2 %v14056_v20  ;;  %9678 = vmatpush.bf16.msrb.mxu1 %v14075_v63 }
 0x690   : > { %v7771_v50 = vpop.permute.xlu0 %7770  ;;  %v8369_v1 = vmax.f32 %v8353_v10, 0.0  ;;  %13016 = vmatmul.msk.bf16.gmra.mxu3 %vm4791_vm10, %v12966_v23  ;;  %7358 = vst.msk [vmem:[#allocation3 + $0x110] sm:$0xf] %vm4128_vm7, %v17051_v52  ;;  %v8039_v15 = vpop.f32.mrf.mxu2  ;;  %9626 = vmatpush.bf16.msrb.mxu0 %v14070_v18 }
 0x691   : > { %7853 = vst.msk [vmem:[#allocation3 + $0xc8] sm:$0xf] %vm4634_vm9, %v7771_v50  ;;  %v12969_v28 = vld [vmem:[#allocation3 + $0xc0] sm:$0xf]  ;;  %v8133_v53 = vadd.f32 %v8132_v35, %v8039_v15 }
 0x692   : > { %v8927_v39 = vld [vmem:[#allocation2 + $0x87] sm:$0xff]  ;;  %8385 = vst [vmem:[#allocation2 + $0x90] sm:$0xff] %v8369_v1  ;;  %9151 = vrot.lane.b32.xlu2 %v9071_v17, %s14217_s23  ;;  %v7521_v57 = vpop.permute.xlu1 %7520  ;;  %v9072_v48 = vpack.c.bf16 %v8369_v1, %v8369_v1  ;;  %v12873_v38 = vld [vmem:[#allocation3 + $0xc0] sm:$0xf] }
 0x693   : > { %9149 = vrot.lane.b32.xlu1 %v9070_v27, %s14217_s23  ;;  %9147 = vrot.lane.b32.xlu0 %v9069_v24, %s14217_s23  ;;  %v8963_v59 = vpack.c.bf16 %v8927_v39, %v8927_v39  ;;  %7602 = vst.msk [vmem:[#allocation3 + $0xd0] sm:$0xf] %vm4381_vm8, %v7521_v57 }
 0x695   : > { %8999 = vst.msk [vmem:[#allocation3 + $0x40] sm:$0xf] %vm1884_vm3, %v8963_v59 }
 0x696   : > { %12916 = vmatmul.msk.bf16.gmra.mxu1 %vm4791_vm10, %v12866_v4  ;;  %v7779_v41 = vpop.permute.xlu2 %7778 }
 0x698   : > { %v14024_v11 = vld [vmem:[#allocation3 + $0xc4] sm:$0xf0] }
 0x699   : > { %v8928_v40 = vld [vmem:[#allocation2 + $0x8f] sm:$0xff]  ;;  %v12970_v46 = vor.u32 %v14024_v11, %v12969_v28  ;;  %v14005_v9 = vld [vmem:[#allocation3 + $0xc4] sm:$0xf0]  ;;  %v8135_v28 = vpop.f32.mrf.mxu3 }
 0x69a   : > { %v9287_v2 = vld [vmem:[#allocation2 + $0x89] sm:$0xff]  ;;  %v9288_v36 = vld [vmem:[#allocation2 + $0x91] sm:$0xff]  ;;  %v8964_v42 = vpack.c.bf16 %v8928_v40, %v8928_v40  ;;  %v12874_v49 = vor.u32 %v14005_v9, %v12873_v38 }
 0x69b   : > { %9153 = vrot.lane.b32.xlu0 %v9072_v48, %s14217_s23  ;;  %v9323_v60 = vpack.c.bf16 %v9287_v2, %v9287_v2  ;;  %v9324_v34 = vpack.c.bf16 %v9288_v36, %v9288_v36  ;;  %v14069_v11 = vld [vmem:[%s17761_s1 + $0x348] sm:$0xff]  ;;  %v14052_v9 = vld [vmem:[%s17761_s1 + $0x2d0] sm:$0xff] }
 0x69c   : > { %9000 = vst.msk [vmem:[#allocation3 + $0x48] sm:$0xf] %vm1884_vm3, %v8964_v42  ;;  %v14055_v42 = vld [vmem:[%s17761_s1 + $0x2e8] sm:$0xff]  ;;  %9627 = vmatpush.bf16.msrb.mxu0 %v14069_v11 }
 0x69d   : > { %9359 = vst.msk [vmem:[#allocation3 + $0x44] sm:$0xf] %vm1884_vm3, %v9323_v60  ;;  %v14061_v60 = vld [vmem:[%s17761_s1 + $0x318] sm:$0xff]  ;;  %9809 = vmatpush.bf16.msrb.mxu2 %v14055_v42 }
 0x69e   : > { %9360 = vst.msk [vmem:[#allocation3 + $0x4c] sm:$0xf] %vm1884_vm3, %v9324_v34  ;;  %v7775_v44 = vpop.permute.xlu1 %7774  ;;  %v7773_v30 = vpop.permute.xlu0 %7772  ;;  %12953 = vmatmul.msk.bf16.gmra.mxu2 %vm4791_vm10, %v12866_v4  ;;  %9860 = vmatpush.bf16.msrb.mxu3 %v14061_v60 }
 0x69f   : > { %7855 = vst.msk [vmem:[#allocation3 + $0xd8] sm:$0xf] %vm4634_vm9, %v7775_v44 }
 0x6a0   : > { %13017 = vmatmul.msk.bf16.gmra.mxu3 %vm4791_vm10, %v12970_v46  ;;  %7854 = vst.msk [vmem:[#allocation3 + $0xd0] sm:$0xf] %vm4634_vm9, %v7773_v30  ;;  %v7287_v30 = vld [vmem:[#allocation2 + $0x22f] sm:$0xff] }
 0x6a1   : > { %v17091_v21 = vpack.c.bf16 %v7287_v30, %v7287_v30 }
 0x6a3   : > { %7359 = vst.msk [vmem:[#allocation3 + $0x118] sm:$0xf] %vm4128_vm7, %v17091_v21 }
 0x6a6   : > { %12917 = vmatmul.msk.bf16.gmra.mxu1 %vm4791_vm10, %v12870_v61  ;;  %v7527_v12 = vpop.permute.xlu0 %7526  ;;  %v14025_v8 = vld [vmem:[#allocation3 + $0xd4] sm:$0xf0]  ;;  %v7781_v62 = vpop.permute.xlu2 %7780 }
 0x6a7   : > { %7605 = vst.msk [vmem:[#allocation3 + $0xe8] sm:$0xf] %vm4381_vm8, %v7527_v12  ;;  %v12973_v33 = vld [vmem:[#allocation3 + $0xd0] sm:$0xf]  ;;  %v14006_v37 = vld [vmem:[#allocation3 + $0xd4] sm:$0xf0] }
 0x6a8   : > { %7857 = vst.msk [vmem:[#allocation3 + $0xe8] sm:$0xf] %vm4634_vm9, %v7779_v41  ;;  %v12974_v19 = vor.u32 %v14025_v8, %v12973_v33  ;;  %v12877_v59 = vld [vmem:[#allocation3 + $0xd0] sm:$0xf]  ;;  %v14054_v33 = vld [vmem:[%s17761_s1 + $0x2e0] sm:$0xff]  ;;  %v8137_v8 = vpop.f32.mrf.mxu3 }
 0x6a9   : > { %v12878_v36 = vor.u32 %v14006_v37, %v12877_v59  ;;  %v8920_v12 = vld [vmem:[#allocation2 + $0xf] sm:$0xff]  ;;  %9810 = vmatpush.bf16.msrb.mxu2 %v14054_v33 }
 0x6aa   : > { %v8956_v41 = vpack.c.bf16 %v8920_v12, %v8920_v12 }
 0x6ab   : > { %v8307_v55 = vpop.f32.mrf.mxu0 }
 0x6ac   : > { %v8335_v7 = vadd.f32 %v8307_v55, %v8131_v14  ;;  %v8955_v14 = vpack.c.bf16 %v8919_v45, %v8919_v45  ;;  %8992 = vst.msk [vmem:[#allocation3 + $0x8] sm:$0xf] %vm1884_vm3, %v8956_v41 }
 0x6ae   : > { %v7777_v47 = vpop.permute.xlu1 %7776  ;;  %v8354_v16 = vadd.f32 %v16877_v54, %v8335_v7  ;;  %12954 = vmatmul.msk.bf16.gmra.mxu2 %vm4791_vm10, %v12870_v61  ;;  %8991 = vst.msk [vmem:[#allocation3] sm:$0xf] %vm1884_vm3, %v8955_v14 }
 0x6af   : > { %7856 = vst.msk [vmem:[#allocation3 + $0xe0] sm:$0xf] %vm4634_vm9, %v7777_v47  ;;  %v7529_v5 = vpop.permute.xlu0 %7528  ;;  %v14026_v56 = vld [vmem:[#allocation3 + $0xe4] sm:$0xf0]  ;;  %v14068_v47 = vld [vmem:[%s17761_s1 + $0x340] sm:$0xff] }
 0x6b0   : > { %13018 = vmatmul.msk.bf16.gmra.mxu3 %vm4791_vm10, %v12974_v19  ;;  %v8370_v13 = vmax.f32 %v8354_v16, 0.0  ;;  %7606 = vst.msk [vmem:[#allocation3 + $0xf0] sm:$0xf] %vm4381_vm8, %v7529_v5  ;;  %v8042_v32 = vpop.f32.mrf.mxu2  ;;  %v14007_v6 = vld [vmem:[#allocation3 + $0xe4] sm:$0xf0]  ;;  %9628 = vmatpush.bf16.msrb.mxu0 %v14068_v47  ;;  %v14053_v5 = vld [vmem:[%s17761_s1 + $0x2d8] sm:$0xff] }
 0x6b1   : > { %7858 = vst.msk [vmem:[#allocation3 + $0xf0] sm:$0xf] %vm4634_vm9, %v7781_v62  ;;  %v8136_v7 = vadd.f32 %v8135_v28, %v8042_v32  ;;  %v8140_v20 = vpop.f32.mrf.mxu3  ;;  %v14067_v62 = vld [vmem:[%s17761_s1 + $0x338] sm:$0xff]  ;;  %9811 = vmatpush.bf16.msrb.mxu2 %v14053_v5 }
 0x6b2   : > { %8386 = vst [vmem:[#allocation2 + $0xa8] sm:$0xff] %v8370_v13  ;;  %v9073_v26 = vpack.c.bf16 %v8370_v13, %v8370_v13 }
 0x6b3   : > { %v8309_v58 = vpop.f32.mrf.mxu0 }
 0x6b4   : > { %v8336_v3 = vadd.f32 %v8309_v58, %v8133_v53  ;;  %9155 = vrot.lane.b32.xlu1 %v9073_v26, %s14217_s23  ;;  %9629 = vmatpush.bf16.msrb.mxu0 %v14067_v62  ;;  %v14066_v26 = vld [vmem:[%s17761_s1 + $0x330] sm:$0xff] }
 0x6b5   : > { %9812 = vmatpush.bf16.msrb.mxu2 %v14052_v9  ;;  %v14038_v9 = vld [vmem:[#allocation3 + $0x14] sm:$0xf] }
 0x6b6   : > { %12918 = vmatmul.msk.bf16.gmra.mxu1 %vm4791_vm10, %v12874_v49  ;;  %v8355_v31 = vadd.f32 %v16877_v54, %v8336_v3  ;;  %v7531_v23 = vpop.permute.xlu1 %7530  ;;  %v12977_v1 = vld [vmem:[#allocation3 + $0xe0] sm:$0xf] }
 0x6b7   : > { %7607 = vst.msk [vmem:[#allocation3 + $0xf8] sm:$0xf] %vm4381_vm8, %v7531_v23  ;;  %v12978_v39 = vor.u32 %v14026_v56, %v12977_v1  ;;  %v12881_v0 = vld [vmem:[#allocation3 + $0xe0] sm:$0xf] }
 0x6b8   : > { %v8371_v10 = vmax.f32 %v8355_v31, 0.0  ;;  %v12981_v44 = vld [vmem:[#allocation3 + $0xf0] sm:$0xf]  ;;  %v12882_v25 = vor.u32 %v14007_v6, %v12881_v0  ;;  %v8044_v55 = vpop.f32.mrf.mxu2  ;;  %9630 = vmatpush.bf16.msrb.mxu0 %v14066_v26 }
 0x6b9   : > { %v8929_v50 = vld [vmem:[#allocation2 + $0xa7] sm:$0xff]  ;;  %v8138_v58 = vadd.f32 %v8137_v8, %v8044_v55  ;;  %v12885_v31 = vld [vmem:[#allocation3 + $0xf0] sm:$0xf]  ;;  %v8142_v56 = vpop.f32.mrf.mxu3 }
 0x6ba   : > { %8387 = vst [vmem:[#allocation2 + $0xb0] sm:$0xff] %v8371_v10  ;;  %v8965_v27 = vpack.c.bf16 %v8929_v50, %v8929_v50  ;;  %v9074_v24 = vpack.c.bf16 %v8371_v10, %v8371_v10 }
 0x6bc   : > { %9001 = vst.msk [vmem:[#allocation3 + $0x50] sm:$0xf] %vm1884_vm3, %v8965_v27  ;;  %9157 = vrot.lane.b32.xlu2 %v9074_v24, %s14217_s23  ;;  %v14060_v24 = vld [vmem:[%s17761_s1 + $0x310] sm:$0xff] }
 0x6bd   : > { %9861 = vmatpush.bf16.msrb.mxu3 %v14060_v24 }
 0x6be   : > { %v7783_v17 = vpop.permute.xlu0 %7782  ;;  %12955 = vmatmul.msk.bf16.gmra.mxu2 %vm4791_vm10, %v12874_v49 }
 0x6bf   : > { %7859 = vst.msk [vmem:[#allocation3 + $0xf8] sm:$0xf] %vm4634_vm9, %v7783_v17 }
 0x6c0   : > { %13019 = vmatmul.msk.bf16.gmra.mxu3 %vm4791_vm10, %v12978_v39 }
 0x6c1   : > { %v8930_v29 = vld [vmem:[#allocation2 + $0xaf] sm:$0xff] }
 0x6c2   : > { %v9289_v57 = vld [vmem:[#allocation2 + $0xa9] sm:$0xff]  ;;  %v9290_v4 = vld [vmem:[#allocation2 + $0xb1] sm:$0xff]  ;;  %v8966_v43 = vpack.c.bf16 %v8930_v29, %v8930_v29 }
 0x6c3   : > { %v9325_v48 = vpack.c.bf16 %v9289_v57, %v9289_v57  ;;  %v9326_v2 = vpack.c.bf16 %v9290_v4, %v9290_v4 }
 0x6c4   : > { %v7535_v40 = vpop.permute.xlu2 %7534  ;;  %9002 = vst.msk [vmem:[#allocation3 + $0x58] sm:$0xf] %vm1884_vm3, %v8966_v43 }
 0x6c5   : > { %7609 = vst.msk [vmem:[#allocation3 + $0x108] sm:$0xf] %vm4381_vm8, %v7535_v40 }
 0x6c6   : > { %12919 = vmatmul.msk.bf16.gmra.mxu1 %vm4791_vm10, %v12878_v36  ;;  %9361 = vst.msk [vmem:[#allocation3 + $0x54] sm:$0xf] %vm1884_vm3, %v9325_v48  ;;  %v14027_v34 = vld [vmem:[#allocation3 + $0xf4] sm:$0xf0] }
 0x6c7   : > { %9362 = vst.msk [vmem:[#allocation3 + $0x5c] sm:$0xf] %vm1884_vm3, %v9326_v2  ;;  %v12982_v22 = vor.u32 %v14027_v34, %v12981_v44  ;;  %v14008_v53 = vld [vmem:[#allocation3 + $0xf4] sm:$0xf0]  ;;  %v14074_v34 = vld [vmem:[%s17761_s1 + $0x370] sm:$0xff] }
 0x6c8   : > { %v12886_v50 = vor.u32 %v14008_v53, %v12885_v31  ;;  %9679 = vmatpush.bf16.msrb.mxu1 %v14074_v34  ;;  %v13028_v53 = vld [vmem:[#allocation3 + $0x18] sm:$0xf0] }
 0x6cc   : > { %v7537_v46 = vpop.permute.xlu2 %7536 }
 0x6cd   : > { %7610 = vst.msk [vmem:[#allocation3 + $0x110] sm:$0xf] %vm4381_vm8, %v7537_v46 }
 0x6ce   : > { %12956 = vmatmul.msk.bf16.gmra.mxu2 %vm4791_vm10, %v12878_v36 }
 0x6d0   : > { %13020 = vmatmul.msk.bf16.gmra.mxu3 %vm4791_vm10, %v12982_v22 }
 0x6d4   : > { %v7533_v61 = vpop.permute.xlu1 %7532  ;;  %v17100_v51 = vpop.permute.xlu2 %7790 }
 0x6d5   : > { %7608 = vst.msk [vmem:[#allocation3 + $0x100] sm:$0xf] %vm4381_vm8, %v7533_v61 }
 0x6d6   : > { %12920 = vmatmul.msk.bf16.gmra.mxu1 %vm4791_vm10, %v12882_v25 }
 0x6dc   : > { %v8312_v19 = vpop.f32.mrf.mxu0  ;;  %v9140_v15 = vpop.permute.xlu2 %9139 }
 0x6dd   : > { %v8337_v16 = vadd.f32 %v8312_v19, %v8136_v7  ;;  %9245 = vst.msk [vmem:[#allocation3 + $0x10] sm:$0xf] %vm2137_vm6, %v9140_v15 }
 0x6de   : > { %12957 = vmatmul.msk.bf16.gmra.mxu2 %vm4791_vm10, %v12882_v25 }
 0x6df   : > { %v8356_v18 = vadd.f32 %v16877_v54, %v8337_v16 }
 0x6e1   : > { %v8372_v13 = vmax.f32 %v8356_v18, 0.0  ;;  %v8047_v35 = vpop.f32.mrf.mxu2  ;;  %v8145_v28 = vpop.f32.mrf.mxu3 }
 0x6e2   : > { %v8141_v37 = vadd.f32 %v8140_v20, %v8047_v35 }
 0x6e3   : > { %8388 = vst [vmem:[#allocation2 + $0xc8] sm:$0xff] %v8372_v13  ;;  %v9075_v38 = vpack.c.bf16 %v8372_v13, %v8372_v13 }
 0x6e4   : > { %v8314_v23 = vpop.f32.mrf.mxu0  ;;  %v9146_v10 = vpop.permute.xlu2 %9145 }
 0x6e5   : > { %v7787_v49 = vpop.permute.xlu1 %7786  ;;  %v7785_v3 = vpop.permute.xlu0 %7784  ;;  %9159 = vrot.lane.b32.xlu0 %v9075_v38, %s14217_s23  ;;  %v8338_v1 = vadd.f32 %v8314_v23, %v8138_v58  ;;  %9248 = vst.msk [vmem:[#allocation3 + $0x28] sm:$0xf] %vm2137_vm6, %v9146_v10 }
 0x6e6   : > { %7861 = vst.msk [vmem:[#allocation3 + $0x108] sm:$0xf] %vm4634_vm9, %v7787_v49  ;;  %12921 = vmatmul.msk.bf16.gmra.mxu1 %vm4791_vm10, %v12886_v50 }
 0x6e7   : > { %7860 = vst.msk [vmem:[#allocation3 + $0x100] sm:$0xf] %vm4634_vm9, %v7785_v3  ;;  %v8357_v27 = vadd.f32 %v16877_v54, %v8338_v1 }
 0x6e9   : > { %v8049_v39 = vpop.f32.mrf.mxu2  ;;  %v8373_v17 = vmax.f32 %v8357_v27, 0.0  ;;  %v8147_v16 = vpop.f32.mrf.mxu3  ;;  %v13026_v27 = vld [vmem:[#allocation3 + $0x10] sm:$0xf] }
 0x6ea   : > { %v8931_v59 = vld [vmem:[#allocation2 + $0xc7] sm:$0xff]  ;;  %v8143_v0 = vadd.f32 %v8142_v56, %v8049_v39 }
 0x6eb   : > { %8389 = vst [vmem:[#allocation2 + $0xd0] sm:$0xff] %v8373_v17  ;;  %v8967_v43 = vpack.c.bf16 %v8931_v59, %v8931_v59  ;;  %v9076_v48 = vpack.c.bf16 %v8373_v17, %v8373_v17  ;;  %v17167_v17 = vor.u32 %v14038_v9, %v13028_v53 }
 0x6ec   : > { %v8317_v2 = vpop.f32.mrf.mxu0  ;;  %v9152_v60 = vpop.permute.xlu2 %9151 }
 0x6ed   : > { %v7789_v29 = vpop.permute.xlu1 %7788  ;;  %v7539_v57 = vpop.permute.xlu0 %7538  ;;  %v14028_v4 = vld [vmem:[#allocation3 + $0x104] sm:$0xf0]  ;;  %v8339_v42 = vadd.f32 %v8317_v2, %v8141_v37  ;;  %9161 = vrot.lane.b32.xlu1 %v9076_v48, %s14217_s23  ;;  %9003 = vst.msk [vmem:[#allocation3 + $0x60] sm:$0xf] %vm1884_vm3, %v8967_v43 }
 0x6ee   : > { %7862 = vst.msk [vmem:[#allocation3 + $0x110] sm:$0xf] %vm4634_vm9, %v7789_v29  ;;  %v12985_v40 = vld [vmem:[#allocation3 + $0x100] sm:$0xf]  ;;  %12958 = vmatmul.msk.bf16.gmra.mxu2 %vm4791_vm10, %v12886_v50  ;;  %v14015_v30 = vld [vmem:[#allocation3 + $0x104] sm:$0xf0] }
 0x6ef   : > { %7611 = vst.msk [vmem:[#allocation3 + $0x118] sm:$0xf] %vm4381_vm8, %v7539_v57  ;;  %v12986_v36 = vor.u32 %v14028_v4, %v12985_v40  ;;  %v8358_v11 = vadd.f32 %v16877_v54, %v8339_v42  ;;  %v12889_v44 = vld [vmem:[#allocation3 + $0x100] sm:$0xf]  ;;  %v17176_v4 = vld [vmem:[%s17762_s2 + $0x4] ss:$0 sm:$0xff] }
 0x6f0   : > { %7863 = vst.msk [vmem:[#allocation3 + $0x118] sm:$0xf] %vm4634_vm9, %v17100_v51  ;;  %v12890_v45 = vor.u32 %v14015_v30, %v12889_v44  ;;  %v14143_v40 = vld [vmem:[%s17761_s1 + $0x368] sm:$0xff] }
 0x6f1   : > { %13021 = vmatmul.msk.bf16.gmra.mxu3 %vm4791_vm10, %v12986_v36  ;;  %9251 = vst.msk [vmem:[#allocation3 + $0x40] sm:$0xf] %vm2137_vm6, %v9152_v60  ;;  %v8374_v46 = vmax.f32 %v8358_v11, 0.0  ;;  %v8052_v22 = vpop.f32.mrf.mxu2  ;;  %v14147_v2 = vld [vmem:[%s17761_s1 + $0x388] sm:$0xff]  ;;  %v14036_v36 = vld [vmem:[#allocation3 + $0x4] sm:$0xf]  ;;  %10494 = vmatpush.bf16.msra.mxu2 %v14143_v40 }
 0x6f2   : > { %v8932_v32 = vld [vmem:[#allocation2 + $0xcf] sm:$0xff]  ;;  %v8146_v31 = vadd.f32 %v8145_v28, %v8052_v22  ;;  %10547 = vmatpush.bf16.msra.mxu3 %v14147_v2 }
 0x6f3   : > { %v9291_v63 = vld [vmem:[#allocation2 + $0xc9] sm:$0xff]  ;;  %8390 = vst [vmem:[#allocation2 + $0xe8] sm:$0xff] %v8374_v46  ;;  %v8968_v12 = vpack.c.bf16 %v8932_v32, %v8932_v32  ;;  %v9077_v51 = vpack.c.bf16 %v8374_v46, %v8374_v46  ;;  %v9292_v25 = vld [vmem:[#allocation2 + $0xd1] sm:$0xff] }
 0x6f4   : > { %v8319_v41 = vpop.f32.mrf.mxu0  ;;  %v9327_v33 = vpack.c.bf16 %v9291_v63, %v9291_v63  ;;  %v9328_v55 = vpack.c.bf16 %v9292_v25, %v9292_v25  ;;  %v13148_v42 = vld [vmem:[#allocation3 + $0x8] sm:$0xf0] }
 0x6f5   : > { %v9138_v61 = vpop.permute.xlu1 %9137  ;;  %v9136_v6 = vpop.permute.xlu0 %9135  ;;  %v8340_v14 = vadd.f32 %v8319_v41, %v8143_v0  ;;  %9163 = vrot.lane.b32.xlu2 %v9077_v51, %s14217_s23  ;;  %9004 = vst.msk [vmem:[#allocation3 + $0x68] sm:$0xf] %vm1884_vm3, %v8968_v12  ;;  %v12989_v8 = vld [vmem:[#allocation3 + $0x110] sm:$0xf]  ;;  %v13151_v30 = vor.u32 %v14036_v36, %v13148_v42  ;;  %v14101_v51 = vld [vmem:[%s17761_s1 + $0x3c8] sm:$0xff] }
 0x6f6   : > { %9244 = vst.msk [vmem:[#allocation3 + $0x8] sm:$0xf] %vm2137_vm6, %v9138_v61  ;;  %12922 = vmatmul.msk.bf16.gmra.mxu1 %vm4791_vm10, %v12890_v45  ;;  %v14105_v25 = vld [vmem:[%s17761_s1 + $0x3e8] sm:$0xff]  ;;  %10111 = vmatpush.bf16.msra.mxu0 %v14101_v51 }
 0x6f7   : > { %9243 = vst.msk [vmem:[#allocation3] sm:$0xf] %vm2137_vm6, %v9136_v6  ;;  %v8359_v7 = vadd.f32 %v16877_v54, %v8340_v14  ;;  %v14029_v19 = vld [vmem:[#allocation3 + $0x114] sm:$0xf0]  ;;  %v14040_v14 = vld [vmem:[#allocation3 + $0x24] sm:$0xf]  ;;  %10164 = vmatpush.bf16.msra.mxu1 %v14105_v25 }
 0x6f8   : > { %9025 = vst.msk [vmem:[#allocation3 + $0x110] sm:$0xf] %vm1884_vm3, %v17051_v52  ;;  %v12990_v62 = vor.u32 %v14029_v19, %v12989_v8  ;;  %v14141_v25 = vld [vmem:[%s17761_s1 + $0x358] sm:$0xff] }
 0x6f9   : > { %9026 = vst.msk [vmem:[#allocation3 + $0x118] sm:$0xf] %vm1884_vm3, %v17091_v21  ;;  %v8375_v47 = vmax.f32 %v8359_v7, 0.0  ;;  %v8054_v15 = vpop.f32.mrf.mxu2  ;;  %v13036_v7 = vld [vmem:[#allocation3 + $0x28] sm:$0xf0] }
 0x6fa   : > { %9363 = vst.msk [vmem:[#allocation3 + $0x64] sm:$0xf] %vm1884_vm3, %v9327_v33  ;;  %v8933_v5 = vld [vmem:[#allocation2 + $0xe7] sm:$0xff]  ;;  %v8148_v46 = vadd.f32 %v8147_v16, %v8054_v15 }
 0x6fb   : > { %9364 = vst.msk [vmem:[#allocation3 + $0x6c] sm:$0xf] %vm1884_vm3, %v9328_v55  ;;  %v8969_v54 = vpack.c.bf16 %v8933_v5, %v8933_v5  ;;  %v9078_v35 = vpack.c.bf16 %v8375_v47, %v8375_v47  ;;  %v14041_v5 = vld [vmem:[#allocation3 + $0x24] sm:$0xf0] }
 0x6fc   : > { %8391 = vst [vmem:[#allocation2 + $0xf0] sm:$0xff] %v8375_v47 }
 0x6fd   : > { %v9144_v20 = vpop.permute.xlu1 %9143  ;;  %v9142_v18 = vpop.permute.xlu0 %9141  ;;  %v14037_v13 = vld [vmem:[#allocation3 + $0x4] sm:$0xf0]  ;;  %9165 = vrot.lane.b32.xlu0 %v9078_v35, %s14217_s23  ;;  %9005 = vst.msk [vmem:[#allocation3 + $0x70] sm:$0xf] %vm1884_vm3, %v8969_v54 }
 0x6fe   : > { %9247 = vst.msk [vmem:[#allocation3 + $0x20] sm:$0xf] %vm2137_vm6, %v9144_v20  ;;  %v13146_v52 = vld [vmem:[#allocation3] sm:$0xf] }
 0x6ff   : > { %9246 = vst.msk [vmem:[#allocation3 + $0x18] sm:$0xf] %vm2137_vm6, %v9142_v18  ;;  %v13147_v21 = vor.u32 %v14037_v13, %v13146_v52  ;;  %v17200_v13 = vor.u32 %v14040_v14, %v13036_v7 }
 0x701   : > { %13022 = vmatmul.msk.bf16.gmra.mxu3 %vm4791_vm10, %v12990_v62  ;;  %9813 = vmatmul.bf16.vlgmr.msrb.gmra.mxu2 %v13147_v21  ;;  %v8638_v26 = vpop.f32.mrf.mxu2 }
 0x702   : > { %v8322_v56 = vpop.f32.mrf.mxu0 }
 0x703   : > { %v8815_v38 = vpop.f32.mrf.mxu3  ;;  %v8934_v58 = vld [vmem:[#allocation2 + $0xef] sm:$0xff]  ;;  %v8545_v39 = vpop.f32.mrf.mxu1  ;;  %v8341_v29 = vadd.f32 %v8322_v56, %v8146_v31 }
 0x704   : > { %v9293_v49 = vld [vmem:[#allocation2 + $0xe9] sm:$0xff]  ;;  %v9294_v3 = vld [vmem:[#allocation2 + $0xf1] sm:$0xff]  ;;  %v8970_v50 = vpack.c.bf16 %v8934_v58, %v8934_v58  ;;  %v8639_v57 = vadd.f32 %v8638_v26, %v8545_v39 }
 0x705   : > { %v9150_v23 = vpop.permute.xlu1 %9149  ;;  %v9148_v10 = vpop.permute.xlu0 %9147  ;;  %v9329_v1 = vpack.c.bf16 %v9293_v49, %v9293_v49  ;;  %v9330_v59 = vpack.c.bf16 %v9294_v3, %v9294_v3  ;;  %v8360_v43 = vadd.f32 %v17176_v4, %v8341_v29  ;;  %v13034_v55 = vld [vmem:[#allocation3 + $0x20] sm:$0xf] }
 0x706   : > { %9250 = vst.msk [vmem:[#allocation3 + $0x38] sm:$0xf] %vm2137_vm6, %v9150_v23  ;;  %v14039_v24 = vld [vmem:[#allocation3 + $0x14] sm:$0xf0]  ;;  %13136 = vmatmul.msk.bf16.vlgmr.msrb.gmra.mxu1 %vm2494_vm5, %v17167_v17  ;;  %v8855_v48 = vadd.f32 %v8815_v38, %v8639_v57  ;;  %v13035_v62 = vor.u32 %v14041_v5, %v13034_v55  ;;  %v14142_v38 = vld [vmem:[%s17761_s1 + $0x360] sm:$0xff] }
 0x707   : > { %9249 = vst.msk [vmem:[#allocation3 + $0x30] sm:$0xf] %vm2137_vm6, %v9148_v10  ;;  %v13027_v37 = vor.u32 %v14039_v24, %v13026_v27  ;;  %v8376_v60 = vmax.f32 %v8360_v43, 0.0  ;;  %10495 = vmatpush.bf16.msra.mxu2 %v14142_v38  ;;  %v14100_v43 = vld [vmem:[%s17761_s1 + $0x3c0] sm:$0xff] }
 0x708   : > { %9006 = vst.msk [vmem:[#allocation3 + $0x78] sm:$0xf] %vm1884_vm3, %v8970_v50  ;;  %v8871_v34 = vadd.f32 %v17176_v4, %v8855_v48  ;;  %10112 = vmatpush.bf16.msra.mxu0 %v14100_v43 }
 0x709   : > { %9631 = vmatmul.bf16.vlgmr.msrb.gmra.mxu0 %v13027_v37  ;;  %9365 = vst.msk [vmem:[#allocation3 + $0x74] sm:$0xf] %vm1884_vm3, %v9329_v1  ;;  %v8640_v11 = vpop.f32.mrf.mxu2  ;;  %v9079_v32 = vpack.c.bf16 %v8376_v60, %v8376_v60 }
 0x70a   : > { %9366 = vst.msk [vmem:[#allocation3 + $0x7c] sm:$0xf] %vm1884_vm3, %v9330_v59  ;;  %v8887_v44 = vmax.f32 %v8871_v34, 0.0  ;;  %v8324_v63 = vpop.f32.mrf.mxu0  ;;  %v13044_v34 = vld [vmem:[#allocation3 + $0x38] sm:$0xf0] }
 0x70b   : > { %v8817_v28 = vpop.f32.mrf.mxu3  ;;  %8392 = vst [vmem:[#allocation2 + $0x108] sm:$0xff] %v8376_v60  ;;  %v8547_v0 = vpop.f32.mrf.mxu1  ;;  %v8342_v61 = vadd.f32 %v8324_v63, %v8148_v46  ;;  %9167 = vrot.lane.b32.xlu1 %v9079_v32, %s14217_s23  ;;  %v14042_v60 = vld [vmem:[#allocation3 + $0x34] sm:$0xf]  ;;  %10496 = vmatpush.bf16.msra.mxu2 %v14141_v25 }
 0x70c   : > { %8903 = vst [vmem:[#allocation2 + $0x128] sm:$0xff] %v8887_v44  ;;  %v8641_v6 = vadd.f32 %v8640_v11, %v8547_v0  ;;  %v9081_v12 = vpack.c.bf16 %v8887_v44, %v8887_v44 }
 0x70d   : > { %v9154_v22 = vpop.permute.xlu0 %9153  ;;  %v8361_v41 = vadd.f32 %v17176_v4, %v8342_v61 }
 0x70e   : > { %9252 = vst.msk [vmem:[#allocation3 + $0x48] sm:$0xf] %vm2137_vm6, %v9154_v22  ;;  %v8856_v45 = vadd.f32 %v8817_v28, %v8641_v6  ;;  %9171 = vrot.lane.b32.xlu0 %v9081_v12, %s14217_s23  ;;  %v13042_v11 = vld [vmem:[#allocation3 + $0x30] sm:$0xf]  ;;  %v14043_v28 = vld [vmem:[#allocation3 + $0x34] sm:$0xf0]  ;;  %v17226_v22 = vor.u32 %v14042_v60, %v13044_v34 }
 0x70f   : > { %v8377_v33 = vmax.f32 %v8361_v41, 0.0  ;;  %v13043_v63 = vor.u32 %v14043_v28, %v13042_v11  ;;  %v14146_v41 = vld [vmem:[%s17761_s1 + $0x380] sm:$0xff] }
 0x710   : > { %v8872_v8 = vadd.f32 %v17176_v4, %v8856_v45  ;;  %10548 = vmatpush.bf16.msra.mxu3 %v14146_v41 }
 0x711   : > { %13200 = vmatmul.msk.bf16.vlgmr.msrb.gmra.mxu3 %vm2494_vm5, %v13151_v30  ;;  %9818 = vmatmul.bf16.gmra.mxu2 %v13027_v37  ;;  %v8643_v19 = vpop.f32.mrf.mxu2  ;;  %8393 = vst [vmem:[#allocation2 + $0x110] sm:$0xff] %v8377_v33  ;;  %v9080_v18 = vpack.c.bf16 %v8377_v33, %v8377_v33 }
 0x712   : > { %v8935_v16 = vld [vmem:[#allocation2 + $0x107] sm:$0xff]  ;;  %v8888_v15 = vmax.f32 %v8872_v8, 0.0 }
 0x713   : > { %v8820_v47 = vpop.f32.mrf.mxu3  ;;  %v8971_v20 = vpack.c.bf16 %v8935_v16, %v8935_v16  ;;  %v8550_v54 = vpop.f32.mrf.mxu1  ;;  %v8937_v35 = vld [vmem:[#allocation2 + $0x127] sm:$0xff]  ;;  %9169 = vrot.lane.b32.xlu2 %v9080_v18, %s14217_s23 }
 0x714   : > { %8904 = vst [vmem:[#allocation2 + $0x130] sm:$0xff] %v8888_v15  ;;  %v8644_v52 = vadd.f32 %v8643_v19, %v8550_v54  ;;  %v8973_v21 = vpack.c.bf16 %v8937_v35, %v8937_v35  ;;  %v9082_v9 = vpack.c.bf16 %v8888_v15, %v8888_v15  ;;  %v14104_v18 = vld [vmem:[%s17761_s1 + $0x3e0] sm:$0xff] }
 0x715   : > { %9007 = vst.msk [vmem:[#allocation3 + $0x80] sm:$0xf] %vm1884_vm3, %v8971_v20  ;;  %v14099_v20 = vld [vmem:[%s17761_s1 + $0x3b8] sm:$0xff]  ;;  %10165 = vmatpush.bf16.msra.mxu1 %v14104_v18 }
 0x716   : > { %13137 = vmatmul.msk.bf16.gmra.mxu1 %vm2494_vm5, %v17200_v13  ;;  %v9158_v53 = vpop.permute.xlu2 %9157  ;;  %v8857_v26 = vadd.f32 %v8820_v47, %v8644_v52  ;;  %9009 = vst.msk [vmem:[#allocation3 + $0x90] sm:$0xf] %vm1884_vm3, %v8973_v21  ;;  %9173 = vrot.lane.b32.xlu1 %v9082_v9, %s14217_s23  ;;  %v14044_v21 = vld [vmem:[#allocation3 + $0x44] sm:$0xf]  ;;  %v13052_v9 = vld [vmem:[#allocation3 + $0x48] sm:$0xf0] }
 0x717   : > { %9254 = vst.msk [vmem:[#allocation3 + $0x58] sm:$0xf] %vm2137_vm6, %v9158_v53  ;;  %10113 = vmatpush.bf16.msra.mxu0 %v14099_v20  ;;  %v14045_v53 = vld [vmem:[#allocation3 + $0x44] sm:$0xf0] }
 0x718   : > { %v8873_v58 = vadd.f32 %v17176_v4, %v8857_v26  ;;  %v8936_v31 = vld [vmem:[#allocation2 + $0x10f] sm:$0xff] }
 0x719   : > { %9636 = vmatmul.bf16.gmra.mxu0 %v13035_v62  ;;  %v8645_v49 = vpop.f32.mrf.mxu2  ;;  %v9295_v23 = vld [vmem:[#allocation2 + $0x109] sm:$0xff]  ;;  %v9296_v10 = vld [vmem:[#allocation2 + $0x111] sm:$0xff]  ;;  %v8972_v1 = vpack.c.bf16 %v8936_v31, %v8936_v31 }
 0x71a   : > { %v8889_v50 = vmax.f32 %v8873_v58, 0.0  ;;  %v9331_v56 = vpack.c.bf16 %v9295_v23, %v9295_v23  ;;  %v9332_v48 = vpack.c.bf16 %v9296_v10, %v9296_v10  ;;  %v13050_v58 = vld [vmem:[#allocation3 + $0x40] sm:$0xf] }
 0x71b   : > { %v8822_v3 = vpop.f32.mrf.mxu3  ;;  %v8552_v27 = vpop.f32.mrf.mxu1  ;;  %v8938_v24 = vld [vmem:[#allocation2 + $0x12f] sm:$0xff]  ;;  %9008 = vst.msk [vmem:[#allocation3 + $0x88] sm:$0xf] %vm1884_vm3, %v8972_v1  ;;  %v13051_v23 = vor.u32 %v14045_v53, %v13050_v58 }
 0x71c   : > { %v9297_v39 = vld [vmem:[#allocation2 + $0x129] sm:$0xff]  ;;  %v9298_v59 = vld [vmem:[#allocation2 + $0x131] sm:$0xff]  ;;  %8905 = vst [vmem:[#allocation2 + $0x148] sm:$0xff] %v8889_v50  ;;  %v8646_v37 = vadd.f32 %v8645_v49, %v8552_v27  ;;  %v8974_v29 = vpack.c.bf16 %v8938_v24, %v8938_v24  ;;  %v9083_v57 = vpack.c.bf16 %v8889_v50, %v8889_v50 }
 0x71d   : > { %v9333_v40 = vpack.c.bf16 %v9297_v39, %v9297_v39  ;;  %v9334_v36 = vpack.c.bf16 %v9298_v59, %v9298_v59  ;;  %9367 = vst.msk [vmem:[#allocation3 + $0x84] sm:$0xf] %vm1884_vm3, %v9331_v56  ;;  %v14140_v27 = vld [vmem:[%s17761_s1 + $0x350] sm:$0xff] }
 0x71e   : > { %v8858_v2 = vadd.f32 %v8822_v3, %v8646_v37  ;;  %9010 = vst.msk [vmem:[#allocation3 + $0x98] sm:$0xf] %vm1884_vm3, %v8974_v29  ;;  %9175 = vrot.lane.b32.xlu2 %v9083_v57, %s14217_s23  ;;  %v17253_v3 = vor.u32 %v14044_v21, %v13052_v9  ;;  %10497 = vmatpush.bf16.msra.mxu2 %v14140_v27 }
 0x71f   : > { %9368 = vst.msk [vmem:[#allocation3 + $0x8c] sm:$0xf] %vm1884_vm3, %v9332_v48 }
 0x720   : > { %v8874_v42 = vadd.f32 %v17176_v4, %v8858_v2  ;;  %9369 = vst.msk [vmem:[#allocation3 + $0x94] sm:$0xf] %vm1884_vm3, %v9333_v40 }
 0x721   : > { %13201 = vmatmul.msk.bf16.gmra.mxu3 %vm2494_vm5, %v17167_v17  ;;  %9823 = vmatmul.bf16.gmra.mxu2 %v13035_v62  ;;  %v8648_v46 = vpop.f32.mrf.mxu2  ;;  %9370 = vst.msk [vmem:[#allocation3 + $0x9c] sm:$0xf] %vm1884_vm3, %v9334_v36 }
 0x722   : > { %v8890_v44 = vmax.f32 %v8874_v42, 0.0  ;;  %v14098_v42 = vld [vmem:[%s17761_s1 + $0x3b0] sm:$0xff] }
 0x723   : > { %v8825_v17 = vpop.f32.mrf.mxu3  ;;  %v8555_v30 = vpop.f32.mrf.mxu1  ;;  %v8939_v32 = vld [vmem:[#allocation2 + $0x147] sm:$0xff]  ;;  %10114 = vmatpush.bf16.msra.mxu0 %v14098_v42 }
 0x724   : > { %8906 = vst [vmem:[#allocation2 + $0x150] sm:$0xff] %v8890_v44  ;;  %v8649_v0 = vadd.f32 %v8648_v46, %v8555_v30  ;;  %v8975_v61 = vpack.c.bf16 %v8939_v32, %v8939_v32  ;;  %v9084_v6 = vpack.c.bf16 %v8890_v44, %v8890_v44  ;;  %v14046_v46 = vld [vmem:[#allocation3 + $0x54] sm:$0xf] }
 0x726   : > { %13138 = vmatmul.msk.bf16.gmra.mxu1 %vm2494_vm5, %v17226_v22  ;;  %v9156_v12 = vpop.permute.xlu1 %9155  ;;  %v8859_v51 = vadd.f32 %v8825_v17, %v8649_v0  ;;  %9011 = vst.msk [vmem:[#allocation3 + $0xa0] sm:$0xf] %vm1884_vm3, %v8975_v61  ;;  %9177 = vrot.lane.b32.xlu0 %v9084_v6, %s14217_s23  ;;  %v13060_v17 = vld [vmem:[#allocation3 + $0x58] sm:$0xf0] }
 0x727   : > { %9253 = vst.msk [vmem:[#allocation3 + $0x50] sm:$0xf] %vm2137_vm6, %v9156_v12  ;;  %v17273_v61 = vor.u32 %v14046_v46, %v13060_v17  ;;  %v14050_v17 = vld [vmem:[#allocation3 + $0x74] sm:$0xf] }
 0x728   : > { %v8875_v45 = vadd.f32 %v17176_v4, %v8859_v51 }
 0x729   : > { %9641 = vmatmul.bf16.gmra.mxu0 %v13043_v63  ;;  %v8650_v14 = vpop.f32.mrf.mxu2 }
 0x72a   : > { %v8891_v8 = vmax.f32 %v8875_v45, 0.0  ;;  %v14139_v45 = vld [vmem:[%s17761_s1 + $0x348] sm:$0xff] }
 0x72b   : > { %v8827_v33 = vpop.f32.mrf.mxu3  ;;  %v8557_v55 = vpop.f32.mrf.mxu1  ;;  %v8940_v7 = vld [vmem:[#allocation2 + $0x14f] sm:$0xff]  ;;  %10498 = vmatpush.bf16.msra.mxu2 %v14139_v45 }
 0x72c   : > { %v9299_v19 = vld [vmem:[#allocation2 + $0x149] sm:$0xff]  ;;  %v9300_v47 = vld [vmem:[#allocation2 + $0x151] sm:$0xff]  ;;  %8907 = vst [vmem:[#allocation2 + $0x168] sm:$0xff] %v8891_v8  ;;  %v8651_v16 = vadd.f32 %v8650_v14, %v8557_v55  ;;  %v8976_v15 = vpack.c.bf16 %v8940_v7, %v8940_v7  ;;  %v9085_v5 = vpack.c.bf16 %v8891_v8, %v8891_v8 }
 0x72d   : > { %v9335_v62 = vpack.c.bf16 %v9299_v19, %v9299_v19  ;;  %v9336_v54 = vpack.c.bf16 %v9300_v47, %v9300_v47  ;;  %v14145_v14 = vld [vmem:[%s17761_s1 + $0x378] sm:$0xff] }
 0x72e   : > { %v8860_v35 = vadd.f32 %v8827_v33, %v8651_v16  ;;  %9012 = vst.msk [vmem:[#allocation3 + $0xa8] sm:$0xf] %vm1884_vm3, %v8976_v15  ;;  %9179 = vrot.lane.b32.xlu1 %v9085_v5, %s14217_s23  ;;  %v13058_v44 = vld [vmem:[#allocation3 + $0x50] sm:$0xf]  ;;  %v14097_v33 = vld [vmem:[%s17761_s1 + $0x3a8] sm:$0xff]  ;;  %v14103_v55 = vld [vmem:[%s17761_s1 + $0x3d8] sm:$0xff]  ;;  %10549 = vmatpush.bf16.msra.mxu3 %v14145_v14 }
 0x72f   : > { %9371 = vst.msk [vmem:[#allocation3 + $0xa4] sm:$0xf] %vm1884_vm3, %v9335_v62  ;;  %10115 = vmatpush.bf16.msra.mxu0 %v14097_v33  ;;  %10166 = vmatpush.bf16.msra.mxu1 %v14103_v55  ;;  %v14137_v14 = vld [vmem:[%s17761_s1 + $0x338] sm:$0xff]  ;;  %v14144_v33 = vld [vmem:[%s17761_s1 + $0x370] sm:$0xff] }
 0x730   : > { %v8876_v52 = vadd.f32 %v17176_v4, %v8860_v35  ;;  %9372 = vst.msk [vmem:[#allocation3 + $0xac] sm:$0xf] %vm1884_vm3, %v9336_v54 }
 0x731   : > { %13202 = vmatmul.msk.bf16.gmra.mxu3 %vm2494_vm5, %v17200_v13  ;;  %9828 = vmatmul.bf16.gmra.mxu2 %v13043_v63  ;;  %v8653_v26 = vpop.f32.mrf.mxu2 }
 0x732   : > { %v8892_v13 = vmax.f32 %v8876_v52, 0.0  ;;  %10550 = vmatpush.bf16.msra.mxu3 %v14144_v33 }
 0x733   : > { %v8830_v38 = vpop.f32.mrf.mxu3  ;;  %v8560_v49 = vpop.f32.mrf.mxu1  ;;  %v8941_v31 = vld [vmem:[#allocation2 + $0x167] sm:$0xff] }
 0x734   : > { %8908 = vst [vmem:[#allocation2 + $0x170] sm:$0xff] %v8892_v13  ;;  %v8654_v10 = vadd.f32 %v8653_v26, %v8560_v49  ;;  %v8977_v50 = vpack.c.bf16 %v8941_v31, %v8941_v31  ;;  %v9086_v1 = vpack.c.bf16 %v8892_v13, %v8892_v13  ;;  %v13068_v13 = vld [vmem:[#allocation3 + $0x68] sm:$0xf0] }
 0x736   : > { %13139 = vmatmul.msk.bf16.gmra.mxu1 %vm2494_vm5, %v17253_v3  ;;  %v8861_v24 = vadd.f32 %v8830_v38, %v8654_v10  ;;  %9013 = vst.msk [vmem:[#allocation3 + $0xb0] sm:$0xf] %vm1884_vm3, %v8977_v50  ;;  %9181 = vrot.lane.b32.xlu2 %v9086_v1, %s14217_s23  ;;  %v14048_v38 = vld [vmem:[#allocation3 + $0x64] sm:$0xf] }
 0x738   : > { %v8877_v56 = vadd.f32 %v17176_v4, %v8861_v24 }
 0x739   : > { %9646 = vmatmul.bf16.gmra.mxu0 %v13051_v23  ;;  %v8655_v39 = vpop.f32.mrf.mxu2 }
 0x73a   : > { %v8893_v37 = vmax.f32 %v8877_v56, 0.0 }
 0x73b   : > { %v8832_v59 = vpop.f32.mrf.mxu3  ;;  %v8562_v29 = vpop.f32.mrf.mxu1  ;;  %v8942_v57 = vld [vmem:[#allocation2 + $0x16f] sm:$0xff] }
 0x73c   : > { %v9301_v43 = vld [vmem:[#allocation2 + $0x169] sm:$0xff]  ;;  %v9302_v48 = vld [vmem:[#allocation2 + $0x171] sm:$0xff]  ;;  %8909 = vst [vmem:[#allocation2 + $0x188] sm:$0xff] %v8893_v37  ;;  %v8656_v40 = vadd.f32 %v8655_v39, %v8562_v29  ;;  %v8978_v2 = vpack.c.bf16 %v8942_v57, %v8942_v57  ;;  %v9087_v36 = vpack.c.bf16 %v8893_v37, %v8893_v37 }
 0x73d   : > { %v9337_v60 = vpack.c.bf16 %v9301_v43, %v9301_v43  ;;  %v9338_v34 = vpack.c.bf16 %v9302_v48, %v9302_v48 }
 0x73e   : > { %v8862_v11 = vadd.f32 %v8832_v59, %v8656_v40  ;;  %9014 = vst.msk [vmem:[#allocation3 + $0xb8] sm:$0xf] %vm1884_vm3, %v8978_v2  ;;  %9183 = vrot.lane.b32.xlu0 %v9087_v36, %s14217_s23  ;;  %v14138_v59 = vld [vmem:[%s17761_s1 + $0x340] sm:$0xff] }
 0x73f   : > { %9373 = vst.msk [vmem:[#allocation3 + $0xb4] sm:$0xf] %vm1884_vm3, %v9337_v60  ;;  %10499 = vmatpush.bf16.msra.mxu2 %v14138_v59 }
 0x740   : > { %v8878_v28 = vadd.f32 %v17176_v4, %v8862_v11  ;;  %9374 = vst.msk [vmem:[#allocation3 + $0xbc] sm:$0xf] %vm1884_vm3, %v9338_v34 }
 0x741   : > { %13203 = vmatmul.msk.bf16.gmra.mxu3 %vm2494_vm5, %v17226_v22  ;;  %9833 = vmatmul.bf16.gmra.mxu2 %v13051_v23  ;;  %v8658_v30 = vpop.f32.mrf.mxu2  ;;  %v14047_v22 = vld [vmem:[#allocation3 + $0x54] sm:$0xf0]  ;;  %v17300_v23 = vor.u32 %v14048_v38, %v13068_v13 }
 0x742   : > { %v8894_v63 = vmax.f32 %v8878_v28, 0.0  ;;  %v13059_v12 = vor.u32 %v14047_v22, %v13058_v44 }
 0x743   : > { %v8835_v32 = vpop.f32.mrf.mxu3  ;;  %v8565_v0 = vpop.f32.mrf.mxu1  ;;  %v8943_v6 = vld [vmem:[#allocation2 + $0x187] sm:$0xff]  ;;  %10500 = vmatpush.bf16.msra.mxu2 %v14137_v14 }
 0x744   : > { %8910 = vst [vmem:[#allocation2 + $0x190] sm:$0xff] %v8894_v63  ;;  %v8659_v51 = vadd.f32 %v8658_v30, %v8565_v0  ;;  %v8979_v25 = vpack.c.bf16 %v8943_v6, %v8943_v6  ;;  %v9088_v41 = vpack.c.bf16 %v8894_v63, %v8894_v63  ;;  %v13076_v30 = vld [vmem:[#allocation3 + $0x78] sm:$0xf0] }
 0x746   : > { %13140 = vmatmul.msk.bf16.gmra.mxu1 %vm2494_vm5, %v17273_v61  ;;  %v8863_v8 = vadd.f32 %v8835_v32, %v8659_v51  ;;  %9015 = vst.msk [vmem:[#allocation3 + $0xc0] sm:$0xf] %vm1884_vm3, %v8979_v25  ;;  %9185 = vrot.lane.b32.xlu1 %v9088_v41, %s14217_s23  ;;  %v14096_v32 = vld [vmem:[%s17761_s1 + $0x3a0] sm:$0xff] }
 0x747   : > { %10116 = vmatpush.bf16.msra.mxu0 %v14096_v32  ;;  %v14171_v32 = vld [vmem:[%s17761_s1 + $0x3c8] sm:$0xff] }
 0x748   : > { %v8879_v7 = vadd.f32 %v17176_v4, %v8863_v8  ;;  %v14102_v8 = vld [vmem:[%s17761_s1 + $0x3d0] sm:$0xff] }
 0x749   : > { %9651 = vmatmul.bf16.gmra.mxu0 %v13059_v12  ;;  %v8660_v19 = vpop.f32.mrf.mxu2  ;;  %10167 = vmatpush.bf16.msra.mxu1 %v14102_v8 }
 0x74a   : > { %v8895_v16 = vmax.f32 %v8879_v7, 0.0 }
 0x74b   : > { %v8837_v47 = vpop.f32.mrf.mxu3  ;;  %v8567_v15 = vpop.f32.mrf.mxu1  ;;  %v8944_v5 = vld [vmem:[#allocation2 + $0x18f] sm:$0xff] }
 0x74c   : > { %v9303_v20 = vld [vmem:[#allocation2 + $0x189] sm:$0xff]  ;;  %v9304_v18 = vld [vmem:[#allocation2 + $0x191] sm:$0xff]  ;;  %8911 = vst [vmem:[#allocation2 + $0x1a8] sm:$0xff] %v8895_v16  ;;  %v8661_v62 = vadd.f32 %v8660_v19, %v8567_v15  ;;  %v8980_v54 = vpack.c.bf16 %v8944_v5, %v8944_v5  ;;  %v9089_v35 = vpack.c.bf16 %v8895_v16, %v8895_v16 }
 0x74d   : > { %v9339_v52 = vpack.c.bf16 %v9303_v20, %v9303_v20  ;;  %v9340_v21 = vpack.c.bf16 %v9304_v18, %v9304_v18 }
 0x74e   : > { %v8864_v9 = vadd.f32 %v8837_v47, %v8661_v62  ;;  %9016 = vst.msk [vmem:[#allocation3 + $0xc8] sm:$0xf] %vm1884_vm3, %v8980_v54  ;;  %9187 = vrot.lane.b32.xlu2 %v9089_v35, %s14217_s23  ;;  %v14064_v54 = vld [vmem:[#allocation3 + $0x84] sm:$0xf] }
 0x74f   : > { %v9164_v53 = vpop.permute.xlu2 %9163  ;;  %9375 = vst.msk [vmem:[#allocation3 + $0xc4] sm:$0xf] %vm1884_vm3, %v9339_v52  ;;  %v13084_v52 = vld [vmem:[#allocation3 + $0x88] sm:$0xf0] }
 0x750   : > { %9257 = vst.msk [vmem:[#allocation3 + $0x70] sm:$0xf] %vm2137_vm6, %v9164_v53  ;;  %v8880_v26 = vadd.f32 %v17176_v4, %v8864_v9  ;;  %v13087_v13 = vor.u32 %v14064_v54, %v13084_v52  ;;  %v14133_v52 = vld [vmem:[%s17761_s1 + $0x328] sm:$0xff] }
 0x751   : > { %13204 = vmatmul.msk.bf16.gmra.mxu3 %vm2494_vm5, %v17253_v3  ;;  %9838 = vmatmul.bf16.gmra.mxu2 %v13059_v12  ;;  %v8663_v58 = vpop.f32.mrf.mxu2  ;;  %9376 = vst.msk [vmem:[#allocation3 + $0xcc] sm:$0xf] %vm1884_vm3, %v9340_v21  ;;  %v14095_v21 = vld [vmem:[%s17761_s1 + $0x398] sm:$0xff] }
 0x752   : > { %v8896_v49 = vmax.f32 %v8880_v26, 0.0  ;;  %10117 = vmatpush.bf16.msra.mxu0 %v14095_v21  ;;  %10729 = vmatpush.bf16.msrb.mxu1 %v14133_v52 }
 0x753   : > { %v8840_v3 = vpop.f32.mrf.mxu3  ;;  %v8570_v31 = vpop.f32.mrf.mxu1  ;;  %v8945_v10 = vld [vmem:[#allocation2 + $0x1a7] sm:$0xff] }
 0x754   : > { %8912 = vst [vmem:[#allocation2 + $0x1b0] sm:$0xff] %v8896_v49  ;;  %v8664_v50 = vadd.f32 %v8663_v58, %v8570_v31  ;;  %v8981_v1 = vpack.c.bf16 %v8945_v10, %v8945_v10  ;;  %v9090_v27 = vpack.c.bf16 %v8896_v49, %v8896_v49  ;;  %v14136_v58 = vld [vmem:[%s17761_s1 + $0x330] sm:$0xff] }
 0x755   : > { %10501 = vmatpush.bf16.msra.mxu2 %v14136_v58 }
 0x756   : > { %13141 = vmatmul.msk.bf16.gmra.mxu1 %vm2494_vm5, %v17300_v23  ;;  %v8865_v56 = vadd.f32 %v8840_v3, %v8664_v50  ;;  %9017 = vst.msk [vmem:[#allocation3 + $0xd0] sm:$0xf] %vm1884_vm3, %v8981_v1  ;;  %9189 = vrot.lane.b32.xlu0 %v9090_v27, %s14217_s23 }
 0x757   : > { %v9160_v24 = vpop.permute.xlu0 %9159  ;;  %v13074_v31 = vld [vmem:[#allocation3 + $0x70] sm:$0xf] }
 0x758   : > { %9255 = vst.msk [vmem:[#allocation3 + $0x60] sm:$0xf] %vm2137_vm6, %v9160_v24  ;;  %v8881_v39 = vadd.f32 %v17176_v4, %v8865_v56 }
 0x759   : > { %v8665_v37 = vpop.f32.mrf.mxu2  ;;  %10982 = vmatpush.bf16.msrb.mxu2 %v14171_v32 }
 0x75a   : > { %v8897_v29 = vmax.f32 %v8881_v39, 0.0 }
 0x75b   : > { %v8572_v57 = vpop.f32.mrf.mxu1  ;;  %v8946_v43 = vld [vmem:[#allocation2 + $0x1af] sm:$0xff]  ;;  %v8842_v34 = vpop.f32.mrf.mxu3 }
 0x75c   : > { %v9305_v48 = vld [vmem:[#allocation2 + $0x1a9] sm:$0xff]  ;;  %v9306_v40 = vld [vmem:[#allocation2 + $0x1b1] sm:$0xff]  ;;  %8913 = vst [vmem:[#allocation2 + $0x1c8] sm:$0xff] %v8897_v29  ;;  %v8666_v2 = vadd.f32 %v8665_v37, %v8572_v57  ;;  %v8982_v36 = vpack.c.bf16 %v8946_v43, %v8946_v43  ;;  %v9091_v42 = vpack.c.bf16 %v8897_v29, %v8897_v29 }
 0x75d   : > { %v9341_v60 = vpack.c.bf16 %v9305_v48, %v9305_v48  ;;  %v9342_v11 = vpack.c.bf16 %v9306_v40, %v9306_v40  ;;  %v14094_v37 = vld [vmem:[%s17761_s1 + $0x390] sm:$0xff] }
 0x75e   : > { %v8866_v28 = vadd.f32 %v8842_v34, %v8666_v2  ;;  %9018 = vst.msk [vmem:[#allocation3 + $0xd8] sm:$0xf] %vm1884_vm3, %v8982_v36  ;;  %9191 = vrot.lane.b32.xlu1 %v9091_v42, %s14217_s23  ;;  %10118 = vmatpush.bf16.msra.mxu0 %v14094_v37  ;;  %v14078_v42 = vld [vmem:[#allocation3 + $0x24] sm:$0xf] }
 0x75f   : > { %v9162_v46 = vpop.permute.xlu1 %9161  ;;  %9377 = vst.msk [vmem:[#allocation3 + $0xd4] sm:$0xf] %vm1884_vm3, %v9341_v60  ;;  %v13066_v25 = vld [vmem:[#allocation3 + $0x60] sm:$0xf]  ;;  %v13212_v60 = vld [vmem:[#allocation3 + $0x28] sm:$0xf0] }
 0x760   : > { %9256 = vst.msk [vmem:[#allocation3 + $0x68] sm:$0xf] %vm2137_vm6, %v9162_v46  ;;  %v8882_v44 = vadd.f32 %v17176_v4, %v8866_v28 }
 0x761   : > { %13205 = vmatmul.msk.bf16.gmra.mxu3 %vm2494_vm5, %v17273_v61  ;;  %v8668_v63 = vpop.f32.mrf.mxu2  ;;  %9378 = vst.msk [vmem:[#allocation3 + $0xdc] sm:$0xf] %vm1884_vm3, %v9342_v11  ;;  %v17322_v61 = vor.u32 %v14050_v17, %v13076_v30  ;;  %v13215_v30 = vor.u32 %v14078_v42, %v13212_v60 }
 0x762   : > { %v8898_v22 = vmax.f32 %v8882_v44, 0.0 }
 0x763   : > { %v8575_v0 = vpop.f32.mrf.mxu1  ;;  %v8947_v6 = vld [vmem:[#allocation2 + $0x1c7] sm:$0xff] }
 0x764   : > { %8914 = vst [vmem:[#allocation2 + $0x1d0] sm:$0xff] %v8898_v22  ;;  %v8983_v12 = vpack.c.bf16 %v8947_v6, %v8947_v6  ;;  %v9092_v51 = vpack.c.bf16 %v8898_v22, %v8898_v22  ;;  %v8669_v35 = vadd.f32 %v8668_v63, %v8575_v0  ;;  %v14175_v63 = vld [vmem:[%s17761_s1 + $0x3e8] sm:$0xff] }
 0x765   : > { %11035 = vmatpush.bf16.msrb.mxu3 %v14175_v63 }
 0x766   : > { %13142 = vmatmul.msk.bf16.gmra.mxu1 %vm2494_vm5, %v17322_v61  ;;  %9019 = vst.msk [vmem:[#allocation3 + $0xe0] sm:$0xf] %vm1884_vm3, %v8983_v12  ;;  %9193 = vrot.lane.b32.xlu2 %v9092_v51, %s14217_s23 }
 0x767   : > { %v14049_v41 = vld [vmem:[#allocation3 + $0x64] sm:$0xf0] }
 0x768   : > { %v13067_v45 = vor.u32 %v14049_v41, %v13066_v25 }
 0x769   : > { %v8670_v55 = vpop.f32.mrf.mxu2 }
 0x76a   : > { %9656 = vmatmul.bf16.gmra.mxu0 %v13067_v45  ;;  %9843 = vmatmul.bf16.gmra.mxu2 %v13067_v45 }
 0x76b   : > { %v8577_v7 = vpop.f32.mrf.mxu1  ;;  %v8948_v19 = vld [vmem:[#allocation2 + $0x1cf] sm:$0xff] }
 0x76c   : > { %v9307_v47 = vld [vmem:[#allocation2 + $0x1c9] sm:$0xff]  ;;  %v9308_v16 = vld [vmem:[#allocation2 + $0x1d1] sm:$0xff]  ;;  %v8984_v15 = vpack.c.bf16 %v8948_v19, %v8948_v19  ;;  %v8671_v10 = vadd.f32 %v8670_v55, %v8577_v7 }
 0x76d   : > { %v9343_v5 = vpack.c.bf16 %v9307_v47, %v9307_v47  ;;  %v9170_v20 = vpop.permute.xlu2 %9169  ;;  %v9344_v62 = vpack.c.bf16 %v9308_v16, %v9308_v16 }
 0x76e   : > { %9020 = vst.msk [vmem:[#allocation3 + $0xe8] sm:$0xf] %vm1884_vm3, %v8984_v15  ;;  %v14108_v15 = vld [vmem:[#allocation3 + $0x94] sm:$0xf] }
 0x76f   : > { %v9166_v18 = vpop.permute.xlu0 %9165  ;;  %9260 = vst.msk [vmem:[#allocation3 + $0x88] sm:$0xf] %vm2137_vm6, %v9170_v20 }
 0x770   : > { %9258 = vst.msk [vmem:[#allocation3 + $0x78] sm:$0xf] %vm2137_vm6, %v9166_v18 }
 0x771   : > { %13206 = vmatmul.msk.bf16.gmra.mxu3 %vm2494_vm5, %v17300_v23  ;;  %v8673_v53 = vpop.f32.mrf.mxu2  ;;  %9379 = vst.msk [vmem:[#allocation3 + $0xe4] sm:$0xf] %vm1884_vm3, %v9343_v5  ;;  %v13332_v5 = vld [vmem:[#allocation3 + $0x98] sm:$0xf0] }
 0x772   : > { %9380 = vst.msk [vmem:[#allocation3 + $0xec] sm:$0xf] %vm1884_vm3, %v9344_v62 }
 0x773   : > { %v8580_v38 = vpop.f32.mrf.mxu1 }
 0x774   : > { %v8845_v9 = vpop.f32.mrf.mxu3  ;;  %v8674_v40 = vadd.f32 %v8673_v53, %v8580_v38  ;;  %v14080_v38 = vld [vmem:[#allocation3 + $0x34] sm:$0xf] }
 0x775   : > { %v8867_v26 = vadd.f32 %v8845_v9, %v8669_v35  ;;  %v14129_v35 = vld [vmem:[%s17761_s1 + $0x308] sm:$0xff]  ;;  %v17383_v9 = vor.u32 %v14108_v15, %v13332_v5 }
 0x776   : > { %13143 = vmatmul.msk.bf16.gmra.mxu1 %vm2494_vm5, %v13087_v13  ;;  %v14065_v51 = vld [vmem:[#allocation3 + $0x84] sm:$0xf0]  ;;  %10676 = vmatpush.bf16.msrb.mxu0 %v14129_v35  ;;  %v13220_v13 = vld [vmem:[#allocation3 + $0x38] sm:$0xf0] }
 0x777   : > { %v8883_v49 = vadd.f32 %v17176_v4, %v8867_v26  ;;  %v14051_v23 = vld [vmem:[#allocation3 + $0x74] sm:$0xf0] }
 0x778   : > { %v13075_v1 = vor.u32 %v14051_v23, %v13074_v31  ;;  %v9176_v39 = vpop.permute.xlu2 %9175 }
 0x779   : > { %v8899_v3 = vmax.f32 %v8883_v49, 0.0  ;;  %v8675_v24 = vpop.f32.mrf.mxu2  ;;  %9263 = vst.msk [vmem:[#allocation3 + $0xa0] sm:$0xf] %vm2137_vm6, %v9176_v39  ;;  %v14170_v39 = vld [vmem:[%s17761_s1 + $0x3c0] sm:$0xff] }
 0x77a   : > { %9661 = vmatmul.bf16.gmra.mxu0 %v13075_v1  ;;  %9848 = vmatmul.bf16.gmra.mxu2 %v13075_v1 }
 0x77b   : > { %8915 = vst [vmem:[#allocation2 + $0x1e8] sm:$0xff] %v8899_v3  ;;  %v9093_v50 = vpack.c.bf16 %v8899_v3, %v8899_v3  ;;  %v8582_v59 = vpop.f32.mrf.mxu1  ;;  %10983 = vmatpush.bf16.msrb.mxu2 %v14170_v39 }
 0x77c   : > { %v8847_v27 = vpop.f32.mrf.mxu3  ;;  %v8676_v25 = vadd.f32 %v8675_v24, %v8582_v59 }
 0x77d   : > { %v8868_v56 = vadd.f32 %v8847_v27, %v8671_v10  ;;  %9195 = vrot.lane.b32.xlu0 %v9093_v50, %s14217_s23  ;;  %v9168_v43 = vpop.permute.xlu1 %9167 }
 0x77e   : > { %9259 = vst.msk [vmem:[#allocation3 + $0x80] sm:$0xf] %vm2137_vm6, %v9168_v43  ;;  %v14079_v43 = vld [vmem:[#allocation3 + $0x24] sm:$0xf0] }
 0x77f   : > { %v8884_v29 = vadd.f32 %v17176_v4, %v8868_v56  ;;  %v13223_v56 = vor.u32 %v14080_v38, %v13220_v13 }
 0x780   : > { %v9172_v46 = vpop.permute.xlu0 %9171 }
 0x781   : > { %v8900_v57 = vmax.f32 %v8884_v29, 0.0  ;;  %13207 = vmatmul.msk.bf16.gmra.mxu3 %vm2494_vm5, %v17322_v61  ;;  %9261 = vst.msk [vmem:[#allocation3 + $0x90] sm:$0xf] %vm2137_vm6, %v9172_v46  ;;  %v13210_v29 = vld [vmem:[#allocation3 + $0x20] sm:$0xf] }
 0x782   : > { %v8949_v48 = vld [vmem:[#allocation2 + $0x1e7] sm:$0xff] }
 0x783   : > { %8916 = vst [vmem:[#allocation2 + $0x1f0] sm:$0xff] %v8900_v57  ;;  %v8985_v2 = vpack.c.bf16 %v8949_v48, %v8949_v48  ;;  %v9094_v36 = vpack.c.bf16 %v8900_v57, %v8900_v57  ;;  %v9681_v44 = vpop.f32.mrf.mxu1 }
 0x784   : > { %v8850_v34 = vpop.f32.mrf.mxu3  ;;  %v9814_v11 = vpop.f32.mrf.mxu2 }
 0x785   : > { %v8869_v28 = vadd.f32 %v8850_v34, %v8674_v40  ;;  %9021 = vst.msk [vmem:[#allocation3 + $0xf0] sm:$0xf] %vm1884_vm3, %v8985_v2  ;;  %9197 = vrot.lane.b32.xlu1 %v9094_v36, %s14217_s23  ;;  %v13082_v12 = vld [vmem:[#allocation3 + $0x80] sm:$0xf]  ;;  %v13211_v40 = vor.u32 %v14079_v43, %v13210_v29 }
 0x786   : > { %v9632_v17 = vpop.f32.mrf.mxu0  ;;  %13320 = vmatmul.msk.bf16.vlgmr.msra.gmra.mxu1 %vm2494_vm5, %v13215_v30  ;;  %v13083_v45 = vor.u32 %v14065_v51, %v13082_v12  ;;  %v13228_v12 = vld [vmem:[#allocation3 + $0x48] sm:$0xf0]  ;;  %v13338_v51 = vld [vmem:[#allocation3 + $0xa0] sm:$0xf] }
 0x787   : > { %v8885_v22 = vadd.f32 %v17176_v4, %v8869_v28  ;;  %v9682_v0 = vadd.f32 %v9681_v44, %v9632_v17  ;;  %v14110_v17 = vld [vmem:[#allocation3 + $0xa4] sm:$0xf]  ;;  %v13340_v44 = vld [vmem:[#allocation3 + $0xa8] sm:$0xf0] }
 0x788   : > { %v9174_v7 = vpop.permute.xlu1 %9173  ;;  %v13330_v31 = vld [vmem:[#allocation3 + $0x90] sm:$0xf] }
 0x789   : > { %v8901_v61 = vmax.f32 %v8885_v22, 0.0  ;;  %v9815_v6 = vadd.f32 %v9814_v11, %v9682_v0  ;;  %9262 = vst.msk [vmem:[#allocation3 + $0x98] sm:$0xf] %vm2137_vm6, %v9174_v7  ;;  %v14128_v0 = vld [vmem:[%s17761_s1 + $0x300] sm:$0xff] }
 0x78a   : > { %v8950_v41 = vld [vmem:[#allocation2 + $0x1ef] sm:$0xff]  ;;  %9666 = vmatmul.bf16.gmra.mxu0 %v13083_v45 }
 0x78b   : > { %v9309_v14 = vld [vmem:[#allocation2 + $0x1e9] sm:$0xff]  ;;  %v9310_v33 = vld [vmem:[#allocation2 + $0x1f1] sm:$0xff]  ;;  %8917 = vst [vmem:[#allocation2 + $0x208] sm:$0xff] %v8901_v61  ;;  %v8986_v8 = vpack.c.bf16 %v8950_v41, %v8950_v41  ;;  %v9095_v55 = vpack.c.bf16 %v8901_v61, %v8901_v61  ;;  %v9683_v54 = vpop.f32.mrf.mxu1  ;;  %v17408_v61 = vor.u32 %v14110_v17, %v13340_v44  ;;  %10677 = vmatpush.bf16.msrb.mxu0 %v14128_v0  ;;  %v14114_v44 = vld [vmem:[#allocation3 + $0xc4] sm:$0xf] }
 0x78c   : > { %v9345_v19 = vpack.c.bf16 %v9309_v14, %v9309_v14  ;;  %v9346_v47 = vpack.c.bf16 %v9310_v33, %v9310_v33  ;;  %v8852_v16 = vpop.f32.mrf.mxu3  ;;  %v9816_v20 = vpop.f32.mrf.mxu2  ;;  %v14126_v0 = vld [vmem:[%s17761_s1 + $0x2f0] sm:$0xff] }
 0x78d   : > { %v8870_v18 = vadd.f32 %v8852_v16, %v8676_v25  ;;  %9022 = vst.msk [vmem:[#allocation3 + $0xf8] sm:$0xf] %vm1884_vm3, %v8986_v8  ;;  %9199 = vrot.lane.b32.xlu2 %v9095_v55, %s14217_s23  ;;  %v14174_v16 = vld [vmem:[%s17761_s1 + $0x3e0] sm:$0xff] }
 0x78e   : > { %v9634_v62 = vpop.f32.mrf.mxu0  ;;  %9381 = vst.msk [vmem:[#allocation3 + $0xf4] sm:$0xf] %vm1884_vm3, %v9345_v19  ;;  %11036 = vmatpush.bf16.msrb.mxu3 %v14174_v16  ;;  %v14173_v16 = vld [vmem:[%s17761_s1 + $0x3d8] sm:$0xff] }
 0x78f   : > { %v8886_v21 = vadd.f32 %v17176_v4, %v8870_v18  ;;  %9382 = vst.msk [vmem:[#allocation3 + $0xfc] sm:$0xf] %vm1884_vm3, %v9346_v47  ;;  %v9684_v59 = vadd.f32 %v9683_v54, %v9634_v62  ;;  %v14169_v47 = vld [vmem:[%s17761_s1 + $0x3b8] sm:$0xff] }
 0x790   : > { %v9182_v3 = vpop.permute.xlu2 %9181  ;;  %v14109_v23 = vld [vmem:[#allocation3 + $0x94] sm:$0xf0]  ;;  %10984 = vmatpush.bf16.msrb.mxu2 %v14169_v47  ;;  %v14167_v47 = vld [vmem:[%s17761_s1 + $0x3a8] sm:$0xff] }
 0x791   : > { %v8902_v53 = vmax.f32 %v8886_v21, 0.0  ;;  %13440 = vmatmul.msk.bf16.vlgmr.msra.gmra.mxu3 %vm2494_vm5, %v17383_v9  ;;  %9266 = vst.msk [vmem:[#allocation3 + $0xb8] sm:$0xf] %vm2137_vm6, %v9182_v3  ;;  %v17389_v50 = vor.u32 %v14109_v23, %v13330_v31  ;;  %v9817_v42 = vadd.f32 %v9816_v20, %v9684_v59  ;;  %v13218_v20 = vld [vmem:[#allocation3 + $0x30] sm:$0xf]  ;;  %v14127_v3 = vld [vmem:[%s17761_s1 + $0x2f8] sm:$0xff] }
 0x792   : > { %v8951_v26 = vld [vmem:[#allocation2 + $0x207] sm:$0xff]  ;;  %v14081_v18 = vld [vmem:[#allocation3 + $0x34] sm:$0xf0]  ;;  %v14112_v21 = vld [vmem:[#allocation3 + $0xb4] sm:$0xf]  ;;  %10678 = vmatpush.bf16.msrb.mxu0 %v14127_v3  ;;  %11037 = vmatpush.bf16.msrb.mxu3 %v14173_v16 }
 0x793   : > { %8918 = vst [vmem:[#allocation2 + $0x210] sm:$0xff] %v8902_v53  ;;  %v8987_v58 = vpack.c.bf16 %v8951_v26, %v8951_v26  ;;  %v9096_v49 = vpack.c.bf16 %v8902_v53, %v8902_v53  ;;  %v9686_v24 = vpop.f32.mrf.mxu1  ;;  %10502 = vmatmul.bf16.vlgmr.msra.gmra.mxu2 %v17389_v50  ;;  %v13219_v35 = vor.u32 %v14081_v18, %v13218_v20  ;;  %v13348_v53 = vld [vmem:[#allocation3 + $0xb8] sm:$0xf0]  ;;  %v14132_v31 = vld [vmem:[%s17761_s1 + $0x320] sm:$0xff]  ;;  %v13260_v16 = vld [vmem:[#allocation3 + $0x88] sm:$0xf0] }
 0x794   : > { %v9863_v4 = vpop.f32.mrf.mxu3  ;;  %v9819_v10 = vpop.f32.mrf.mxu2  ;;  %v17435_v23 = vor.u32 %v14112_v21, %v13348_v53  ;;  %10730 = vmatpush.bf16.msrb.mxu1 %v14132_v31  ;;  %v14085_v53 = vld [vmem:[#allocation3 + $0x54] sm:$0xf0]  ;;  %v13364_v31 = vld [vmem:[#allocation3 + $0xd8] sm:$0xf0] }
 0x795   : > { %v17391_v1 = vadd.f32 %v9863_v4, %v9815_v6  ;;  %9023 = vst.msk [vmem:[#allocation3 + $0x100] sm:$0xf] %vm1884_vm3, %v8987_v58  ;;  %9201 = vrot.lane.b32.xlu0 %v9096_v49, %s14217_s23  ;;  %v14082_v6 = vld [vmem:[#allocation3 + $0x44] sm:$0xf] }
 0x796   : > { %v9637_v27 = vpop.f32.mrf.mxu0  ;;  %13321 = vmatmul.msk.bf16.gmra.mxu1 %vm2494_vm5, %v13223_v56  ;;  %v13231_v19 = vor.u32 %v14082_v6, %v13228_v12  ;;  %10679 = vmatpush.bf16.msrb.mxu0 %v14126_v0 }
 0x797   : > { %v9687_v37 = vadd.f32 %v9686_v24, %v9637_v27  ;;  %v13236_v27 = vld [vmem:[#allocation3 + $0x58] sm:$0xf0] }
 0x798   : > { %v9178_v34 = vpop.permute.xlu0 %9177  ;;  %v14113_v24 = vld [vmem:[#allocation3 + $0xb4] sm:$0xf0] }
 0x799   : > { %v9820_v57 = vadd.f32 %v9819_v10, %v9687_v37  ;;  %9264 = vst.msk [vmem:[#allocation3 + $0xa8] sm:$0xf] %vm2137_vm6, %v9178_v34  ;;  %v14084_v10 = vld [vmem:[#allocation3 + $0x54] sm:$0xf]  ;;  %v13226_v34 = vld [vmem:[#allocation3 + $0x40] sm:$0xf] }
 0x79a   : > { %v8952_v48 = vld [vmem:[#allocation2 + $0x20f] sm:$0xff]  ;;  %10119 = vmatmul.bf16.vlgmr.msra.gmra.mxu0 %v13211_v40  ;;  %v13239_v40 = vor.u32 %v14084_v10, %v13236_v27  ;;  %v14131_v10 = vld [vmem:[%s17761_s1 + $0x318] sm:$0xff] }
 0x79b   : > { %v9311_v2 = vld [vmem:[#allocation2 + $0x209] sm:$0xff]  ;;  %v9312_v36 = vld [vmem:[#allocation2 + $0x211] sm:$0xff]  ;;  %v8988_v60 = vpack.c.bf16 %v8952_v48, %v8952_v48  ;;  %v9688_v22 = vpop.f32.mrf.mxu1  ;;  %10731 = vmatpush.bf16.msrb.mxu1 %v14131_v10 }
 0x79c   : > { %v9347_v11 = vpack.c.bf16 %v9311_v2, %v9311_v2  ;;  %v9348_v28 = vpack.c.bf16 %v9312_v36, %v9312_v36  ;;  %v9865_v46 = vpop.f32.mrf.mxu3  ;;  %v9821_v30 = vpop.f32.mrf.mxu2  ;;  %v14120_v10 = vld [vmem:[#allocation3 + $0xf4] sm:$0xf] }
 0x79d   : > { %v17401_v32 = vadd.f32 %v9865_v46, %v9817_v42  ;;  %9024 = vst.msk [vmem:[#allocation3 + $0x108] sm:$0xf] %vm1884_vm3, %v8988_v60  ;;  %v14083_v42 = vld [vmem:[#allocation3 + $0x44] sm:$0xf0] }
 0x79e   : > { %v9639_v63 = vpop.f32.mrf.mxu0  ;;  %9383 = vst.msk [vmem:[#allocation3 + $0x104] sm:$0xf] %vm1884_vm3, %v9347_v11  ;;  %v13227_v46 = vor.u32 %v14083_v42, %v13226_v34  ;;  %v14166_v42 = vld [vmem:[%s17761_s1 + $0x3a0] sm:$0xff] }
 0x79f   : > { %9384 = vst.msk [vmem:[#allocation3 + $0x10c] sm:$0xf] %vm1884_vm3, %v9348_v28  ;;  %v9689_v15 = vadd.f32 %v9688_v22, %v9639_v63 }
 0x7a0   : > { %v14111_v25 = vld [vmem:[#allocation3 + $0xa4] sm:$0xf0]  ;;  %v9180_v8 = vpop.permute.xlu1 %9179 }
 0x7a1   : > { %13441 = vmatmul.msk.bf16.gmra.mxu3 %vm2494_vm5, %v17408_v61  ;;  %v17413_v14 = vor.u32 %v14111_v25, %v13338_v51  ;;  %9265 = vst.msk [vmem:[#allocation3 + $0xb0] sm:$0xf] %vm2137_vm6, %v9180_v8  ;;  %v9822_v54 = vadd.f32 %v9821_v30, %v9689_v15  ;;  %v13356_v30 = vld [vmem:[#allocation3 + $0xc8] sm:$0xf0]  ;;  %v14086_v25 = vld [vmem:[#allocation3 + $0x64] sm:$0xf] }
 0x7a2   : > { %v17455_v51 = vor.u32 %v14114_v44, %v13356_v30  ;;  %v13242_v44 = vld [vmem:[#allocation3 + $0x60] sm:$0xf] }
 0x7a3   : > { %v9691_v7 = vpop.f32.mrf.mxu1  ;;  %10507 = vmatmul.bf16.gmra.mxu2 %v17413_v14 }
 0x7a4   : > { %v9868_v41 = vpop.f32.mrf.mxu3  ;;  %v9824_v45 = vpop.f32.mrf.mxu2 }
 0x7a5   : > { %v17415_v33 = vadd.f32 %v9868_v41, %v9820_v57  ;;  %v14168_v57 = vld [vmem:[%s17761_s1 + $0x3b0] sm:$0xff]  ;;  %v13244_v41 = vld [vmem:[#allocation3 + $0x68] sm:$0xf0] }
 0x7a6   : > { %v9642_v55 = vpop.f32.mrf.mxu0  ;;  %13322 = vmatmul.msk.bf16.gmra.mxu1 %vm2494_vm5, %v13231_v19  ;;  %10985 = vmatpush.bf16.msrb.mxu2 %v14168_v57  ;;  %v13247_v18 = vor.u32 %v14086_v25, %v13244_v41  ;;  %v14124_v25 = vld [vmem:[%s17761_s1 + $0x2e0] sm:$0xff] }
 0x7a7   : > { %v9692_v5 = vadd.f32 %v9691_v7, %v9642_v55 }
 0x7a8   : > { %v9188_v13 = vpop.permute.xlu2 %9187  ;;  %v13346_v4 = vld [vmem:[#allocation3 + $0xb0] sm:$0xf] }
 0x7a9   : > { %v9825_v62 = vadd.f32 %v9824_v45, %v9692_v5  ;;  %9269 = vst.msk [vmem:[#allocation3 + $0xd0] sm:$0xf] %vm2137_vm6, %v9188_v13  ;;  %v17439_v59 = vor.u32 %v14113_v24, %v13346_v4  ;;  %v14116_v13 = vld [vmem:[#allocation3 + $0xd4] sm:$0xf]  ;;  %v14125_v4 = vld [vmem:[%s17761_s1 + $0x2e8] sm:$0xff] }
 0x7aa   : > { %10124 = vmatmul.bf16.gmra.mxu0 %v13219_v35  ;;  %10986 = vmatpush.bf16.msrb.mxu2 %v14167_v47  ;;  %v14090_v47 = vld [vmem:[#allocation3 + $0x84] sm:$0xf] }
 0x7ab   : > { %v9693_v49 = vpop.f32.mrf.mxu1  ;;  %10680 = vmatpush.bf16.msrb.mxu0 %v14125_v4 }
 0x7ac   : > { %v9870_v52 = vpop.f32.mrf.mxu3  ;;  %v9826_v26 = vpop.f32.mrf.mxu2 }
 0x7ad   : > { %v17426_v38 = vadd.f32 %v9870_v52, %v9822_v54  ;;  %v13234_v52 = vld [vmem:[#allocation3 + $0x50] sm:$0xf] }
 0x7ae   : > { %v9644_v58 = vpop.f32.mrf.mxu0  ;;  %10987 = vmatpush.bf16.msrb.mxu2 %v14166_v42 }
 0x7af   : > { %v9694_v2 = vadd.f32 %v9693_v49, %v9644_v58  ;;  %v13235_v49 = vor.u32 %v14085_v53, %v13234_v52  ;;  %10681 = vmatpush.bf16.msrb.mxu0 %v14124_v25  ;;  %v13263_v52 = vor.u32 %v14090_v47, %v13260_v16  ;;  %v14134_v16 = vld [vmem:[#allocation3 + $0x104] sm:$0xf] }
 0x7b0   : > { %v9184_v29 = vpop.permute.xlu0 %9183 }
 0x7b1   : > { %13442 = vmatmul.msk.bf16.gmra.mxu3 %vm2494_vm5, %v17435_v23  ;;  %9267 = vst.msk [vmem:[#allocation3 + $0xc0] sm:$0xf] %vm2137_vm6, %v9184_v29  ;;  %v9827_v11 = vadd.f32 %v9826_v26, %v9694_v2  ;;  %v13252_v29 = vld [vmem:[#allocation3 + $0x78] sm:$0xf0] }
 0x7b3   : > { %v9696_v48 = vpop.f32.mrf.mxu1  ;;  %10512 = vmatmul.bf16.gmra.mxu2 %v17439_v59 }
 0x7b4   : > { %v9873_v56 = vpop.f32.mrf.mxu3  ;;  %v9829_v39 = vpop.f32.mrf.mxu2 }
 0x7b5   : > { %v17441_v37 = vadd.f32 %v9873_v56, %v9825_v62  ;;  %v17481_v56 = vor.u32 %v14116_v13, %v13364_v31 }
 0x7b6   : > { %v9647_v43 = vpop.f32.mrf.mxu0  ;;  %13323 = vmatmul.msk.bf16.gmra.mxu1 %vm2494_vm5, %v13239_v40 }
 0x7b7   : > { %v9697_v36 = vadd.f32 %v9696_v48, %v9647_v43  ;;  %v13362_v43 = vld [vmem:[#allocation3 + $0xd0] sm:$0xf] }
 0x7b8   : > { %v9186_v28 = vpop.permute.xlu1 %9185  ;;  %v13354_v8 = vld [vmem:[#allocation3 + $0xc0] sm:$0xf] }
 0x7b9   : > { %v9830_v60 = vadd.f32 %v9829_v39, %v9697_v36  ;;  %9268 = vst.msk [vmem:[#allocation3 + $0xc8] sm:$0xf] %vm2137_vm6, %v9186_v28  ;;  %v14088_v39 = vld [vmem:[#allocation3 + $0x74] sm:$0xf] }
 0x7ba   : > { %10129 = vmatmul.bf16.gmra.mxu0 %v13227_v46 }
 0x7bb   : > { %v9698_v12 = vpop.f32.mrf.mxu1 }
 0x7bc   : > { %v9875_v17 = vpop.f32.mrf.mxu3  ;;  %v9831_v22 = vpop.f32.mrf.mxu2 }
 0x7bd   : > { %v17450_v63 = vadd.f32 %v9875_v17, %v9827_v11  ;;  %v13255_v11 = vor.u32 %v14088_v39, %v13252_v29  ;;  %v14087_v17 = vld [vmem:[#allocation3 + $0x64] sm:$0xf0]  ;;  %v14123_v29 = vld [vmem:[%s17761_s1 + $0x2d8] sm:$0xff] }
 0x7be   : > { %v9649_v6 = vpop.f32.mrf.mxu0  ;;  %10682 = vmatpush.bf16.msrb.mxu0 %v14123_v29 }
 0x7bf   : > { %v9699_v62 = vadd.f32 %v9698_v12, %v9649_v6  ;;  %v14118_v6 = vld [vmem:[#allocation3 + $0xe4] sm:$0xf]  ;;  %v13372_v12 = vld [vmem:[#allocation3 + $0xe8] sm:$0xf0] }
 0x7c0   : > { %v9194_v45 = vpop.permute.xlu2 %9193  ;;  %v14115_v55 = vld [vmem:[#allocation3 + $0xc4] sm:$0xf0] }
 0x7c1   : > { %13443 = vmatmul.msk.bf16.gmra.mxu3 %vm2494_vm5, %v17455_v51  ;;  %9272 = vst.msk [vmem:[#allocation3 + $0xe8] sm:$0xf] %vm2137_vm6, %v9194_v45  ;;  %v17460_v19 = vor.u32 %v14115_v55, %v13354_v8  ;;  %v9832_v26 = vadd.f32 %v9831_v22, %v9699_v62  ;;  %v13243_v22 = vor.u32 %v14087_v17, %v13242_v44  ;;  %v14165_v62 = vld [vmem:[%s17761_s1 + $0x398] sm:$0xff]  ;;  %v14164_v44 = vld [vmem:[%s17761_s1 + $0x390] sm:$0xff] }
 0x7c2   : > { %v17500_v8 = vor.u32 %v14118_v6, %v13372_v12  ;;  %10988 = vmatpush.bf16.msrb.mxu2 %v14165_v62  ;;  %v13258_v12 = vld [vmem:[#allocation3 + $0x80] sm:$0xf] }
 0x7c3   : > { %v9701_v20 = vpop.f32.mrf.mxu1  ;;  %10517 = vmatmul.bf16.gmra.mxu2 %v17460_v19 }
 0x7c4   : > { %v9878_v7 = vpop.f32.mrf.mxu3  ;;  %v9834_v35 = vpop.f32.mrf.mxu2 }
 0x7c5   : > { %v17468_v15 = vadd.f32 %v9878_v7, %v9830_v60 }
 0x7c6   : > { %v9652_v5 = vpop.f32.mrf.mxu0  ;;  %13324 = vmatmul.msk.bf16.gmra.mxu1 %vm2494_vm5, %v13247_v18  ;;  %10989 = vmatpush.bf16.msrb.mxu2 %v14164_v44 }
 0x7c7   : > { %v9702_v54 = vadd.f32 %v9701_v20, %v9652_v5 }
 0x7c8   : > { %v9190_v58 = vpop.permute.xlu0 %9189  ;;  %v14119_v5 = vld [vmem:[#allocation3 + $0xe4] sm:$0xf0] }
 0x7c9   : > { %v9835_v21 = vadd.f32 %v9834_v35, %v9702_v54  ;;  %9270 = vst.msk [vmem:[#allocation3 + $0xd8] sm:$0xf] %vm2137_vm6, %v9190_v58  ;;  %v14172_v54 = vld [vmem:[%s17761_s1 + $0x3d0] sm:$0xff] }
 0x7ca   : > { %10134 = vmatmul.bf16.gmra.mxu0 %v13235_v49  ;;  %11038 = vmatpush.bf16.msrb.mxu3 %v14172_v54  ;;  %v13250_v49 = vld [vmem:[#allocation3 + $0x70] sm:$0xf] }
 0x7cb   : > { %v9703_v24 = vpop.f32.mrf.mxu1  ;;  %v14122_v54 = vld [vmem:[%s17761_s1 + $0x2d0] sm:$0xff] }
 0x7cc   : > { %v9880_v3 = vpop.f32.mrf.mxu3  ;;  %v9836_v28 = vpop.f32.mrf.mxu2  ;;  %10683 = vmatpush.bf16.msrb.mxu0 %v14122_v54 }
 0x7cd   : > { %v17479_v27 = vadd.f32 %v9880_v3, %v9832_v26  ;;  %v14089_v26 = vld [vmem:[#allocation3 + $0x74] sm:$0xf0] }
 0x7ce   : > { %v9654_v40 = vpop.f32.mrf.mxu0  ;;  %v13251_v31 = vor.u32 %v14089_v26, %v13250_v49 }
 0x7cf   : > { %v9704_v46 = vadd.f32 %v9703_v24, %v9654_v40  ;;  %v13380_v24 = vld [vmem:[#allocation3 + $0xf8] sm:$0xf0] }
 0x7d0   : > { %v9192_v57 = vpop.permute.xlu1 %9191  ;;  %v14117_v48 = vld [vmem:[#allocation3 + $0xd4] sm:$0xf0] }
 0x7d1   : > { %13444 = vmatmul.msk.bf16.gmra.mxu3 %vm2494_vm5, %v17481_v56  ;;  %9271 = vst.msk [vmem:[#allocation3 + $0xe0] sm:$0xf] %vm2137_vm6, %v9192_v57  ;;  %v17486_v36 = vor.u32 %v14117_v48, %v13362_v43  ;;  %v9837_v30 = vadd.f32 %v9836_v28, %v9704_v46  ;;  %v17523_v48 = vor.u32 %v14120_v10, %v13380_v24  ;;  %v13268_v28 = vld [vmem:[#allocation3 + $0x98] sm:$0xf0] }
 0x7d3   : > { %v9706_v34 = vpop.f32.mrf.mxu1  ;;  %10522 = vmatmul.bf16.gmra.mxu2 %v17486_v36 }
 0x7d4   : > { %v9883_v2 = vpop.f32.mrf.mxu3  ;;  %v9839_v55 = vpop.f32.mrf.mxu2 }
 0x7d5   : > { %v17491_v60 = vadd.f32 %v9883_v2, %v9835_v21  ;;  %v14130_v21 = vld [vmem:[%s17761_s1 + $0x310] sm:$0xff] }
 0x7d6   : > { %13325 = vmatmul.msk.bf16.gmra.mxu1 %vm2494_vm5, %v13255_v11  ;;  %v14092_v11 = vld [vmem:[#allocation3 + $0x94] sm:$0xf] }
 0x7d7   : > { %10732 = vmatpush.bf16.msrb.mxu1 %v14130_v21 }
 0x7d8   : > { %v13370_v7 = vld [vmem:[#allocation3 + $0xe0] sm:$0xf] }
 0x7d9   : > { %v17504_v18 = vor.u32 %v14119_v5, %v13370_v7  ;;  %v13388_v5 = vld [vmem:[#allocation3 + $0x108] sm:$0xf0] }
 0x7da   : > { %10139 = vmatmul.bf16.gmra.mxu0 %v13243_v22  ;;  %v13271_v22 = vor.u32 %v14092_v11, %v13268_v28  ;;  %v13391_v26 = vor.u32 %v14134_v16, %v13388_v5  ;;  %v14093_v11 = vld [vmem:[#allocation3 + $0x94] sm:$0xf0] }
 0x7db   : > { %v9708_v45 = vpop.f32.mrf.mxu1 }
 0x7dc   : > { %v9885_v0 = vpop.f32.mrf.mxu3  ;;  %v9841_v3 = vpop.f32.mrf.mxu2 }
 0x7dd   : > { %v17498_v41 = vadd.f32 %v9885_v0, %v9837_v30 }
 0x7e1   : > { %13445 = vmatmul.msk.bf16.gmra.mxu3 %vm2494_vm5, %v17500_v8 }
 0x7e3   : > { %v9711_v35 = vpop.f32.mrf.mxu1  ;;  %10527 = vmatmul.bf16.gmra.mxu2 %v17504_v18 }
 0x7e4   : > { %v9888_v20 = vpop.f32.mrf.mxu3 }
 0x7e6   : > { %13326 = vmatmul.msk.bf16.gmra.mxu1 %vm2494_vm5, %v13263_v52 }
 0x7e7   : > { %v9200_v53 = vpop.permute.xlu2 %9199  ;;  %v9657_v13 = vpop.f32.mrf.mxu0 }
 0x7e8   : > { %9275 = vst.msk [vmem:[#allocation3 + $0x100] sm:$0xf] %vm2137_vm6, %v9200_v53  ;;  %v9707_v58 = vadd.f32 %v9706_v34, %v9657_v13 }
 0x7ea   : > { %v9840_v39 = vadd.f32 %v9839_v55, %v9707_v58  ;;  %10144 = vmatmul.bf16.gmra.mxu0 %v13251_v31  ;;  %v14106_v31 = vld [vmem:[#allocation3 + $0x84] sm:$0xf] }
 0x7eb   : > { %v9713_v57 = vpop.f32.mrf.mxu1 }
 0x7ec   : > { %v9890_v4 = vpop.f32.mrf.mxu3  ;;  %v17521_v43 = vadd.f32 %v9888_v20, %v9840_v39  ;;  %v14205_v20 = vld [vmem:[#allocation2] sm:$0xff] }
 0x7ed   : > { %v9844_v34 = vpop.f32.mrf.mxu2  ;;  %v9097_v62 = vpack.c.bf16 %v14205_v20, %v14205_v20 }
 0x7ef   : > { %v9196_v40 = vpop.permute.xlu0 %9195  ;;  %v9659_v2 = vpop.f32.mrf.mxu0  ;;  %9203 = vrot.lane.b32.xlu1 %v9097_v62, %s14217_s23  ;;  %9205 = vrot.lane.b32.xlu2 %v9097_v62, %s14217_s23 }
 0x7f0   : > { %9273 = vst.msk [vmem:[#allocation3 + $0xf0] sm:$0xf] %vm2137_vm6, %v9196_v40  ;;  %v9709_v42 = vadd.f32 %v9708_v45, %v9659_v2  ;;  %v14091_v45 = vld [vmem:[#allocation3 + $0x84] sm:$0xf0] }
 0x7f1   : > { %13446 = vmatmul.msk.bf16.gmra.mxu3 %vm2494_vm5, %v17523_v48  ;;  %v13259_v7 = vor.u32 %v14091_v45, %v13258_v12 }
 0x7f2   : > { %v9842_v17 = vadd.f32 %v9841_v3, %v9709_v42 }
 0x7f3   : > { %v9716_v30 = vpop.f32.mrf.mxu1 }
 0x7f4   : > { %v9893_v46 = vpop.f32.mrf.mxu3  ;;  %v17531_v0 = vadd.f32 %v9890_v4, %v9842_v17  ;;  %v13452_v4 = vld [vmem:[#allocation3 + $0x88] sm:$0xf0] }
 0x7f5   : > { %v9846_v52 = vpop.f32.mrf.mxu2  ;;  %v13455_v40 = vor.u32 %v14106_v31, %v13452_v4  ;;  %v14107_v31 = vld [vmem:[#allocation3 + $0x84] sm:$0xf0] }
 0x7f6   : > { %13327 = vmatmul.msk.bf16.gmra.mxu1 %vm2494_vm5, %v13271_v22 }
 0x7f7   : > { %v9198_v6 = vpop.permute.xlu1 %9197  ;;  %v9662_v25 = vpop.f32.mrf.mxu0  ;;  %v13378_v13 = vld [vmem:[#allocation3 + $0xf0] sm:$0xf] }
 0x7f8   : > { %9274 = vst.msk [vmem:[#allocation3 + $0xf8] sm:$0xf] %vm2137_vm6, %v9198_v6  ;;  %v9712_v55 = vadd.f32 %v9711_v35, %v9662_v25  ;;  %v14148_v6 = vld [vmem:[#allocation3 + $0xa4] sm:$0xf] }
 0x7fa   : > { %v9845_v21 = vadd.f32 %v9844_v34, %v9712_v55  ;;  %10149 = vmatmul.bf16.gmra.mxu0 %v13259_v7  ;;  %v13386_v55 = vld [vmem:[#allocation3 + $0x100] sm:$0xf] }
 0x7fb   : > { %v9718_v53 = vpop.f32.mrf.mxu1 }
 0x7fc   : > { %v9895_v47 = vpop.f32.mrf.mxu3  ;;  %v17540_v58 = vadd.f32 %v9893_v46, %v9845_v21  ;;  %v13266_v46 = vld [vmem:[#allocation3 + $0x90] sm:$0xf] }
 0x7fd   : > { %v9849_v2 = vpop.f32.mrf.mxu2  ;;  %v13267_v44 = vor.u32 %v14093_v11, %v13266_v46 }
 0x7ff   : > { %v14121_v35 = vld [vmem:[#allocation3 + $0xf4] sm:$0xf0]  ;;  %v9664_v3 = vpop.f32.mrf.mxu0 }
 0x800   : > { %v17542_v49 = vor.u32 %v14121_v35, %v13378_v13  ;;  %v9714_v10 = vadd.f32 %v9713_v57, %v9664_v3  ;;  %v13516_v57 = vld [vmem:[#allocation3 + $0xa8] sm:$0xf0] }
 0x801   : > { %13447 = vmatmul.msk.bf16.gmra.mxu3 %vm2494_vm5, %v13391_v26  ;;  %v13519_v45 = vor.u32 %v14148_v6, %v13516_v57  ;;  %v13450_v26 = vld [vmem:[#allocation3 + $0x80] sm:$0xf] }
 0x802   : > { %10532 = vmatmul.bf16.gmra.mxu2 %v17542_v49  ;;  %v9847_v39 = vadd.f32 %v9846_v52, %v9714_v10  ;;  %v13451_v10 = vor.u32 %v14107_v31, %v13450_v26 }
 0x803   : > { %v10169_v29 = vpop.f32.mrf.mxu1 }
 0x804   : > { %v9898_v24 = vpop.f32.mrf.mxu3  ;;  %v17546_v34 = vadd.f32 %v9895_v47, %v9847_v39  ;;  %v14150_v39 = vld [vmem:[#allocation3 + $0xb4] sm:$0xf] }
 0x805   : > { %v9851_v5 = vpop.f32.mrf.mxu2 }
 0x806   : > { %13504 = vmatmul.msk.bf16.vlgmr.msrb.gmra.mxu1 %vm2494_vm5, %v13455_v40  ;;  %v13524_v40 = vld [vmem:[#allocation3 + $0xb8] sm:$0xf0] }
 0x807   : > { %v9202_v42 = vpop.permute.xlu0 %9201  ;;  %v9667_v28 = vpop.f32.mrf.mxu0 }
 0x808   : > { %9276 = vst.msk [vmem:[#allocation3 + $0x108] sm:$0xf] %vm2137_vm6, %v9202_v42  ;;  %v9717_v17 = vadd.f32 %v9716_v30, %v9667_v28  ;;  %v13514_v28 = vld [vmem:[#allocation3 + $0xa0] sm:$0xf] }
 0x80a   : > { %v9850_v12 = vadd.f32 %v9849_v2, %v9717_v17  ;;  %10154 = vmatmul.bf16.gmra.mxu0 %v13267_v44 }
 0x80b   : > { %v10171_v25 = vpop.f32.mrf.mxu1 }
 0x80c   : > { %v9900_v22 = vpop.f32.mrf.mxu3  ;;  %v17550_v47 = vadd.f32 %v9898_v24, %v9850_v12 }
 0x80f   : > { %v14135_v7 = vld [vmem:[#allocation3 + $0x104] sm:$0xf0]  ;;  %v9669_v20 = vpop.f32.mrf.mxu0 }
 0x810   : > { %v13387_v16 = vor.u32 %v14135_v7, %v13386_v55  ;;  %v9719_v62 = vadd.f32 %v9718_v53, %v9669_v20  ;;  %v17562_v53 = vld [vmem:[%s17762_s2 + $0x5] ss:$0 sm:$0xff] }
 0x811   : > { %13624 = vmatmul.msk.bf16.vlgmr.msrb.gmra.mxu3 %vm2494_vm5, %v13519_v45 }
 0x812   : > { %10537 = vmatmul.bf16.gmra.mxu2 %v13387_v16  ;;  %v9852_v54 = vadd.f32 %v9851_v5, %v9719_v62  ;;  %v14152_v62 = vld [vmem:[#allocation3 + $0xc4] sm:$0xf] }
 0x813   : > { %v10174_v52 = vpop.f32.mrf.mxu1 }
 0x814   : > { %v10552_v30 = vpop.f32.mrf.mxu3  ;;  %v17553_v21 = vadd.f32 %v9900_v22, %v9852_v54 }
 0x816   : > { %13505 = vmatmul.msk.bf16.gmra.mxu1 %vm2494_vm5, %v17383_v9  ;;  %v10503_v13 = vpop.f32.mrf.mxu2  ;;  %v14149_v9 = vld [vmem:[#allocation3 + $0xa4] sm:$0xf0] }
 0x817   : > { %v17557_v35 = vadd.f32 %v10552_v30, %v10503_v13  ;;  %v10120_v3 = vpop.f32.mrf.mxu0  ;;  %v13515_v46 = vor.u32 %v14149_v9, %v13514_v28  ;;  %v14151_v13 = vld [vmem:[#allocation3 + $0xb4] sm:$0xf0]  ;;  %v14154_v28 = vld [vmem:[#allocation3 + $0xd4] sm:$0xf] }
 0x818   : > { %v10170_v4 = vadd.f32 %v10169_v29, %v10120_v3  ;;  %v13527_v29 = vor.u32 %v14150_v39, %v13524_v40 }
 0x81a   : > { %v10209_v2 = vadd.f32 %v10170_v4, %v17391_v1  ;;  %10684 = vmatmul.bf16.vlgmr.msrb.gmra.mxu0 %v13451_v10 }
 0x81b   : > { %v10176_v42 = vpop.f32.mrf.mxu1 }
 0x81c   : > { %v10554_v24 = vpop.f32.mrf.mxu3  ;;  %v10228_v11 = vadd.f32 %v17562_v53, %v10209_v2 }
 0x81e   : > { %10244 = vst.msk [vmem:[%s17570_s26] sm:$0xff] %vm5170_vm11, %v10228_v11  ;;  %v10505_v1 = vpop.f32.mrf.mxu2 }
 0x81f   : > { %v17576_v17 = vadd.f32 %v10554_v24, %v10505_v1  ;;  %v10122_v44 = vpop.f32.mrf.mxu0 }
 0x820   : > { %v10172_v22 = vadd.f32 %v10171_v25, %v10122_v44  ;;  %v13532_v25 = vld [vmem:[#allocation3 + $0xc8] sm:$0xf0] }
 0x821   : > { %13625 = vmatmul.msk.bf16.gmra.mxu3 %vm2494_vm5, %v13527_v29  ;;  %v13535_v26 = vor.u32 %v14152_v62, %v13532_v25 }
 0x822   : > { %10990 = vmatmul.bf16.vlgmr.msrb.gmra.mxu2 %v13515_v46  ;;  %v10210_v57 = vadd.f32 %v10172_v22, %v17401_v32  ;;  %v13522_v32 = vld [vmem:[#allocation3 + $0xb0] sm:$0xf]  ;;  %v13530_v22 = vld [vmem:[#allocation3 + $0xc0] sm:$0xf] }
 0x823   : > { %v10179_v12 = vpop.f32.mrf.mxu1  ;;  %v13523_v3 = vor.u32 %v14151_v13, %v13522_v32 }
 0x824   : > { %v10557_v6 = vpop.f32.mrf.mxu3  ;;  %v10229_v45 = vadd.f32 %v17562_v53, %v10210_v57 }
 0x826   : > { %13506 = vmatmul.msk.bf16.gmra.mxu1 %vm2494_vm5, %v17408_v61  ;;  %10245 = vst.msk [vmem:[%s17570_s26 + $0x8] sm:$0xff] %vm5170_vm11, %v10229_v45  ;;  %v10508_v55 = vpop.f32.mrf.mxu2 }
 0x827   : > { %v17584_v7 = vadd.f32 %v10557_v6, %v10508_v55  ;;  %v10125_v16 = vpop.f32.mrf.mxu0 }
 0x828   : > { %v10175_v5 = vadd.f32 %v10174_v52, %v10125_v16 }
 0x82a   : > { %v10211_v30 = vadd.f32 %v10175_v5, %v17415_v33  ;;  %10689 = vmatmul.bf16.gmra.mxu0 %v17389_v50 }
 0x82b   : > { %v10181_v54 = vpop.f32.mrf.mxu1 }
 0x82c   : > { %v10559_v20 = vpop.f32.mrf.mxu3  ;;  %v10230_v61 = vadd.f32 %v17562_v53, %v10211_v30 }
 0x82e   : > { %10246 = vst.msk [vmem:[%s17570_s26 + $0x10] sm:$0xff] %vm5170_vm11, %v10230_v61  ;;  %v10510_v52 = vpop.f32.mrf.mxu2 }
 0x82f   : > { %v17592_v31 = vadd.f32 %v10559_v20, %v10510_v52  ;;  %v10127_v4 = vpop.f32.mrf.mxu0  ;;  %v13538_v52 = vld [vmem:[#allocation3 + $0xd0] sm:$0xf] }
 0x830   : > { %v10177_v33 = vadd.f32 %v10176_v42, %v10127_v4  ;;  %v13540_v42 = vld [vmem:[#allocation3 + $0xd8] sm:$0xf0] }
 0x831   : > { %13626 = vmatmul.msk.bf16.gmra.mxu3 %vm2494_vm5, %v13535_v26  ;;  %v13543_v44 = vor.u32 %v14154_v28, %v13540_v42  ;;  %v14156_v26 = vld [vmem:[#allocation3 + $0xe4] sm:$0xf] }
 0x832   : > { %10995 = vmatmul.bf16.gmra.mxu2 %v13523_v3  ;;  %v10212_v50 = vadd.f32 %v10177_v33, %v17426_v38  ;;  %v14153_v38 = vld [vmem:[#allocation3 + $0xc4] sm:$0xf0] }
 0x833   : > { %v10184_v24 = vpop.f32.mrf.mxu1  ;;  %v13531_v6 = vor.u32 %v14153_v38, %v13530_v22  ;;  %v13556_v38 = vld [vmem:[#allocation3 + $0xf8] sm:$0xf0]  ;;  %v14157_v22 = vld [vmem:[#allocation3 + $0xe4] sm:$0xf0] }
 0x834   : > { %v10562_v10 = vpop.f32.mrf.mxu3  ;;  %v10231_v39 = vadd.f32 %v17562_v53, %v10212_v50 }
 0x836   : > { %13507 = vmatmul.msk.bf16.gmra.mxu1 %vm2494_vm5, %v17435_v23  ;;  %10247 = vst.msk [vmem:[%s17570_s26 + $0x18] sm:$0xff] %vm5170_vm11, %v10231_v39  ;;  %v10513_v40 = vpop.f32.mrf.mxu2 }
 0x837   : > { %v17600_v2 = vadd.f32 %v10562_v10, %v10513_v40  ;;  %v10130_v9 = vpop.f32.mrf.mxu0 }
 0x838   : > { %v10180_v29 = vadd.f32 %v10179_v12, %v10130_v9 }
 0x83a   : > { %v10213_v46 = vadd.f32 %v10180_v29, %v17441_v37  ;;  %10694 = vmatmul.bf16.gmra.mxu0 %v17413_v14 }
 0x83b   : > { %v10186_v1 = vpop.f32.mrf.mxu1 }
 0x83c   : > { %v10564_v11 = vpop.f32.mrf.mxu3  ;;  %v10232_v23 = vadd.f32 %v17562_v53, %v10213_v46  ;;  %v14158_v46 = vld [vmem:[#allocation3 + $0xf4] sm:$0xf] }
 0x83e   : > { %10248 = vst.msk [vmem:[%s17570_s26 + $0x20] sm:$0xff] %vm5170_vm11, %v10232_v23  ;;  %v10515_v57 = vpop.f32.mrf.mxu2  ;;  %v13559_v23 = vor.u32 %v14158_v46, %v13556_v38  ;;  %v14161_v38 = vld [vmem:[#allocation3 + $0x104] sm:$0xf0] }
 0x83f   : > { %v17608_v12 = vadd.f32 %v10564_v11, %v10515_v57  ;;  %v10132_v45 = vpop.f32.mrf.mxu0 }
 0x840   : > { %v10182_v37 = vadd.f32 %v10181_v54, %v10132_v45  ;;  %v13548_v54 = vld [vmem:[#allocation3 + $0xe8] sm:$0xf0] }
 0x841   : > { %13627 = vmatmul.msk.bf16.gmra.mxu3 %vm2494_vm5, %v13543_v44  ;;  %v13551_v3 = vor.u32 %v14156_v26, %v13548_v54  ;;  %v14160_v26 = vld [vmem:[#allocation3 + $0x104] sm:$0xf]  ;;  %v13564_v54 = vld [vmem:[#allocation3 + $0x108] sm:$0xf0] }
 0x842   : > { %11000 = vmatmul.bf16.gmra.mxu2 %v13531_v6  ;;  %v10214_v14 = vadd.f32 %v10182_v37, %v17450_v63  ;;  %v14155_v63 = vld [vmem:[#allocation3 + $0xd4] sm:$0xf0] }
 0x843   : > { %v10189_v16 = vpop.f32.mrf.mxu1  ;;  %v13539_v4 = vor.u32 %v14155_v63, %v13538_v52  ;;  %v14159_v63 = vld [vmem:[#allocation3 + $0xf4] sm:$0xf0] }
 0x844   : > { %v10567_v55 = vpop.f32.mrf.mxu3  ;;  %v10233_v5 = vadd.f32 %v17562_v53, %v10214_v14 }
 0x846   : > { %13508 = vmatmul.msk.bf16.gmra.mxu1 %vm2494_vm5, %v17455_v51  ;;  %10249 = vst.msk [vmem:[%s17570_s26 + $0x28] sm:$0xff] %vm5170_vm11, %v10233_v5  ;;  %v10518_v20 = vpop.f32.mrf.mxu2 }
 0x847   : > { %v17616_v62 = vadd.f32 %v10567_v55, %v10518_v20  ;;  %v10135_v25 = vpop.f32.mrf.mxu0 }
 0x848   : > { %v10185_v30 = vadd.f32 %v10184_v24, %v10135_v25 }
 0x84a   : > { %v10215_v61 = vadd.f32 %v10185_v30, %v17468_v15  ;;  %10699 = vmatmul.bf16.gmra.mxu0 %v17439_v59 }
 0x84b   : > { %v10191_v13 = vpop.f32.mrf.mxu1 }
 0x84c   : > { %v10569_v32 = vpop.f32.mrf.mxu3  ;;  %v10234_v51 = vadd.f32 %v17562_v53, %v10215_v61  ;;  %v9206_v61 = vpop.permute.xlu2 %9205 }
 0x84d   : > { %9278 = vst.msk [vmem:[#allocation3 + $0x118] sm:$0xf] %vm2137_vm6, %v9206_v61 }
 0x84e   : > { %10250 = vst.msk [vmem:[%s17570_s26 + $0x30] sm:$0xff] %vm5170_vm11, %v10234_v51  ;;  %v10520_v33 = vpop.f32.mrf.mxu2  ;;  %v13554_v51 = vld [vmem:[#allocation3 + $0xf0] sm:$0xf] }
 0x84f   : > { %v17624_v10 = vadd.f32 %v10569_v32, %v10520_v33  ;;  %v10137_v50 = vpop.f32.mrf.mxu0  ;;  %v13555_v52 = vor.u32 %v14159_v63, %v13554_v51 }
 0x850   : > { %v10187_v15 = vadd.f32 %v10186_v1, %v10137_v50 }
 0x851   : > { %13628 = vmatmul.msk.bf16.gmra.mxu3 %vm2494_vm5, %v13551_v3 }
 0x852   : > { %11005 = vmatmul.bf16.gmra.mxu2 %v13539_v4  ;;  %v10216_v59 = vadd.f32 %v10187_v15, %v17479_v27  ;;  %v13546_v27 = vld [vmem:[#allocation3 + $0xe0] sm:$0xf] }
 0x853   : > { %v10194_v39 = vpop.f32.mrf.mxu1  ;;  %v13547_v6 = vor.u32 %v14157_v22, %v13546_v27 }
 0x854   : > { %v10572_v24 = vpop.f32.mrf.mxu3  ;;  %v10235_v40 = vadd.f32 %v17562_v53, %v10216_v59 }
 0x856   : > { %13509 = vmatmul.msk.bf16.gmra.mxu1 %vm2494_vm5, %v17481_v56  ;;  %10251 = vst.msk [vmem:[%s17570_s26 + $0x38] sm:$0xff] %vm5170_vm11, %v10235_v40  ;;  %v10523_v9 = vpop.f32.mrf.mxu2 }
 0x857   : > { %v17632_v29 = vadd.f32 %v10572_v24, %v10523_v9  ;;  %v10140_v11 = vpop.f32.mrf.mxu0  ;;  %v14162_v9 = vld [vmem:[#allocation3 + $0x114] sm:$0xf] }
 0x858   : > { %v10190_v28 = vadd.f32 %v10189_v16, %v10140_v11  ;;  %v13572_v11 = vld [vmem:[#allocation3 + $0x118] sm:$0xf0] }
 0x85a   : > { %v10217_v1 = vadd.f32 %v10190_v28, %v17491_v60  ;;  %10704 = vmatmul.bf16.gmra.mxu0 %v17460_v19 }
 0x85b   : > { %v10196_v44 = vpop.f32.mrf.mxu1 }
 0x85c   : > { %v10574_v42 = vpop.f32.mrf.mxu3  ;;  %v10236_v56 = vadd.f32 %v17562_v53, %v10217_v1 }
 0x85e   : > { %10252 = vst.msk [vmem:[%s17570_s26 + $0x40] sm:$0xff] %vm5170_vm11, %v10236_v56  ;;  %v10525_v57 = vpop.f32.mrf.mxu2 }
 0x85f   : > { %v17640_v45 = vadd.f32 %v10574_v42, %v10525_v57  ;;  %v10142_v37 = vpop.f32.mrf.mxu0 }
 0x860   : > { %v10192_v60 = vadd.f32 %v10191_v13, %v10142_v37  ;;  %v13567_v13 = vor.u32 %v14160_v26, %v13564_v54 }
 0x861   : > { %13629 = vmatmul.msk.bf16.gmra.mxu3 %vm2494_vm5, %v13559_v23  ;;  %v9204_v4 = vpop.permute.xlu1 %9203 }
 0x862   : > { %11010 = vmatmul.bf16.gmra.mxu2 %v13547_v6  ;;  %v10218_v19 = vadd.f32 %v10192_v60, %v17498_v41  ;;  %9277 = vst.msk [vmem:[#allocation3 + $0x110] sm:$0xf] %vm2137_vm6, %v9204_v4 }
 0x863   : > { %v10199_v14 = vpop.f32.mrf.mxu1 }
 0x864   : > { %v10577_v55 = vpop.f32.mrf.mxu3  ;;  %v10237_v16 = vadd.f32 %v17562_v53, %v10218_v19 }
 0x866   : > { %13510 = vmatmul.msk.bf16.gmra.mxu1 %vm2494_vm5, %v17500_v8  ;;  %10253 = vst.msk [vmem:[%s17570_s26 + $0x48] sm:$0xff] %vm5170_vm11, %v10237_v16  ;;  %v10528_v5 = vpop.f32.mrf.mxu2 }
 0x867   : > { %v17648_v20 = vadd.f32 %v10577_v55, %v10528_v5  ;;  %v10145_v25 = vpop.f32.mrf.mxu0 }
 0x868   : > { %v10195_v30 = vadd.f32 %v10194_v39, %v10145_v25 }
 0x869   : > { %v13570_v19 = vld [vmem:[#allocation3 + $0x110] sm:$0xf] }
 0x86a   : > { %v10219_v41 = vadd.f32 %v10195_v30, %v17521_v43  ;;  %10709 = vmatmul.bf16.gmra.mxu0 %v17486_v36 }
 0x86b   : > { %v10201_v8 = vpop.f32.mrf.mxu1 }
 0x86c   : > { %v10579_v32 = vpop.f32.mrf.mxu3  ;;  %v10238_v3 = vadd.f32 %v17562_v53, %v10219_v41 }
 0x86e   : > { %10254 = vst.msk [vmem:[%s17570_s26 + $0x50] sm:$0xff] %vm5170_vm11, %v10238_v3  ;;  %v10530_v33 = vpop.f32.mrf.mxu2 }
 0x86f   : > { %v17657_v43 = vadd.f32 %v10579_v32, %v10530_v33  ;;  %v10147_v36 = vpop.f32.mrf.mxu0 }
 0x870   : > { %v10197_v50 = vadd.f32 %v10196_v44, %v10147_v36  ;;  %v13562_v44 = vld [vmem:[#allocation3 + $0x100] sm:$0xf] }
 0x871   : > { %13630 = vmatmul.msk.bf16.gmra.mxu3 %vm2494_vm5, %v13567_v13  ;;  %v13563_v23 = vor.u32 %v14161_v38, %v13562_v44 }
 0x872   : > { %11015 = vmatmul.bf16.gmra.mxu2 %v13555_v52  ;;  %v10220_v24 = vadd.f32 %v10197_v50, %v17531_v0  ;;  %v13575_v0 = vor.u32 %v14162_v9, %v13572_v11 }
 0x873   : > { %v10204_v59 = vpop.f32.mrf.mxu1 }
 0x874   : > { %v10582_v15 = vpop.f32.mrf.mxu3  ;;  %v10239_v39 = vadd.f32 %v17562_v53, %v10220_v24 }
 0x876   : > { %13511 = vmatmul.msk.bf16.gmra.mxu1 %vm2494_vm5, %v17523_v48  ;;  %10255 = vst.msk [vmem:[%s17570_s26 + $0x58] sm:$0xff] %vm5170_vm11, %v10239_v39 }
 0x877   : > { %v10150_v40 = vpop.f32.mrf.mxu0 }
 0x878   : > { %v10200_v28 = vadd.f32 %v10199_v14, %v10150_v40  ;;  %v14163_v14 = vld [vmem:[#allocation3 + $0x114] sm:$0xf0] }
 0x879   : > { %v13571_v30 = vor.u32 %v14163_v14, %v13570_v19 }
 0x87a   : > { %v10221_v46 = vadd.f32 %v10200_v28, %v17540_v58  ;;  %10714 = vmatmul.bf16.gmra.mxu0 %v17504_v18 }
 0x87b   : > { %v10206_v1 = vpop.f32.mrf.mxu1 }
 0x87c   : > { %v10584_v42 = vpop.f32.mrf.mxu3  ;;  %v10240_v27 = vadd.f32 %v17562_v53, %v10221_v46 }
 0x87e   : > { %10256 = vst.msk [vmem:[%s17570_s26 + $0x60] sm:$0xff] %vm5170_vm11, %v10240_v27 }
 0x87f   : > { %v10152_v48 = vpop.f32.mrf.mxu0 }
 0x880   : > { %v10202_v56 = vadd.f32 %v10201_v8, %v10152_v48 }
 0x881   : > { %13631 = vmatmul.msk.bf16.gmra.mxu3 %vm2494_vm5, %v13575_v0 }
 0x882   : > { %11020 = vmatmul.bf16.gmra.mxu2 %v13563_v23  ;;  %v10222_v58 = vadd.f32 %v10202_v56, %v17546_v34 }
 0x883   : > { %v10734_v18 = vpop.f32.mrf.mxu1 }
 0x884   : > { %v10587_v22 = vpop.f32.mrf.mxu3  ;;  %v10241_v37 = vadd.f32 %v17562_v53, %v10222_v58 }
 0x885   : > { %v10533_v6 = vpop.f32.mrf.mxu2 }
 0x886   : > { %v17673_v57 = vadd.f32 %v10582_v15, %v10533_v6  ;;  %10257 = vst.msk [vmem:[%s17570_s26 + $0x68] sm:$0xff] %vm5170_vm11, %v10241_v37 }
 0x887   : > { %v10155_v60 = vpop.f32.mrf.mxu0 }
 0x888   : > { %v10205_v55 = vadd.f32 %v10204_v59, %v10155_v60 }
 0x88a   : > { %v10223_v25 = vadd.f32 %v10205_v55, %v17550_v47  ;;  %10719 = vmatmul.bf16.gmra.mxu0 %v17542_v49 }
 0x88b   : > { %v10736_v26 = vpop.f32.mrf.mxu1 }
 0x88c   : > { %v10589_v16 = vpop.f32.mrf.mxu3  ;;  %v10242_v32 = vadd.f32 %v17562_v53, %v10223_v25 }
 0x88d   : > { %v10535_v5 = vpop.f32.mrf.mxu2 }
 0x88e   : > { %v17680_v34 = vadd.f32 %v10584_v42, %v10535_v5  ;;  %10258 = vst.msk [vmem:[%s17570_s26 + $0x70] sm:$0xff] %vm5170_vm11, %v10242_v32 }
 0x88f   : > { %v10157_v54 = vpop.f32.mrf.mxu0 }
 0x890   : > { %v10207_v61 = vadd.f32 %v10206_v1, %v10157_v54 }
 0x892   : > { %11025 = vmatmul.bf16.gmra.mxu2 %v13571_v30  ;;  %v10224_v8 = vadd.f32 %v10207_v61, %v17553_v21 }
 0x893   : > { %v10739_v49 = vpop.f32.mrf.mxu1 }
 0x894   : > { %v11040_v41 = vpop.f32.mrf.mxu3  ;;  %v10243_v47 = vadd.f32 %v17562_v53, %v10224_v8 }
 0x895   : > { %v10538_v63 = vpop.f32.mrf.mxu2 }
 0x896   : > { %v17686_v13 = vadd.f32 %v10587_v22, %v10538_v63  ;;  %10259 = vst.msk [vmem:[%s17570_s26 + $0x78] sm:$0xff] %vm5170_vm11, %v10243_v47 }
 0x897   : > { %v10685_v3 = vpop.f32.mrf.mxu0 }
 0x898   : > { %v10686_v33 = vadd.f32 %v10685_v3, %v17557_v35 }
 0x89a   : > { %v10735_v21 = vadd.f32 %v10734_v18, %v10686_v33 }
 0x89b   : > { %v10741_v50 = vpop.f32.mrf.mxu1 }
 0x89c   : > { %v11042_v51 = vpop.f32.mrf.mxu3 }
 0x89d   : > { %v10540_v52 = vpop.f32.mrf.mxu2 }
 0x89e   : > { %v17691_v4 = vadd.f32 %v10589_v16, %v10540_v52 }
 0x89f   : > { %v10687_v36 = vpop.f32.mrf.mxu0 }
 0x8a0   : > { %v10688_v9 = vadd.f32 %v10687_v36, %v17576_v17 }
 0x8a2   : > { %v10737_v38 = vadd.f32 %v10736_v26, %v10688_v9 }
 0x8a3   : > { %v10744_v46 = vpop.f32.mrf.mxu1 }
 0x8a4   : > { %v11045_v15 = vpop.f32.mrf.mxu3 }
 0x8a5   : > { %v10991_v24 = vpop.f32.mrf.mxu2 }
 0x8a6   : > { %v11041_v59 = vadd.f32 %v11040_v41, %v10991_v24 }
 0x8a7   : > { %v10690_v11 = vpop.f32.mrf.mxu0 }
 0x8a8   : > { %v11080_v39 = vadd.f32 %v11041_v59, %v10735_v21  ;;  %v10691_v27 = vadd.f32 %v10690_v11, %v17584_v7 }
 0x8aa   : > { %v11096_v40 = vadd.f32 %v17562_v53, %v11080_v39  ;;  %v10740_v17 = vadd.f32 %v10739_v49, %v10691_v27 }
 0x8ab   : > { %v10746_v22 = vpop.f32.mrf.mxu1 }
 0x8ac   : > { %v11047_v28 = vpop.f32.mrf.mxu3  ;;  %13632 = vst.msk [vmem:[%s17570_s26 + $0x80] sm:$0xff] %vm5170_vm11, %v11096_v40 }
 0x8ad   : > { %v10993_v42 = vpop.f32.mrf.mxu2 }
 0x8ae   : > { %v11043_v35 = vadd.f32 %v11042_v51, %v10993_v42 }
 0x8af   : > { %v10692_v44 = vpop.f32.mrf.mxu0 }
 0x8b0   : > { %v11081_v0 = vadd.f32 %v11043_v35, %v10737_v38  ;;  %v10693_v18 = vadd.f32 %v10692_v44, %v17592_v31 }
 0x8b2   : > { %v11097_v1 = vadd.f32 %v17562_v53, %v11081_v0  ;;  %v10742_v7 = vadd.f32 %v10741_v50, %v10693_v18 }
 0x8b3   : > { %v10749_v16 = vpop.f32.mrf.mxu1 }
 0x8b4   : > { %v11050_v23 = vpop.f32.mrf.mxu3  ;;  %13633 = vst.msk [vmem:[%s17570_s26 + $0x88] sm:$0xff] %vm5170_vm11, %v11097_v1 }
 0x8b5   : > { %v10996_v48 = vpop.f32.mrf.mxu2 }
 0x8b6   : > { %v11046_v56 = vadd.f32 %v11045_v15, %v10996_v48 }
 0x8b7   : > { %v10695_v37 = vpop.f32.mrf.mxu0 }
 0x8b8   : > { %v11082_v6 = vadd.f32 %v11046_v56, %v10740_v17  ;;  %v10696_v25 = vadd.f32 %v10695_v37, %v17600_v2 }
 0x8ba   : > { %v11098_v58 = vadd.f32 %v17562_v53, %v11082_v6  ;;  %v10745_v31 = vadd.f32 %v10744_v46, %v10696_v25 }
 0x8bb   : > { %v10751_v47 = vpop.f32.mrf.mxu1 }
 0x8bc   : > { %v11052_v60 = vpop.f32.mrf.mxu3  ;;  %13634 = vst.msk [vmem:[%s17570_s26 + $0x90] sm:$0xff] %vm5170_vm11, %v11098_v58 }
 0x8bd   : > { %v10998_v55 = vpop.f32.mrf.mxu2 }
 0x8be   : > { %v11048_v19 = vadd.f32 %v11047_v28, %v10998_v55 }
 0x8bf   : > { %v10697_v30 = vpop.f32.mrf.mxu0 }
 0x8c0   : > { %v11083_v14 = vadd.f32 %v11048_v19, %v10742_v7  ;;  %v10698_v63 = vadd.f32 %v10697_v30, %v17608_v12 }
 0x8c2   : > { %v11099_v5 = vadd.f32 %v17562_v53, %v11083_v14  ;;  %v10747_v3 = vadd.f32 %v10746_v22, %v10698_v63 }
 0x8c3   : > { %v10754_v24 = vpop.f32.mrf.mxu1 }
 0x8c4   : > { %13635 = vst.msk [vmem:[%s17570_s26 + $0x98] sm:$0xff] %vm5170_vm11, %v11099_v5  ;;  %v11055_v32 = vpop.f32.mrf.mxu3 }
 0x8c5   : > { %v11001_v26 = vpop.f32.mrf.mxu2 }
 0x8c6   : > { %v11051_v54 = vadd.f32 %v11050_v23, %v11001_v26 }
 0x8c7   : > { %v10700_v8 = vpop.f32.mrf.mxu0 }
 0x8c8   : > { %v11084_v61 = vadd.f32 %v11051_v54, %v10745_v31  ;;  %v10701_v36 = vadd.f32 %v10700_v8, %v17616_v62 }
 0x8ca   : > { %v11100_v41 = vadd.f32 %v17562_v53, %v11084_v61  ;;  %v10750_v12 = vadd.f32 %v10749_v16, %v10701_v36 }
 0x8cb   : > { %v10756_v46 = vpop.f32.mrf.mxu1 }
 0x8cc   : > { %13636 = vst.msk [vmem:[%s17570_s26 + $0xa0] sm:$0xff] %vm5170_vm11, %v11100_v41  ;;  %v11057_v51 = vpop.f32.mrf.mxu3 }
 0x8cd   : > { %v11003_v49 = vpop.f32.mrf.mxu2 }
 0x8ce   : > { %v11053_v2 = vadd.f32 %v11052_v60, %v11003_v49 }
 0x8cf   : > { %v10702_v50 = vpop.f32.mrf.mxu0 }
 0x8d0   : > { %v11085_v52 = vadd.f32 %v11053_v2, %v10747_v3  ;;  %v10703_v9 = vadd.f32 %v10702_v50, %v17624_v10 }
 0x8d2   : > { %v11101_v33 = vadd.f32 %v17562_v53, %v11085_v52  ;;  %v10752_v42 = vadd.f32 %v10751_v47, %v10703_v9 }
 0x8d3   : > { %v10759_v17 = vpop.f32.mrf.mxu1 }
 0x8d4   : > { %13637 = vst.msk [vmem:[%s17570_s26 + $0xa8] sm:$0xff] %vm5170_vm11, %v11101_v33  ;;  %v11060_v39 = vpop.f32.mrf.mxu3 }
 0x8d5   : > { %v11006_v15 = vpop.f32.mrf.mxu2 }
 0x8d6   : > { %v11056_v21 = vadd.f32 %v11055_v32, %v11006_v15 }
 0x8d7   : > { %v10705_v11 = vpop.f32.mrf.mxu0 }
 0x8d8   : > { %v11086_v59 = vadd.f32 %v11056_v21, %v10750_v12  ;;  %v10706_v0 = vadd.f32 %v10705_v11, %v17632_v29 }
 0x8da   : > { %v11102_v40 = vadd.f32 %v17562_v53, %v11086_v59  ;;  %v10755_v23 = vadd.f32 %v10754_v24, %v10706_v0 }
 0x8db   : > { %v10761_v14 = vpop.f32.mrf.mxu1 }
 0x8dc   : > { %13638 = vst.msk [vmem:[%s17570_s26 + $0xb0] sm:$0xff] %vm5170_vm11, %v11102_v40  ;;  %v11062_v27 = vpop.f32.mrf.mxu3 }
 0x8dd   : > { %v11008_v28 = vpop.f32.mrf.mxu2 }
 0x8de   : > { %v11058_v62 = vadd.f32 %v11057_v51, %v11008_v28 }
 0x8df   : > { %v10707_v1 = vpop.f32.mrf.mxu0 }
 0x8e0   : > { %v11087_v38 = vadd.f32 %v11058_v62, %v10752_v42  ;;  %v10708_v22 = vadd.f32 %v10707_v1, %v17640_v45 }
 0x8e2   : > { %v11103_v35 = vadd.f32 %v17562_v53, %v11087_v38  ;;  %v10757_v29 = vadd.f32 %v10756_v46, %v10708_v22 }
 0x8e3   : > { %v10764_v61 = vpop.f32.mrf.mxu1 }
 0x8e4   : > { %13639 = vst.msk [vmem:[%s17570_s26 + $0xb8] sm:$0xff] %vm5170_vm11, %v11103_v35  ;;  %v11065_v58 = vpop.f32.mrf.mxu3 }
 0x8e5   : > { %v11011_v44 = vpop.f32.mrf.mxu2 }
 0x8e6   : > { %v11061_v10 = vadd.f32 %v11060_v39, %v11011_v44 }
 0x8e7   : > { %v10710_v6 = vpop.f32.mrf.mxu0 }
 0x8e8   : > { %v11088_v48 = vadd.f32 %v11061_v10, %v10755_v23  ;;  %v10711_v7 = vadd.f32 %v10710_v6, %v17648_v20 }
 0x8ea   : > { %v11104_v56 = vadd.f32 %v17562_v53, %v11088_v48  ;;  %v10760_v5 = vadd.f32 %v10759_v17, %v10711_v7 }
 0x8eb   : > { %v10766_v52 = vpop.f32.mrf.mxu1 }
 0x8ec   : > { %13640 = vst.msk [vmem:[%s17570_s26 + $0xc0] sm:$0xff] %vm5170_vm11, %v11104_v56  ;;  %v11067_v25 = vpop.f32.mrf.mxu3 }
 0x8ed   : > { %v11013_v18 = vpop.f32.mrf.mxu2 }
 0x8ee   : > { %v11063_v37 = vadd.f32 %v11062_v27, %v11013_v18 }
 0x8ef   : > { %v10712_v19 = vpop.f32.mrf.mxu0 }
 0x8f0   : > { %v11089_v60 = vadd.f32 %v11063_v37, %v10757_v29  ;;  %v10713_v26 = vadd.f32 %v10712_v19, %v17657_v43 }
 0x8f2   : > { %v11105_v55 = vadd.f32 %v17562_v53, %v11089_v60  ;;  %v10762_v20 = vadd.f32 %v10761_v14, %v10713_v26 }
 0x8f3   : > { %v10769_v39 = vpop.f32.mrf.mxu1 }
 0x8f4   : > { %13641 = vst.msk [vmem:[%s17570_s26 + $0xc8] sm:$0xff] %vm5170_vm11, %v11105_v55  ;;  %v11070_v8 = vpop.f32.mrf.mxu3 }
 0x8f5   : > { %v11016_v16 = vpop.f32.mrf.mxu2 }
 0x8f6   : > { %v11066_v45 = vadd.f32 %v11065_v58, %v11016_v16 }
 0x8f7   : > { %v10715_v31 = vpop.f32.mrf.mxu0 }
 0x8f8   : > { %v11090_v30 = vadd.f32 %v11066_v45, %v10760_v5  ;;  %v10716_v49 = vadd.f32 %v10715_v31, %v17673_v57 }
 0x8fa   : > { %v11106_v32 = vadd.f32 %v17562_v53, %v11090_v30  ;;  %v10765_v51 = vadd.f32 %v10764_v61, %v10716_v49 }
 0x8fb   : > { %v10771_v0 = vpop.f32.mrf.mxu1 }
 0x8fc   : > { %13642 = vst.msk [vmem:[%s17570_s26 + $0xd0] sm:$0xff] %vm5170_vm11, %v11106_v32  ;;  %v11072_v15 = vpop.f32.mrf.mxu3 }
 0x8fd   : > { %v11018_v54 = vpop.f32.mrf.mxu2 }
 0x8fe   : > { %v11068_v41 = vadd.f32 %v11067_v25, %v11018_v54 }
 0x8ff   : > { %v10717_v3 = vpop.f32.mrf.mxu0 }
 0x900   : > { %v11091_v63 = vadd.f32 %v11068_v41, %v10762_v20  ;;  %v10718_v50 = vadd.f32 %v10717_v3, %v17680_v34 }
 0x902   : > { %v11107_v47 = vadd.f32 %v17562_v53, %v11091_v63  ;;  %v10767_v21 = vadd.f32 %v10766_v52, %v10718_v50 }
 0x904   : > { %13643 = vst.msk [vmem:[%s17570_s26 + $0xd8] sm:$0xff] %vm5170_vm11, %v11107_v47  ;;  %v11075_v11 = vpop.f32.mrf.mxu3 }
 0x905   : > { %v11021_v2 = vpop.f32.mrf.mxu2 }
 0x906   : > { %v11071_v43 = vadd.f32 %v11070_v8, %v11021_v2 }
 0x907   : > { %v10720_v12 = vpop.f32.mrf.mxu0 }
 0x908   : > { %v11092_v33 = vadd.f32 %v11071_v43, %v10765_v51  ;;  %v10721_v9 = vadd.f32 %v10720_v12, %v17686_v13 }
 0x90a   : > { %v11108_v36 = vadd.f32 %v17562_v53, %v11092_v33  ;;  %v10770_v34 = vadd.f32 %v10769_v39, %v10721_v9 }
 0x90c   : > { %13644 = vst.msk [vmem:[%s17570_s26 + $0xe0] sm:$0xff] %vm5170_vm11, %v11108_v36  ;;  %v11077_v1 = vpop.f32.mrf.mxu3 }
 0x90d   : > { %v11023_v24 = vpop.f32.mrf.mxu2 }
 0x90e   : > { %v11073_v57 = vadd.f32 %v11072_v15, %v11023_v24 }
 0x90f   : > { %v10722_v62 = vpop.f32.mrf.mxu0 }
 0x910   : > { %v11093_v59 = vadd.f32 %v11073_v57, %v10767_v21  ;;  %v10723_v35 = vadd.f32 %v10722_v62, %v17691_v4 }
 0x912   : > { %v11109_v40 = vadd.f32 %v17562_v53, %v11093_v59  ;;  %v10772_v44 = vadd.f32 %v10771_v0, %v10723_v35 }
 0x914   : > { %13645 = vst.msk [vmem:[%s17570_s26 + $0xe8] sm:$0xff] %vm5170_vm11, %v11109_v40 }
 0x915   : > { %v11026_v28 = vpop.f32.mrf.mxu2 }
 0x916   : > { %v11076_v42 = vadd.f32 %v11075_v11, %v11026_v28 }
 0x918   : > { %v11094_v46 = vadd.f32 %v11076_v42, %v10770_v34 }
 0x91a   : > { %v11110_v38 = vadd.f32 %v17562_v53, %v11094_v46 }
 0x91c   : > { %13646 = vst.msk [vmem:[%s17570_s26 + $0xf0] sm:$0xff] %vm5170_vm11, %v11110_v38 }
 0x91d   : > { %v11028_v27 = vpop.f32.mrf.mxu2 }
 0x91e   : > { %v11078_v13 = vadd.f32 %v11077_v1, %v11028_v27 }
 0x920   : > { %v11095_v23 = vadd.f32 %v11078_v13, %v10772_v44 }
 0x922   : > { %v11111_v10 = vadd.f32 %v17562_v53, %v11095_v23 }
 0x924   : > { %13647 = vst.msk [vmem:[%s17570_s26 + $0xf8] sm:$0xff] %vm5170_vm11, %v11111_v10 }
 0x925 PF: > { %s15_s15 = sadd.s32 1, %s14212_s15  }
 0x926   : > { %p12_p4 = scmp.ge.s32.totalorder %s15_s15, 4  }
 0x928   :  { %14 = sbr.rel (!%p12_p4) target bundleno = 1 (0x1), region = 83 }

</bundles_post_ra>
